<compile_context>
chip_gen: v7x
topology: tpu7x:2x2x1
jax: 0.10.0
libtpu: 0.0.40
codegen_flags: <defaults>
</compile_context>

<pallas_src>
import functools

import numpy as np
import jax
import jax.numpy as jnp
from jax.experimental import pallas as pl
from jax.experimental.pallas import tpu as pltpu


# ----------------------------------------------------------------------------
# helpers
# ----------------------------------------------------------------------------
def _round_up(n, m):
    return (n + m - 1) // m * m


def _gelu_f32(x):
    c = 0.7978845608028654  # sqrt(2/pi)
    return 0.5 * x * (1.0 + jnp.tanh(c * (x + 0.044715 * (x * x * x))))


def _interp_matrix(n_out, n_in):
    """1-D linear interpolation matrix, PyTorch align_corners=True semantics."""
    A = np.zeros((n_out, n_in), np.float32)
    for i in range(n_out):
        src = i * (n_in - 1) / (n_out - 1) if n_out > 1 else 0.0
        i0 = min(max(int(np.floor(src)), 0), n_in - 1)
        i1 = min(i0 + 1, n_in - 1)
        frac = src - i0
        A[i, i0] += 1.0 - frac
        A[i, i1] += frac
    return jnp.asarray(A)


def bilinear_resize_ac(x_nhwc, h_out, w_out):
    """Bilinear resize (align_corners=True) as two separable interp matmuls."""
    _, H, W, _ = x_nhwc.shape
    if (H, W) == (h_out, w_out):
        return x_nhwc
    Ah = _interp_matrix(h_out, H)
    Aw = _interp_matrix(w_out, W)
    y = jnp.einsum('ph,bhwc->bpwc', Ah, x_nhwc.astype(jnp.float32))
    y = jnp.einsum('qw,bpwc->bpqc', Aw, y)
    return y.astype(x_nhwc.dtype)


def _im2col3x3(x_nhwc):
    """3x3/pad-1 patches, tap-major then channel: column index = (dy*3+dx)*C + c."""
    B, H, W, C = x_nhwc.shape
    xp = jnp.pad(x_nhwc, ((0, 0), (1, 1), (1, 1), (0, 0)))
    cols = [xp[:, dy:dy + H, dx:dx + W, :] for dy in range(3) for dx in range(3)]
    return jnp.concatenate(cols, axis=-1)


# ----------------------------------------------------------------------------
# Pallas kernel 1: fused matmul engine
#   out = act(x @ W + bias) [+ residual]
# ----------------------------------------------------------------------------
def _make_matmul_kernel(has_bias, act, has_res):
    def kernel(*refs):
        it = iter(refs)
        x_ref = next(it)
        w_ref = next(it)
        b_ref = next(it) if has_bias else None
        r_ref = next(it) if has_res else None
        o_ref = next(it)

        acc = jnp.dot(x_ref[...].astype(w_ref.dtype), w_ref[...],
                      preferred_element_type=jnp.float32)
        if has_bias:
            acc = acc + b_ref[...].astype(jnp.float32)
        if act == 'relu':
            acc = jnp.maximum(acc, 0.0)
        elif act == 'gelu':
            acc = _gelu_f32(acc)
        if has_res:
            acc = acc + r_ref[...].astype(jnp.float32)
        o_ref[...] = acc.astype(o_ref.dtype)

    return kernel


def pointwise_conv(x2d, w, *, bias=None, act='none', residual=None, n_out=None,
                   tile_rows=256, tile_cols=512, out_dtype=jnp.float32):
    """x2d: (rows, K); w: (K, Np) pre-transposed, Np pre-padded to 128.
    bias: (1, Np) f32. Returns (rows, n_out)."""
    assert act in ('none', 'relu', 'gelu')
    rows, K = x2d.shape
    Kw, Np = w.shape
    assert K == Kw
    n_out = Np if n_out is None else n_out

    # lane-aligned column tiling
    cols_p = _round_up(Np, 128)
    if cols_p != Np:
        w = jnp.pad(w, ((0, 0), (0, cols_p - Np)))
        if bias is not None:
            bias = jnp.pad(bias, ((0, 0), (0, cols_p - Np)))
    if cols_p <= tile_cols:
        tn = cols_p
    else:
        tn = (tile_cols // 128) * 128
        while cols_p % tn:
            tn -= 128

    # rows padded to a multiple of 128 (when large) with a dividing tile size
    if rows >= 128:
        rows_p = _round_up(rows, 128)
        tm = tile_rows if (tile_rows <= rows_p and rows_p % tile_rows == 0) else 128
    else:
        rows_p = _round_up(rows, 8)
        tm = rows_p

    if rows_p != rows:
        x2d = jnp.pad(x2d, ((0, rows_p - rows), (0, 0)))
    if residual is not None:
        pad_r = rows_p - residual.shape[0]
        pad_c = cols_p - residual.shape[1]
        if pad_r or pad_c:
            residual = jnp.pad(residual, ((0, pad_r), (0, pad_c)))

    grid = (rows_p // tm, cols_p // tn)

    inputs = [x2d, w]
    in_specs = [pl.BlockSpec((tm, K), lambda i, j: (i, 0)),
                pl.BlockSpec((K, tn), lambda i, j: (0, j))]
    if bias is not None:
        inputs.append(bias)
        in_specs.append(pl.BlockSpec((1, tn), lambda i, j: (0, j)))
    if residual is not None:
        inputs.append(residual)
        in_specs.append(pl.BlockSpec((tm, tn), lambda i, j: (i, j)))

    out = pl.pallas_call(
        _make_matmul_kernel(bias is not None, act, residual is not None),
        out_shape=jax.ShapeDtypeStruct((rows_p, cols_p), out_dtype),
        grid_spec=pltpu.PrefetchScalarGridSpec(
            num_scalar_prefetch=0,
            grid=grid,
            in_specs=in_specs,
            out_specs=pl.BlockSpec((tm, tn), lambda i, j: (i, j))),
        compiler_params=pltpu.CompilerParams(
            dimension_semantics=("parallel", "parallel"),
            vmem_limit_bytes=48 * 1024 * 1024),
    )(*inputs)
    return out[:rows, :n_out]


# ----------------------------------------------------------------------------
# Pallas kernel 2: fused MLP depthwise 3x3 (pad=1):
#   out = gelu(x + gelu(dw(x) + b)) + residual
# ----------------------------------------------------------------------------
def _make_dwmlp_kernel(H, W, C):
    def kernel(xp_ref, w_ref, b_ref, r_ref, o_ref):
        acc = jnp.zeros((1, H, W, C), jnp.float32)
        for dy in range(3):
            for dx in range(3):
                tap = w_ref[dy * 3 + dx].reshape(1, 1, 1, C).astype(jnp.float32)
                acc = acc + xp_ref[:, dy:dy + H, dx:dx + W, :].astype(jnp.float32) * tap
        acc = acc + b_ref[...].reshape(1, 1, 1, C).astype(jnp.float32)
        center = xp_ref[:, 1:1 + H, 1:1 + W, :].astype(jnp.float32)
        h = center + _gelu_f32(acc)
        out = _gelu_f32(h) + r_ref[...].astype(jnp.float32)
        o_ref[...] = out.astype(o_ref.dtype)

    return kernel


def depthwise3x3_mlp(x_nhwc, w9c, bias_1c, residual_nhwc):
    B, H, W, C = x_nhwc.shape
    xp = jnp.pad(x_nhwc, ((0, 0), (1, 1), (1, 1), (0, 0)))
    return pl.pallas_call(
        _make_dwmlp_kernel(H, W, C),
        out_shape=jax.ShapeDtypeStruct((B, H, W, C), jnp.float32),
        grid_spec=pltpu.PrefetchScalarGridSpec(
            num_scalar_prefetch=0,
            grid=(B,),
            in_specs=[pl.BlockSpec((1, H + 2, W + 2, C), lambda b: (b, 0, 0, 0)),
                      pl.BlockSpec((9, C), lambda b: (0, 0)),
                      pl.BlockSpec((1, C), lambda b: (0, 0)),
                      pl.BlockSpec((1, H, W, C), lambda b: (b, 0, 0, 0))],
            out_specs=pl.BlockSpec((1, H, W, C), lambda b: (b, 0, 0, 0))),
        compiler_params=pltpu.CompilerParams(
            dimension_semantics=("parallel",),
            vmem_limit_bytes=48 * 1024 * 1024),
    )(xp, w9c, bias_1c, residual_nhwc)


# ----------------------------------------------------------------------------
# Pallas kernel 3: attention, all heads of one batch per grid step,
# deferred softmax normalisation via pl.reciprocal(approx=True)
# ----------------------------------------------------------------------------
def _make_attn_kernel(scale):
    def kernel(q_ref, k_ref, v_ref, o_ref):
        q = q_ref[0].astype(jnp.float32)      # (h, N, d)
        k = k_ref[0].astype(jnp.float32)      # (h, M, d)
        v = v_ref[0].astype(jnp.float32)      # (h, M, d)
        s = jnp.einsum('hnd,hmd->hnm', q, k,
                       preferred_element_type=jnp.float32) * scale
        s = s - jnp.max(s, axis=-1, keepdims=True)
        p = jnp.exp(s)
        o = jnp.einsum('hnm,hmd->hnd', p, v, preferred_element_type=jnp.float32)
        l = jnp.sum(p, axis=-1, keepdims=True)
        o_ref[0] = (o * pl.reciprocal(l, approx=True)).astype(o_ref.dtype)

    return kernel


def attention(q, k, v, scale):
    B, h, N, d = q.shape
    _, _, M, _ = k.shape
    return pl.pallas_call(
        _make_attn_kernel(scale),
        out_shape=jax.ShapeDtypeStruct((B, h, N, d), jnp.float32),
        grid_spec=pltpu.PrefetchScalarGridSpec(
            num_scalar_prefetch=0,
            grid=(B,),
            in_specs=[pl.BlockSpec((1, h, N, d), lambda b: (b, 0, 0, 0)),
                      pl.BlockSpec((1, h, M, d), lambda b: (b, 0, 0, 0)),
                      pl.BlockSpec((1, h, M, d), lambda b: (b, 0, 0, 0))],
            out_specs=pl.BlockSpec((1, h, N, d), lambda b: (b, 0, 0, 0))),
        compiler_params=pltpu.CompilerParams(
            dimension_semantics=("parallel",),
            vmem_limit_bytes=48 * 1024 * 1024),
    )(q, k, v)


# ----------------------------------------------------------------------------
# UpTransBlock forward (Pallas pipeline), consumes prepared (folded) params
# ----------------------------------------------------------------------------
def up_trans_block(x_nchw, skip_nchw, pp, *, heads=4, reduce_ratio=2):
    xh = jnp.transpose(x_nchw, (0, 2, 3, 1))      # NHWC
    sh = jnp.transpose(skip_nchw, (0, 2, 3, 1))
    B, Hx, Wx, Cin = xh.shape
    _, Hs, Ws, Cout = sh.shape
    dh = Cout // heads
    inner = dh * heads
    scale = float(dh) ** -0.5
    hr, wr = Hs // reduce_ratio, Ws // reduce_ratio

    # residue = bilinear_up(conv_ch(x))
    cc = pointwise_conv(xh.reshape(-1, Cin), pp['conv_ch_w'], bias=pp['conv_ch_b'],
                        n_out=Cout).reshape(B, Hx, Wx, Cout)
    residue = bilinear_resize_ac(cc, Hs, Ws)

    # to_q / to_kv as dense (dw*pw folded) 3x3 convs with K = 9*C. The inference
    # BN affine is applied here so it fuses into the XLA im2col (no standalone pass).
    sb = (sh * pp['bn_h_s'] + pp['bn_h_t']).astype(jnp.bfloat16)
    xb = (xh * pp['bn_l_s'] + pp['bn_l_t']).astype(jnp.bfloat16)
    q_cols = _im2col3x3(sb).reshape(-1, 9 * Cout)
    kv_cols = _im2col3x3(xb).reshape(-1, 9 * Cin)
    q = pointwise_conv(q_cols, pp['q_dense_w'], n_out=inner).reshape(B, Hs, Ws, inner)
    kv = pointwise_conv(kv_cols, pp['kv_dense_w'],
                        n_out=2 * inner).reshape(B, Hx, Wx, 2 * inner)
    k, v = kv[..., :inner], kv[..., inner:]
    k = bilinear_resize_ac(k, hr, wr)
    v = bilinear_resize_ac(v, hr, wr)

    def split_heads(t):
        b, h, w, _ = t.shape
        return t.reshape(b, h * w, heads, dh).transpose(0, 2, 1, 3)   # (B, heads, HW, dh)

    ao = attention(split_heads(q), split_heads(k), split_heads(v), scale)
    ao = ao.transpose(0, 2, 1, 3).reshape(B * Hs * Ws, inner)

    # to_out (1x1, no bias) + residue, fused
    out = pointwise_conv(ao, pp['to_out_w'], residual=residue.reshape(-1, Cout),
                         n_out=Cout).reshape(B, Hs, Ws, Cout)
    residue2 = out

    # MLP: gelu(fc1(bn_mlp(out)))  [bn_mlp folded into fc1], then fused
    # gelu(x + gelu(pos(x)+b)) + residue2 in one depthwise kernel.
    x1 = pointwise_conv(out.reshape(-1, Cout), pp['fc1_w'], bias=pp['fc1_b'],
                        act='gelu', n_out=Cout).reshape(B, Hs, Ws, Cout)
    ff = depthwise3x3_mlp(x1, pp['pos_dw_w'], pp['pos_dw_b'], residue2)

    # cat with original skip, then conv3x3 (+ folded bn2) + ReLU as one K=9*2C matmul
    cat = jnp.concatenate([ff, sh], axis=-1).astype(jnp.bfloat16)
    cols = _im2col3x3(cat).reshape(-1, 9 * 2 * Cout)
    out2 = pointwise_conv(cols, pp['conv2_w'], bias=pp['conv2_b'],
                          act='relu', n_out=Cout).reshape(B, Hs, Ws, Cout)
    # self.layers is empty (range(0)) for this module config.
    return jnp.transpose(out2, (0, 3, 1, 2))


# ----------------------------------------------------------------------------
# Pure-JAX reference (original unfolded params, f32) for correctness checking
# ----------------------------------------------------------------------------
def up_trans_block_ref(x_nchw, skip_nchw, p, *, heads=4, reduce_ratio=2):
    xh = jnp.transpose(x_nchw, (0, 2, 3, 1)).astype(jnp.float32)
    sh = jnp.transpose(skip_nchw, (0, 2, 3, 1)).astype(jnp.float32)
    B, Hx, Wx, Cin = xh.shape
    _, Hs, Ws, Cout = sh.shape
    dh = Cout // heads
    inner = dh * heads
    scale = float(dh) ** -0.5
    hr, wr = Hs // reduce_ratio, Ws // reduce_ratio

    def pw(t, w, b=None):
        y = jnp.einsum('bhwc,cd->bhwd', t, w)
        return y if b is None else y + b

    def dw(t, w9c, b=None):
        C = t.shape[-1]
        y = jax.lax.conv_general_dilated(
            t, w9c.reshape(3, 3, 1, C), (1, 1), 'SAME',
            dimension_numbers=('NHWC', 'HWIO', 'NHWC'), feature_group_count=C)
        return y if b is None else y + b

    cc = pw(xh, p['conv_ch_w'], p['conv_ch_b'])
    residue = bilinear_resize_ac(cc, Hs, Ws)
    xb = xh * p['bn_l_s'] + p['bn_l_t']
    sb = sh * p['bn_h_s'] + p['bn_h_t']

    q = pw(dw(sb, p['q_dw_w']), p['q_pw_w'])
    kv = pw(dw(xb, p['kv_dw_w']), p['kv_pw_w'])
    k, v = kv[..., :inner], kv[..., inner:]
    k = bilinear_resize_ac(k, hr, wr)
    v = bilinear_resize_ac(v, hr, wr)

    def split_heads(t):
        b, h, w, _ = t.shape
        return t.reshape(b, h * w, heads, dh).transpose(0, 2, 1, 3)

    qh, kh, vh = split_heads(q), split_heads(k), split_heads(v)
    dots = jnp.einsum('bhnd,bhmd->bhnm', qh, kh) * scale
    attn_p = jax.nn.softmax(dots, axis=-1)
    ao = jnp.einsum('bhnm,bhmd->bhnd', attn_p, vh)
    ao = ao.transpose(0, 2, 1, 3).reshape(B, Hs, Ws, inner)

    out = pw(ao, p['to_out_w']) + residue
    residue2 = out
    x1 = _gelu_f32(pw(out * p['bn_mlp_s'] + p['bn_mlp_t'], p['fc1_w'], p['fc1_b']))
    pos = dw(x1, p['pos_dw_w'], p['pos_dw_b'])
    ff = _gelu_f32(x1 + _gelu_f32(pos)) + residue2

    cat = jnp.concatenate([ff, sh], axis=-1)
    y = jax.lax.conv_general_dilated(
        cat, p['conv2_w'].reshape(3, 3, 2 * Cout, Cout), (1, 1), 'SAME',
        dimension_numbers=('NHWC', 'HWIO', 'NHWC'))
    y = y + p['conv2_b']
    y = jnp.maximum(y * p['bn2_s'] + p['bn2_t'], 0.0)
    return jnp.transpose(y, (0, 3, 1, 2))


# ----------------------------------------------------------------------------
# parameter construction + one-time folding / bf16 / padding prep
# ----------------------------------------------------------------------------
def init_params(key, in_ch, out_ch, heads):
    dh = out_ch // heads
    inner = dh * heads
    ks = jax.random.split(key, 18)

    def w_init(k, shape, fan_in):
        w = jax.random.normal(k, shape, jnp.float32) / np.sqrt(fan_in)
        # store bf16-representable values so the bf16 kernel path matches the f32 reference
        return w.astype(jnp.bfloat16).astype(jnp.float32)

    def bn_init(k, c):
        k1, k2, k3, k4 = jax.random.split(k, 4)
        gamma = 1.0 + 0.1 * jax.random.normal(k1, (c,), jnp.float32)
        beta = 0.1 * jax.random.normal(k2, (c,), jnp.float32)
        mean = 0.1 * jax.random.normal(k3, (c,), jnp.float32)
        var = jax.random.uniform(k4, (c,), jnp.float32, minval=0.5, maxval=1.5)
        s = gamma / jnp.sqrt(var + 1e-5)
        t = beta - mean * s
        return s.astype(jnp.float32), t.astype(jnp.float32)

    p = {}
    p['conv_ch_w'] = w_init(ks[0], (in_ch, out_ch), in_ch)
    p['conv_ch_b'] = 0.1 * jax.random.normal(ks[1], (out_ch,), jnp.float32)
    p['bn_l_s'], p['bn_l_t'] = bn_init(ks[2], in_ch)
    p['bn_h_s'], p['bn_h_t'] = bn_init(ks[3], out_ch)
    p['bn_mlp_s'], p['bn_mlp_t'] = bn_init(ks[4], out_ch)
    p['q_dw_w'] = w_init(ks[5], (9, out_ch), 9)            # depthwise taps (tap, C)
    p['q_pw_w'] = w_init(ks[6], (out_ch, inner), out_ch)
    p['kv_dw_w'] = w_init(ks[7], (9, in_ch), 9)
    p['kv_pw_w'] = w_init(ks[8], (in_ch, 2 * inner), in_ch)
    p['to_out_w'] = w_init(ks[9], (inner, out_ch), inner)
    p['fc1_w'] = w_init(ks[10], (out_ch, out_ch), out_ch)
    p['fc1_b'] = 0.1 * jax.random.normal(ks[11], (out_ch,), jnp.float32)
    p['pos_dw_w'] = w_init(ks[12], (9, out_ch), 9)
    p['pos_dw_b'] = 0.1 * jax.random.normal(ks[13], (out_ch,), jnp.float32)
    p['conv2_w'] = w_init(ks[14], (9 * 2 * out_ch, out_ch), 9 * 2 * out_ch)
    p['conv2_b'] = 0.1 * jax.random.normal(ks[15], (out_ch,), jnp.float32)
    p['bn2_s'], p['bn2_t'] = bn_init(ks[16], out_ch)
    return p


def prepare_params(p):
    """One-time fold of BN affines into weights/biases, dw*pw dense-3x3 fold,
    bf16 cast of matmul weights and pre-pad of output dims to 128 lanes."""
    def pad_n(w):
        n = w.shape[-1]
        return jnp.pad(w, ((0, 0), (0, _round_up(n, 128) - n)))

    def w_bf16(w):
        return pad_n(w.astype(jnp.float32)).astype(jnp.bfloat16)

    def b_row(b):
        return pad_n(b.reshape(1, -1).astype(jnp.float32))

    pp = {}
    pp['conv_ch_w'] = w_bf16(p['conv_ch_w'])
    pp['conv_ch_b'] = b_row(p['conv_ch_b'])
    pp['bn_l_s'], pp['bn_l_t'] = p['bn_l_s'], p['bn_l_t']
    pp['bn_h_s'], pp['bn_h_t'] = p['bn_h_s'], p['bn_h_t']
    # dense depthwise-separable weight: W[(tap,c),n] = dw[tap,c] * pw[c,n]
    q_dense = (p['q_dw_w'][:, :, None] * p['q_pw_w'][None, :, :]).reshape(
        9 * p['q_pw_w'].shape[0], p['q_pw_w'].shape[1])
    kv_dense = (p['kv_dw_w'][:, :, None] * p['kv_pw_w'][None, :, :]).reshape(
        9 * p['kv_pw_w'].shape[0], p['kv_pw_w'].shape[1])
    pp['q_dense_w'] = w_bf16(q_dense)
    pp['kv_dense_w'] = w_bf16(kv_dense)
    pp['to_out_w'] = w_bf16(p['to_out_w'])
    # bn_mlp folded into fc1 (1x1 conv => exact fold)
    pp['fc1_w'] = w_bf16(p['bn_mlp_s'][:, None] * p['fc1_w'])
    pp['fc1_b'] = b_row(p['fc1_b'] + p['bn_mlp_t'] @ p['fc1_w'])
    pp['pos_dw_w'] = p['pos_dw_w'].astype(jnp.float32)
    pp['pos_dw_b'] = p['pos_dw_b'].reshape(1, -1).astype(jnp.float32)
    # bn2 (per output channel) folded into conv2 weight + bias
    pp['conv2_w'] = w_bf16(p['conv2_w'] * p['bn2_s'][None, :])
    pp['conv2_b'] = b_row(p['bn2_s'] * p['conv2_b'] + p['bn2_t'])
    return pp


if __name__ == "__main__":
    B = 2
    in_ch, out_ch = 32, 32
    image_size = 16
    heads = 4
    reduce_ratio = 2
    Hx = Wx = image_size // 2    # low-res decoder input

    key = jax.random.PRNGKey(0)
    kx, ksk, kp = jax.random.split(key, 3)
    x = jax.random.normal(kx, (B, in_ch, Hx, Wx), jnp.float32)
    skip = jax.random.normal(ksk, (B, out_ch, image_size, image_size), jnp.float32)
    params = init_params(kp, in_ch, out_ch, heads)
    pparams = prepare_params(params)

    fwd = jax.jit(functools.partial(up_trans_block, heads=heads, reduce_ratio=reduce_ratio))
    out = jax.block_until_ready(fwd(x, skip, pparams))

    ref = jax.block_until_ready(
        up_trans_block_ref(x, skip, params, heads=heads, reduce_ratio=reduce_ratio))

    assert out.shape == (B, out_ch, image_size, image_size), out.shape
    diff = jnp.abs(out - ref)
    max_err = float(jnp.max(diff))
    mean_err = float(jnp.mean(diff))
    # tolerance covers bf16 weights/activations on the MXU path (accumulation stays f32)
    assert max_err < 2e-1 and mean_err < 4e-2, f"mismatch vs ref: max={max_err}, mean={mean_err}"
    print("KERNEL_OK")
</pallas_src>

<mosaic_0001>
module attributes {stable_mosaic.version = 11 : i64} {
  func.func @kernel(%arg0: i32, %arg1: i32, %arg2: memref<256x288xbf16, #tpu.memory_space<vmem>>, %arg3: memref<288x128xbf16, #tpu.memory_space<vmem>>, %arg4: memref<256x128xf32, #tpu.memory_space<vmem>>) attributes {dimension_semantics = [#tpu.dimension_semantics<parallel>, #tpu.dimension_semantics<parallel>], iteration_bounds = array<i64: 2, 1>, scalar_prefetch = 0 : i64, scratch_operands = 0 : i64, tpu.core_type = #tpu.core_type<tc>, window_params = [{transform_indices = @transform_0, window_bounds = array<i64: 256, 288>}, {transform_indices = @transform_1, window_bounds = array<i64: 288, 128>}, {transform_indices = @transform_2, window_bounds = array<i64: 256, 128>}]} {
    %c0 = arith.constant 0 : index
    %c0_0 = arith.constant 0 : index
    %0 = vector.load %arg2[%c0, %c0_0] : memref<256x288xbf16, #tpu.memory_space<vmem>>, vector<256x288xbf16>
    %c0_1 = arith.constant 0 : index
    %c0_2 = arith.constant 0 : index
    %1 = vector.load %arg3[%c0_1, %c0_2] : memref<288x128xbf16, #tpu.memory_space<vmem>>, vector<288x128xbf16>
    %cst = arith.constant dense<0.000000e+00> : vector<256x128xf32>
    %2 = tpu.matmul %0, %1, %cst {dimension_numbers = #tpu.dot_dimension_numbers<[1], [0], [0], [1], [0, 0, 1, 1], [], []>} : vector<256x288xbf16>, vector<288x128xbf16>, vector<256x128xf32> -> vector<256x128xf32>
    %c0_3 = arith.constant 0 : index
    %c0_4 = arith.constant 0 : index
    %3 = vector.load %arg4[%c0_3, %c0_4] : memref<256x128xf32, #tpu.memory_space<vmem>>, vector<256x128xf32>
    tpu.vector_store %arg4[%c0_3, %c0_4], %2 {strides = array<i32>} : memref<256x128xf32, #tpu.memory_space<vmem>>, vector<256x128xf32>,
    return
  }
  func.func @transform_0(%arg0: i32, %arg1: i32) -> (i32, i32) {
    %c0_i32 = arith.constant 0 : i32
    %c0_i32_0 = arith.constant 0 : i32
    return %arg0, %c0_i32 : i32, i32
  }
  func.func @transform_1(%arg0: i32, %arg1: i32) -> (i32, i32) {
    %c0_i32 = arith.constant 0 : i32
    %c0_i32_0 = arith.constant 0 : i32
    return %c0_i32, %arg1 : i32, i32
  }
  func.func @transform_2(%arg0: i32, %arg1: i32) -> (i32, i32) {
    %c0_i32 = arith.constant 0 : i32
    return %arg0, %arg1 : i32, i32
  }
}

module attributes {stable_mosaic.version = 11 : i64} {
  func.func @kernel(%arg0: i32, %arg1: i32, %arg2: memref<128x288xbf16, #tpu.memory_space<vmem>>, %arg3: memref<288x128xbf16, #tpu.memory_space<vmem>>, %arg4: memref<128x128xf32, #tpu.memory_space<vmem>>) attributes {dimension_semantics = [#tpu.dimension_semantics<parallel>, #tpu.dimension_semantics<parallel>], iteration_bounds = array<i64: 1, 1>, scalar_prefetch = 0 : i64, scratch_operands = 0 : i64, tpu.core_type = #tpu.core_type<tc>, window_params = [{transform_indices = @transform_0, window_bounds = array<i64: 128, 288>}, {transform_indices = @transform_1, window_bounds = array<i64: 288, 128>}, {transform_indices = @transform_2, window_bounds = array<i64: 128, 128>}]} {
    %c0 = arith.constant 0 : index
    %c0_0 = arith.constant 0 : index
    %0 = vector.load %arg2[%c0, %c0_0] : memref<128x288xbf16, #tpu.memory_space<vmem>>, vector<128x288xbf16>
    %c0_1 = arith.constant 0 : index
    %c0_2 = arith.constant 0 : index
    %1 = vector.load %arg3[%c0_1, %c0_2] : memref<288x128xbf16, #tpu.memory_space<vmem>>, vector<288x128xbf16>
    %cst = arith.constant dense<0.000000e+00> : vector<128x128xf32>
    %2 = tpu.matmul %0, %1, %cst {dimension_numbers = #tpu.dot_dimension_numbers<[1], [0], [0], [1], [0, 0, 1, 1], [], []>} : vector<128x288xbf16>, vector<288x128xbf16>, vector<128x128xf32> -> vector<128x128xf32>
    %c0_3 = arith.constant 0 : index
    %c0_4 = arith.constant 0 : index
    %3 = vector.load %arg4[%c0_3, %c0_4] : memref<128x128xf32, #tpu.memory_space<vmem>>, vector<128x128xf32>
    tpu.vector_store %arg4[%c0_3, %c0_4], %2 {strides = array<i32>} : memref<128x128xf32, #tpu.memory_space<vmem>>, vector<128x128xf32>,
    return
  }
  func.func @transform_0(%arg0: i32, %arg1: i32) -> (i32, i32) {
    %c0_i32 = arith.constant 0 : i32
    %c0_i32_0 = arith.constant 0 : i32
    return %arg0, %c0_i32 : i32, i32
  }
  func.func @transform_1(%arg0: i32, %arg1: i32) -> (i32, i32) {
    %c0_i32 = arith.constant 0 : i32
    %c0_i32_0 = arith.constant 0 : i32
    return %c0_i32, %arg1 : i32, i32
  }
  func.func @transform_2(%arg0: i32, %arg1: i32) -> (i32, i32) {
    %c0_i32 = arith.constant 0 : i32
    return %arg0, %arg1 : i32, i32
  }
}

module attributes {stable_mosaic.version = 11 : i64} {
  func.func @kernel(%arg0: i32, %arg1: memref<1x4x256x8xf32, #tpu.memory_space<vmem>>, %arg2: memref<1x4x64x8xf32, #tpu.memory_space<vmem>>, %arg3: memref<1x4x64x8xf32, #tpu.memory_space<vmem>>, %arg4: memref<1x4x256x8xf32, #tpu.memory_space<vmem>>) attributes {dimension_semantics = [#tpu.dimension_semantics<parallel>], iteration_bounds = array<i64: 2>, scalar_prefetch = 0 : i64, scratch_operands = 0 : i64, tpu.core_type = #tpu.core_type<tc>, window_params = [{transform_indices = @transform_0, window_bounds = array<i64: 1, 4, 256, 8>}, {transform_indices = @transform_1, window_bounds = array<i64: 1, 4, 64, 8>}, {transform_indices = @transform_2, window_bounds = array<i64: 1, 4, 64, 8>}, {transform_indices = @transform_3, window_bounds = array<i64: 1, 4, 256, 8>}]} {
    %c0 = arith.constant 0 : index
    %c0_0 = arith.constant 0 : index
    %c0_1 = arith.constant 0 : index
    %c0_2 = arith.constant 0 : index
    %0 = vector.load %arg1[%c0, %c0_0, %c0_1, %c0_2] : memref<1x4x256x8xf32, #tpu.memory_space<vmem>>, vector<1x4x256x8xf32>
    %1 = vector.shape_cast %0 : vector<1x4x256x8xf32> to vector<4x256x8xf32>
    %c0_3 = arith.constant 0 : index
    %c0_4 = arith.constant 0 : index
    %c0_5 = arith.constant 0 : index
    %c0_6 = arith.constant 0 : index
    %2 = vector.load %arg2[%c0_3, %c0_4, %c0_5, %c0_6] : memref<1x4x64x8xf32, #tpu.memory_space<vmem>>, vector<1x4x64x8xf32>
    %3 = vector.shape_cast %2 : vector<1x4x64x8xf32> to vector<4x64x8xf32>
    %c0_7 = arith.constant 0 : index
    %c0_8 = arith.constant 0 : index
    %c0_9 = arith.constant 0 : index
    %c0_10 = arith.constant 0 : index
    %4 = vector.load %arg3[%c0_7, %c0_8, %c0_9, %c0_10] : memref<1x4x64x8xf32, #tpu.memory_space<vmem>>, vector<1x4x64x8xf32>
    %5 = vector.shape_cast %4 : vector<1x4x64x8xf32> to vector<4x64x8xf32>
    "tpu.trace_start"() <{level = 10 : i32, message = "hnd,hmd->hnm"}> : () -> ()
    %cst = arith.constant dense<0.000000e+00> : vector<4x256x64xf32>
    %6 = tpu.matmul %1, %3, %cst {dimension_numbers = #tpu.dot_dimension_numbers<[2], [2], [1], [1], [0, 0, 0, 1, 1, 1], [0], [0]>} : vector<4x256x8xf32>, vector<4x64x8xf32>, vector<4x256x64xf32> -> vector<4x256x64xf32>
    "tpu.trace_stop"() : () -> ()
    %cst_11 = arith.constant 0.353553385 : f32
    %7 = vector.broadcast %cst_11 : f32 to vector<4x256x64xf32>
    %8 = arith.mulf %6, %7 : vector<4x256x64xf32>
    %cst_12 = arith.constant dense<0xFF800000> : vector<4x256xf32>
    %9 = vector.multi_reduction <maximumf>, %8, %cst_12 [2] : vector<4x256x64xf32> to vector<4x256xf32>
    %10 = vector.shape_cast %9 : vector<4x256xf32> to vector<4x256x1xf32>
    %11 = vector.broadcast %10 : vector<4x256x1xf32> to vector<4x256x64xf32>
    %12 = arith.subf %8, %11 : vector<4x256x64xf32>
    %13 = math.exp %12 : vector<4x256x64xf32>
    "tpu.trace_start"() <{level = 10 : i32, message = "hnm,hmd->hnd"}> : () -> ()
    %cst_13 = arith.constant dense<0.000000e+00> : vector<4x256x8xf32>
    %14 = tpu.matmul %13, %5, %cst_13 {dimension_numbers = #tpu.dot_dimension_numbers<[2], [1], [1], [2], [0, 0, 0, 1, 1, 2], [0], [0]>} : vector<4x256x64xf32>, vector<4x64x8xf32>, vector<4x256x8xf32> -> vector<4x256x8xf32>
    "tpu.trace_stop"() : () -> ()
    %cst_14 = arith.constant dense<0.000000e+00> : vector<4x256xf32>
    %15 = vector.multi_reduction <add>, %13, %cst_14 [2] : vector<4x256x64xf32> to vector<4x256xf32>
    %16 = vector.shape_cast %15 : vector<4x256xf32> to vector<4x256x1xf32>
    %17 = tpu.reciprocal %16 {approx = true} : vector<4x256x1xf32> -> vector<4x256x1xf32>
    %18 = vector.broadcast %17 : vector<4x256x1xf32> to vector<4x256x8xf32>
    %19 = arith.mulf %14, %18 : vector<4x256x8xf32>
    %c0_15 = arith.constant 0 : index
    %c0_16 = arith.constant 0 : index
    %c0_17 = arith.constant 0 : index
    %c0_18 = arith.constant 0 : index
    %20 = vector.load %arg4[%c0_15, %c0_16, %c0_17, %c0_18] : memref<1x4x256x8xf32, #tpu.memory_space<vmem>>, vector<1x4x256x8xf32>
    %21 = vector.shape_cast %20 : vector<1x4x256x8xf32> to vector<4x256x8xf32>
    %22 = vector.shape_cast %19 : vector<4x256x8xf32> to vector<1x4x256x8xf32>
    tpu.vector_store %arg4[%c0_15, %c0_16, %c0_17, %c0_18], %22 {strides = array<i32>} : memref<1x4x256x8xf32, #tpu.memory_space<vmem>>, vector<1x4x256x8xf32>,
    return
  }
  func.func @transform_0(%arg0: i32) -> (i32, i32, i32, i32) {
    %c0_i32 = arith.constant 0 : i32
    %c0_i32_0 = arith.constant 0 : i32
    %c0_i32_1 = arith.constant 0 : i32
    %c0_i32_2 = arith.constant 0 : i32
    return %arg0, %c0_i32, %c0_i32_0, %c0_i32_1 : i32, i32, i32, i32
  }
  func.func @transform_1(%arg0: i32) -> (i32, i32, i32, i32) {
    %c0_i32 = arith.constant 0 : i32
    %c0_i32_0 = arith.constant 0 : i32
    %c0_i32_1 = arith.constant 0 : i32
    %c0_i32_2 = arith.constant 0 : i32
    return %arg0, %c0_i32, %c0_i32_0, %c0_i32_1 : i32, i32, i32, i32
  }
  func.func @transform_2(%arg0: i32) -> (i32, i32, i32, i32) {
    %c0_i32 = arith.constant 0 : i32
    %c0_i32_0 = arith.constant 0 : i32
    %c0_i32_1 = arith.constant 0 : i32
    %c0_i32_2 = arith.constant 0 : i32
    return %arg0, %c0_i32, %c0_i32_0, %c0_i32_1 : i32, i32, i32, i32
  }
  func.func @transform_3(%arg0: i32) -> (i32, i32, i32, i32) {
    %c0_i32 = arith.constant 0 : i32
    %c0_i32_0 = arith.constant 0 : i32
    %c0_i32_1 = arith.constant 0 : i32
    %c0_i32_2 = arith.constant 0 : i32
    return %arg0, %c0_i32, %c0_i32_0, %c0_i32_1 : i32, i32, i32, i32
  }
}

module attributes {stable_mosaic.version = 11 : i64} {
  func.func @kernel(%arg0: i32, %arg1: i32, %arg2: memref<128x32xf32, #tpu.memory_space<vmem>>, %arg3: memref<32x128xbf16, #tpu.memory_space<vmem>>, %arg4: memref<1x128xf32, #tpu.memory_space<vmem>>, %arg5: memref<128x128xf32, #tpu.memory_space<vmem>>) attributes {dimension_semantics = [#tpu.dimension_semantics<parallel>, #tpu.dimension_semantics<parallel>], iteration_bounds = array<i64: 1, 1>, scalar_prefetch = 0 : i64, scratch_operands = 0 : i64, tpu.core_type = #tpu.core_type<tc>, window_params = [{transform_indices = @transform_0, window_bounds = array<i64: 128, 32>}, {transform_indices = @transform_1, window_bounds = array<i64: 32, 128>}, {transform_indices = @transform_2, window_bounds = array<i64: 1, 128>}, {transform_indices = @transform_3, window_bounds = array<i64: 128, 128>}]} {
    %c0 = arith.constant 0 : index
    %c0_0 = arith.constant 0 : index
    %0 = vector.load %arg2[%c0, %c0_0] : memref<128x32xf32, #tpu.memory_space<vmem>>, vector<128x32xf32>
    %1 = arith.truncf %0 : vector<128x32xf32> to vector<128x32xbf16>
    %c0_1 = arith.constant 0 : index
    %c0_2 = arith.constant 0 : index
    %2 = vector.load %arg3[%c0_1, %c0_2] : memref<32x128xbf16, #tpu.memory_space<vmem>>, vector<32x128xbf16>
    %cst = arith.constant dense<0.000000e+00> : vector<128x128xf32>
    %3 = tpu.matmul %1, %2, %cst {dimension_numbers = #tpu.dot_dimension_numbers<[1], [0], [0], [1], [0, 0, 1, 1], [], []>} : vector<128x32xbf16>, vector<32x128xbf16>, vector<128x128xf32> -> vector<128x128xf32>
    %c0_3 = arith.constant 0 : index
    %c0_4 = arith.constant 0 : index
    %4 = vector.load %arg4[%c0_3, %c0_4] : memref<1x128xf32, #tpu.memory_space<vmem>>, vector<1x128xf32>
    %5 = vector.broadcast %4 : vector<1x128xf32> to vector<128x128xf32>
    %6 = arith.addf %3, %5 : vector<128x128xf32>
    %c0_5 = arith.constant 0 : index
    %c0_6 = arith.constant 0 : index
    %7 = vector.load %arg5[%c0_5, %c0_6] : memref<128x128xf32, #tpu.memory_space<vmem>>, vector<128x128xf32>
    tpu.vector_store %arg5[%c0_5, %c0_6], %6 {strides = array<i32>} : memref<128x128xf32, #tpu.memory_space<vmem>>, vector<128x128xf32>,
    return
  }
  func.func @transform_0(%arg0: i32, %arg1: i32) -> (i32, i32) {
    %c0_i32 = arith.constant 0 : i32
    %c0_i32_0 = arith.constant 0 : i32
    return %arg0, %c0_i32 : i32, i32
  }
  func.func @transform_1(%arg0: i32, %arg1: i32) -> (i32, i32) {
    %c0_i32 = arith.constant 0 : i32
    %c0_i32_0 = arith.constant 0 : i32
    return %c0_i32, %arg1 : i32, i32
  }
  func.func @transform_2(%arg0: i32, %arg1: i32) -> (i32, i32) {
    %c0_i32 = arith.constant 0 : i32
    %c0_i32_0 = arith.constant 0 : i32
    return %c0_i32, %arg1 : i32, i32
  }
  func.func @transform_3(%arg0: i32, %arg1: i32) -> (i32, i32) {
    %c0_i32 = arith.constant 0 : i32
    return %arg0, %arg1 : i32, i32
  }
}

module attributes {stable_mosaic.version = 11 : i64} {
  func.func @kernel(%arg0: i32, %arg1: i32, %arg2: memref<256x32xf32, #tpu.memory_space<vmem>>, %arg3: memref<32x128xbf16, #tpu.memory_space<vmem>>, %arg4: memref<256x128xf32, #tpu.memory_space<vmem>>, %arg5: memref<256x128xf32, #tpu.memory_space<vmem>>) attributes {dimension_semantics = [#tpu.dimension_semantics<parallel>, #tpu.dimension_semantics<parallel>], iteration_bounds = array<i64: 2, 1>, scalar_prefetch = 0 : i64, scratch_operands = 0 : i64, tpu.core_type = #tpu.core_type<tc>, window_params = [{transform_indices = @transform_0, window_bounds = array<i64: 256, 32>}, {transform_indices = @transform_1, window_bounds = array<i64: 32, 128>}, {transform_indices = @transform_2, window_bounds = array<i64: 256, 128>}, {transform_indices = @transform_3, window_bounds = array<i64: 256, 128>}]} {
    %c0 = arith.constant 0 : index
    %c0_0 = arith.constant 0 : index
    %0 = vector.load %arg2[%c0, %c0_0] : memref<256x32xf32, #tpu.memory_space<vmem>>, vector<256x32xf32>
    %1 = arith.truncf %0 : vector<256x32xf32> to vector<256x32xbf16>
    %c0_1 = arith.constant 0 : index
    %c0_2 = arith.constant 0 : index
    %2 = vector.load %arg3[%c0_1, %c0_2] : memref<32x128xbf16, #tpu.memory_space<vmem>>, vector<32x128xbf16>
    %cst = arith.constant dense<0.000000e+00> : vector<256x128xf32>
    %3 = tpu.matmul %1, %2, %cst {dimension_numbers = #tpu.dot_dimension_numbers<[1], [0], [0], [1], [0, 0, 1, 1], [], []>} : vector<256x32xbf16>, vector<32x128xbf16>, vector<256x128xf32> -> vector<256x128xf32>
    %c0_3 = arith.constant 0 : index
    %c0_4 = arith.constant 0 : index
    %4 = vector.load %arg4[%c0_3, %c0_4] : memref<256x128xf32, #tpu.memory_space<vmem>>, vector<256x128xf32>
    %5 = arith.addf %3, %4 : vector<256x128xf32>
    %c0_5 = arith.constant 0 : index
    %c0_6 = arith.constant 0 : index
    %6 = vector.load %arg5[%c0_5, %c0_6] : memref<256x128xf32, #tpu.memory_space<vmem>>, vector<256x128xf32>
    tpu.vector_store %arg5[%c0_5, %c0_6], %5 {strides = array<i32>} : memref<256x128xf32, #tpu.memory_space<vmem>>, vector<256x128xf32>,
    return
  }
  func.func @transform_0(%arg0: i32, %arg1: i32) -> (i32, i32) {
    %c0_i32 = arith.constant 0 : i32
    %c0_i32_0 = arith.constant 0 : i32
    return %arg0, %c0_i32 : i32, i32
  }
  func.func @transform_1(%arg0: i32, %arg1: i32) -> (i32, i32) {
    %c0_i32 = arith.constant 0 : i32
    %c0_i32_0 = arith.constant 0 : i32
    return %c0_i32, %arg1 : i32, i32
  }
  func.func @transform_2(%arg0: i32, %arg1: i32) -> (i32, i32) {
    %c0_i32 = arith.constant 0 : i32
    return %arg0, %arg1 : i32, i32
  }
  func.func @transform_3(%arg0: i32, %arg1: i32) -> (i32, i32) {
    %c0_i32 = arith.constant 0 : i32
    return %arg0, %arg1 : i32, i32
  }
}

module attributes {stable_mosaic.version = 11 : i64} {
  func.func @kernel(%arg0: i32, %arg1: i32, %arg2: memref<256x32xf32, #tpu.memory_space<vmem>>, %arg3: memref<32x128xbf16, #tpu.memory_space<vmem>>, %arg4: memref<1x128xf32, #tpu.memory_space<vmem>>, %arg5: memref<256x128xf32, #tpu.memory_space<vmem>>) attributes {dimension_semantics = [#tpu.dimension_semantics<parallel>, #tpu.dimension_semantics<parallel>], iteration_bounds = array<i64: 2, 1>, scalar_prefetch = 0 : i64, scratch_operands = 0 : i64, tpu.core_type = #tpu.core_type<tc>, window_params = [{transform_indices = @transform_0, window_bounds = array<i64: 256, 32>}, {transform_indices = @transform_1, window_bounds = array<i64: 32, 128>}, {transform_indices = @transform_2, window_bounds = array<i64: 1, 128>}, {transform_indices = @transform_3, window_bounds = array<i64: 256, 128>}]} {
    %c0 = arith.constant 0 : index
    %c0_0 = arith.constant 0 : index
    %0 = vector.load %arg2[%c0, %c0_0] : memref<256x32xf32, #tpu.memory_space<vmem>>, vector<256x32xf32>
    %1 = arith.truncf %0 : vector<256x32xf32> to vector<256x32xbf16>
    %c0_1 = arith.constant 0 : index
    %c0_2 = arith.constant 0 : index
    %2 = vector.load %arg3[%c0_1, %c0_2] : memref<32x128xbf16, #tpu.memory_space<vmem>>, vector<32x128xbf16>
    %cst = arith.constant dense<0.000000e+00> : vector<256x128xf32>
    %3 = tpu.matmul %1, %2, %cst {dimension_numbers = #tpu.dot_dimension_numbers<[1], [0], [0], [1], [0, 0, 1, 1], [], []>} : vector<256x32xbf16>, vector<32x128xbf16>, vector<256x128xf32> -> vector<256x128xf32>
    %c0_3 = arith.constant 0 : index
    %c0_4 = arith.constant 0 : index
    %4 = vector.load %arg4[%c0_3, %c0_4] : memref<1x128xf32, #tpu.memory_space<vmem>>, vector<1x128xf32>
    %5 = vector.broadcast %4 : vector<1x128xf32> to vector<256x128xf32>
    %6 = arith.addf %3, %5 : vector<256x128xf32>
    %cst_5 = arith.constant 5.000000e-01 : f32
    %7 = vector.broadcast %cst_5 : f32 to vector<256x128xf32>
    %8 = arith.mulf %7, %6 : vector<256x128xf32>
    %9 = arith.mulf %6, %6 : vector<256x128xf32>
    %10 = arith.mulf %9, %6 : vector<256x128xf32>
    %cst_6 = arith.constant 4.471500e-02 : f32
    %11 = vector.broadcast %cst_6 : f32 to vector<256x128xf32>
    %12 = arith.mulf %11, %10 : vector<256x128xf32>
    %13 = arith.addf %6, %12 : vector<256x128xf32>
    %cst_7 = arith.constant 0.797884583 : f32
    %14 = vector.broadcast %cst_7 : f32 to vector<256x128xf32>
    %15 = arith.mulf %14, %13 : vector<256x128xf32>
    %16 = math.tanh %15 : vector<256x128xf32>
    %cst_8 = arith.constant 1.000000e+00 : f32
    %17 = vector.broadcast %cst_8 : f32 to vector<256x128xf32>
    %18 = arith.addf %17, %16 : vector<256x128xf32>
    %19 = arith.mulf %8, %18 : vector<256x128xf32>
    %c0_9 = arith.constant 0 : index
    %c0_10 = arith.constant 0 : index
    %20 = vector.load %arg5[%c0_9, %c0_10] : memref<256x128xf32, #tpu.memory_space<vmem>>, vector<256x128xf32>
    tpu.vector_store %arg5[%c0_9, %c0_10], %19 {strides = array<i32>} : memref<256x128xf32, #tpu.memory_space<vmem>>, vector<256x128xf32>,
    return
  }
  func.func @transform_0(%arg0: i32, %arg1: i32) -> (i32, i32) {
    %c0_i32 = arith.constant 0 : i32
    %c0_i32_0 = arith.constant 0 : i32
    return %arg0, %c0_i32 : i32, i32
  }
  func.func @transform_1(%arg0: i32, %arg1: i32) -> (i32, i32) {
    %c0_i32 = arith.constant 0 : i32
    %c0_i32_0 = arith.constant 0 : i32
    return %c0_i32, %arg1 : i32, i32
  }
  func.func @transform_2(%arg0: i32, %arg1: i32) -> (i32, i32) {
    %c0_i32 = arith.constant 0 : i32
    %c0_i32_0 = arith.constant 0 : i32
    return %c0_i32, %arg1 : i32, i32
  }
  func.func @transform_3(%arg0: i32, %arg1: i32) -> (i32, i32) {
    %c0_i32 = arith.constant 0 : i32
    return %arg0, %arg1 : i32, i32
  }
}

module attributes {stable_mosaic.version = 11 : i64} {
  func.func @kernel(%arg0: i32, %arg1: memref<1x18x18x32xf32, #tpu.memory_space<vmem>>, %arg2: memref<9x32xf32, #tpu.memory_space<vmem>>, %arg3: memref<1x32xf32, #tpu.memory_space<vmem>>, %arg4: memref<1x16x16x32xf32, #tpu.memory_space<vmem>>, %arg5: memref<1x16x16x32xf32, #tpu.memory_space<vmem>>) attributes {dimension_semantics = [#tpu.dimension_semantics<parallel>], iteration_bounds = array<i64: 2>, scalar_prefetch = 0 : i64, scratch_operands = 0 : i64, tpu.core_type = #tpu.core_type<tc>, window_params = [{transform_indices = @transform_0, window_bounds = array<i64: 1, 18, 18, 32>}, {pipeline_mode = #tpu.pipeline_mode<synchronous>, transform_indices = @transform_1, window_bounds = array<i64: 9, 32>}, {pipeline_mode = #tpu.pipeline_mode<synchronous>, transform_indices = @transform_2, window_bounds = array<i64: 1, 32>}, {transform_indices = @transform_3, window_bounds = array<i64: 1, 16, 16, 32>}, {transform_indices = @transform_4, window_bounds = array<i64: 1, 16, 16, 32>}]} {
    %cst = arith.constant 0.000000e+00 : f32
    %0 = vector.broadcast %cst : f32 to vector<1x16x16x32xf32>
    %c0 = arith.constant 0 : index
    %c0_0 = arith.constant 0 : index
    %1 = vector.load %arg2[%c0, %c0_0] : memref<9x32xf32, #tpu.memory_space<vmem>>, vector<1x32xf32>
    %2 = vector.shape_cast %1 : vector<1x32xf32> to vector<32xf32>
    %3 = vector.shape_cast %2 : vector<32xf32> to vector<1x1x1x32xf32>
    %c0_1 = arith.constant 0 : index
    %c0_2 = arith.constant 0 : index
    %c0_3 = arith.constant 0 : index
    %c0_4 = arith.constant 0 : index
    %4 = vector.load %arg1[%c0_1, %c0_2, %c0_3, %c0_4] : memref<1x18x18x32xf32, #tpu.memory_space<vmem>>, vector<1x16x16x32xf32>
    %5 = vector.broadcast %3 : vector<1x1x1x32xf32> to vector<1x16x16x32xf32>
    %6 = arith.mulf %4, %5 : vector<1x16x16x32xf32>
    %7 = arith.addf %0, %6 : vector<1x16x16x32xf32>
    %c1 = arith.constant 1 : index
    %c0_5 = arith.constant 0 : index
    %8 = vector.load %arg2[%c1, %c0_5] : memref<9x32xf32, #tpu.memory_space<vmem>>, vector<1x32xf32>
    %9 = vector.shape_cast %8 : vector<1x32xf32> to vector<32xf32>
    %10 = vector.shape_cast %9 : vector<32xf32> to vector<1x1x1x32xf32>
    %c0_6 = arith.constant 0 : index
    %c0_7 = arith.constant 0 : index
    %c1_8 = arith.constant 1 : index
    %c0_9 = arith.constant 0 : index
    %11 = vector.load %arg1[%c0_6, %c0_7, %c1_8, %c0_9] : memref<1x18x18x32xf32, #tpu.memory_space<vmem>>, vector<1x16x16x32xf32>
    %12 = vector.broadcast %10 : vector<1x1x1x32xf32> to vector<1x16x16x32xf32>
    %13 = arith.mulf %11, %12 : vector<1x16x16x32xf32>
    %14 = arith.addf %7, %13 : vector<1x16x16x32xf32>
    %c2 = arith.constant 2 : index
    %c0_10 = arith.constant 0 : index
    %15 = vector.load %arg2[%c2, %c0_10] : memref<9x32xf32, #tpu.memory_space<vmem>>, vector<1x32xf32>
    %16 = vector.shape_cast %15 : vector<1x32xf32> to vector<32xf32>
    %17 = vector.shape_cast %16 : vector<32xf32> to vector<1x1x1x32xf32>
    %c0_11 = arith.constant 0 : index
    %c0_12 = arith.constant 0 : index
    %c2_13 = arith.constant 2 : index
    %c0_14 = arith.constant 0 : index
    %18 = vector.load %arg1[%c0_11, %c0_12, %c2_13, %c0_14] : memref<1x18x18x32xf32, #tpu.memory_space<vmem>>, vector<1x16x16x32xf32>
    %19 = vector.broadcast %17 : vector<1x1x1x32xf32> to vector<1x16x16x32xf32>
    %20 = arith.mulf %18, %19 : vector<1x16x16x32xf32>
    %21 = arith.addf %14, %20 : vector<1x16x16x32xf32>
    %c3 = arith.constant 3 : index
    %c0_15 = arith.constant 0 : index
    %22 = vector.load %arg2[%c3, %c0_15] : memref<9x32xf32, #tpu.memory_space<vmem>>, vector<1x32xf32>
    %23 = vector.shape_cast %22 : vector<1x32xf32> to vector<32xf32>
    %24 = vector.shape_cast %23 : vector<32xf32> to vector<1x1x1x32xf32>
    %c0_16 = arith.constant 0 : index
    %c1_17 = arith.constant 1 : index
    %c0_18 = arith.constant 0 : index
    %c0_19 = arith.constant 0 : index
    %25 = vector.load %arg1[%c0_16, %c1_17, %c0_18, %c0_19] : memref<1x18x18x32xf32, #tpu.memory_space<vmem>>, vector<1x16x16x32xf32>
    %26 = vector.broadcast %24 : vector<1x1x1x32xf32> to vector<1x16x16x32xf32>
    %27 = arith.mulf %25, %26 : vector<1x16x16x32xf32>
    %28 = arith.addf %21, %27 : vector<1x16x16x32xf32>
    %c4 = arith.constant 4 : index
    %c0_20 = arith.constant 0 : index
    %29 = vector.load %arg2[%c4, %c0_20] : memref<9x32xf32, #tpu.memory_space<vmem>>, vector<1x32xf32>
    %30 = vector.shape_cast %29 : vector<1x32xf32> to vector<32xf32>
    %31 = vector.shape_cast %30 : vector<32xf32> to vector<1x1x1x32xf32>
    %c0_21 = arith.constant 0 : index
    %c1_22 = arith.constant 1 : index
    %c1_23 = arith.constant 1 : index
    %c0_24 = arith.constant 0 : index
    %32 = vector.load %arg1[%c0_21, %c1_22, %c1_23, %c0_24] : memref<1x18x18x32xf32, #tpu.memory_space<vmem>>, vector<1x16x16x32xf32>
    %33 = vector.broadcast %31 : vector<1x1x1x32xf32> to vector<1x16x16x32xf32>
    %34 = arith.mulf %32, %33 : vector<1x16x16x32xf32>
    %35 = arith.addf %28, %34 : vector<1x16x16x32xf32>
    %c5 = arith.constant 5 : index
    %c0_25 = arith.constant 0 : index
    %36 = vector.load %arg2[%c5, %c0_25] : memref<9x32xf32, #tpu.memory_space<vmem>>, vector<1x32xf32>
    %37 = vector.shape_cast %36 : vector<1x32xf32> to vector<32xf32>
    %38 = vector.shape_cast %37 : vector<32xf32> to vector<1x1x1x32xf32>
    %c0_26 = arith.constant 0 : index
    %c1_27 = arith.constant 1 : index
    %c2_28 = arith.constant 2 : index
    %c0_29 = arith.constant 0 : index
    %39 = vector.load %arg1[%c0_26, %c1_27, %c2_28, %c0_29] : memref<1x18x18x32xf32, #tpu.memory_space<vmem>>, vector<1x16x16x32xf32>
    %40 = vector.broadcast %38 : vector<1x1x1x32xf32> to vector<1x16x16x32xf32>
    %41 = arith.mulf %39, %40 : vector<1x16x16x32xf32>
    %42 = arith.addf %35, %41 : vector<1x16x16x32xf32>
    %c6 = arith.constant 6 : index
    %c0_30 = arith.constant 0 : index
    %43 = vector.load %arg2[%c6, %c0_30] : memref<9x32xf32, #tpu.memory_space<vmem>>, vector<1x32xf32>
    %44 = vector.shape_cast %43 : vector<1x32xf32> to vector<32xf32>
    %45 = vector.shape_cast %44 : vector<32xf32> to vector<1x1x1x32xf32>
    %c0_31 = arith.constant 0 : index
    %c2_32 = arith.constant 2 : index
    %c0_33 = arith.constant 0 : index
    %c0_34 = arith.constant 0 : index
    %46 = vector.load %arg1[%c0_31, %c2_32, %c0_33, %c0_34] : memref<1x18x18x32xf32, #tpu.memory_space<vmem>>, vector<1x16x16x32xf32>
    %47 = vector.broadcast %45 : vector<1x1x1x32xf32> to vector<1x16x16x32xf32>
    %48 = arith.mulf %46, %47 : vector<1x16x16x32xf32>
    %49 = arith.addf %42, %48 : vector<1x16x16x32xf32>
    %c7 = arith.constant 7 : index
    %c0_35 = arith.constant 0 : index
    %50 = vector.load %arg2[%c7, %c0_35] : memref<9x32xf32, #tpu.memory_space<vmem>>, vector<1x32xf32>
    %51 = vector.shape_cast %50 : vector<1x32xf32> to vector<32xf32>
    %52 = vector.shape_cast %51 : vector<32xf32> to vector<1x1x1x32xf32>
    %c0_36 = arith.constant 0 : index
    %c2_37 = arith.constant 2 : index
    %c1_38 = arith.constant 1 : index
    %c0_39 = arith.constant 0 : index
    %53 = vector.load %arg1[%c0_36, %c2_37, %c1_38, %c0_39] : memref<1x18x18x32xf32, #tpu.memory_space<vmem>>, vector<1x16x16x32xf32>
    %54 = vector.broadcast %52 : vector<1x1x1x32xf32> to vector<1x16x16x32xf32>
    %55 = arith.mulf %53, %54 : vector<1x16x16x32xf32>
    %56 = arith.addf %49, %55 : vector<1x16x16x32xf32>
    %c8 = arith.constant 8 : index
    %c0_40 = arith.constant 0 : index
    %57 = vector.load %arg2[%c8, %c0_40] : memref<9x32xf32, #tpu.memory_space<vmem>>, vector<1x32xf32>
    %58 = vector.shape_cast %57 : vector<1x32xf32> to vector<32xf32>
    %59 = vector.shape_cast %58 : vector<32xf32> to vector<1x1x1x32xf32>
    %c0_41 = arith.constant 0 : index
    %c2_42 = arith.constant 2 : index
    %c2_43 = arith.constant 2 : index
    %c0_44 = arith.constant 0 : index
    %60 = vector.load %arg1[%c0_41, %c2_42, %c2_43, %c0_44] : memref<1x18x18x32xf32, #tpu.memory_space<vmem>>, vector<1x16x16x32xf32>
    %61 = vector.broadcast %59 : vector<1x1x1x32xf32> to vector<1x16x16x32xf32>
    %62 = arith.mulf %60, %61 : vector<1x16x16x32xf32>
    %63 = arith.addf %56, %62 : vector<1x16x16x32xf32>
    %c0_45 = arith.constant 0 : index
    %c0_46 = arith.constant 0 : index
    %64 = vector.load %arg3[%c0_45, %c0_46] : memref<1x32xf32, #tpu.memory_space<vmem>>, vector<1x32xf32>
    %65 = vector.shape_cast %64 : vector<1x32xf32> to vector<1x1x1x32xf32>
    %66 = vector.broadcast %65 : vector<1x1x1x32xf32> to vector<1x16x16x32xf32>
    %67 = arith.addf %63, %66 : vector<1x16x16x32xf32>
    %c0_47 = arith.constant 0 : index
    %c1_48 = arith.constant 1 : index
    %c1_49 = arith.constant 1 : index
    %c0_50 = arith.constant 0 : index
    %68 = vector.load %arg1[%c0_47, %c1_48, %c1_49, %c0_50] : memref<1x18x18x32xf32, #tpu.memory_space<vmem>>, vector<1x16x16x32xf32>
    %cst_51 = arith.constant 5.000000e-01 : f32
    %69 = vector.broadcast %cst_51 : f32 to vector<1x16x16x32xf32>
    %70 = arith.mulf %69, %67 : vector<1x16x16x32xf32>
    %71 = arith.mulf %67, %67 : vector<1x16x16x32xf32>
    %72 = arith.mulf %71, %67 : vector<1x16x16x32xf32>
    %cst_52 = arith.constant 4.471500e-02 : f32
    %73 = vector.broadcast %cst_52 : f32 to vector<1x16x16x32xf32>
    %74 = arith.mulf %73, %72 : vector<1x16x16x32xf32>
    %75 = arith.addf %67, %74 : vector<1x16x16x32xf32>
    %cst_53 = arith.constant 0.797884583 : f32
    %76 = vector.broadcast %cst_53 : f32 to vector<1x16x16x32xf32>
    %77 = arith.mulf %76, %75 : vector<1x16x16x32xf32>
    %78 = math.tanh %77 : vector<1x16x16x32xf32>
    %cst_54 = arith.constant 1.000000e+00 : f32
    %79 = vector.broadcast %cst_54 : f32 to vector<1x16x16x32xf32>
    %80 = arith.addf %79, %78 : vector<1x16x16x32xf32>
    %81 = arith.mulf %70, %80 : vector<1x16x16x32xf32>
    %82 = arith.addf %68, %81 : vector<1x16x16x32xf32>
    %cst_55 = arith.constant 5.000000e-01 : f32
    %83 = vector.broadcast %cst_55 : f32 to vector<1x16x16x32xf32>
    %84 = arith.mulf %83, %82 : vector<1x16x16x32xf32>
    %85 = arith.mulf %82, %82 : vector<1x16x16x32xf32>
    %86 = arith.mulf %85, %82 : vector<1x16x16x32xf32>
    %cst_56 = arith.constant 4.471500e-02 : f32
    %87 = vector.broadcast %cst_56 : f32 to vector<1x16x16x32xf32>
    %88 = arith.mulf %87, %86 : vector<1x16x16x32xf32>
    %89 = arith.addf %82, %88 : vector<1x16x16x32xf32>
    %cst_57 = arith.constant 0.797884583 : f32
    %90 = vector.broadcast %cst_57 : f32 to vector<1x16x16x32xf32>
    %91 = arith.mulf %90, %89 : vector<1x16x16x32xf32>
    %92 = math.tanh %91 : vector<1x16x16x32xf32>
    %cst_58 = arith.constant 1.000000e+00 : f32
    %93 = vector.broadcast %cst_58 : f32 to vector<1x16x16x32xf32>
    %94 = arith.addf %93, %92 : vector<1x16x16x32xf32>
    %95 = arith.mulf %84, %94 : vector<1x16x16x32xf32>
    %c0_59 = arith.constant 0 : index
    %c0_60 = arith.constant 0 : index
    %c0_61 = arith.constant 0 : index
    %c0_62 = arith.constant 0 : index
    %96 = vector.load %arg4[%c0_59, %c0_60, %c0_61, %c0_62] : memref<1x16x16x32xf32, #tpu.memory_space<vmem>>, vector<1x16x16x32xf32>
    %97 = arith.addf %95, %96 : vector<1x16x16x32xf32>
    %c0_63 = arith.constant 0 : index
    %c0_64 = arith.constant 0 : index
    %c0_65 = arith.constant 0 : index
    %c0_66 = arith.constant 0 : index
    %98 = vector.load %arg5[%c0_63, %c0_64, %c0_65, %c0_66] : memref<1x16x16x32xf32, #tpu.memory_space<vmem>>, vector<1x16x16x32xf32>
    tpu.vector_store %arg5[%c0_63, %c0_64, %c0_65, %c0_66], %97 {strides = array<i32>} : memref<1x16x16x32xf32, #tpu.memory_space<vmem>>, vector<1x16x16x32xf32>,
    return
  }
  func.func @transform_0(%arg0: i32) -> (i32, i32, i32, i32) {
    %c0_i32 = arith.constant 0 : i32
    %c0_i32_0 = arith.constant 0 : i32
    %c0_i32_1 = arith.constant 0 : i32
    %c0_i32_2 = arith.constant 0 : i32
    return %arg0, %c0_i32, %c0_i32_0, %c0_i32_1 : i32, i32, i32, i32
  }
  func.func @transform_1(%arg0: i32) -> (i32, i32) {
    %c0_i32 = arith.constant 0 : i32
    %c0_i32_0 = arith.constant 0 : i32
    %c0_i32_1 = arith.constant 0 : i32
    return %c0_i32, %c0_i32_0 : i32, i32
  }
  func.func @transform_2(%arg0: i32) -> (i32, i32) {
    %c0_i32 = arith.constant 0 : i32
    %c0_i32_0 = arith.constant 0 : i32
    %c0_i32_1 = arith.constant 0 : i32
    return %c0_i32, %c0_i32_0 : i32, i32
  }
  func.func @transform_3(%arg0: i32) -> (i32, i32, i32, i32) {
    %c0_i32 = arith.constant 0 : i32
    %c0_i32_0 = arith.constant 0 : i32
    %c0_i32_1 = arith.constant 0 : i32
    %c0_i32_2 = arith.constant 0 : i32
    return %arg0, %c0_i32, %c0_i32_0, %c0_i32_1 : i32, i32, i32, i32
  }
  func.func @transform_4(%arg0: i32) -> (i32, i32, i32, i32) {
    %c0_i32 = arith.constant 0 : i32
    %c0_i32_0 = arith.constant 0 : i32
    %c0_i32_1 = arith.constant 0 : i32
    %c0_i32_2 = arith.constant 0 : i32
    return %arg0, %c0_i32, %c0_i32_0, %c0_i32_1 : i32, i32, i32, i32
  }
}

module attributes {stable_mosaic.version = 11 : i64} {
  func.func @kernel(%arg0: i32, %arg1: i32, %arg2: memref<256x576xbf16, #tpu.memory_space<vmem>>, %arg3: memref<576x128xbf16, #tpu.memory_space<vmem>>, %arg4: memref<1x128xf32, #tpu.memory_space<vmem>>, %arg5: memref<256x128xf32, #tpu.memory_space<vmem>>) attributes {dimension_semantics = [#tpu.dimension_semantics<parallel>, #tpu.dimension_semantics<parallel>], iteration_bounds = array<i64: 2, 1>, scalar_prefetch = 0 : i64, scratch_operands = 0 : i64, tpu.core_type = #tpu.core_type<tc>, window_params = [{transform_indices = @transform_0, window_bounds = array<i64: 256, 576>}, {transform_indices = @transform_1, window_bounds = array<i64: 576, 128>}, {transform_indices = @transform_2, window_bounds = array<i64: 1, 128>}, {transform_indices = @transform_3, window_bounds = array<i64: 256, 128>}]} {
    %c0 = arith.constant 0 : index
    %c0_0 = arith.constant 0 : index
    %0 = vector.load %arg2[%c0, %c0_0] : memref<256x576xbf16, #tpu.memory_space<vmem>>, vector<256x576xbf16>
    %c0_1 = arith.constant 0 : index
    %c0_2 = arith.constant 0 : index
    %1 = vector.load %arg3[%c0_1, %c0_2] : memref<576x128xbf16, #tpu.memory_space<vmem>>, vector<576x128xbf16>
    %cst = arith.constant dense<0.000000e+00> : vector<256x128xf32>
    %2 = tpu.matmul %0, %1, %cst {dimension_numbers = #tpu.dot_dimension_numbers<[1], [0], [0], [1], [0, 0, 1, 1], [], []>} : vector<256x576xbf16>, vector<576x128xbf16>, vector<256x128xf32> -> vector<256x128xf32>
    %c0_3 = arith.constant 0 : index
    %c0_4 = arith.constant 0 : index
    %3 = vector.load %arg4[%c0_3, %c0_4] : memref<1x128xf32, #tpu.memory_space<vmem>>, vector<1x128xf32>
    %4 = vector.broadcast %3 : vector<1x128xf32> to vector<256x128xf32>
    %5 = arith.addf %2, %4 : vector<256x128xf32>
    %cst_5 = arith.constant 0.000000e+00 : f32
    %6 = vector.broadcast %cst_5 : f32 to vector<256x128xf32>
    %7 = arith.maximumf %5, %6 : vector<256x128xf32>
    %c0_6 = arith.constant 0 : index
    %c0_7 = arith.constant 0 : index
    %8 = vector.load %arg5[%c0_6, %c0_7] : memref<256x128xf32, #tpu.memory_space<vmem>>, vector<256x128xf32>
    tpu.vector_store %arg5[%c0_6, %c0_7], %7 {strides = array<i32>} : memref<256x128xf32, #tpu.memory_space<vmem>>, vector<256x128xf32>,
    return
  }
  func.func @transform_0(%arg0: i32, %arg1: i32) -> (i32, i32) {
    %c0_i32 = arith.constant 0 : i32
    %c0_i32_0 = arith.constant 0 : i32
    return %arg0, %c0_i32 : i32, i32
  }
  func.func @transform_1(%arg0: i32, %arg1: i32) -> (i32, i32) {
    %c0_i32 = arith.constant 0 : i32
    %c0_i32_0 = arith.constant 0 : i32
    return %c0_i32, %arg1 : i32, i32
  }
  func.func @transform_2(%arg0: i32, %arg1: i32) -> (i32, i32) {
    %c0_i32 = arith.constant 0 : i32
    %c0_i32_0 = arith.constant 0 : i32
    return %c0_i32, %arg1 : i32, i32
  }
  func.func @transform_3(%arg0: i32, %arg1: i32) -> (i32, i32) {
    %c0_i32 = arith.constant 0 : i32
    return %arg0, %arg1 : i32, i32
  }
}

</mosaic_0001>

<bundles_post_ra>
// kernel: up_trans_block.9
= control target key start
LH: loop header
LB: loop body
LE: loop exit
PB: predicated region body
PF: predicated region fallthrough
CT: control target
= control target key end

     0   :  { %s1551_s9 = smov 0   ;;  %s1553_s10 = smov 0   ;;  %s1766_s0 = inlined_call_operand.vmem [shape: bf16[512,288], index: 0, kind: input, shape index: {}]   ;;  %s1767_s1 = inlined_call_operand.vmem [shape: bf16[288,128], index: 1, kind: input, shape index: {}]   ;;  %s1768_s2 = inlined_call_operand.vmem [shape: f32[512,128], index: 2, kind: output, shape index: {}]  }
   0x1   :  { %s1555_s11 = smov 0  }
   0x2 LB: > { %s24_s12 = sadd.s32 1, %s1530_s10  ;;  %p1134_p0 = scmp.ge.s32.totalorder %s1534_s11, 1  ;;  %s1534_s11 = sphi %s1555_s11, %s12_s11   ;;  %s1530_s10 = sphi %s1553_s10, %s1770_s10   ;;  %s1526_s9 = sphi %s1551_s9, %s1769_s9  }
   0x3   : > { %p26_p1 = scmp.ge.s32.totalorder %s24_s12, 2  ;;  %p137_p2 = scmp.lt.s32.totalorder %s1534_s11, 3 }
   0x5   : > { %s1772_s12 = smov (%p26_p1, %s24_s12), 0  ;;  %p138_p3 = pnand %p1134_p0, %p137_p2 }
   0x6   : > { %v1430_v0 = vld [vmem:[%s1767_s1 + $0x40] sm:$0xff] (!%p138_p3)   ;;  %s1135_s15 = sshll.u32 (!%p138_p3), %s1526_s9, 5  ;;  %v1432_v2 = vld [vmem:[%s1767_s1 + $0x48] sm:$0xff] (!%p138_p3)   ;;  %v1434_v4 = vld [vmem:[%s1767_s1 + $0x50] sm:$0xff] (!%p138_p3)   ;;  %vm636_vm0 = vcmask (!%p138_p3), 261120  }
   0x7   : > { %141 = sbr.rel (%p138_p3) target bundleno = 347 (0x15b), region = 28  ;;  %v1431_v1 = vld [vmem:[%s1767_s1] sm:$0xff] (!%p138_p3)   ;;  %1223 = vmatprep.subr.bf16.mxu0 (!%p138_p3), %v1430_v0  ;;  %1389 = vmatprep.subr.bf16.mxu1 (!%p138_p3), %v1430_v0  ;;  %p168_p4 = scmp.lt.s32.totalorder (!%p138_p3), %s1135_s15, 63  ;;  %v1433_v3 = vld [vmem:[%s1767_s1 + $0x8] sm:$0xff] (!%p138_p3)   ;;  %v1435_v5 = vld [vmem:[%s1767_s1 + $0x10] sm:$0xff] (!%p138_p3)  }
   0x8   : > { %1224 = vmatpush3.bf16.msra.mxu0 (!%p138_p3), %v1431_v1  ;;  %1397 = vmatpush3.bf16.msra.mxu1 (!%p138_p3), %v1431_v1  ;;  %v1436_v6 = vld [vmem:[%s1767_s1 + $0x58] sm:$0xff] (!%p138_p3)   ;;  %v1438_v8 = vld [vmem:[%s1767_s1 + $0x60] sm:$0xff] (!%p138_p3)   ;;  %v1440_v10 = vld [vmem:[%s1767_s1 + $0x68] sm:$0xff] (!%p138_p3)  }
   0x9   : > { %1225 = vmatprep.subr.bf16.mxu0 (!%p138_p3), %v1432_v2  ;;  %1390 = vmatprep.subr.bf16.mxu1 (!%p138_p3), %v1432_v2  ;;  %v1437_v7 = vld [vmem:[%s1767_s1 + $0x18] sm:$0xff] (!%p138_p3)   ;;  %v1439_v9 = vld [vmem:[%s1767_s1 + $0x20] sm:$0xff] (!%p138_p3)   ;;  %v1441_v13 = vld [vmem:[%s1767_s1 + $0x28] sm:$0xff] (!%p138_p3)  }
   0xa   : > { %v1442_v14 = vld [vmem:[%s1767_s1 + $0x70] sm:$0xff] (!%p138_p3)   ;;  %v1444_v16 = vld [vmem:[%s1767_s1 + $0x78] sm:$0xff] (!%p138_p3)   ;;  %v1452_v18 = vld [vmem:[%s1767_s1 + $0x80] sm:$0xff] (!%p138_p3)  }
   0xb   : > { %v1443_v15 = vld [vmem:[%s1767_s1 + $0x30] sm:$0xff] (!%p138_p3)   ;;  %v1445_v17 = vld [vmem:[%s1767_s1 + $0x38] sm:$0xff] (!%p138_p3)   ;;  %v1465_v23 = vld [vmem:[%s1767_s1 + $0x88] sm:$0xff] (!%p138_p3)  }
   0xc   : > { %1226 = vmatpush3.bf16.msra.mxu0 (!%p138_p3), %v1433_v3  ;;  %1398 = vmatpush3.bf16.msra.mxu1 (!%p138_p3), %v1433_v3 }
   0xd   : > { %1227 = vmatprep.subr.bf16.mxu0 (!%p138_p3), %v1434_v4  ;;  %1391 = vmatprep.subr.bf16.mxu1 (!%p138_p3), %v1434_v4 }
   0xe   : > { %s1774_s15 = smov (!%p168_p4, %s1135_s15), 63 }
   0xf   : > { %s1405_s28 = smul.u32 12, %s1774_s15  ;;  %s1138_s30 = sshll.u32 %s1774_s15, 3 }
  0x10   : > { %1228 = vmatpush3.bf16.msra.mxu0 %v1435_v5  ;;  %1399 = vmatpush3.bf16.msra.mxu1 %v1435_v5  ;;  %s1715_s5 = scalar_lea.vmem %s1768_s2, %s1138_s30 }
  0x11   : > { %1229 = vmatprep.subr.bf16.mxu0 %v1436_v6  ;;  %1392 = vmatprep.subr.bf16.mxu1 %v1436_v6  ;;  %s1602_s7 = scalar_lea.vmem %s1766_s0, %s1405_s28 }
  0x12   : > { %v1448_v11 = vld [vmem:[%s1602_s7 + $0x4] ss:$12 sps:$4 sm:$0xff]   ;;  %v1446_v19 = vld [vmem:[%s1602_s7] ss:$12 sps:$4 sm:$0xff]   ;;  %v1453_v21 = vld [vmem:[%s1602_s7 + $0x1c] ss:$12 sps:$4 sm:$0xff]  }
  0x13   : > { %v1451_v12 = vld [vmem:[%s1602_s7 + $0x124] ss:$12 sps:$4 sm:$0xff]   ;;  %717 = vmatprep.mubr.bf16.mxu0 %v1448_v11  ;;  %v1449_v20 = vld [vmem:[%s1602_s7 + $0x120] ss:$12 sps:$4 sm:$0xff]   ;;  %v1455_v22 = vld [vmem:[%s1602_s7 + $0x13c] ss:$12 sps:$4 sm:$0xff]  }
  0x14   : > { %1230 = vmatpush3.bf16.msra.mxu0 %v1437_v7  ;;  %1400 = vmatpush3.bf16.msra.mxu1 %v1437_v7  ;;  %v1457_v24 = vld [vmem:[%s1602_s7 + $0x18] ss:$12 sps:$4 sm:$0xff]   ;;  %v1459_v26 = vld [vmem:[%s1602_s7 + $0x34] ss:$12 sps:$4 sm:$0xff]   ;;  %v1463_v28 = vld [vmem:[%s1602_s7 + $0x30] ss:$12 sps:$4 sm:$0xff]  }
  0x15   : > { %1231 = vmatprep.subr.bf16.mxu0 %v1438_v8  ;;  %1393 = vmatprep.subr.bf16.mxu1 %v1438_v8  ;;  %v1458_v25 = vld [vmem:[%s1602_s7 + $0x138] ss:$12 sps:$4 sm:$0xff]   ;;  %v1461_v27 = vld [vmem:[%s1602_s7 + $0x154] ss:$12 sps:$4 sm:$0xff]   ;;  %v1464_v29 = vld [vmem:[%s1602_s7 + $0x150] ss:$12 sps:$4 sm:$0xff]  }
  0x16   : > { %813 = vmatprep.mubr.bf16.mxu1 %v1451_v12  ;;  %v1466_v30 = vld [vmem:[%s1602_s7 + $0x4c] ss:$12 sps:$4 sm:$0xff]   ;;  %v1470_v32 = vld [vmem:[%s1602_s7 + $0x48] ss:$12 sps:$4 sm:$0xff]   ;;  %v1472_v34 = vld [vmem:[%s1602_s7 + $0x64] ss:$12 sps:$4 sm:$0xff]  }
  0x17   : > { %v1468_v31 = vld [vmem:[%s1602_s7 + $0x16c] ss:$12 sps:$4 sm:$0xff]   ;;  %v1471_v33 = vld [vmem:[%s1602_s7 + $0x168] ss:$12 sps:$4 sm:$0xff]   ;;  %v1481_v41 = vld [vmem:[%s1602_s7 + $0x50] ss:$12 sps:$4 sm:$0xff]  }
  0x18   : > { %1232 = vmatpush3.bf16.msra.mxu0 %v1439_v9  ;;  %1401 = vmatpush3.bf16.msra.mxu1 %v1439_v9  ;;  %v1474_v35 = vld [vmem:[%s1602_s7 + $0x8] ss:$12 sps:$4 sm:$0xff]   ;;  %v1475_v36 = vld [vmem:[%s1602_s7 + $0x60] ss:$12 sps:$4 sm:$0xff]   ;;  %v1479_v39 = vld [vmem:[%s1602_s7 + $0x38] ss:$12 sps:$4 sm:$0xff]  }
  0x19   : > { %1233 = vmatprep.subr.bf16.mxu0 %v1440_v10  ;;  %1394 = vmatprep.subr.bf16.mxu1 %v1440_v10  ;;  %v1476_v37 = vld [vmem:[%s1602_s7 + $0x20] ss:$12 sps:$4 sm:$0xff]   ;;  %v1477_v38 = vld [vmem:[%s1602_s7 + $0x7c] ss:$12 sps:$4 sm:$0xff]   ;;  %v1480_v40 = vld [vmem:[%s1602_s7 + $0x78] ss:$12 sps:$4 sm:$0xff]  }
  0x1a   : > { %v1482_v42 = vld [vmem:[%s1602_s7 + $0x94] ss:$12 sps:$4 sm:$0xff]   ;;  %v1485_v44 = vld [vmem:[%s1602_s7 + $0x90] ss:$12 sps:$4 sm:$0xff]   ;;  %v1487_v46 = vld [vmem:[%s1602_s7 + $0xac] ss:$12 sps:$4 sm:$0xff]  }
  0x1b   : > { %v1484_v43 = vld [vmem:[%s1602_s7 + $0x68] ss:$12 sps:$4 sm:$0xff]   ;;  %v1486_v45 = vld [vmem:[%s1602_s7 + $0x80] ss:$12 sps:$4 sm:$0xff]   ;;  %v1489_v47 = vld [vmem:[%s1602_s7 + $0x98] ss:$12 sps:$4 sm:$0xff]  }
  0x1c   : > { %1234 = vmatpush3.bf16.msra.mxu0 %v1441_v13  ;;  %1402 = vmatpush3.bf16.msra.mxu1 %v1441_v13  ;;  %v1490_v48 = vld [vmem:[%s1602_s7 + $0xa8] ss:$12 sps:$4 sm:$0xff]   ;;  %v1491_v49 = vld [vmem:[%s1602_s7 + $0xb0] ss:$12 sps:$4 sm:$0xff]   ;;  %v1495_v52 = vld [vmem:[%s1602_s7 + $0xc0] ss:$12 sps:$4 sm:$0xff]  }
  0x1d   : > { %1235 = vmatprep.subr.bf16.mxu0 %v1442_v14  ;;  %1395 = vmatprep.subr.bf16.mxu1 %v1442_v14  ;;  %v1492_v50 = vld [vmem:[%s1602_s7 + $0xc4] ss:$12 sps:$4 sm:$0xff]   ;;  %v1494_v51 = vld [vmem:[%s1602_s7 + $0xc8] ss:$12 sps:$4 sm:$0xff]   ;;  %v1496_v53 = vld [vmem:[%s1602_s7 + $0xe0] ss:$12 sps:$4 sm:$0xff]  }
  0x1e   : > { %v1497_v54 = vld [vmem:[%s1602_s7 + $0xdc] ss:$12 sps:$4 sm:$0xff]   ;;  %v1499_v55 = vld [vmem:[%s1602_s7 + $0xf8] ss:$12 sps:$4 sm:$0xff]   ;;  %v1502_v58 = vld [vmem:[%s1602_s7 + $0xf4] ss:$12 sps:$4 sm:$0xff]  }
  0x1f   : > { %v1500_v56 = vld [vmem:[%s1602_s7 + $0xd8] ss:$12 sps:$4 sm:$0xff]   ;;  %v1501_v57 = vld [vmem:[%s1602_s7 + $0x110] ss:$12 sps:$4 sm:$0xff]   ;;  %v1504_v59 = vld [vmem:[%s1602_s7 + $0x128] ss:$12 sps:$4 sm:$0xff]  }
  0x20   : > { %1236 = vmatpush3.bf16.msra.mxu0 %v1443_v15  ;;  %1403 = vmatpush3.bf16.msra.mxu1 %v1443_v15  ;;  %v1505_v60 = vld [vmem:[%s1602_s7 + $0xf0] ss:$12 sps:$4 sm:$0xff]   ;;  %v1506_v61 = vld [vmem:[%s1602_s7 + $0x140] ss:$12 sps:$4 sm:$0xff]   ;;  %v1509_v63 = vld [vmem:[%s1602_s7 + $0x158] ss:$12 sps:$4 sm:$0xff]  }
  0x21   : > { %1237 = vmatprep.subr.bf16.mxu0 %v1444_v16  ;;  %1396 = vmatprep.subr.bf16.mxu1 %v1444_v16  ;;  %v1507_v62 = vld [vmem:[%s1602_s7 + $0x10c] ss:$12 sps:$4 sm:$0xff]   ;;  %v1510_v0 = vld [vmem:[%s1602_s7 + $0x108] ss:$12 sps:$4 sm:$0xff]   ;;  %v1511_v1 = vld [vmem:[%s1602_s7 + $0x170] ss:$12 sps:$4 sm:$0xff]  }
  0x24   : > { %1238 = vmatpush3.bf16.msra.mxu0 %v1445_v17  ;;  %1404 = vmatpush3.bf16.msra.mxu1 %v1445_v17 }
  0x25   : > { %1353 = vmatprep.subr.bf16.mxu1 %v1452_v18 }
  0x27   : > { %718 = vmatmul.mubr.bf16.vlgmr.msra.gmra.mrb[0].mxu0 %v1446_v19  ;;  %814 = vmatmul.mubr.bf16.vlgmr.msra.gmra.mrb[0].mxu1 %v1449_v20 }
  0x28   : > { %1354 = vmatpush3.bf16.msra.mxu1 %v1452_v18  ;;  %725 = vmatprep.mubr.bf16.mxu0 %v1453_v21 }
  0x29   : > { %821 = vmatprep.mubr.bf16.mxu1 %v1455_v22  ;;  %1355 = vmatprep.subr.bf16.mxu1 %v1465_v23 }
  0x2c   : > { %1356 = vmatpush3.bf16.msra.mxu1 %v1465_v23 }
  0x2f   : > { %726 = vmatmul.mubr.bf16.gmra.mrb[4].mxu0 %v1457_v24  ;;  %822 = vmatmul.mubr.bf16.gmra.mrb[4].mxu1 %v1458_v25 }
  0x30   : > { %733 = vmatprep.mubr.bf16.mxu0 %v1459_v26  ;;  %829 = vmatprep.mubr.bf16.mxu1 %v1461_v27 }
  0x37   : > { %734 = vmatmul.mubr.bf16.gmra.mrb[8].mxu0 %v1463_v28  ;;  %830 = vmatmul.mubr.bf16.gmra.mrb[8].mxu1 %v1464_v29 }
  0x38   : > { %741 = vmatprep.mubr.bf16.mxu0 %v1466_v30  ;;  %837 = vmatprep.mubr.bf16.mxu1 %v1468_v31 }
  0x3f   : > { %742 = vmatmul.mubr.bf16.gmra.mrb[12].mxu0 %v1470_v32  ;;  %838 = vmatmul.mubr.bf16.gmra.mrb[12].mxu1 %v1471_v33 }
  0x40   : > { %749 = vmatprep.mubr.bf16.mxu0 %v1472_v34  ;;  %1357 = vmatprep.mubr.msk.bf16.mxu1 %vm636_vm0, %v1474_v35 }
  0x47   : > { %750 = vmatmul.mubr.bf16.gmra.mrb[16].mxu0 %v1475_v36  ;;  %1358 = vmatmul.mubr.msk.bf16.vlgmr.msra.gmra.mrb[16].mxu1 %vm636_vm0, %v1476_v37 }
  0x48   : > { %757 = vmatprep.mubr.bf16.mxu0 %v1477_v38  ;;  %1361 = vmatprep.mubr.msk.bf16.mxu1 %vm636_vm0, %v1479_v39 }
  0x4f   : > { %758 = vmatmul.mubr.bf16.gmra.mrb[20].mxu0 %v1480_v40  ;;  %1362 = vmatmul.mubr.msk.bf16.gmra.mrb[20].mxu1 %vm636_vm0, %v1481_v41 }
  0x50   : > { %765 = vmatprep.mubr.bf16.mxu0 %v1482_v42  ;;  %1365 = vmatprep.mubr.msk.bf16.mxu1 %vm636_vm0, %v1484_v43 }
  0x57   : > { %766 = vmatmul.mubr.bf16.gmra.mrb[24].mxu0 %v1485_v44  ;;  %1366 = vmatmul.mubr.msk.bf16.gmra.mrb[24].mxu1 %vm636_vm0, %v1486_v45 }
  0x58   : > { %773 = vmatprep.mubr.bf16.mxu0 %v1487_v46  ;;  %1369 = vmatprep.mubr.msk.bf16.mxu1 %vm636_vm0, %v1489_v47 }
  0x5f   : > { %774 = vmatmul.mubr.bf16.gmra.mrb[28].mxu0 %v1490_v48  ;;  %1370 = vmatmul.mubr.msk.bf16.gmra.mrb[28].mxu1 %vm636_vm0, %v1491_v49 }
  0x60   : > { %781 = vmatprep.mubr.bf16.mxu0 %v1492_v50  ;;  %1373 = vmatprep.mubr.msk.bf16.mxu1 %vm636_vm0, %v1494_v51 }
  0x67   : > { %782 = vmatmul.mubr.bf16.gmra.mrb[32].mxu0 %v1495_v52  ;;  %1374 = vmatmul.mubr.msk.bf16.gmra.mrb[32].mxu1 %vm636_vm0, %v1496_v53 }
  0x68   : > { %789 = vmatprep.mubr.bf16.mxu0 %v1497_v54  ;;  %1377 = vmatprep.mubr.msk.bf16.mxu1 %vm636_vm0, %v1499_v55 }
  0x6f   : > { %790 = vmatmul.mubr.bf16.gmra.mrb[36].mxu0 %v1500_v56  ;;  %1378 = vmatmul.mubr.msk.bf16.gmra.mrb[36].mxu1 %vm636_vm0, %v1501_v57 }
  0x70   : > { %797 = vmatprep.mubr.bf16.mxu0 %v1502_v58  ;;  %1381 = vmatprep.mubr.msk.bf16.mxu1 %vm636_vm0, %v1504_v59 }
  0x77   : > { %798 = vmatmul.mubr.bf16.gmra.mrb[40].mxu0 %v1505_v60  ;;  %1382 = vmatmul.mubr.msk.bf16.gmra.mrb[40].mxu1 %vm636_vm0, %v1506_v61 }
  0x78   : > { %805 = vmatprep.mubr.bf16.mxu0 %v1507_v62  ;;  %1385 = vmatprep.mubr.msk.bf16.mxu1 %vm636_vm0, %v1509_v63 }
  0x7f   : > { %806 = vmatmul.mubr.bf16.gmra.mrb[44].mxu0 %v1510_v0  ;;  %1386 = vmatmul.mubr.msk.bf16.gmra.mrb[44].mxu1 %vm636_vm0, %v1511_v1 }
  0xfa   : > { %v1239_v2 = vpop.f32.mrb[0].mxu0  ;;  %v1311_v3 = vpop.f32.mrb[0].mxu1 }
  0xfb   : > { %v1240_v4 = vpop.f32.mrb[1].mxu0  ;;  %v1312_v5 = vpop.f32.mrb[1].mxu1 }
  0xfc   : > { %v1241_v6 = vadd.f32 %v1240_v4, %v1239_v2  ;;  %v1695_v7 = vadd.f32 %v1312_v5, %v1311_v3  ;;  %v1242_v8 = vpop.f32.mrb[2].mxu0  ;;  %v1314_v9 = vpop.f32.mrb[2].mxu1 }
  0xfd   : > { %v1243_v10 = vpop.f32.mrb[3].mxu0  ;;  %v1315_v11 = vpop.f32.mrb[3].mxu1 }
  0xfe   : > { %v1244_v12 = vadd.f32 %v1243_v10, %v1242_v8  ;;  %v1697_v13 = vadd.f32 %v1315_v11, %v1314_v9 }
 0x102   : > { %v1245_v14 = vpop.f32.mrb[4].mxu0  ;;  %v1317_v15 = vpop.f32.mrb[4].mxu1 }
 0x103   : > { %v1246_v16 = vpop.f32.mrb[5].mxu0  ;;  %v1318_v17 = vpop.f32.mrb[5].mxu1 }
 0x104   : > { %v1247_v18 = vadd.f32 %v1246_v16, %v1245_v14  ;;  %v1699_v19 = vadd.f32 %v1318_v17, %v1317_v15  ;;  %v1248_v20 = vpop.f32.mrb[6].mxu0  ;;  %v1320_v21 = vpop.f32.mrb[6].mxu1 }
 0x105   : > { %v1249_v22 = vpop.f32.mrb[7].mxu0  ;;  %v1321_v23 = vpop.f32.mrb[7].mxu1 }
 0x106   : > { %v1250_v24 = vadd.f32 %v1249_v22, %v1248_v20  ;;  %v1701_v25 = vadd.f32 %v1321_v23, %v1320_v21 }
 0x10a   : > { %v1251_v26 = vpop.f32.mrb[8].mxu0  ;;  %v1323_v27 = vpop.f32.mrb[8].mxu1 }
 0x10b   : > { %v1252_v28 = vpop.f32.mrb[9].mxu0  ;;  %v1324_v29 = vpop.f32.mrb[9].mxu1 }
 0x10c   : > { %v1253_v30 = vadd.f32 %v1252_v28, %v1251_v26  ;;  %v1703_v31 = vadd.f32 %v1324_v29, %v1323_v27  ;;  %v1254_v32 = vpop.f32.mrb[10].mxu0  ;;  %v1326_v33 = vpop.f32.mrb[10].mxu1 }
 0x10d   : > { %v1255_v34 = vpop.f32.mrb[11].mxu0  ;;  %v1327_v35 = vpop.f32.mrb[11].mxu1 }
 0x10e   : > { %v1256_v36 = vadd.f32 %v1255_v34, %v1254_v32  ;;  %v1705_v37 = vadd.f32 %v1327_v35, %v1326_v33 }
 0x112   : > { %v1257_v38 = vpop.f32.mrb[12].mxu0  ;;  %v1329_v39 = vpop.f32.mrb[12].mxu1 }
 0x113   : > { %v1258_v40 = vpop.f32.mrb[13].mxu0  ;;  %v1330_v41 = vpop.f32.mrb[13].mxu1 }
 0x114   : > { %v1259_v42 = vadd.f32 %v1258_v40, %v1257_v38  ;;  %v1707_v43 = vadd.f32 %v1330_v41, %v1329_v39  ;;  %v1260_v44 = vpop.f32.mrb[14].mxu0  ;;  %v1332_v45 = vpop.f32.mrb[14].mxu1 }
 0x115   : > { %v1261_v46 = vpop.f32.mrb[15].mxu0  ;;  %v1333_v47 = vpop.f32.mrb[15].mxu1 }
 0x116   : > { %v1262_v48 = vadd.f32 %v1261_v46, %v1260_v44  ;;  %v1709_v49 = vadd.f32 %v1333_v47, %v1332_v45 }
 0x11a   : > { %v1263_v50 = vpop.f32.mrb[16].mxu0  ;;  %v1359_v51 = vpop.f32.mrb[16].mxu1 }
 0x11b   : > { %v889_v52 = vadd.f32 %v1359_v51, %v1247_v18  ;;  %v1264_v53 = vpop.f32.mrb[17].mxu0  ;;  %v880_v54 = vpop.f32.mrb[17].mxu1 }
 0x11c   : > { %v1265_v55 = vadd.f32 %v1264_v53, %v1263_v50  ;;  %v881_v56 = vadd.f32 %v1241_v6, %v880_v54  ;;  %v1266_v57 = vpop.f32.mrb[18].mxu0  ;;  %v1360_v58 = vpop.f32.mrb[18].mxu1 }
 0x11d   : > { %1009 = vst [vmem:[%s1715_s5 + $0x10] sm:$0xff] %v889_v52  ;;  %v892_v59 = vadd.f32 %v1360_v58, %v1250_v24  ;;  %v1267_v60 = vpop.f32.mrb[19].mxu0  ;;  %v883_v61 = vpop.f32.mrb[19].mxu1 }
 0x11e   : > { %1007 = vst [vmem:[%s1715_s5] sm:$0xff] %v881_v56  ;;  %v1268_v62 = vadd.f32 %v1267_v60, %v1266_v57  ;;  %v884_v63 = vadd.f32 %v1244_v12, %v883_v61 }
 0x11f   : > { %1010 = vst [vmem:[%s1715_s5 + $0x18] sm:$0xff] %v892_v59 }
 0x120   : > { %1008 = vst [vmem:[%s1715_s5 + $0x8] sm:$0xff] %v884_v63 }
 0x122   : > { %v1269_v0 = vpop.f32.mrb[20].mxu0  ;;  %v1363_v1 = vpop.f32.mrb[20].mxu1 }
 0x123   : > { %v905_v2 = vadd.f32 %v1363_v1, %v1259_v42  ;;  %v1270_v3 = vpop.f32.mrb[21].mxu0  ;;  %v896_v4 = vpop.f32.mrb[21].mxu1 }
 0x124   : > { %v1271_v5 = vadd.f32 %v1270_v3, %v1269_v0  ;;  %v897_v6 = vadd.f32 %v1253_v30, %v896_v4  ;;  %v1272_v8 = vpop.f32.mrb[22].mxu0  ;;  %v1364_v9 = vpop.f32.mrb[22].mxu1 }
 0x125   : > { %1013 = vst [vmem:[%s1715_s5 + $0x30] sm:$0xff] %v905_v2  ;;  %v908_v10 = vadd.f32 %v1364_v9, %v1262_v48  ;;  %v1273_v11 = vpop.f32.mrb[23].mxu0  ;;  %v899_v14 = vpop.f32.mrb[23].mxu1 }
 0x126   : > { %1011 = vst [vmem:[%s1715_s5 + $0x20] sm:$0xff] %v897_v6  ;;  %v1274_v12 = vadd.f32 %v1273_v11, %v1272_v8  ;;  %v900_v15 = vadd.f32 %v1256_v36, %v899_v14 }
 0x127   : > { %1014 = vst [vmem:[%s1715_s5 + $0x38] sm:$0xff] %v908_v10 }
 0x128   : > { %1012 = vst [vmem:[%s1715_s5 + $0x28] sm:$0xff] %v900_v15 }
 0x12a   : > { %v1275_v16 = vpop.f32.mrb[24].mxu0  ;;  %v1367_v17 = vpop.f32.mrb[24].mxu1 }
 0x12b   : > { %v921_v18 = vadd.f32 %v1367_v17, %v1271_v5  ;;  %v1276_v20 = vpop.f32.mrb[25].mxu0  ;;  %v912_v21 = vpop.f32.mrb[25].mxu1 }
 0x12c   : > { %v1277_v22 = vadd.f32 %v1276_v20, %v1275_v16  ;;  %v913_v23 = vadd.f32 %v1265_v55, %v912_v21  ;;  %v1278_v24 = vpop.f32.mrb[26].mxu0  ;;  %v1368_v26 = vpop.f32.mrb[26].mxu1 }
 0x12d   : > { %1017 = vst [vmem:[%s1715_s5 + $0x50] sm:$0xff] %v921_v18  ;;  %v924_v27 = vadd.f32 %v1368_v26, %v1274_v12  ;;  %v1279_v28 = vpop.f32.mrb[27].mxu0  ;;  %v915_v29 = vpop.f32.mrb[27].mxu1 }
 0x12e   : > { %1015 = vst [vmem:[%s1715_s5 + $0x40] sm:$0xff] %v913_v23  ;;  %v1280_v30 = vadd.f32 %v1279_v28, %v1278_v24  ;;  %v916_v32 = vadd.f32 %v1268_v62, %v915_v29 }
 0x12f   : > { %1018 = vst [vmem:[%s1715_s5 + $0x58] sm:$0xff] %v924_v27 }
 0x130   : > { %1016 = vst [vmem:[%s1715_s5 + $0x48] sm:$0xff] %v916_v32 }
 0x132   : > { %v1281_v33 = vpop.f32.mrb[28].mxu0  ;;  %v1371_v34 = vpop.f32.mrb[28].mxu1 }
 0x133   : > { %v1282_v35 = vpop.f32.mrb[29].mxu0  ;;  %v928_v36 = vpop.f32.mrb[29].mxu1 }
 0x134   : > { %v1283_v38 = vadd.f32 %v1282_v35, %v1281_v33  ;;  %v929_v39 = vadd.f32 %v1277_v22, %v928_v36  ;;  %v1284_v40 = vpop.f32.mrb[30].mxu0  ;;  %v1372_v41 = vpop.f32.mrb[30].mxu1 }
 0x135   : > { %v1285_v42 = vpop.f32.mrb[31].mxu0  ;;  %v931_v44 = vpop.f32.mrb[31].mxu1 }
 0x136   : > { %v937_v45 = vadd.f32 %v1371_v34, %v1283_v38  ;;  %1019 = vst [vmem:[%s1715_s5 + $0x60] sm:$0xff] %v929_v39  ;;  %v1286_v46 = vadd.f32 %v1285_v42, %v1284_v40  ;;  %v932_v47 = vadd.f32 %v1280_v30, %v931_v44 }
 0x138   : > { %1021 = vst [vmem:[%s1715_s5 + $0x70] sm:$0xff] %v937_v45  ;;  %v940_v48 = vadd.f32 %v1372_v41, %v1286_v46  ;;  %1020 = vst [vmem:[%s1715_s5 + $0x68] sm:$0xff] %v932_v47 }
 0x13a   : > { %1022 = vst [vmem:[%s1715_s5 + $0x78] sm:$0xff] %v940_v48  ;;  %v1287_v50 = vpop.f32.mrb[32].mxu0  ;;  %v1375_v51 = vpop.f32.mrb[32].mxu1 }
 0x13b   : > { %v1288_v52 = vpop.f32.mrb[33].mxu0  ;;  %v944_v53 = vpop.f32.mrb[33].mxu1 }
 0x13c   : > { %v1289_v54 = vadd.f32 %v1288_v52, %v1287_v50  ;;  %v1290_v55 = vpop.f32.mrb[34].mxu0  ;;  %v1376_v56 = vpop.f32.mrb[34].mxu1 }
 0x13d   : > { %v1291_v57 = vpop.f32.mrb[35].mxu0  ;;  %v947_v58 = vpop.f32.mrb[35].mxu1 }
 0x13e   : > { %v945_v59 = vadd.f32 %v1289_v54, %v944_v53  ;;  %v1292_v60 = vadd.f32 %v1291_v57, %v1290_v55 }
 0x140   : > { %1023 = vst [vmem:[%s1715_s5 + $0x80] sm:$0xff] %v945_v59  ;;  %v948_v61 = vadd.f32 %v1292_v60, %v947_v58 }
 0x142   : > { %1024 = vst [vmem:[%s1715_s5 + $0x88] sm:$0xff] %v948_v61  ;;  %v1293_v62 = vpop.f32.mrb[36].mxu0  ;;  %v1379_v63 = vpop.f32.mrb[36].mxu1 }
 0x143   : > { %v1294_v0 = vpop.f32.mrb[37].mxu0  ;;  %v960_v1 = vpop.f32.mrb[37].mxu1 }
 0x144   : > { %v1295_v2 = vadd.f32 %v1294_v0, %v1293_v62  ;;  %v1296_v3 = vpop.f32.mrb[38].mxu0  ;;  %v1380_v4 = vpop.f32.mrb[38].mxu1 }
 0x145   : > { %v1297_v5 = vpop.f32.mrb[39].mxu0  ;;  %v963_v6 = vpop.f32.mrb[39].mxu1 }
 0x146   : > { %v953_v8 = vadd.f32 %v1375_v51, %v1295_v2  ;;  %v1298_v9 = vadd.f32 %v1297_v5, %v1296_v3 }
 0x148   : > { %1025 = vst [vmem:[%s1715_s5 + $0x90] sm:$0xff] %v953_v8  ;;  %v956_v10 = vadd.f32 %v1376_v56, %v1298_v9 }
 0x14a   : > { %1026 = vst [vmem:[%s1715_s5 + $0x98] sm:$0xff] %v956_v10  ;;  %v1299_v11 = vpop.f32.mrb[40].mxu0  ;;  %v1383_v14 = vpop.f32.mrb[40].mxu1 }
 0x14b   : > { %v985_v12 = vadd.f32 %v1383_v14, %v1699_v19  ;;  %v1300_v15 = vpop.f32.mrb[41].mxu0  ;;  %v976_v16 = vpop.f32.mrb[41].mxu1 }
 0x14c   : > { %v1301_v17 = vadd.f32 %v1300_v15, %v1299_v11  ;;  %v977_v18 = vadd.f32 %v1695_v7, %v976_v16  ;;  %v1302_v20 = vpop.f32.mrb[42].mxu0  ;;  %v1384_v21 = vpop.f32.mrb[42].mxu1 }
 0x14d   : > { %1033 = vst [vmem:[%s1715_s5 + $0xd0] sm:$0xff] %v985_v12  ;;  %v988_v22 = vadd.f32 %v1384_v21, %v1701_v25  ;;  %v1303_v23 = vpop.f32.mrb[43].mxu0  ;;  %v979_v24 = vpop.f32.mrb[43].mxu1 }
 0x14e   : > { %v961_v26 = vadd.f32 %v1301_v17, %v960_v1  ;;  %1031 = vst [vmem:[%s1715_s5 + $0xc0] sm:$0xff] %v977_v18  ;;  %v1304_v27 = vadd.f32 %v1303_v23, %v1302_v20  ;;  %v980_v19 = vadd.f32 %v1697_v13, %v979_v24 }
 0x14f   : > { %1034 = vst [vmem:[%s1715_s5 + $0xd8] sm:$0xff] %v988_v22 }
 0x150   : > { %1027 = vst [vmem:[%s1715_s5 + $0xa0] sm:$0xff] %v961_v26  ;;  %v964_v28 = vadd.f32 %v1304_v27, %v963_v6  ;;  %1032 = vst [vmem:[%s1715_s5 + $0xc8] sm:$0xff] %v980_v19 }
 0x152   : > { %1028 = vst [vmem:[%s1715_s5 + $0xa8] sm:$0xff] %v964_v28  ;;  %v1305_v7 = vpop.f32.mrb[44].mxu0  ;;  %v1387_v29 = vpop.f32.mrb[44].mxu1 }
 0x153   : > { %v1001_v30 = vadd.f32 %v1387_v29, %v1707_v43  ;;  %v1306_v25 = vpop.f32.mrb[45].mxu0  ;;  %v992_v32 = vpop.f32.mrb[45].mxu1 }
 0x154   : > { %v1307_v33 = vadd.f32 %v1306_v25, %v1305_v7  ;;  %v993_v34 = vadd.f32 %v1703_v31, %v992_v32  ;;  %v1308_v13 = vpop.f32.mrb[46].mxu0  ;;  %v1388_v35 = vpop.f32.mrb[46].mxu1 }
 0x155   : > { %1037 = vst [vmem:[%s1715_s5 + $0xf0] sm:$0xff] %v1001_v30  ;;  %v1004_v36 = vadd.f32 %v1388_v35, %v1709_v49  ;;  %v1309_v38 = vpop.f32.mrb[47].mxu0  ;;  %v995_v39 = vpop.f32.mrb[47].mxu1 }
 0x156   : > { %v969_v40 = vadd.f32 %v1379_v63, %v1307_v33  ;;  %1035 = vst [vmem:[%s1715_s5 + $0xe0] sm:$0xff] %v993_v34  ;;  %v1310_v41 = vadd.f32 %v1309_v38, %v1308_v13  ;;  %v996_v43 = vadd.f32 %v1705_v37, %v995_v39 }
 0x157   : > { %1038 = vst [vmem:[%s1715_s5 + $0xf8] sm:$0xff] %v1004_v36 }
 0x158   : > { %1029 = vst [vmem:[%s1715_s5 + $0xb0] sm:$0xff] %v969_v40  ;;  %v972_v42 = vadd.f32 %v1380_v4, %v1310_v41  ;;  %1036 = vst [vmem:[%s1715_s5 + $0xe8] sm:$0xff] %v996_v43 }
 0x15a   : > { %1030 = vst [vmem:[%s1715_s5 + $0xb8] sm:$0xff] %v972_v42 }
 0x15b PF: > { %s12_s11 = sadd.s32 1, %s1534_s11   ;;  %s1769_s9 = smov %s1530_s10 }
 0x15c   : > { %p9_p5 = scmp.ge.s32.totalorder %s12_s11, 4   ;;  %s1770_s10 = smov %s1772_s12 }
 0x15e   :  { %11 = sbr.rel (!%p9_p5) target bundleno = 2 (0x2), region = 61 }

// kernel: up_trans_block.10
= control target key start
LH: loop header
LB: loop body
LE: loop exit
PB: predicated region body
PF: predicated region fallthrough
CT: control target
= control target key end

     0   :  { %vm308_vm0 = vcmask 261120   ;;  %s960_s1 = inlined_call_operand.vmem [shape: bf16[288,128], index: 1, kind: input, shape index: {}]   ;;  %s961_s0 = inlined_call_operand.vmem [shape: bf16[128,288], index: 0, kind: input, shape index: {}]   ;;  %s962_s2 = inlined_call_operand.vmem [shape: f32[128,128], index: 2, kind: output, shape index: {}]  }
   0x1   :  { %v707_v0 = vld [vmem:[%s960_s1 + $0x40] sm:$0xff]   ;;  %v709_v2 = vld [vmem:[%s960_s1 + $0x48] sm:$0xff]   ;;  %v711_v4 = vld [vmem:[%s960_s1 + $0x50] sm:$0xff]  }
   0x2   :  { %v708_v1 = vld [vmem:[%s960_s1] sm:$0xff]   ;;  %597 = vmatprep.subr.bf16.mxu0 %v707_v0  ;;  %691 = vmatprep.subr.bf16.mxu1 %v707_v0  ;;  %v710_v3 = vld [vmem:[%s960_s1 + $0x8] sm:$0xff]   ;;  %v712_v5 = vld [vmem:[%s960_s1 + $0x10] sm:$0xff]  }
   0x3   :  { %598 = vmatpush3.bf16.msra.mxu0 %v708_v1  ;;  %699 = vmatpush3.bf16.msra.mxu1 %v708_v1  ;;  %v713_v6 = vld [vmem:[%s960_s1 + $0x58] sm:$0xff]   ;;  %v715_v8 = vld [vmem:[%s960_s1 + $0x60] sm:$0xff]   ;;  %v717_v10 = vld [vmem:[%s960_s1 + $0x68] sm:$0xff]  }
   0x4   :  { %599 = vmatprep.subr.bf16.mxu0 %v709_v2  ;;  %692 = vmatprep.subr.bf16.mxu1 %v709_v2  ;;  %v714_v7 = vld [vmem:[%s960_s1 + $0x18] sm:$0xff]   ;;  %v716_v9 = vld [vmem:[%s960_s1 + $0x20] sm:$0xff]   ;;  %v718_v13 = vld [vmem:[%s960_s1 + $0x28] sm:$0xff]  }
   0x5   :  { %v725_v11 = vld [vmem:[%s961_s0 + $0x4] ss:$12 sps:$4 sm:$0xff]   ;;  %v728_v12 = vld [vmem:[%s961_s0 + $0x94] ss:$12 sps:$4 sm:$0xff]   ;;  %v721_v16 = vld [vmem:[%s960_s1 + $0x78] sm:$0xff]  }
   0x6   :  { %v719_v14 = vld [vmem:[%s960_s1 + $0x70] sm:$0xff]   ;;  %365 = vmatprep.mubr.bf16.mxu0 %v725_v11  ;;  %413 = vmatprep.mubr.bf16.mxu1 %v728_v12  ;;  %v722_v17 = vld [vmem:[%s960_s1 + $0x38] sm:$0xff]   ;;  %v723_v18 = vld [vmem:[%s961_s0] ss:$12 sps:$4 sm:$0xff]  }
   0x7   :  { %600 = vmatpush3.bf16.msra.mxu0 %v710_v3  ;;  %700 = vmatpush3.bf16.msra.mxu1 %v710_v3  ;;  %v720_v15 = vld [vmem:[%s960_s1 + $0x30] sm:$0xff]   ;;  %v729_v19 = vld [vmem:[%s960_s1 + $0x80] sm:$0xff]   ;;  %v730_v21 = vld [vmem:[%s961_s0 + $0x1c] ss:$12 sps:$4 sm:$0xff]  }
   0x8   :  { %601 = vmatprep.subr.bf16.mxu0 %v711_v4  ;;  %693 = vmatprep.subr.bf16.mxu1 %v711_v4  ;;  %v726_v20 = vld [vmem:[%s961_s0 + $0x90] ss:$12 sps:$4 sm:$0xff]   ;;  %v732_v22 = vld [vmem:[%s961_s0 + $0xac] ss:$12 sps:$4 sm:$0xff]   ;;  %v735_v25 = vld [vmem:[%s961_s0 + $0xa8] ss:$12 sps:$4 sm:$0xff]  }
   0x9   :  { %v736_v23 = vld [vmem:[%s960_s1 + $0x88] sm:$0xff]   ;;  %v734_v24 = vld [vmem:[%s961_s0 + $0x18] ss:$12 sps:$4 sm:$0xff]   ;;  %v737_v26 = vld [vmem:[%s961_s0 + $0x34] ss:$12 sps:$4 sm:$0xff]  }
   0xa   :  { %v739_v27 = vld [vmem:[%s961_s0 + $0x8] ss:$12 sps:$4 sm:$0xff]   ;;  %v740_v28 = vld [vmem:[%s961_s0 + $0x30] ss:$12 sps:$4 sm:$0xff]   ;;  %v741_v29 = vld [vmem:[%s961_s0 + $0x20] ss:$12 sps:$4 sm:$0xff]  }
   0xb   :  { %602 = vmatpush3.bf16.msra.mxu0 %v712_v5  ;;  %701 = vmatpush3.bf16.msra.mxu1 %v712_v5  ;;  %v742_v30 = vld [vmem:[%s961_s0 + $0x4c] ss:$12 sps:$4 sm:$0xff]   ;;  %v745_v32 = vld [vmem:[%s961_s0 + $0x48] ss:$12 sps:$4 sm:$0xff]   ;;  %v746_v33 = vld [vmem:[%s961_s0 + $0x50] ss:$12 sps:$4 sm:$0xff]  }
   0xc   :  { %603 = vmatprep.subr.bf16.mxu0 %v713_v6  ;;  %694 = vmatprep.subr.bf16.mxu1 %v713_v6  ;;  %v744_v31 = vld [vmem:[%s961_s0 + $0x38] ss:$12 sps:$4 sm:$0xff]   ;;  %v749_v35 = vld [vmem:[%s961_s0 + $0x68] ss:$12 sps:$4 sm:$0xff]   ;;  %v750_v36 = vld [vmem:[%s961_s0 + $0x60] ss:$12 sps:$4 sm:$0xff]  }
   0xd   :  { %v747_v34 = vld [vmem:[%s961_s0 + $0x64] ss:$12 sps:$4 sm:$0xff]   ;;  %v751_v37 = vld [vmem:[%s961_s0 + $0x80] ss:$12 sps:$4 sm:$0xff]   ;;  %v752_v38 = vld [vmem:[%s961_s0 + $0x7c] ss:$12 sps:$4 sm:$0xff]  }
   0xe   :  { %v754_v39 = vld [vmem:[%s961_s0 + $0x98] ss:$12 sps:$4 sm:$0xff]   ;;  %v756_v41 = vld [vmem:[%s961_s0 + $0xb0] ss:$12 sps:$4 sm:$0xff]  }
   0xf   :  { %604 = vmatpush3.bf16.msra.mxu0 %v714_v7  ;;  %702 = vmatpush3.bf16.msra.mxu1 %v714_v7  ;;  %v755_v40 = vld [vmem:[%s961_s0 + $0x78] ss:$12 sps:$4 sm:$0xff]  }
  0x10   :  { %605 = vmatprep.subr.bf16.mxu0 %v715_v8  ;;  %695 = vmatprep.subr.bf16.mxu1 %v715_v8 }
  0x13   :  { %606 = vmatpush3.bf16.msra.mxu0 %v716_v9  ;;  %703 = vmatpush3.bf16.msra.mxu1 %v716_v9 }
  0x14   :  { %607 = vmatprep.subr.bf16.mxu0 %v717_v10  ;;  %696 = vmatprep.subr.bf16.mxu1 %v717_v10 }
  0x17   :  { %608 = vmatpush3.bf16.msra.mxu0 %v718_v13  ;;  %704 = vmatpush3.bf16.msra.mxu1 %v718_v13 }
  0x18   :  { %609 = vmatprep.subr.bf16.mxu0 %v719_v14  ;;  %697 = vmatprep.subr.bf16.mxu1 %v719_v14 }
  0x1b   :  { %610 = vmatpush3.bf16.msra.mxu0 %v720_v15  ;;  %705 = vmatpush3.bf16.msra.mxu1 %v720_v15 }
  0x1c   :  { %611 = vmatprep.subr.bf16.mxu0 %v721_v16  ;;  %698 = vmatprep.subr.bf16.mxu1 %v721_v16 }
  0x1f   :  { %612 = vmatpush3.bf16.msra.mxu0 %v722_v17  ;;  %706 = vmatpush3.bf16.msra.mxu1 %v722_v17 }
  0x20   :  { %671 = vmatprep.subr.bf16.mxu1 %v729_v19 }
  0x22   :  { %366 = vmatmul.mubr.bf16.vlgmr.msra.gmra.mrb[0].mxu0 %v723_v18  ;;  %414 = vmatmul.mubr.bf16.vlgmr.msra.gmra.mrb[0].mxu1 %v726_v20 }
  0x23   :  { %672 = vmatpush3.bf16.msra.mxu1 %v729_v19  ;;  %373 = vmatprep.mubr.bf16.mxu0 %v730_v21 }
  0x24   :  { %421 = vmatprep.mubr.bf16.mxu1 %v732_v22  ;;  %673 = vmatprep.subr.bf16.mxu1 %v736_v23 }
  0x27   :  { %674 = vmatpush3.bf16.msra.mxu1 %v736_v23 }
  0x2a   :  { %374 = vmatmul.mubr.bf16.gmra.mrb[4].mxu0 %v734_v24  ;;  %422 = vmatmul.mubr.bf16.gmra.mrb[4].mxu1 %v735_v25 }
  0x2b   :  { %381 = vmatprep.mubr.bf16.mxu0 %v737_v26  ;;  %675 = vmatprep.mubr.msk.bf16.mxu1 %vm308_vm0, %v739_v27 }
  0x32   :  { %382 = vmatmul.mubr.bf16.gmra.mrb[8].mxu0 %v740_v28  ;;  %676 = vmatmul.mubr.msk.bf16.vlgmr.msra.gmra.mrb[8].mxu1 %vm308_vm0, %v741_v29 }
  0x33   :  { %389 = vmatprep.mubr.bf16.mxu0 %v742_v30  ;;  %679 = vmatprep.mubr.msk.bf16.mxu1 %vm308_vm0, %v744_v31 }
  0x3a   :  { %390 = vmatmul.mubr.bf16.gmra.mrb[12].mxu0 %v745_v32  ;;  %680 = vmatmul.mubr.msk.bf16.gmra.mrb[12].mxu1 %vm308_vm0, %v746_v33 }
  0x3b   :  { %397 = vmatprep.mubr.bf16.mxu0 %v747_v34  ;;  %683 = vmatprep.mubr.msk.bf16.mxu1 %vm308_vm0, %v749_v35 }
  0x42   :  { %398 = vmatmul.mubr.bf16.gmra.mrb[16].mxu0 %v750_v36  ;;  %684 = vmatmul.mubr.msk.bf16.gmra.mrb[16].mxu1 %vm308_vm0, %v751_v37 }
  0x43   :  { %405 = vmatprep.mubr.bf16.mxu0 %v752_v38  ;;  %687 = vmatprep.mubr.msk.bf16.mxu1 %vm308_vm0, %v754_v39 }
  0x4a   :  { %406 = vmatmul.mubr.bf16.gmra.mrb[20].mxu0 %v755_v40  ;;  %688 = vmatmul.mubr.msk.bf16.gmra.mrb[20].mxu1 %vm308_vm0, %v756_v41 }
  0xf5   :  { %v613_v42 = vpop.f32.mrb[0].mxu0  ;;  %v649_v43 = vpop.f32.mrb[0].mxu1 }
  0xf6   :  { %v614_v44 = vpop.f32.mrb[1].mxu0  ;;  %v650_v45 = vpop.f32.mrb[1].mxu1 }
  0xf7   :  { %v615_v46 = vadd.f32 %v614_v44, %v613_v42  ;;  %v906_v47 = vadd.f32 %v650_v45, %v649_v43  ;;  %v616_v48 = vpop.f32.mrb[2].mxu0  ;;  %v652_v49 = vpop.f32.mrb[2].mxu1 }
  0xf8   :  { %v617_v50 = vpop.f32.mrb[3].mxu0  ;;  %v653_v51 = vpop.f32.mrb[3].mxu1 }
  0xf9   :  { %v618_v52 = vadd.f32 %v617_v50, %v616_v48  ;;  %v908_v53 = vadd.f32 %v653_v51, %v652_v49 }
  0xfd   :  { %v619_v54 = vpop.f32.mrb[4].mxu0  ;;  %v655_v55 = vpop.f32.mrb[4].mxu1 }
  0xfe   :  { %v620_v56 = vpop.f32.mrb[5].mxu0  ;;  %v656_v57 = vpop.f32.mrb[5].mxu1 }
  0xff   :  { %v621_v58 = vadd.f32 %v620_v56, %v619_v54  ;;  %v657_v59 = vadd.f32 %v656_v57, %v655_v55  ;;  %v622_v60 = vpop.f32.mrb[6].mxu0  ;;  %v658_v61 = vpop.f32.mrb[6].mxu1 }
 0x100   :  { %v623_v62 = vpop.f32.mrb[7].mxu0  ;;  %v659_v63 = vpop.f32.mrb[7].mxu1 }
 0x101   :  { %v624_v0 = vadd.f32 %v623_v62, %v622_v60  ;;  %v660_v1 = vadd.f32 %v659_v63, %v658_v61 }
 0x105   :  { %v625_v2 = vpop.f32.mrb[8].mxu0  ;;  %v677_v3 = vpop.f32.mrb[8].mxu1 }
 0x106   :  { %v473_v4 = vadd.f32 %v677_v3, %v621_v58  ;;  %v626_v5 = vpop.f32.mrb[9].mxu0  ;;  %v464_v6 = vpop.f32.mrb[9].mxu1 }
 0x107   :  { %v627_v7 = vadd.f32 %v626_v5, %v625_v2  ;;  %v465_v8 = vadd.f32 %v615_v46, %v464_v6  ;;  %v628_v9 = vpop.f32.mrb[10].mxu0  ;;  %v678_v10 = vpop.f32.mrb[10].mxu1 }
 0x108   :  { %529 = vst [vmem:[%s962_s2 + $0x10] sm:$0xff] %v473_v4  ;;  %v476_v11 = vadd.f32 %v678_v10, %v624_v0  ;;  %v629_v12 = vpop.f32.mrb[11].mxu0  ;;  %v467_v13 = vpop.f32.mrb[11].mxu1 }
 0x109   :  { %527 = vst [vmem:[%s962_s2] sm:$0xff] %v465_v8  ;;  %v630_v14 = vadd.f32 %v629_v12, %v628_v9  ;;  %v468_v15 = vadd.f32 %v618_v52, %v467_v13 }
 0x10a   :  { %530 = vst [vmem:[%s962_s2 + $0x18] sm:$0xff] %v476_v11 }
 0x10b   :  { %528 = vst [vmem:[%s962_s2 + $0x8] sm:$0xff] %v468_v15 }
 0x10d   :  { %v631_v16 = vpop.f32.mrb[12].mxu0  ;;  %v681_v17 = vpop.f32.mrb[12].mxu1 }
 0x10e   :  { %v632_v18 = vpop.f32.mrb[13].mxu0  ;;  %v480_v19 = vpop.f32.mrb[13].mxu1 }
 0x10f   :  { %v633_v20 = vadd.f32 %v632_v18, %v631_v16  ;;  %v481_v21 = vadd.f32 %v627_v7, %v480_v19  ;;  %v634_v22 = vpop.f32.mrb[14].mxu0  ;;  %v682_v23 = vpop.f32.mrb[14].mxu1 }
 0x110   :  { %v635_v24 = vpop.f32.mrb[15].mxu0  ;;  %v483_v25 = vpop.f32.mrb[15].mxu1 }
 0x111   :  { %v489_v26 = vadd.f32 %v681_v17, %v633_v20  ;;  %531 = vst [vmem:[%s962_s2 + $0x20] sm:$0xff] %v481_v21  ;;  %v636_v27 = vadd.f32 %v635_v24, %v634_v22  ;;  %v484_v28 = vadd.f32 %v630_v14, %v483_v25 }
 0x113   :  { %533 = vst [vmem:[%s962_s2 + $0x30] sm:$0xff] %v489_v26  ;;  %v492_v29 = vadd.f32 %v682_v23, %v636_v27  ;;  %532 = vst [vmem:[%s962_s2 + $0x28] sm:$0xff] %v484_v28 }
 0x115   :  { %534 = vst [vmem:[%s962_s2 + $0x38] sm:$0xff] %v492_v29  ;;  %v637_v30 = vpop.f32.mrb[16].mxu0  ;;  %v685_v31 = vpop.f32.mrb[16].mxu1 }
 0x116   :  { %v638_v32 = vpop.f32.mrb[17].mxu0  ;;  %v496_v33 = vpop.f32.mrb[17].mxu1 }
 0x117   :  { %v639_v34 = vadd.f32 %v638_v32, %v637_v30  ;;  %v640_v35 = vpop.f32.mrb[18].mxu0  ;;  %v686_v36 = vpop.f32.mrb[18].mxu1 }
 0x118   :  { %v641_v37 = vpop.f32.mrb[19].mxu0  ;;  %v499_v38 = vpop.f32.mrb[19].mxu1 }
 0x119   :  { %v497_v39 = vadd.f32 %v639_v34, %v496_v33  ;;  %v642_v40 = vadd.f32 %v641_v37, %v640_v35 }
 0x11b   :  { %535 = vst [vmem:[%s962_s2 + $0x40] sm:$0xff] %v497_v39  ;;  %v500_v41 = vadd.f32 %v642_v40, %v499_v38 }
 0x11d   :  { %536 = vst [vmem:[%s962_s2 + $0x48] sm:$0xff] %v500_v41  ;;  %v643_v42 = vpop.f32.mrb[20].mxu0  ;;  %v689_v43 = vpop.f32.mrb[20].mxu1 }
 0x11e   :  { %v521_v44 = vadd.f32 %v689_v43, %v657_v59  ;;  %v644_v45 = vpop.f32.mrb[21].mxu0  ;;  %v512_v46 = vpop.f32.mrb[21].mxu1 }
 0x11f   :  { %v645_v48 = vadd.f32 %v644_v45, %v643_v42  ;;  %v513_v49 = vadd.f32 %v906_v47, %v512_v46  ;;  %v646_v50 = vpop.f32.mrb[22].mxu0  ;;  %v690_v51 = vpop.f32.mrb[22].mxu1 }
 0x120   :  { %541 = vst [vmem:[%s962_s2 + $0x70] sm:$0xff] %v521_v44  ;;  %v524_v52 = vadd.f32 %v690_v51, %v660_v1  ;;  %v647_v54 = vpop.f32.mrb[23].mxu0  ;;  %v515_v55 = vpop.f32.mrb[23].mxu1 }
 0x121   :  { %v505_v56 = vadd.f32 %v685_v31, %v645_v48  ;;  %539 = vst [vmem:[%s962_s2 + $0x60] sm:$0xff] %v513_v49  ;;  %v648_v57 = vadd.f32 %v647_v54, %v646_v50  ;;  %v516_v58 = vadd.f32 %v908_v53, %v515_v55 }
 0x122   :  { %542 = vst [vmem:[%s962_s2 + $0x78] sm:$0xff] %v524_v52 }
 0x123   :  { %537 = vst [vmem:[%s962_s2 + $0x50] sm:$0xff] %v505_v56  ;;  %v508_v47 = vadd.f32 %v686_v36, %v648_v57  ;;  %540 = vst [vmem:[%s962_s2 + $0x68] sm:$0xff] %v516_v58 }
 0x125   :  { %538 = vst [vmem:[%s962_s2 + $0x58] sm:$0xff] %v508_v47 }

// kernel: up_trans_block.8
= control target key start
LH: loop header
LB: loop body
LE: loop exit
PB: predicated region body
PF: predicated region fallthrough
CT: control target
= control target key end

     0   :  { %vm62_vm0 = vcmask 261120   ;;  %s384_s1 = inlined_call_operand.vmem [shape: bf16[32,128], index: 1, kind: input, shape index: {}]   ;;  %s385_s0 = inlined_call_operand.vmem [shape: f32[128,32], index: 0, kind: input, shape index: {}]   ;;  %s386_s2 = inlined_call_operand.vmem [shape: f32[1,128], index: 2, kind: input, shape index: {}]   ;;  %s387_s3 = inlined_call_operand.vmem [shape: f32[128,128], index: 3, kind: output, shape index: {}]  }
   0x1   :  { %v249_v0 = vld [vmem:[%s384_s1] sm:$0xff]   ;;  %v250_v1 = vld [vmem:[%s384_s1 + $0x8] sm:$0xff]   ;;  %v17_v7 = vld [vmem:[%s385_s0 + $0x10] sm:$0xff] }
   0x2   :  { %225 = vmatprep.subr.bf16.mxu0 %v249_v0  ;;  %245 = vmatprep.subr.bf16.mxu1 %v249_v0  ;;  %v15_v2 = vld [vmem:[%s385_s0] sm:$0xff]  ;;  %v16_v3 = vld [vmem:[%s385_s0 + $0x8] sm:$0xff]  ;;  %v18_v8 = vld [vmem:[%s385_s0 + $0x18] sm:$0xff] }
   0x3   :  { %v23_v4 = vld [vmem:[%s385_s0 + $0x40] sm:$0xff]  ;;  %226 = vmatpush3.bf16.msra.mxu0 %v249_v0  ;;  %247 = vmatpush3.bf16.msra.mxu1 %v249_v0  ;;  %v31_v5 = vpack.c.bf16 %v16_v3, %v15_v2  ;;  %v24_v6 = vld [vmem:[%s385_s0 + $0x48] sm:$0xff]  ;;  %v25_v10 = vld [vmem:[%s385_s0 + $0x50] sm:$0xff]  ;;  %v32_v16 = vpack.c.bf16 %v18_v8, %v17_v7 }
   0x4   :  { %227 = vmatprep.subr.bf16.mxu0 %v250_v1  ;;  %246 = vmatprep.subr.bf16.mxu1 %v250_v1  ;;  %v35_v9 = vpack.c.bf16 %v24_v6, %v23_v4  ;;  %v26_v11 = vld [vmem:[%s385_s0 + $0x58] sm:$0xff]  ;;  %v19_v12 = vld [vmem:[%s385_s0 + $0x20] sm:$0xff]  ;;  %v20_v13 = vld [vmem:[%s385_s0 + $0x28] sm:$0xff] }
   0x5   :  { %229 = vmatprep.mubr.msk.bf16.mxu0 %vm62_vm0, %v31_v5  ;;  %v27_v14 = vld [vmem:[%s385_s0 + $0x60] sm:$0xff]  ;;  %v28_v15 = vld [vmem:[%s385_s0 + $0x68] sm:$0xff]  ;;  %v36_v17 = vpack.c.bf16 %v26_v11, %v25_v10  ;;  %v33_v18 = vpack.c.bf16 %v20_v13, %v19_v12  ;;  %v21_v20 = vld [vmem:[%s385_s0 + $0x30] sm:$0xff] }
   0x6   :  { %237 = vmatprep.mubr.msk.bf16.mxu1 %vm62_vm0, %v35_v9  ;;  %v37_v19 = vpack.c.bf16 %v28_v15, %v27_v14  ;;  %v22_v21 = vld [vmem:[%s385_s0 + $0x38] sm:$0xff]  ;;  %v29_v22 = vld [vmem:[%s385_s0 + $0x70] sm:$0xff]  ;;  %v204_v26 = vld [vmem:[%s386_s2] ss:$0 sm:$0xff] }
   0x7   :  { %228 = vmatpush3.bf16.msra.mxu0 %v250_v1  ;;  %248 = vmatpush3.bf16.msra.mxu1 %v250_v1  ;;  %v30_v23 = vld [vmem:[%s385_s0 + $0x78] sm:$0xff]  ;;  %v34_v24 = vpack.c.bf16 %v22_v21, %v21_v20 }
   0x8   :  { %v38_v25 = vpack.c.bf16 %v30_v23, %v29_v22 }
   0xa   :  { %230 = vmatmul.mubr.msk.bf16.vlgmr.msra.gmra.mrb[0].mxu0 %vm62_vm0, %v32_v16  ;;  %238 = vmatmul.mubr.msk.bf16.vlgmr.msra.gmra.mrb[0].mxu1 %vm62_vm0, %v36_v17 }
   0xb   :  { %233 = vmatprep.mubr.msk.bf16.mxu0 %vm62_vm0, %v33_v18  ;;  %241 = vmatprep.mubr.msk.bf16.mxu1 %vm62_vm0, %v37_v19 }
  0x12   :  { %234 = vmatmul.mubr.msk.bf16.gmra.mrb[4].mxu0 %vm62_vm0, %v34_v24  ;;  %242 = vmatmul.mubr.msk.bf16.gmra.mrb[4].mxu1 %vm62_vm0, %v38_v25 }
  0xdd   :  { %v231_v27 = vpop.f32.mrb[0].mxu0  ;;  %v239_v28 = vpop.f32.mrb[0].mxu1 }
  0xde   :  { %v130_v29 = vadd.f32 %v231_v27, %v204_v26  ;;  %v162_v30 = vadd.f32 %v239_v28, %v204_v26  ;;  %v121_v31 = vpop.f32.mrb[1].mxu0  ;;  %v153_v32 = vpop.f32.mrb[1].mxu1 }
  0xdf   :  { %v122_v33 = vadd.f32 %v204_v26, %v121_v31  ;;  %v154_v34 = vadd.f32 %v204_v26, %v153_v32  ;;  %v232_v35 = vpop.f32.mrb[2].mxu0  ;;  %v240_v36 = vpop.f32.mrb[2].mxu1 }
  0xe0   :  { %186 = vst [vmem:[%s387_s3 + $0x10] sm:$0xff] %v130_v29  ;;  %194 = vst [vmem:[%s387_s3 + $0x50] sm:$0xff] %v162_v30  ;;  %v133_v37 = vadd.f32 %v232_v35, %v204_v26  ;;  %v165_v38 = vadd.f32 %v240_v36, %v204_v26  ;;  %v124_v39 = vpop.f32.mrb[3].mxu0  ;;  %v156_v40 = vpop.f32.mrb[3].mxu1 }
  0xe1   :  { %184 = vst [vmem:[%s387_s3] sm:$0xff] %v122_v33  ;;  %192 = vst [vmem:[%s387_s3 + $0x40] sm:$0xff] %v154_v34  ;;  %v125_v41 = vadd.f32 %v204_v26, %v124_v39  ;;  %v157_v42 = vadd.f32 %v204_v26, %v156_v40 }
  0xe2   :  { %187 = vst [vmem:[%s387_s3 + $0x18] sm:$0xff] %v133_v37  ;;  %195 = vst [vmem:[%s387_s3 + $0x58] sm:$0xff] %v165_v38 }
  0xe3   :  { %185 = vst [vmem:[%s387_s3 + $0x8] sm:$0xff] %v125_v41  ;;  %193 = vst [vmem:[%s387_s3 + $0x48] sm:$0xff] %v157_v42 }
  0xe5   :  { %v235_v43 = vpop.f32.mrb[4].mxu0  ;;  %v243_v44 = vpop.f32.mrb[4].mxu1 }
  0xe6   :  { %v146_v45 = vadd.f32 %v235_v43, %v204_v26  ;;  %v178_v46 = vadd.f32 %v243_v44, %v204_v26  ;;  %v137_v47 = vpop.f32.mrb[5].mxu0  ;;  %v169_v48 = vpop.f32.mrb[5].mxu1 }
  0xe7   :  { %v138_v49 = vadd.f32 %v204_v26, %v137_v47  ;;  %v170_v50 = vadd.f32 %v204_v26, %v169_v48  ;;  %v236_v51 = vpop.f32.mrb[6].mxu0  ;;  %v244_v52 = vpop.f32.mrb[6].mxu1 }
  0xe8   :  { %190 = vst [vmem:[%s387_s3 + $0x30] sm:$0xff] %v146_v45  ;;  %198 = vst [vmem:[%s387_s3 + $0x70] sm:$0xff] %v178_v46  ;;  %v149_v53 = vadd.f32 %v236_v51, %v204_v26  ;;  %v181_v54 = vadd.f32 %v244_v52, %v204_v26  ;;  %v140_v55 = vpop.f32.mrb[7].mxu0  ;;  %v172_v56 = vpop.f32.mrb[7].mxu1 }
  0xe9   :  { %188 = vst [vmem:[%s387_s3 + $0x20] sm:$0xff] %v138_v49  ;;  %196 = vst [vmem:[%s387_s3 + $0x60] sm:$0xff] %v170_v50  ;;  %v141_v57 = vadd.f32 %v204_v26, %v140_v55  ;;  %v173_v58 = vadd.f32 %v204_v26, %v172_v56 }
  0xea   :  { %191 = vst [vmem:[%s387_s3 + $0x38] sm:$0xff] %v149_v53  ;;  %199 = vst [vmem:[%s387_s3 + $0x78] sm:$0xff] %v181_v54 }
  0xeb   :  { %189 = vst [vmem:[%s387_s3 + $0x28] sm:$0xff] %v141_v57  ;;  %197 = vst [vmem:[%s387_s3 + $0x68] sm:$0xff] %v173_v58 }

// kernel: up_trans_block.12
= control target key start
LH: loop header
LB: loop body
LE: loop exit
PB: predicated region body
PF: predicated region fallthrough
CT: control target
= control target key end

     0   :  { %s848_s12 = smov 0   ;;  %s850_s13 = smov 0   ;;  %s1013_s0 = inlined_call_operand.vmem [shape: f32[512,32], index: 0, kind: input, shape index: {}]   ;;  %s1014_s1 = inlined_call_operand.vmem [shape: bf16[32,128], index: 1, kind: input, shape index: {}]   ;;  %s1015_s2 = inlined_call_operand.vmem [shape: f32[512,128], index: 2, kind: input, shape index: {}]   ;;  %s1016_s3 = inlined_call_operand.vmem [shape: f32[512,128], index: 3, kind: output, shape index: {}]  }
   0x1   :  { %s852_s14 = smov 0  }
   0x2 LB: > { %s25_s15 = sadd.s32 1, %s822_s13  ;;  %p693_p0 = scmp.ge.s32.totalorder %s826_s14, 1  ;;  %s826_s14 = sphi %s852_s14, %s13_s14   ;;  %s822_s13 = sphi %s850_s13, %s1018_s13   ;;  %s818_s12 = sphi %s848_s12, %s1017_s12  }
   0x3   : > { %p27_p1 = scmp.ge.s32.totalorder %s25_s15, 2  ;;  %p177_p2 = scmp.lt.s32.totalorder %s826_s14, 3 }
   0x5   : > { %s1020_s15 = smov (%p27_p1, %s25_s15), 0  ;;  %p178_p3 = pnand %p693_p0, %p177_p2 }
   0x6   : > { %v802_v0 = vld [vmem:[%s1014_s1] sm:$0xff] (!%p178_p3)   ;;  %s694_s18 = sshll.u32 (!%p178_p3), %s818_s12, 5  ;;  %v803_v1 = vld [vmem:[%s1014_s1 + $0x8] sm:$0xff] (!%p178_p3)   ;;  %vm341_vm0 = vcmask (!%p178_p3), 261120  }
   0x7   : > { %181 = sbr.rel (%p178_p3) target bundleno = 264 (0x108), region = 32  ;;  %p217_p4 = scmp.lt.s32.totalorder (!%p178_p3), %s694_s18, 63  ;;  %738 = vmatprep.subr.bf16.mxu0 (!%p178_p3), %v802_v0  ;;  %774 = vmatprep.subr.bf16.mxu1 (!%p178_p3), %v802_v0 }
   0x8   : > { %739 = vmatpush3.bf16.msra.mxu0 (!%p178_p3), %v802_v0  ;;  %776 = vmatpush3.bf16.msra.mxu1 (!%p178_p3), %v802_v0 }
   0x9   : > { %740 = vmatprep.subr.bf16.mxu0 (!%p178_p3), %v803_v1  ;;  %775 = vmatprep.subr.bf16.mxu1 (!%p178_p3), %v803_v1 }
   0xc   : > { %741 = vmatpush3.bf16.msra.mxu0 (!%p178_p3), %v803_v1  ;;  %777 = vmatpush3.bf16.msra.mxu1 (!%p178_p3), %v803_v1 }
   0xe   : > { %s1022_s18 = smov (!%p217_p4, %s694_s18), 63 }
   0xf   : > { %s872_s21 = sshll.u32 %s1022_s18, 3 }
  0x10   : > { %s878_s24 = scalar_lea.vmem %s1013_s0, %s872_s21  ;;  %s932_s27 = scalar_lea.vmem %s1015_s2, %s872_s21 }
  0x11   : > { %v245_v2 = vld [vmem:[%s878_s24] sm:$0xff]  ;;  %v246_v3 = vld [vmem:[%s878_s24 + $0x8] sm:$0xff]  ;;  %v247_v7 = vld [vmem:[%s878_s24 + $0x10] sm:$0xff]  ;;  %s941_s30 = scalar_lea.vmem %s1016_s3, %s872_s21 }
  0x12   : > { %v261_v4 = vld [vmem:[%s878_s24 + $0x80] sm:$0xff]  ;;  %v277_v5 = vpack.c.bf16 %v246_v3, %v245_v2  ;;  %v262_v6 = vld [vmem:[%s878_s24 + $0x88] sm:$0xff]  ;;  %v248_v8 = vld [vmem:[%s878_s24 + $0x18] sm:$0xff] }
  0x13   : > { %v285_v9 = vpack.c.bf16 %v262_v6, %v261_v4  ;;  %v278_v10 = vpack.c.bf16 %v248_v8, %v247_v7  ;;  %v263_v11 = vld [vmem:[%s878_s24 + $0x90] sm:$0xff]  ;;  %v264_v12 = vld [vmem:[%s878_s24 + $0x98] sm:$0xff]  ;;  %v249_v13 = vld [vmem:[%s878_s24 + $0x20] sm:$0xff] }
  0x14   : > { %742 = vmatprep.mubr.msk.bf16.mxu0 %vm341_vm0, %v277_v5  ;;  %v286_v14 = vpack.c.bf16 %v264_v12, %v263_v11  ;;  %v250_v15 = vld [vmem:[%s878_s24 + $0x28] sm:$0xff]  ;;  %v265_v16 = vld [vmem:[%s878_s24 + $0xa0] sm:$0xff]  ;;  %v251_v20 = vld [vmem:[%s878_s24 + $0x30] sm:$0xff] }
  0x15   : > { %v266_v17 = vld [vmem:[%s878_s24 + $0xa8] sm:$0xff]  ;;  %758 = vmatprep.mubr.msk.bf16.mxu1 %vm341_vm0, %v285_v9  ;;  %743 = vmatmul.mubr.msk.bf16.vlgmr.msra.gmra.mrb[0].mxu0 %vm341_vm0, %v278_v10  ;;  %v279_v18 = vpack.c.bf16 %v250_v15, %v249_v13  ;;  %v252_v21 = vld [vmem:[%s878_s24 + $0x38] sm:$0xff]  ;;  %v267_v22 = vld [vmem:[%s878_s24 + $0xb0] sm:$0xff] }
  0x16   : > { %v287_v19 = vpack.c.bf16 %v266_v17, %v265_v16  ;;  %759 = vmatmul.mubr.msk.bf16.vlgmr.msra.gmra.mrb[0].mxu1 %vm341_vm0, %v286_v14  ;;  %v268_v23 = vld [vmem:[%s878_s24 + $0xb8] sm:$0xff]  ;;  %v253_v24 = vld [vmem:[%s878_s24 + $0x40] sm:$0xff]  ;;  %v254_v25 = vld [vmem:[%s878_s24 + $0x48] sm:$0xff]  ;;  %v280_v28 = vpack.c.bf16 %v252_v21, %v251_v20 }
  0x17   : > { %746 = vmatprep.mubr.msk.bf16.mxu0 %vm341_vm0, %v279_v18  ;;  %v269_v26 = vld [vmem:[%s878_s24 + $0xc0] sm:$0xff]  ;;  %v270_v27 = vld [vmem:[%s878_s24 + $0xc8] sm:$0xff]  ;;  %v288_v29 = vpack.c.bf16 %v268_v23, %v267_v22  ;;  %v281_v30 = vpack.c.bf16 %v254_v25, %v253_v24  ;;  %v255_v32 = vld [vmem:[%s878_s24 + $0x50] sm:$0xff] }
  0x18   : > { %762 = vmatprep.mubr.msk.bf16.mxu1 %vm341_vm0, %v287_v19  ;;  %v289_v31 = vpack.c.bf16 %v270_v27, %v269_v26  ;;  %v256_v33 = vld [vmem:[%s878_s24 + $0x58] sm:$0xff]  ;;  %v271_v34 = vld [vmem:[%s878_s24 + $0xd0] sm:$0xff]  ;;  %v257_v36 = vld [vmem:[%s878_s24 + $0x60] sm:$0xff] }
  0x19   : > { %v272_v35 = vld [vmem:[%s878_s24 + $0xd8] sm:$0xff]  ;;  %v258_v37 = vld [vmem:[%s878_s24 + $0x68] sm:$0xff]  ;;  %v273_v38 = vld [vmem:[%s878_s24 + $0xe0] sm:$0xff]  ;;  %v282_v40 = vpack.c.bf16 %v256_v33, %v255_v32 }
  0x1a   : > { %v274_v39 = vld [vmem:[%s878_s24 + $0xe8] sm:$0xff]  ;;  %v290_v41 = vpack.c.bf16 %v272_v35, %v271_v34  ;;  %v283_v42 = vpack.c.bf16 %v258_v37, %v257_v36  ;;  %v259_v44 = vld [vmem:[%s878_s24 + $0x70] sm:$0xff]  ;;  %v260_v45 = vld [vmem:[%s878_s24 + $0x78] sm:$0xff] }
  0x1b   : > { %v291_v43 = vpack.c.bf16 %v274_v39, %v273_v38  ;;  %v275_v46 = vld [vmem:[%s878_s24 + $0xf0] sm:$0xff]  ;;  %v276_v47 = vld [vmem:[%s878_s24 + $0xf8] sm:$0xff]  ;;  %v284_v48 = vpack.c.bf16 %v260_v45, %v259_v44  ;;  %v297_v52 = vld [vmem:[%s932_s27] sm:$0xff] }
  0x1c   : > { %v292_v49 = vpack.c.bf16 %v276_v47, %v275_v46  ;;  %v299_v50 = vld [vmem:[%s932_s27 + $0x10] sm:$0xff]  ;;  %v313_v54 = vld [vmem:[%s932_s27 + $0x80] sm:$0xff]  ;;  %v300_v55 = vld [vmem:[%s932_s27 + $0x18] sm:$0xff] }
  0x1d   : > { %747 = vmatmul.mubr.msk.bf16.gmra.mrb[4].mxu0 %vm341_vm0, %v280_v28  ;;  %v315_v51 = vld [vmem:[%s932_s27 + $0x90] sm:$0xff]  ;;  %v316_v59 = vld [vmem:[%s932_s27 + $0x98] sm:$0xff]  ;;  %v298_v60 = vld [vmem:[%s932_s27 + $0x8] sm:$0xff] }
  0x1e   : > { %763 = vmatmul.mubr.msk.bf16.gmra.mrb[4].mxu1 %vm341_vm0, %v288_v29  ;;  %750 = vmatprep.mubr.msk.bf16.mxu0 %vm341_vm0, %v281_v30  ;;  %v314_v1 = vld [vmem:[%s932_s27 + $0x88] sm:$0xff]  ;;  %v303_v10 = vld [vmem:[%s932_s27 + $0x30] sm:$0xff]  ;;  %v301_v12 = vld [vmem:[%s932_s27 + $0x20] sm:$0xff] }
  0x1f   : > { %766 = vmatprep.mubr.msk.bf16.mxu1 %vm341_vm0, %v289_v31  ;;  %v319_v11 = vld [vmem:[%s932_s27 + $0xb0] sm:$0xff]  ;;  %v317_v14 = vld [vmem:[%s932_s27 + $0xa0] sm:$0xff]  ;;  %v304_v15 = vld [vmem:[%s932_s27 + $0x38] sm:$0xff] }
  0x20   : > { %v320_v19 = vld [vmem:[%s932_s27 + $0xb8] sm:$0xff]  ;;  %v302_v20 = vld [vmem:[%s932_s27 + $0x28] sm:$0xff]  ;;  %v307_v34 = vld [vmem:[%s932_s27 + $0x50] sm:$0xff] }
  0x21   : > { %v318_v25 = vld [vmem:[%s932_s27 + $0xa8] sm:$0xff]  ;;  %v323_v35 = vld [vmem:[%s932_s27 + $0xd0] sm:$0xff]  ;;  %v305_v36 = vld [vmem:[%s932_s27 + $0x40] sm:$0xff] }
  0x22   : > { %v321_v38 = vld [vmem:[%s932_s27 + $0xc0] sm:$0xff]  ;;  %v308_v39 = vld [vmem:[%s932_s27 + $0x58] sm:$0xff]  ;;  %v306_v44 = vld [vmem:[%s932_s27 + $0x48] sm:$0xff] }
  0x25   : > { %751 = vmatmul.mubr.msk.bf16.gmra.mrb[8].mxu0 %vm341_vm0, %v282_v40 }
  0x26   : > { %767 = vmatmul.mubr.msk.bf16.gmra.mrb[8].mxu1 %vm341_vm0, %v290_v41  ;;  %754 = vmatprep.mubr.msk.bf16.mxu0 %vm341_vm0, %v283_v42 }
  0x27   : > { %770 = vmatprep.mubr.msk.bf16.mxu1 %vm341_vm0, %v291_v43  ;;  %v324_v43 = vld [vmem:[%s932_s27 + $0xd8] sm:$0xff] }
  0x2d   : > { %755 = vmatmul.mubr.msk.bf16.gmra.mrb[12].mxu0 %vm341_vm0, %v284_v48 }
  0x2e   : > { %771 = vmatmul.mubr.msk.bf16.gmra.mrb[12].mxu1 %vm341_vm0, %v292_v49  ;;  %v322_v49 = vld [vmem:[%s932_s27 + $0xc8] sm:$0xff] }
  0xe8   : > { %v744_v53 = vpop.f32.mrb[0].mxu0 }
  0xe9   : > { %v433_v56 = vadd.f32 %v744_v53, %v299_v50  ;;  %v760_v57 = vpop.f32.mrb[0].mxu1  ;;  %v424_v58 = vpop.f32.mrb[1].mxu0 }
  0xea   : > { %v497_v61 = vadd.f32 %v760_v57, %v315_v51  ;;  %v425_v62 = vadd.f32 %v424_v58, %v297_v52  ;;  %v488_v63 = vpop.f32.mrb[1].mxu1  ;;  %v745_v0 = vpop.f32.mrb[2].mxu0  ;;  %v311_v58 = vld [vmem:[%s932_s27 + $0x70] sm:$0xff] }
  0xeb   : > { %553 = vst [vmem:[%s941_s30 + $0x10] sm:$0xff] %v433_v56  ;;  %v489_v2 = vadd.f32 %v488_v63, %v313_v54  ;;  %v436_v3 = vadd.f32 %v745_v0, %v300_v55  ;;  %v761_v4 = vpop.f32.mrb[2].mxu1  ;;  %v427_v5 = vpop.f32.mrb[3].mxu0  ;;  %v312_v63 = vld [vmem:[%s932_s27 + $0x78] sm:$0xff] }
  0xec   : > { %569 = vst [vmem:[%s941_s30 + $0x90] sm:$0xff] %v497_v61  ;;  %551 = vst [vmem:[%s941_s30] sm:$0xff] %v425_v62  ;;  %v500_v6 = vadd.f32 %v761_v4, %v316_v59  ;;  %v428_v7 = vadd.f32 %v427_v5, %v298_v60  ;;  %v491_v8 = vpop.f32.mrb[3].mxu1  ;;  %v327_v59 = vld [vmem:[%s932_s27 + $0xf0] sm:$0xff]  ;;  %v309_v60 = vld [vmem:[%s932_s27 + $0x60] sm:$0xff] }
  0xed   : > { %567 = vst [vmem:[%s941_s30 + $0x80] sm:$0xff] %v489_v2  ;;  %554 = vst [vmem:[%s941_s30 + $0x18] sm:$0xff] %v436_v3  ;;  %v492_v9 = vadd.f32 %v491_v8, %v314_v1  ;;  %v325_v62 = vld [vmem:[%s932_s27 + $0xe0] sm:$0xff]  ;;  %v328_v3 = vld [vmem:[%s932_s27 + $0xf8] sm:$0xff] }
  0xee   : > { %570 = vst [vmem:[%s941_s30 + $0x98] sm:$0xff] %v500_v6  ;;  %552 = vst [vmem:[%s941_s30 + $0x8] sm:$0xff] %v428_v7  ;;  %v310_v4 = vld [vmem:[%s932_s27 + $0x68] sm:$0xff] }
  0xef   : > { %568 = vst [vmem:[%s941_s30 + $0x88] sm:$0xff] %v492_v9  ;;  %v326_v9 = vld [vmem:[%s932_s27 + $0xe8] sm:$0xff] }
  0xf0   : > { %v748_v13 = vpop.f32.mrb[4].mxu0 }
  0xf1   : > { %v449_v16 = vadd.f32 %v748_v13, %v303_v10  ;;  %v764_v17 = vpop.f32.mrb[4].mxu1  ;;  %v440_v18 = vpop.f32.mrb[5].mxu0 }
  0xf2   : > { %v513_v21 = vadd.f32 %v764_v17, %v319_v11  ;;  %v441_v22 = vadd.f32 %v440_v18, %v301_v12  ;;  %v504_v23 = vpop.f32.mrb[5].mxu1  ;;  %v749_v24 = vpop.f32.mrb[6].mxu0 }
  0xf3   : > { %557 = vst [vmem:[%s941_s30 + $0x30] sm:$0xff] %v449_v16  ;;  %v505_v26 = vadd.f32 %v504_v23, %v317_v14  ;;  %v452_v27 = vadd.f32 %v749_v24, %v304_v15  ;;  %v765_v28 = vpop.f32.mrb[6].mxu1  ;;  %v443_v29 = vpop.f32.mrb[7].mxu0 }
  0xf4   : > { %573 = vst [vmem:[%s941_s30 + $0xb0] sm:$0xff] %v513_v21  ;;  %555 = vst [vmem:[%s941_s30 + $0x20] sm:$0xff] %v441_v22  ;;  %v516_v30 = vadd.f32 %v765_v28, %v320_v19  ;;  %v444_v31 = vadd.f32 %v443_v29, %v302_v20  ;;  %v507_v32 = vpop.f32.mrb[7].mxu1 }
  0xf5   : > { %571 = vst [vmem:[%s941_s30 + $0xa0] sm:$0xff] %v505_v26  ;;  %558 = vst [vmem:[%s941_s30 + $0x38] sm:$0xff] %v452_v27  ;;  %v508_v33 = vadd.f32 %v507_v32, %v318_v25 }
  0xf6   : > { %574 = vst [vmem:[%s941_s30 + $0xb8] sm:$0xff] %v516_v30  ;;  %556 = vst [vmem:[%s941_s30 + $0x28] sm:$0xff] %v444_v31 }
  0xf7   : > { %572 = vst [vmem:[%s941_s30 + $0xa8] sm:$0xff] %v508_v33 }
  0xf8   : > { %v752_v37 = vpop.f32.mrb[8].mxu0 }
  0xf9   : > { %v465_v40 = vadd.f32 %v752_v37, %v307_v34  ;;  %v768_v41 = vpop.f32.mrb[8].mxu1  ;;  %v456_v42 = vpop.f32.mrb[9].mxu0 }
  0xfa   : > { %v529_v45 = vadd.f32 %v768_v41, %v323_v35  ;;  %v457_v46 = vadd.f32 %v456_v42, %v305_v36  ;;  %v520_v47 = vpop.f32.mrb[9].mxu1  ;;  %v753_v48 = vpop.f32.mrb[10].mxu0 }
  0xfb   : > { %561 = vst [vmem:[%s941_s30 + $0x50] sm:$0xff] %v465_v40  ;;  %v521_v50 = vadd.f32 %v520_v47, %v321_v38  ;;  %v468_v51 = vadd.f32 %v753_v48, %v308_v39  ;;  %v769_v52 = vpop.f32.mrb[10].mxu1  ;;  %v459_v53 = vpop.f32.mrb[11].mxu0 }
  0xfc   : > { %577 = vst [vmem:[%s941_s30 + $0xd0] sm:$0xff] %v529_v45  ;;  %559 = vst [vmem:[%s941_s30 + $0x40] sm:$0xff] %v457_v46  ;;  %v532_v54 = vadd.f32 %v769_v52, %v324_v43  ;;  %v460_v55 = vadd.f32 %v459_v53, %v306_v44  ;;  %v523_v56 = vpop.f32.mrb[11].mxu1 }
  0xfd   : > { %575 = vst [vmem:[%s941_s30 + $0xc0] sm:$0xff] %v521_v50  ;;  %562 = vst [vmem:[%s941_s30 + $0x58] sm:$0xff] %v468_v51  ;;  %v524_v57 = vadd.f32 %v523_v56, %v322_v49 }
  0xfe   : > { %578 = vst [vmem:[%s941_s30 + $0xd8] sm:$0xff] %v532_v54  ;;  %560 = vst [vmem:[%s941_s30 + $0x48] sm:$0xff] %v460_v55 }
  0xff   : > { %576 = vst [vmem:[%s941_s30 + $0xc8] sm:$0xff] %v524_v57 }
 0x100   : > { %v756_v61 = vpop.f32.mrb[12].mxu0 }
 0x101   : > { %v481_v0 = vadd.f32 %v756_v61, %v311_v58  ;;  %v772_v1 = vpop.f32.mrb[12].mxu1  ;;  %v472_v2 = vpop.f32.mrb[13].mxu0 }
 0x102   : > { %v545_v5 = vadd.f32 %v772_v1, %v327_v59  ;;  %v473_v6 = vadd.f32 %v472_v2, %v309_v60  ;;  %v536_v7 = vpop.f32.mrb[13].mxu1  ;;  %v757_v8 = vpop.f32.mrb[14].mxu0 }
 0x103   : > { %565 = vst [vmem:[%s941_s30 + $0x70] sm:$0xff] %v481_v0  ;;  %v537_v10 = vadd.f32 %v536_v7, %v325_v62  ;;  %v484_v11 = vadd.f32 %v757_v8, %v312_v63  ;;  %v773_v12 = vpop.f32.mrb[14].mxu1  ;;  %v475_v13 = vpop.f32.mrb[15].mxu0 }
 0x104   : > { %581 = vst [vmem:[%s941_s30 + $0xf0] sm:$0xff] %v545_v5  ;;  %563 = vst [vmem:[%s941_s30 + $0x60] sm:$0xff] %v473_v6  ;;  %v548_v14 = vadd.f32 %v773_v12, %v328_v3  ;;  %v476_v15 = vadd.f32 %v475_v13, %v310_v4  ;;  %v539_v16 = vpop.f32.mrb[15].mxu1 }
 0x105   : > { %579 = vst [vmem:[%s941_s30 + $0xe0] sm:$0xff] %v537_v10  ;;  %566 = vst [vmem:[%s941_s30 + $0x78] sm:$0xff] %v484_v11  ;;  %v540_v17 = vadd.f32 %v539_v16, %v326_v9 }
 0x106   : > { %582 = vst [vmem:[%s941_s30 + $0xf8] sm:$0xff] %v548_v14  ;;  %564 = vst [vmem:[%s941_s30 + $0x68] sm:$0xff] %v476_v15 }
 0x107   : > { %580 = vst [vmem:[%s941_s30 + $0xe8] sm:$0xff] %v540_v17 }
 0x108 PF: > { %s13_s14 = sadd.s32 1, %s826_s14   ;;  %s1017_s12 = smov %s822_s13 }
 0x109   : > { %p10_p5 = scmp.ge.s32.totalorder %s13_s14, 4   ;;  %s1018_s13 = smov %s1020_s15 }
 0x10b   :  { %12 = sbr.rel (!%p10_p5) target bundleno = 2 (0x2), region = 68 }

// kernel: up_trans_block.13
= control target key start
LH: loop header
LB: loop body
LE: loop exit
PB: predicated region body
PF: predicated region fallthrough
CT: control target
= control target key end

     0   :  { %s1153_s12 = smov 0   ;;  %s1155_s13 = smov 0   ;;  %s1586_s0 = inlined_call_operand.vmem [shape: f32[512,32], index: 0, kind: input, shape index: {}]   ;;  %s1587_s1 = inlined_call_operand.vmem [shape: bf16[32,128], index: 1, kind: input, shape index: {}]   ;;  %s1588_s2 = inlined_call_operand.vmem [shape: f32[1,128], index: 2, kind: input, shape index: {}]   ;;  %s1589_s3 = inlined_call_operand.vmem [shape: f32[512,128], index: 3, kind: output, shape index: {}]  }
   0x1   :  { %s1157_s14 = smov 0  }
   0x2 LB: > { %s25_s15 = sadd.s32 1, %s1127_s13  ;;  %p935_p0 = scmp.ge.s32.totalorder %s1131_s14, 1  ;;  %s1131_s14 = sphi %s1157_s14, %s13_s14   ;;  %s1127_s13 = sphi %s1155_s13, %s1591_s13   ;;  %s1123_s12 = sphi %s1153_s12, %s1590_s12  }
   0x3   : > { %p27_p1 = scmp.ge.s32.totalorder %s25_s15, 2  ;;  %p169_p2 = scmp.lt.s32.totalorder %s1131_s14, 3 }
   0x5   : > { %s1593_s15 = smov (%p27_p1, %s25_s15), 0  ;;  %p170_p3 = pnand %p935_p0, %p169_p2 }
   0x6   : > { %v1043_v0 = vld [vmem:[%s1587_s1] sm:$0xff] (!%p170_p3)   ;;  %s936_s18 = sshll.u32 (!%p170_p3), %s1123_s12, 5  ;;  %v1044_v1 = vld [vmem:[%s1587_s1 + $0x8] sm:$0xff] (!%p170_p3)   ;;  %vm297_vm0 = vcmask (!%p170_p3), 261120  }
   0x7   : > { %173 = sbr.rel (%p170_p3) target bundleno = 330 (0x14a), region = 32  ;;  %p204_p4 = scmp.lt.s32.totalorder (!%p170_p3), %s936_s18, 63  ;;  %979 = vmatprep.subr.bf16.mxu0 (!%p170_p3), %v1043_v0  ;;  %1015 = vmatprep.subr.bf16.mxu1 (!%p170_p3), %v1043_v0  ;;  %v1238_v50 = vld [vmem:[%s1588_s2] ss:$0 sm:$0xff] (!%p170_p3) }
   0x8   : > { %980 = vmatpush3.bf16.msra.mxu0 (!%p170_p3), %v1043_v0  ;;  %1017 = vmatpush3.bf16.msra.mxu1 (!%p170_p3), %v1043_v0 }
   0x9   : > { %981 = vmatprep.subr.bf16.mxu0 (!%p170_p3), %v1044_v1  ;;  %1016 = vmatprep.subr.bf16.mxu1 (!%p170_p3), %v1044_v1 }
   0xc   : > { %982 = vmatpush3.bf16.msra.mxu0 (!%p170_p3), %v1044_v1  ;;  %1018 = vmatpush3.bf16.msra.mxu1 (!%p170_p3), %v1044_v1 }
   0xe   : > { %s1595_s18 = smov (!%p204_p4, %s936_s18), 63 }
   0xf   : > { %s937_s21 = sshll.u32 %s1595_s18, 3 }
  0x10   : > { %s1185_s24 = scalar_lea.vmem %s1586_s0, %s937_s21  ;;  %s1354_s29 = scalar_lea.vmem %s1589_s3, %s937_s21 }
  0x11   : > { %v226_v2 = vld [vmem:[%s1185_s24] sm:$0xff]  ;;  %v227_v3 = vld [vmem:[%s1185_s24 + $0x8] sm:$0xff]  ;;  %v228_v7 = vld [vmem:[%s1185_s24 + $0x10] sm:$0xff] }
  0x12   : > { %v242_v4 = vld [vmem:[%s1185_s24 + $0x80] sm:$0xff]  ;;  %v258_v5 = vpack.c.bf16 %v227_v3, %v226_v2  ;;  %v243_v6 = vld [vmem:[%s1185_s24 + $0x88] sm:$0xff]  ;;  %v229_v8 = vld [vmem:[%s1185_s24 + $0x18] sm:$0xff] }
  0x13   : > { %v266_v9 = vpack.c.bf16 %v243_v6, %v242_v4  ;;  %v259_v10 = vpack.c.bf16 %v229_v8, %v228_v7  ;;  %v244_v11 = vld [vmem:[%s1185_s24 + $0x90] sm:$0xff]  ;;  %v245_v12 = vld [vmem:[%s1185_s24 + $0x98] sm:$0xff]  ;;  %v230_v13 = vld [vmem:[%s1185_s24 + $0x20] sm:$0xff] }
  0x14   : > { %983 = vmatprep.mubr.msk.bf16.mxu0 %vm297_vm0, %v258_v5  ;;  %v267_v14 = vpack.c.bf16 %v245_v12, %v244_v11  ;;  %v231_v15 = vld [vmem:[%s1185_s24 + $0x28] sm:$0xff]  ;;  %v246_v16 = vld [vmem:[%s1185_s24 + $0xa0] sm:$0xff]  ;;  %v232_v20 = vld [vmem:[%s1185_s24 + $0x30] sm:$0xff] }
  0x15   : > { %v247_v17 = vld [vmem:[%s1185_s24 + $0xa8] sm:$0xff]  ;;  %999 = vmatprep.mubr.msk.bf16.mxu1 %vm297_vm0, %v266_v9  ;;  %984 = vmatmul.mubr.msk.bf16.vlgmr.msra.gmra.mrb[0].mxu0 %vm297_vm0, %v259_v10  ;;  %v260_v18 = vpack.c.bf16 %v231_v15, %v230_v13  ;;  %v233_v21 = vld [vmem:[%s1185_s24 + $0x38] sm:$0xff]  ;;  %v248_v22 = vld [vmem:[%s1185_s24 + $0xb0] sm:$0xff] }
  0x16   : > { %v268_v19 = vpack.c.bf16 %v247_v17, %v246_v16  ;;  %1000 = vmatmul.mubr.msk.bf16.vlgmr.msra.gmra.mrb[0].mxu1 %vm297_vm0, %v267_v14  ;;  %v249_v23 = vld [vmem:[%s1185_s24 + $0xb8] sm:$0xff]  ;;  %v234_v24 = vld [vmem:[%s1185_s24 + $0x40] sm:$0xff]  ;;  %v235_v25 = vld [vmem:[%s1185_s24 + $0x48] sm:$0xff]  ;;  %v261_v28 = vpack.c.bf16 %v233_v21, %v232_v20 }
  0x17   : > { %987 = vmatprep.mubr.msk.bf16.mxu0 %vm297_vm0, %v260_v18  ;;  %v250_v26 = vld [vmem:[%s1185_s24 + $0xc0] sm:$0xff]  ;;  %v251_v27 = vld [vmem:[%s1185_s24 + $0xc8] sm:$0xff]  ;;  %v269_v29 = vpack.c.bf16 %v249_v23, %v248_v22  ;;  %v262_v30 = vpack.c.bf16 %v235_v25, %v234_v24  ;;  %v236_v32 = vld [vmem:[%s1185_s24 + $0x50] sm:$0xff] }
  0x18   : > { %1003 = vmatprep.mubr.msk.bf16.mxu1 %vm297_vm0, %v268_v19  ;;  %v270_v31 = vpack.c.bf16 %v251_v27, %v250_v26  ;;  %v237_v33 = vld [vmem:[%s1185_s24 + $0x58] sm:$0xff]  ;;  %v252_v34 = vld [vmem:[%s1185_s24 + $0xd0] sm:$0xff]  ;;  %v238_v36 = vld [vmem:[%s1185_s24 + $0x60] sm:$0xff] }
  0x19   : > { %v253_v35 = vld [vmem:[%s1185_s24 + $0xd8] sm:$0xff]  ;;  %v239_v37 = vld [vmem:[%s1185_s24 + $0x68] sm:$0xff]  ;;  %v254_v38 = vld [vmem:[%s1185_s24 + $0xe0] sm:$0xff]  ;;  %v263_v40 = vpack.c.bf16 %v237_v33, %v236_v32 }
  0x1a   : > { %v255_v39 = vld [vmem:[%s1185_s24 + $0xe8] sm:$0xff]  ;;  %v271_v41 = vpack.c.bf16 %v253_v35, %v252_v34  ;;  %v264_v42 = vpack.c.bf16 %v239_v37, %v238_v36  ;;  %v240_v44 = vld [vmem:[%s1185_s24 + $0x70] sm:$0xff]  ;;  %v241_v45 = vld [vmem:[%s1185_s24 + $0x78] sm:$0xff] }
  0x1b   : > { %v272_v43 = vpack.c.bf16 %v255_v39, %v254_v38  ;;  %v256_v46 = vld [vmem:[%s1185_s24 + $0xf0] sm:$0xff]  ;;  %v257_v47 = vld [vmem:[%s1185_s24 + $0xf8] sm:$0xff]  ;;  %v265_v48 = vpack.c.bf16 %v241_v45, %v240_v44 }
  0x1c   : > { %v273_v49 = vpack.c.bf16 %v257_v47, %v256_v46 }
  0x1d   : > { %988 = vmatmul.mubr.msk.bf16.gmra.mrb[4].mxu0 %vm297_vm0, %v261_v28 }
  0x1e   : > { %1004 = vmatmul.mubr.msk.bf16.gmra.mrb[4].mxu1 %vm297_vm0, %v269_v29  ;;  %991 = vmatprep.mubr.msk.bf16.mxu0 %vm297_vm0, %v262_v30 }
  0x1f   : > { %1007 = vmatprep.mubr.msk.bf16.mxu1 %vm297_vm0, %v270_v31 }
  0x25   : > { %992 = vmatmul.mubr.msk.bf16.gmra.mrb[8].mxu0 %vm297_vm0, %v263_v40 }
  0x26   : > { %1008 = vmatmul.mubr.msk.bf16.gmra.mrb[8].mxu1 %vm297_vm0, %v271_v41  ;;  %995 = vmatprep.mubr.msk.bf16.mxu0 %vm297_vm0, %v264_v42 }
  0x27   : > { %1011 = vmatprep.mubr.msk.bf16.mxu1 %vm297_vm0, %v272_v43 }
  0x2d   : > { %996 = vmatmul.mubr.msk.bf16.gmra.mrb[12].mxu0 %vm297_vm0, %v265_v48 }
  0x2e   : > { %1012 = vmatmul.mubr.msk.bf16.gmra.mrb[12].mxu1 %vm297_vm0, %v273_v49 }
  0xe8   : > { %v985_v51 = vpop.f32.mrb[0].mxu0 }
  0xe9   : > { %v389_v52 = vadd.f32 %v985_v51, %v1238_v50  ;;  %v1001_v53 = vpop.f32.mrb[0].mxu1  ;;  %v380_v54 = vpop.f32.mrb[1].mxu0 }
  0xea   : > { %v453_v55 = vadd.f32 %v1001_v53, %v1238_v50  ;;  %v1243_v56 = vadd.f32 %v1238_v50, %v380_v54  ;;  %v444_v57 = vpop.f32.mrb[1].mxu1  ;;  %v986_v58 = vpop.f32.mrb[2].mxu0 }
  0xeb   : > { %v541_v59 = vmul.f32 %v389_v52, %v389_v52  ;;  %v1246_v60 = vadd.f32 %v1238_v50, %v444_v57  ;;  %v1249_v61 = vadd.f32 %v986_v58, %v1238_v50  ;;  %v1002_v62 = vpop.f32.mrb[2].mxu1  ;;  %v383_v63 = vpop.f32.mrb[3].mxu0  ;;  %v1274_v28 = vmul.f32 0.5, %v389_v52 }
  0xec   : > { %v557_v0 = vmul.f32 %v453_v55, %v453_v55  ;;  %v539_v1 = vmul.f32 %v1243_v56, %v1243_v56  ;;  %v447_v2 = vpop.f32.mrb[3].mxu1  ;;  %v1259_v8 = vadd.f32 %v1002_v62, %v1238_v50  ;;  %v1263_v11 = vadd.f32 %v1238_v50, %v383_v63 }
  0xed   : > { %v573_v3 = vmul.f32 %v541_v59, %v389_v52  ;;  %v555_v4 = vmul.f32 %v1246_v60, %v1246_v60  ;;  %v542_v7 = vmul.f32 %v1249_v61, %v1249_v61  ;;  %v1269_v19 = vadd.f32 %v1238_v50, %v447_v2 }
  0xee   : > { %v589_v5 = vmul.f32 %v557_v0, %v453_v55  ;;  %v571_v6 = vmul.f32 %v539_v1, %v1243_v56  ;;  %v558_v18 = vmul.f32 %v1259_v8, %v1259_v8  ;;  %v540_v25 = vmul.f32 %v1263_v11, %v1263_v11 }
  0xef   : > { %v605_v9 = vmul.f32 0.044715, %v573_v3  ;;  %v587_v10 = vmul.f32 %v555_v4, %v1246_v60  ;;  %v574_v14 = vmul.f32 %v542_v7, %v1249_v61  ;;  %v556_v41 = vmul.f32 %v1269_v19, %v1269_v19 }
  0xf0   : > { %v621_v12 = vmul.f32 0.044715, %v589_v5  ;;  %v603_v13 = vmul.f32 0.044715, %v571_v6  ;;  %v989_v15 = vpop.f32.mrb[4].mxu0  ;;  %v590_v31 = vmul.f32 %v558_v18, %v1259_v8  ;;  %v572_v37 = vmul.f32 %v540_v25, %v1263_v11 }
  0xf1   : > { %v637_v16 = vadd.f32 %v605_v9, %v389_v52  ;;  %v619_v17 = vmul.f32 0.044715, %v587_v10  ;;  %v1005_v20 = vpop.f32.mrb[4].mxu1  ;;  %v396_v21 = vpop.f32.mrb[5].mxu0  ;;  %v606_v24 = vmul.f32 0.044715, %v574_v14  ;;  %v1289_v44 = vadd.f32 %v989_v15, %v1238_v50 }
  0xf2   : > { %v653_v22 = vadd.f32 %v621_v12, %v453_v55  ;;  %v635_v23 = vadd.f32 %v603_v13, %v1243_v56  ;;  %v460_v26 = vpop.f32.mrb[5].mxu1  ;;  %v990_v27 = vpop.f32.mrb[6].mxu0  ;;  %v622_v40 = vmul.f32 0.044715, %v590_v31  ;;  %v604_v43 = vmul.f32 0.044715, %v572_v37 }
  0xf3   : > { %v669_v29 = vmul.f32 0.7978846, %v637_v16  ;;  %v651_v30 = vadd.f32 %v619_v17, %v1246_v60  ;;  %v1278_v32 = vpop.f32.mrb[6].mxu1  ;;  %v1280_v33 = vpop.f32.mrb[7].mxu0  ;;  %v638_v36 = vadd.f32 %v606_v24, %v1249_v61  ;;  %v588_v46 = vmul.f32 %v556_v41, %v1269_v19 }
  0xf4   : > { %v685_v34 = vmul.f32 0.7978846, %v653_v22  ;;  %v667_v35 = vmul.f32 0.7978846, %v635_v23  ;;  %v1284_v38 = vpop.f32.mrb[7].mxu1  ;;  %v654_v45 = vadd.f32 %v622_v40, %v1259_v8  ;;  %v1294_v47 = vadd.f32 %v1005_v20, %v1238_v50 }
  0xf5   : > { %1045 = vtanh.f32 %v669_v29  ;;  %v683_v39 = vmul.f32 0.7978846, %v651_v30  ;;  %v670_v42 = vmul.f32 0.7978846, %v638_v36  ;;  %v525_v48 = vmul.f32 0.5, %v453_v55 }
  0xf6   : > { %1047 = vtanh.f32 %v685_v34  ;;  %v636_v49 = vadd.f32 %v604_v43, %v1263_v11  ;;  %v545_v51 = vmul.f32 %v1289_v44, %v1289_v44  ;;  %v1302_v53 = vmul.f32 0.5, %v1243_v56 }
  0xf7   : > { %1049 = vtanh.f32 %v667_v35  ;;  %v686_v54 = vmul.f32 0.7978846, %v654_v45  ;;  %v620_v57 = vmul.f32 0.044715, %v588_v46  ;;  %v561_v55 = vmul.f32 %v1294_v47, %v1294_v47 }
  0xf8   : > { %1051 = vtanh.f32 %v683_v39  ;;  %v1299_v52 = vpop.f32.mrb[8].mxu0  ;;  %v668_v59 = vmul.f32 0.7978846, %v636_v49  ;;  %v577_v62 = vmul.f32 %v545_v51, %v1289_v44  ;;  %v1310_v63 = vadd.f32 %v1238_v50, %v396_v21 }
  0xf9   : > { %1053 = vtanh.f32 %v670_v42  ;;  %v1304_v58 = vpop.f32.mrb[8].mxu1  ;;  %v1312_v0 = vpop.f32.mrb[9].mxu0  ;;  %v652_v56 = vadd.f32 %v620_v57, %v1269_v19  ;;  %v1318_v2 = vadd.f32 %v1238_v50, %v460_v26  ;;  %v1321_v3 = vadd.f32 %v990_v27, %v1238_v50 }
  0xfa   : > { %v1314_v1 = vpop.f32.mrb[9].mxu1  ;;  %1055 = vtanh.f32 %v686_v54  ;;  %v1323_v4 = vpop.f32.mrb[10].mxu0  ;;  %v523_v6 = vmul.f32 0.5, %v1246_v60  ;;  %v609_v7 = vmul.f32 0.044715, %v577_v62  ;;  %v593_v9 = vmul.f32 %v561_v55, %v1294_v47 }
  0xfb   : > { %v1325_v5 = vpop.f32.mrb[10].mxu1  ;;  %1057 = vtanh.f32 %v668_v59  ;;  %v1329_v10 = vpop.f32.mrb[11].mxu0  ;;  %v510_v13 = vmul.f32 0.5, %v1249_v61  ;;  %v684_v14 = vmul.f32 0.7978846, %v652_v56  ;;  %v543_v15 = vmul.f32 %v1310_v63, %v1310_v63 }
  0xfc   : > { %v1331_v12 = vpop.f32.mrb[11].mxu1  ;;  %v559_v16 = vmul.f32 %v1318_v2, %v1318_v2  ;;  %v526_v17 = vmul.f32 0.5, %v1259_v8  ;;  %v641_v60 = vadd.f32 %v609_v7, %v1289_v44  ;;  %v625_v18 = vmul.f32 0.044715, %v593_v9 }
  0xfd   : > { %v546_v20 = vmul.f32 %v1321_v3, %v1321_v3  ;;  %v508_v22 = vmul.f32 0.5, %v1263_v11  ;;  %1059 = vtanh.f32 %v684_v14  ;;  %v575_v61 = vmul.f32 %v543_v15, %v1310_v63 }
  0xfe   : > { %v591_v23 = vmul.f32 %v559_v16, %v1318_v2  ;;  %v673_v26 = vmul.f32 0.7978846, %v641_v60  ;;  %v657_v8 = vadd.f32 %v625_v18, %v1294_v47  ;;  %v1358_v35 = vadd.f32 %v1278_v32, %v1238_v50 }
  0xff   : > { %v1046_v21 = vpop.eup %1045  ;;  %v578_v27 = vmul.f32 %v546_v20, %v1321_v3  ;;  %v607_v31 = vmul.f32 0.044715, %v575_v61  ;;  %v1386_v20 = vadd.f32 %v1238_v50, %v1280_v33  ;;  %v1392_v61 = vadd.f32 %v1238_v50, %v1284_v38 }
 0x100   : > { %v1048_v24 = vpop.eup %1047  ;;  %v733_v25 = vadd.f32 1.0, %v1046_v21  ;;  %v1347_v29 = vpop.f32.mrb[12].mxu0  ;;  %v623_v34 = vmul.f32 0.044715, %v591_v23  ;;  %1061 = vtanh.f32 %v673_v26  ;;  %v689_v40 = vmul.f32 0.7978846, %v657_v8 }
 0x101   : > { %v1050_v30 = vpop.eup %1049  ;;  %v749_v11 = vadd.f32 1.0, %v1048_v24  ;;  %v1361_v41 = vpop.f32.mrb[12].mxu1  ;;  %v639_v49 = vadd.f32 %v607_v31, %v1310_v63  ;;  %v610_v59 = vmul.f32 0.044715, %v578_v27  ;;  %v562_v14 = vmul.f32 %v1358_v35, %v1358_v35 }
 0x102   : > { %v1052_v36 = vpop.eup %1051  ;;  %v765_v37 = vmul.f32 %v733_v25, %v1274_v28  ;;  %v731_v39 = vadd.f32 1.0, %v1050_v30  ;;  %v1363_v42 = vpop.f32.mrb[13].mxu0  ;;  %v655_v51 = vadd.f32 %v623_v34, %v1318_v2  ;;  %1063 = vtanh.f32 %v689_v40 }
 0x103   : > { %v1054_v43 = vpop.eup %1053  ;;  %v781_v45 = vmul.f32 %v749_v11, %v525_v48  ;;  %v747_v46 = vadd.f32 1.0, %v1052_v36  ;;  %v1367_v32 = vpop.f32.mrb[13].mxu1  ;;  %v671_v7 = vmul.f32 0.7978846, %v639_v49  ;;  %v642_v18 = vadd.f32 %v610_v59, %v1321_v3 }
 0x104   : > { %v1369_v54 = vpop.f32.mrb[14].mxu0  ;;  %797 = vst [vmem:[%s1354_s29 + $0x10] sm:$0xff] %v765_v37  ;;  %v763_v28 = vmul.f32 %v731_v39, %v1302_v53  ;;  %v734_v57 = vadd.f32 1.0, %v1054_v43  ;;  %v1373_v62 = vpop.f32.mrb[14].mxu1  ;;  %v687_v9 = vmul.f32 0.7978846, %v655_v51  ;;  %v594_v21 = vmul.f32 %v562_v14, %v1358_v35 }
 0x105   : > { %v1375_v48 = vpop.f32.mrb[15].mxu0  ;;  %v1056_v55 = vpop.eup %1055  ;;  %813 = vst [vmem:[%s1354_s29 + $0x90] sm:$0xff] %v781_v45  ;;  %v779_v56 = vmul.f32 %v747_v46, %v523_v6  ;;  %1065 = vtanh.f32 %v671_v7  ;;  %v524_v23 = vmul.f32 0.5, %v1269_v19  ;;  %v674_v24 = vmul.f32 0.7978846, %v642_v18 }
 0x106   : > { %v1380_v15 = vpop.f32.mrb[15].mxu1  ;;  %v1058_v53 = vpop.eup %1057  ;;  %795 = vst [vmem:[%s1354_s29] sm:$0xff] %v763_v28  ;;  %v766_v16 = vmul.f32 %v734_v57, %v510_v13  ;;  %v750_v60 = vadd.f32 1.0, %v1056_v55  ;;  %1067 = vtanh.f32 %v687_v9  ;;  %v513_v26 = vmul.f32 0.5, %v1289_v44 }
 0x107   : > { %811 = vst [vmem:[%s1354_s29 + $0x80] sm:$0xff] %v779_v56  ;;  %v732_v6 = vadd.f32 1.0, %v1058_v53  ;;  %v1060_v25 = vpop.eup %1059  ;;  %v626_v8 = vmul.f32 0.044715, %v594_v21  ;;  %v544_v27 = vmul.f32 %v1386_v20, %v1386_v20  ;;  %1069 = vtanh.f32 %v674_v24 }
 0x108   : > { %798 = vst [vmem:[%s1354_s29 + $0x18] sm:$0xff] %v766_v16  ;;  %v782_v13 = vmul.f32 %v750_v60, %v526_v17  ;;  %v748_v30 = vadd.f32 1.0, %v1060_v25  ;;  %v560_v38 = vmul.f32 %v1392_v61, %v1392_v61  ;;  %v1404_v17 = vadd.f32 %v1299_v52, %v1238_v50 }
 0x109   : > { %v764_v33 = vmul.f32 %v732_v6, %v508_v22  ;;  %v529_v19 = vmul.f32 0.5, %v1294_v47  ;;  %v658_v44 = vadd.f32 %v626_v8, %v1358_v35  ;;  %v576_v22 = vmul.f32 %v544_v27, %v1386_v20 }
 0x10a   : > { %814 = vst [vmem:[%s1354_s29 + $0x98] sm:$0xff] %v782_v13  ;;  %v1412_v11 = vadd.f32 %v1304_v58, %v1238_v50  ;;  %v1062_v31 = vpop.eup %1061  ;;  %v780_v34 = vmul.f32 %v748_v30, %v524_v23  ;;  %v592_v36 = vmul.f32 %v560_v38, %v1392_v61  ;;  %v549_v52 = vmul.f32 %v1404_v17, %v1404_v17 }
 0x10b   : > { %796 = vst [vmem:[%s1354_s29 + $0x8] sm:$0xff] %v764_v33  ;;  %v1419_v37 = vadd.f32 %v1238_v50, %v1312_v0  ;;  %v737_v47 = vadd.f32 1.0, %v1062_v31  ;;  %v511_v39 = vmul.f32 0.5, %v1310_v63  ;;  %v690_v40 = vmul.f32 0.7978846, %v658_v44 }
 0x10c   : > { %v608_v43 = vmul.f32 0.044715, %v576_v22  ;;  %v1064_v45 = vpop.eup %1063  ;;  %812 = vst [vmem:[%s1354_s29 + $0x88] sm:$0xff] %v780_v34  ;;  %v527_v58 = vmul.f32 0.5, %v1318_v2  ;;  %v624_v46 = vmul.f32 0.044715, %v592_v36  ;;  %v581_v49 = vmul.f32 %v549_v52, %v1404_v17 }
 0x10d   : > { %v565_v51 = vmul.f32 %v1412_v11, %v1412_v11  ;;  %v769_v28 = vmul.f32 %v737_v47, %v513_v26  ;;  %v753_v57 = vadd.f32 1.0, %v1064_v45  ;;  %1071 = vtanh.f32 %v690_v40 }
 0x10e   : > { %v640_v0 = vadd.f32 %v608_v43, %v1386_v20  ;;  %v656_v63 = vadd.f32 %v624_v46, %v1392_v61  ;;  %v613_v59 = vmul.f32 0.044715, %v581_v49  ;;  %v547_v2 = vmul.f32 %v1419_v37, %v1419_v37 }
 0x10f   : > { %v597_v55 = vmul.f32 %v565_v51, %v1412_v11  ;;  %v1066_v56 = vpop.eup %1065  ;;  %801 = vst [vmem:[%s1354_s29 + $0x30] sm:$0xff] %v769_v28  ;;  %v785_v7 = vmul.f32 %v753_v57, %v529_v19  ;;  %v1435_v14 = vadd.f32 %v1238_v50, %v1314_v1  ;;  %v1439_v53 = vadd.f32 %v1323_v4, %v1238_v50 }
 0x110   : > { %v672_v9 = vmul.f32 0.7978846, %v640_v0  ;;  %v1068_v16 = vpop.eup %1067  ;;  %v735_v60 = vadd.f32 1.0, %v1066_v56  ;;  %v688_v18 = vmul.f32 0.7978846, %v656_v63  ;;  %v645_v6 = vadd.f32 %v613_v59, %v1404_v17 }
 0x111   : > { %v629_v21 = vmul.f32 0.044715, %v597_v55  ;;  %817 = vst [vmem:[%s1354_s29 + $0xb0] sm:$0xff] %v785_v7  ;;  %v751_v13 = vadd.f32 1.0, %v1068_v16  ;;  %v514_v23 = vmul.f32 0.5, %v1321_v3  ;;  %v579_v1 = vmul.f32 %v547_v2, %v1419_v37  ;;  %v1070_v24 = vpop.eup %1069 }
 0x112   : > { %1073 = vtanh.f32 %v672_v9  ;;  %v767_v25 = vmul.f32 %v735_v60, %v511_v39  ;;  %v677_v4 = vmul.f32 0.7978846, %v645_v6  ;;  %v738_v8 = vadd.f32 1.0, %v1070_v24 }
 0x113   : > { %1075 = vtanh.f32 %v688_v18  ;;  %v661_v33 = vadd.f32 %v629_v21, %v1412_v11  ;;  %v783_v26 = vmul.f32 %v751_v13, %v527_v58  ;;  %v611_v27 = vmul.f32 0.044715, %v579_v1 }
 0x114   : > { %v563_v30 = vmul.f32 %v1435_v14, %v1435_v14  ;;  %799 = vst [vmem:[%s1354_s29 + $0x20] sm:$0xff] %v767_v25  ;;  %v530_v3 = vmul.f32 0.5, %v1358_v35  ;;  %1077 = vtanh.f32 %v677_v4  ;;  %v550_v19 = vmul.f32 %v1439_v53, %v1439_v53 }
 0x115   : > { %v693_v38 = vmul.f32 0.7978846, %v661_v33  ;;  %815 = vst [vmem:[%s1354_s29 + $0xa0] sm:$0xff] %v783_v26  ;;  %v770_v44 = vmul.f32 %v738_v8, %v514_v23  ;;  %v643_v22 = vadd.f32 %v611_v27, %v1419_v37  ;;  %v1457_v34 = vadd.f32 %v1325_v5, %v1238_v50 }
 0x116   : > { %v595_v31 = vmul.f32 %v563_v30, %v1435_v14  ;;  %v582_v36 = vmul.f32 %v550_v19, %v1439_v53  ;;  %v1462_v35 = vadd.f32 %v1238_v50, %v1329_v10  ;;  %v1466_v52 = vadd.f32 %v1238_v50, %v1331_v12 }
 0x117   : > { %1079 = vtanh.f32 %v693_v38  ;;  %v1072_v47 = vpop.eup %1071  ;;  %802 = vst [vmem:[%s1354_s29 + $0x38] sm:$0xff] %v770_v44  ;;  %v512_v39 = vmul.f32 0.5, %v1386_v20  ;;  %v675_v40 = vmul.f32 0.7978846, %v643_v22  ;;  %v566_v5 = vmul.f32 %v1457_v34, %v1457_v34 }
 0x118   : > { %v627_v43 = vmul.f32 0.044715, %v595_v31  ;;  %v754_v45 = vadd.f32 1.0, %v1072_v47  ;;  %v528_v58 = vmul.f32 0.5, %v1392_v61  ;;  %v614_v46 = vmul.f32 0.044715, %v582_v36 }
 0x119   : > { %v548_v10 = vmul.f32 %v1462_v35, %v1462_v35  ;;  %v517_v12 = vmul.f32 0.5, %v1404_v17  ;;  %1081 = vtanh.f32 %v675_v40  ;;  %v598_v20 = vmul.f32 %v566_v5, %v1457_v34 }
 0x11a   : > { %v659_v49 = vadd.f32 %v627_v43, %v1435_v14  ;;  %v786_v51 = vmul.f32 %v754_v45, %v530_v3  ;;  %v646_v28 = vadd.f32 %v614_v46, %v1439_v53  ;;  %v564_v61 = vmul.f32 %v1466_v52, %v1466_v52 }
 0x11b   : > { %v580_v57 = vmul.f32 %v548_v10, %v1462_v35  ;;  %v630_v59 = vmul.f32 0.044715, %v598_v20  ;;  %v1484_v55 = vadd.f32 %v1347_v29, %v1238_v50  ;;  %v1488_v17 = vadd.f32 %v1361_v41, %v1238_v50 }
 0x11c   : > { %v1074_v0 = vpop.eup %1073  ;;  %v691_v63 = vmul.f32 0.7978846, %v659_v49  ;;  %818 = vst [vmem:[%s1354_s29 + $0xb8] sm:$0xff] %v786_v51  ;;  %v678_v7 = vmul.f32 0.7978846, %v646_v28  ;;  %v596_v16 = vmul.f32 %v564_v61, %v1466_v52  ;;  %v533_v18 = vmul.f32 0.5, %v1412_v11 }
 0x11d   : > { %v1076_v2 = vpop.eup %1075  ;;  %v736_v56 = vadd.f32 1.0, %v1074_v0  ;;  %v612_v9 = vmul.f32 0.044715, %v580_v57  ;;  %v662_v6 = vadd.f32 %v630_v59, %v1457_v34  ;;  %v553_v25 = vmul.f32 %v1484_v55, %v1484_v55 }
 0x11e   : > { %v752_v60 = vadd.f32 1.0, %v1076_v2  ;;  %1083 = vtanh.f32 %v691_v63  ;;  %v1078_v29 = vpop.eup %1077  ;;  %v628_v13 = vmul.f32 0.044715, %v596_v16  ;;  %v515_v11 = vmul.f32 0.5, %v1419_v37 }
 0x11f   : > { %v768_v21 = vmul.f32 %v736_v56, %v512_v39  ;;  %1085 = vtanh.f32 %v678_v7  ;;  %v644_v41 = vadd.f32 %v612_v9, %v1462_v35  ;;  %v741_v1 = vadd.f32 1.0, %v1078_v29 }
 0x120   : > { %v784_v23 = vmul.f32 %v752_v60, %v528_v58  ;;  %v694_v24 = vmul.f32 0.7978846, %v662_v6  ;;  %v660_v26 = vadd.f32 %v628_v13, %v1466_v52  ;;  %v569_v8 = vmul.f32 %v1488_v17, %v1488_v17 }
 0x121   : > { %v1080_v4 = vpop.eup %1079  ;;  %800 = vst [vmem:[%s1354_s29 + $0x28] sm:$0xff] %v768_v21  ;;  %v676_v33 = vmul.f32 0.7978846, %v644_v41  ;;  %v773_v27 = vmul.f32 %v741_v1, %v517_v12  ;;  %v585_v3 = vmul.f32 %v553_v25, %v1484_v55  ;;  %v1507_v37 = vadd.f32 %v1238_v50, %v1363_v42 }
 0x122   : > { %816 = vst [vmem:[%s1354_s29 + $0xa8] sm:$0xff] %v784_v23  ;;  %v757_v30 = vadd.f32 1.0, %v1080_v4  ;;  %1087 = vtanh.f32 %v694_v24  ;;  %v692_v38 = vmul.f32 0.7978846, %v660_v26  ;;  %v601_v19 = vmul.f32 %v569_v8, %v1488_v17 }
 0x123   : > { %1089 = vtanh.f32 %v676_v33  ;;  %v1082_v44 = vpop.eup %1081  ;;  %805 = vst [vmem:[%s1354_s29 + $0x50] sm:$0xff] %v773_v27  ;;  %v617_v31 = vmul.f32 0.044715, %v585_v3  ;;  %v1512_v36 = vadd.f32 %v1238_v50, %v1367_v32  ;;  %v1516_v47 = vadd.f32 %v1369_v54, %v1238_v50 }
 0x124   : > { %v789_v22 = vmul.f32 %v757_v30, %v533_v18  ;;  %v739_v39 = vadd.f32 1.0, %v1082_v44  ;;  %v531_v40 = vmul.f32 0.5, %v1435_v14  ;;  %1091 = vtanh.f32 %v692_v38 }
 0x125   : > { %v633_v43 = vmul.f32 0.044715, %v601_v19  ;;  %v518_v42 = vmul.f32 0.5, %v1439_v53  ;;  %v649_v5 = vadd.f32 %v617_v31, %v1484_v55  ;;  %v551_v45 = vmul.f32 %v1507_v37, %v1507_v37 }
 0x126   : > { %821 = vst [vmem:[%s1354_s29 + $0xd0] sm:$0xff] %v789_v22  ;;  %v567_v32 = vmul.f32 %v1512_v36, %v1512_v36  ;;  %v771_v58 = vmul.f32 %v739_v39, %v515_v11  ;;  %v534_v54 = vmul.f32 0.5, %v1457_v34  ;;  %v554_v14 = vmul.f32 %v1516_v47, %v1516_v47 }
 0x127   : > { %v665_v46 = vadd.f32 %v633_v43, %v1488_v17  ;;  %v681_v12 = vmul.f32 0.7978846, %v649_v5  ;;  %v583_v53 = vmul.f32 %v551_v45, %v1507_v37  ;;  %v1534_v20 = vadd.f32 %v1373_v62, %v1238_v50 }
 0x128   : > { %v1084_v10 = vpop.eup %1083  ;;  %v599_v49 = vmul.f32 %v567_v32, %v1512_v36  ;;  %803 = vst [vmem:[%s1354_s29 + $0x40] sm:$0xff] %v771_v58  ;;  %v586_v34 = vmul.f32 %v554_v14, %v1516_v47  ;;  %v1540_v61 = vadd.f32 %v1238_v50, %v1375_v48  ;;  %v516_v62 = vmul.f32 0.5, %v1462_v35 }
 0x129   : > { %v1086_v51 = vpop.eup %1085  ;;  %v755_v28 = vadd.f32 1.0, %v1084_v10  ;;  %v697_v57 = vmul.f32 0.7978846, %v665_v46  ;;  %1093 = vtanh.f32 %v681_v12  ;;  %v615_v63 = vmul.f32 0.044715, %v583_v53 }
 0x12a   : > { %v742_v0 = vadd.f32 1.0, %v1086_v51  ;;  %v631_v59 = vmul.f32 0.044715, %v599_v49  ;;  %v618_v56 = vmul.f32 0.044715, %v586_v34  ;;  %v570_v48 = vmul.f32 %v1534_v20, %v1534_v20 }
 0x12b   : > { %v787_v2 = vmul.f32 %v755_v28, %v531_v40  ;;  %1095 = vtanh.f32 %v697_v57  ;;  %v647_v16 = vadd.f32 %v615_v63, %v1507_v37  ;;  %v532_v29 = vmul.f32 0.5, %v1466_v52 }
 0x12c   : > { %v1088_v7 = vpop.eup %1087  ;;  %v774_v9 = vmul.f32 %v742_v0, %v518_v42  ;;  %v663_v60 = vadd.f32 %v631_v59, %v1512_v36  ;;  %v650_v21 = vadd.f32 %v618_v56, %v1516_v47  ;;  %v552_v35 = vmul.f32 %v1540_v61, %v1540_v61 }
 0x12d   : > { %v1090_v18 = vpop.eup %1089  ;;  %819 = vst [vmem:[%s1354_s29 + $0xc0] sm:$0xff] %v787_v2  ;;  %v758_v6 = vadd.f32 1.0, %v1088_v7  ;;  %v679_v13 = vmul.f32 0.7978846, %v647_v16  ;;  %v602_v1 = vmul.f32 %v570_v48, %v1534_v20  ;;  %v496_v52 = vadd.f32 %v1238_v50, %v1380_v15 }
 0x12e   : > { %806 = vst [vmem:[%s1354_s29 + $0x58] sm:$0xff] %v774_v9  ;;  %v740_v41 = vadd.f32 1.0, %v1090_v18  ;;  %v695_v23 = vmul.f32 0.7978846, %v663_v60  ;;  %v1092_v24 = vpop.eup %1091  ;;  %v682_v4 = vmul.f32 0.7978846, %v650_v21  ;;  %v584_v11 = vmul.f32 %v552_v35, %v1540_v61 }
 0x12f   : > { %v790_v25 = vmul.f32 %v758_v6, %v534_v54  ;;  %v756_v26 = vadd.f32 1.0, %v1092_v24  ;;  %1097 = vtanh.f32 %v679_v13  ;;  %v634_v8 = vmul.f32 0.044715, %v602_v1 }
 0x130   : > { %v772_v33 = vmul.f32 %v740_v41, %v516_v62  ;;  %1099 = vtanh.f32 %v695_v23  ;;  %v616_v27 = vmul.f32 0.044715, %v584_v11  ;;  %v568_v30 = vmul.f32 %v496_v52, %v496_v52 }
 0x131   : > { %822 = vst [vmem:[%s1354_s29 + $0xd8] sm:$0xff] %v790_v25  ;;  %v788_v3 = vmul.f32 %v756_v26, %v532_v29  ;;  %1101 = vtanh.f32 %v682_v4  ;;  %v666_v38 = vadd.f32 %v634_v8, %v1534_v20  ;;  %v521_v31 = vmul.f32 0.5, %v1484_v55 }
 0x132   : > { %804 = vst [vmem:[%s1354_s29 + $0x48] sm:$0xff] %v772_v33  ;;  %v648_v19 = vadd.f32 %v616_v27, %v1540_v61  ;;  %v600_v44 = vmul.f32 %v568_v30, %v496_v52  ;;  %v537_v42 = vmul.f32 0.5, %v1488_v17  ;;  %v519_v55 = vmul.f32 0.5, %v1507_v37 }
 0x133   : > { %v1094_v22 = vpop.eup %1093  ;;  %820 = vst [vmem:[%s1354_s29 + $0xc8] sm:$0xff] %v788_v3  ;;  %v698_v50 = vmul.f32 0.7978846, %v666_v38  ;;  %v535_v17 = vmul.f32 0.5, %v1512_v36  ;;  %v522_v51 = vmul.f32 0.5, %v1516_v47  ;;  %v538_v37 = vmul.f32 0.5, %v1534_v20 }
 0x134   : > { %v745_v39 = vadd.f32 1.0, %v1094_v22  ;;  %v680_v40 = vmul.f32 0.7978846, %v648_v19  ;;  %v632_v43 = vmul.f32 0.044715, %v600_v44  ;;  %v520_v36 = vmul.f32 0.5, %v1540_v61 }
 0x135   : > { %v1096_v15 = vpop.eup %1095  ;;  %1103 = vtanh.f32 %v698_v50  ;;  %v536_v7 = vmul.f32 0.5, %v496_v52 }
 0x136   : > { %v761_v5 = vadd.f32 1.0, %v1096_v15  ;;  %v777_v45 = vmul.f32 %v745_v39, %v521_v31  ;;  %1105 = vtanh.f32 %v680_v40  ;;  %v664_v32 = vadd.f32 %v632_v43, %v496_v52 }
 0x138   : > { %v793_v58 = vmul.f32 %v761_v5, %v537_v42  ;;  %809 = vst [vmem:[%s1354_s29 + $0x70] sm:$0xff] %v777_v45  ;;  %v696_v54 = vmul.f32 0.7978846, %v664_v32 }
 0x139   : > { %v1098_v46 = vpop.eup %1097 }
 0x13a   : > { %825 = vst [vmem:[%s1354_s29 + $0xf0] sm:$0xff] %v793_v58  ;;  %v1100_v14 = vpop.eup %1099  ;;  %v743_v10 = vadd.f32 1.0, %v1098_v46  ;;  %1107 = vtanh.f32 %v696_v54 }
 0x13b   : > { %v1102_v12 = vpop.eup %1101  ;;  %v759_v53 = vadd.f32 1.0, %v1100_v14 }
 0x13c   : > { %v775_v49 = vmul.f32 %v743_v10, %v519_v55  ;;  %v746_v28 = vadd.f32 1.0, %v1102_v12 }
 0x13d   : > { %v791_v57 = vmul.f32 %v759_v53, %v535_v17 }
 0x13e   : > { %807 = vst [vmem:[%s1354_s29 + $0x60] sm:$0xff] %v775_v49  ;;  %v778_v34 = vmul.f32 %v746_v28, %v522_v51 }
 0x13f   : > { %v1104_v0 = vpop.eup %1103  ;;  %823 = vst [vmem:[%s1354_s29 + $0xe0] sm:$0xff] %v791_v57 }
 0x140   : > { %v1106_v63 = vpop.eup %1105  ;;  %810 = vst [vmem:[%s1354_s29 + $0x78] sm:$0xff] %v778_v34  ;;  %v762_v59 = vadd.f32 1.0, %v1104_v0 }
 0x141   : > { %v744_v2 = vadd.f32 1.0, %v1106_v63 }
 0x142   : > { %v794_v62 = vmul.f32 %v762_v59, %v538_v37 }
 0x143   : > { %v776_v56 = vmul.f32 %v744_v2, %v520_v36 }
 0x144   : > { %v1108_v47 = vpop.eup %1107  ;;  %826 = vst [vmem:[%s1354_s29 + $0xf8] sm:$0xff] %v794_v62 }
 0x145   : > { %808 = vst [vmem:[%s1354_s29 + $0x68] sm:$0xff] %v776_v56  ;;  %v760_v9 = vadd.f32 1.0, %v1108_v47 }
 0x147   : > { %v792_v16 = vmul.f32 %v760_v9, %v536_v7 }
 0x149   : > { %824 = vst [vmem:[%s1354_s29 + $0xe8] sm:$0xff] %v792_v16 }
 0x14a PF: > { %s13_s14 = sadd.s32 1, %s1131_s14   ;;  %s1590_s12 = smov %s1127_s13 }
 0x14b   : > { %p10_p5 = scmp.ge.s32.totalorder %s13_s14, 4   ;;  %s1591_s13 = smov %s1593_s15 }
 0x14d   :  { %12 = sbr.rel (!%p10_p5) target bundleno = 2 (0x2), region = 68 }

// kernel: up_trans_block.11
= control target key start
LH: loop header
LB: loop body
LE: loop exit
PB: predicated region body
PF: predicated region fallthrough
CT: control target
= control target key end

     0   :  { %s6659_s12 = smov 0   ;;  %s9475_s0 = inlined_call_operand.vmem [shape: f32[2,4,256,8], index: 0, kind: input, shape index: {}]   ;;  %s9476_s1 = inlined_call_operand.vmem [shape: f32[2,4,64,8], index: 1, kind: input, shape index: {}]   ;;  %s9477_s2 = inlined_call_operand.vmem [shape: f32[2,4,64,8], index: 2, kind: input, shape index: {}]   ;;  %s9478_s3 = inlined_call_operand.vmem [shape: f32[2,4,256,8], index: 3, kind: output, shape index: {}]  }
   0x1 LB: > { %s4812_s13 = sadd.s32 4294967295, %s6637_s12   ;;  %p4816_p0 = scmp.ge.s32.totalorder %s6637_s12, 1  ;;  %s6637_s12 = sphi %s6659_s12, %s13_s12  }
   0x2   : > { %p157_p1 = scmp.lt.s32.totalorder %s6637_s12, 3 }
   0x4   : > { %p158_p2 = pnand %p4816_p0, %p157_p1 }
   0x6   : > { %161 = sbr.rel (%p158_p2) target bundleno = 935 (0x3a7), region = 32 }
   0xd   : > { %p191_p3 = scmp.lt.s32.totalorder %s4812_s13, 1  ;;  %vm403_vm0 = vcmask 64512   ;;  %vm1912_vm2 = vcmask 523264  }
   0xe   : > { %vm6680_vm1 = vmpackc.low %vm403_vm0, %vm403_vm0 }
   0xf   : > { %s9921_s13 = smov (!%p191_p3, %s4812_s13), 1 }
  0x10   : > { %s5116_s14 = sshll.u32 %s9921_s13, 8  ;;  %s5115_s15 = sshll.u32 %s9921_s13, 10 }
  0x11   : > { %s6676_s18 = scalar_lea.vmem %s9476_s1, %s5116_s14  ;;  %s6695_s21 = scalar_lea.vmem %s9475_s0, %s5115_s15 }
  0x12   : > { %v339_v1 = vld [vmem:[%s6676_s18] sm:$0xff]  ;;  %v340_v2 = vld [vmem:[%s6676_s18 + $0x8] sm:$0xff]  ;;  %v341_v6 = vld [vmem:[%s6676_s18 + $0x10] sm:$0xff]  ;;  %s7084_s24 = scalar_lea.vmem %s9477_s2, %s5116_s14  ;;  %s8766_s27 = scalar_lea.vmem %s9478_s3, %s5115_s15 }
  0x13   : > { %v347_v3 = vld [vmem:[%s6676_s18 + $0x40] sm:$0xff]  ;;  %v5951_v4 = vpack.c.bf16 %v340_v2, %v339_v1  ;;  %v348_v5 = vld [vmem:[%s6676_s18 + $0x48] sm:$0xff]  ;;  %v342_v7 = vld [vmem:[%s6676_s18 + $0x18] sm:$0xff] }
  0x14   : > { %v5975_v8 = vpack.c.bf16 %v348_v5, %v347_v3  ;;  %v5957_v9 = vpack.c.bf16 %v342_v7, %v341_v6  ;;  %v349_v10 = vld [vmem:[%s6676_s18 + $0x50] sm:$0xff]  ;;  %v350_v11 = vld [vmem:[%s6676_s18 + $0x58] sm:$0xff]  ;;  %v211_v13 = vld [vmem:[%s6695_s21] sm:$0xff] }
  0x15   : > { %5953 = vmatprep.subr.msk.bf16.mxu0 %vm6680_vm1, %v5951_v4  ;;  %v5981_v12 = vpack.c.bf16 %v350_v11, %v349_v10  ;;  %v243_v14 = vld [vmem:[%s6695_s21 + $0x100] sm:$0xff]  ;;  %v344_v16 = vld [vmem:[%s6676_s18 + $0x28] sm:$0xff]  ;;  %5455 = vmatprep.mubr.msk.f32.mxu0 %vm403_vm0, %v211_v13  ;;  %v345_v21 = vld [vmem:[%s6676_s18 + $0x30] sm:$0xff] }
  0x16   : > { %5977 = vmatprep.subr.msk.bf16.mxu1 %vm6680_vm1, %v5975_v8  ;;  %5956 = vmatpush3.bf16.xpose.msk.msra.mxu0 %vm6680_vm1, %v5951_v4  ;;  %v343_v15 = vld [vmem:[%s6676_s18 + $0x20] sm:$0xff]  ;;  %v352_v18 = vld [vmem:[%s6676_s18 + $0x68] sm:$0xff]  ;;  %v346_v22 = vld [vmem:[%s6676_s18 + $0x38] sm:$0xff] }
  0x17   : > { %5980 = vmatpush3.bf16.xpose.msk.msra.mxu1 %vm6680_vm1, %v5975_v8  ;;  %5959 = vmatprep.subr.msk.bf16.mxu0 %vm6680_vm1, %v5957_v9  ;;  %v351_v17 = vld [vmem:[%s6676_s18 + $0x60] sm:$0xff]  ;;  %v5963_v19 = vpack.c.bf16 %v344_v16, %v343_v15  ;;  %v353_v23 = vld [vmem:[%s6676_s18 + $0x70] sm:$0xff]  ;;  %v354_v24 = vld [vmem:[%s6676_s18 + $0x78] sm:$0xff]  ;;  %v5969_v25 = vpack.c.bf16 %v346_v22, %v345_v21 }
  0x18   : > { %5983 = vmatprep.subr.msk.bf16.mxu1 %vm6680_vm1, %v5981_v12  ;;  %5519 = vmatprep.mubr.msk.f32.mxu1 %vm403_vm0, %v243_v14  ;;  %v5987_v20 = vpack.c.bf16 %v352_v18, %v351_v17  ;;  %v5993_v26 = vpack.c.bf16 %v354_v24, %v353_v23  ;;  %v355_v27 = vld [vmem:[%s6676_s18 + $0x80] sm:$0xff]  ;;  %v356_v28 = vld [vmem:[%s6676_s18 + $0x88] sm:$0xff]  ;;  %v357_v33 = vld [vmem:[%s6676_s18 + $0x90] sm:$0xff] }
  0x19   : > { %v363_v29 = vld [vmem:[%s6676_s18 + $0xc0] sm:$0xff]  ;;  %v364_v30 = vld [vmem:[%s6676_s18 + $0xc8] sm:$0xff]  ;;  %v5999_v31 = vpack.c.bf16 %v356_v28, %v355_v27  ;;  %v358_v34 = vld [vmem:[%s6676_s18 + $0x98] sm:$0xff] }
  0x1a   : > { %v6023_v32 = vpack.c.bf16 %v364_v30, %v363_v29  ;;  %v212_v35 = vld [vmem:[%s6695_s21 + $0x8] sm:$0xff]  ;;  %v365_v36 = vld [vmem:[%s6676_s18 + $0xd0] sm:$0xff]  ;;  %v366_v37 = vld [vmem:[%s6676_s18 + $0xd8] sm:$0xff]  ;;  %v6005_v41 = vpack.c.bf16 %v358_v34, %v357_v33 }
  0x1b   : > { %v244_v38 = vld [vmem:[%s6695_s21 + $0x108] sm:$0xff]  ;;  %v213_v39 = vld [vmem:[%s6695_s21 + $0x10] sm:$0xff]  ;;  %v6029_v42 = vpack.c.bf16 %v366_v37, %v365_v36  ;;  %v214_v43 = vld [vmem:[%s6695_s21 + $0x18] sm:$0xff] }
  0x1c   : > { %v245_v40 = vld [vmem:[%s6695_s21 + $0x110] sm:$0xff]  ;;  %v246_v44 = vld [vmem:[%s6695_s21 + $0x118] sm:$0xff]  ;;  %v215_v45 = vld [vmem:[%s6695_s21 + $0x20] sm:$0xff] }
  0x1d   : > { %v247_v46 = vld [vmem:[%s6695_s21 + $0x120] sm:$0xff]  ;;  %v360_v48 = vld [vmem:[%s6676_s18 + $0xa8] sm:$0xff]  ;;  %v217_v53 = vld [vmem:[%s6695_s21 + $0x30] sm:$0xff] }
  0x1e   : > { %5962 = vmatpush3.bf16.xpose.msk.msra.mxu0 %vm6680_vm1, %v5957_v9  ;;  %v359_v47 = vld [vmem:[%s6676_s18 + $0xa0] sm:$0xff]  ;;  %v216_v49 = vld [vmem:[%s6695_s21 + $0x28] sm:$0xff]  ;;  %v249_v54 = vld [vmem:[%s6695_s21 + $0x130] sm:$0xff] }
  0x1f   : > { %5986 = vmatpush3.bf16.xpose.msk.msra.mxu1 %vm6680_vm1, %v5981_v12  ;;  %5965 = vmatprep.subr.msk.bf16.mxu0 %vm6680_vm1, %v5963_v19  ;;  %v367_v50 = vld [vmem:[%s6676_s18 + $0xe0] sm:$0xff]  ;;  %v368_v51 = vld [vmem:[%s6676_s18 + $0xe8] sm:$0xff]  ;;  %v6011_v55 = vpack.c.bf16 %v360_v48, %v359_v47  ;;  %v218_v57 = vld [vmem:[%s6695_s21 + $0x38] sm:$0xff] }
  0x20   : > { %5989 = vmatprep.subr.msk.bf16.mxu1 %vm6680_vm1, %v5987_v20  ;;  %v248_v52 = vld [vmem:[%s6695_s21 + $0x128] sm:$0xff]  ;;  %v6035_v56 = vpack.c.bf16 %v368_v51, %v367_v50  ;;  %v250_v58 = vld [vmem:[%s6695_s21 + $0x138] sm:$0xff]  ;;  %v219_v59 = vld [vmem:[%s6695_s21 + $0x40] sm:$0xff] }
  0x21   : > { %v251_v60 = vld [vmem:[%s6695_s21 + $0x140] sm:$0xff]  ;;  %v361_v61 = vld [vmem:[%s6676_s18 + $0xb0] sm:$0xff]  ;;  %v362_v62 = vld [vmem:[%s6676_s18 + $0xb8] sm:$0xff] }
  0x22   : > { %v220_v63 = vld [vmem:[%s6695_s21 + $0x48] sm:$0xff]  ;;  %v369_v1 = vld [vmem:[%s6676_s18 + $0xf0] sm:$0xff]  ;;  %v370_v2 = vld [vmem:[%s6676_s18 + $0xf8] sm:$0xff]  ;;  %v6017_v6 = vpack.c.bf16 %v362_v62, %v361_v61 }
  0x23   : > { %v252_v3 = vld [vmem:[%s6695_s21 + $0x148] sm:$0xff]  ;;  %v221_v4 = vld [vmem:[%s6695_s21 + $0x50] sm:$0xff]  ;;  %v6041_v7 = vpack.c.bf16 %v370_v2, %v369_v1  ;;  %v222_v8 = vld [vmem:[%s6695_s21 + $0x58] sm:$0xff] }
  0x24   : > { %v253_v5 = vld [vmem:[%s6695_s21 + $0x150] sm:$0xff]  ;;  %v254_v9 = vld [vmem:[%s6695_s21 + $0x158] sm:$0xff]  ;;  %v223_v10 = vld [vmem:[%s6695_s21 + $0x60] sm:$0xff] }
  0x25   : > { %v255_v11 = vld [vmem:[%s6695_s21 + $0x160] sm:$0xff]  ;;  %v224_v12 = vld [vmem:[%s6695_s21 + $0x68] sm:$0xff]  ;;  %v225_v14 = vld [vmem:[%s6695_s21 + $0x70] sm:$0xff] }
  0x26   : > { %5968 = vmatpush3.bf16.xpose.msk.msra.mxu0 %vm6680_vm1, %v5963_v19  ;;  %v256_v13 = vld [vmem:[%s6695_s21 + $0x168] sm:$0xff]  ;;  %v257_v15 = vld [vmem:[%s6695_s21 + $0x170] sm:$0xff]  ;;  %v226_v16 = vld [vmem:[%s6695_s21 + $0x78] sm:$0xff] }
  0x27   : > { %5992 = vmatpush3.bf16.xpose.msk.msra.mxu1 %vm6680_vm1, %v5987_v20  ;;  %5971 = vmatprep.subr.msk.bf16.mxu0 %vm6680_vm1, %v5969_v25  ;;  %v258_v17 = vld [vmem:[%s6695_s21 + $0x178] sm:$0xff]  ;;  %v227_v18 = vld [vmem:[%s6695_s21 + $0x80] sm:$0xff]  ;;  %v228_v20 = vld [vmem:[%s6695_s21 + $0x88] sm:$0xff] }
  0x28   : > { %5995 = vmatprep.subr.msk.bf16.mxu1 %vm6680_vm1, %v5993_v26  ;;  %v259_v19 = vld [vmem:[%s6695_s21 + $0x180] sm:$0xff]  ;;  %v260_v21 = vld [vmem:[%s6695_s21 + $0x188] sm:$0xff]  ;;  %v229_v22 = vld [vmem:[%s6695_s21 + $0x90] sm:$0xff] }
  0x29   : > { %v261_v23 = vld [vmem:[%s6695_s21 + $0x190] sm:$0xff]  ;;  %v230_v0 = vld [vmem:[%s6695_s21 + $0x98] sm:$0xff]  ;;  %v232_v27 = vld [vmem:[%s6695_s21 + $0xa8] sm:$0xff] }
  0x2a   : > { %v262_v24 = vld [vmem:[%s6695_s21 + $0x198] sm:$0xff]  ;;  %v264_v28 = vld [vmem:[%s6695_s21 + $0x1a8] sm:$0xff]  ;;  %v233_v29 = vld [vmem:[%s6695_s21 + $0xb0] sm:$0xff] }
  0x2b   : > { %v265_v30 = vld [vmem:[%s6695_s21 + $0x1b0] sm:$0xff]  ;;  %v235_v33 = vld [vmem:[%s6695_s21 + $0xc0] sm:$0xff]  ;;  %v268_v36 = vld [vmem:[%s6695_s21 + $0x1c8] sm:$0xff] }
  0x2c   : > { %v267_v34 = vld [vmem:[%s6695_s21 + $0x1c0] sm:$0xff]  ;;  %v237_v37 = vld [vmem:[%s6695_s21 + $0xd0] sm:$0xff]  ;;  %v242_v47 = vld [vmem:[%s6695_s21 + $0xf8] sm:$0xff] }
  0x2d   : > { %v274_v48 = vld [vmem:[%s6695_s21 + $0x1f8] sm:$0xff]  ;;  %v307_v50 = vld [vmem:[%s6695_s21 + $0x300] sm:$0xff]  ;;  %v276_v51 = vld [vmem:[%s6695_s21 + $0x208] sm:$0xff] }
  0x2e   : > { %5974 = vmatpush3.bf16.xpose.msk.msra.mxu0 %vm6680_vm1, %v5969_v25  ;;  %v231_v25 = vld [vmem:[%s6695_s21 + $0xa0] sm:$0xff]  ;;  %v281_v61 = vld [vmem:[%s6695_s21 + $0x230] sm:$0xff]  ;;  %v314_v1 = vld [vmem:[%s6695_s21 + $0x338] sm:$0xff] }
  0x2f   : > { %5998 = vmatpush3.bf16.xpose.msk.msra.mxu1 %vm6680_vm1, %v5993_v26  ;;  %6001 = vmatprep.subr.msk.bf16.mxu0 %vm6680_vm1, %v5999_v31  ;;  %v263_v26 = vld [vmem:[%s6695_s21 + $0x1a0] sm:$0xff]  ;;  %v313_v62 = vld [vmem:[%s6695_s21 + $0x330] sm:$0xff] }
  0x30   : > { %6025 = vmatprep.subr.msk.bf16.mxu1 %vm6680_vm1, %v6023_v32  ;;  %v283_v2 = vld [vmem:[%s6695_s21 + $0x240] sm:$0xff] }
  0x35   : > { %5456 = vmatmul.mubr.msk.f32.vlgmr.msra.gmra.mrb[0].mxu0 %vm403_vm0, %v212_v35  ;;  %v236_v35 = vld [vmem:[%s6695_s21 + $0xc8] sm:$0xff] }
  0x36   : > { %5520 = vmatmul.mubr.msk.f32.vlgmr.msra.gmra.mrb[0].mxu1 %vm403_vm0, %v244_v38  ;;  %5458 = vmatprep.mubr.msk.f32.mxu0 %vm403_vm0, %v213_v39  ;;  %v269_v38 = vld [vmem:[%s6695_s21 + $0x1d0] sm:$0xff]  ;;  %v238_v39 = vld [vmem:[%s6695_s21 + $0xd8] sm:$0xff] }
  0x37   : > { %5522 = vmatprep.mubr.msk.f32.mxu1 %vm403_vm0, %v245_v40  ;;  %6004 = vmatpush3.bf16.xpose.msk.msra.mxu0 %vm6680_vm1, %v5999_v31  ;;  %v234_v31 = vld [vmem:[%s6695_s21 + $0xb8] sm:$0xff] }
  0x38   : > { %6028 = vmatpush3.bf16.xpose.msk.msra.mxu1 %vm6680_vm1, %v6023_v32  ;;  %6007 = vmatprep.subr.msk.bf16.mxu0 %vm6680_vm1, %v6005_v41  ;;  %v266_v32 = vld [vmem:[%s6695_s21 + $0x1b8] sm:$0xff] }
  0x39   : > { %5459 = vmatmul.mubr.msk.f32.gmra.mrb[2].mxu0 %vm403_vm0, %v214_v43  ;;  %6031 = vmatprep.subr.msk.bf16.mxu1 %vm6680_vm1, %v6029_v42  ;;  %v270_v40 = vld [vmem:[%s6695_s21 + $0x1d8] sm:$0xff]  ;;  %v240_v43 = vld [vmem:[%s6695_s21 + $0xe8] sm:$0xff] }
  0x3a   : > { %5523 = vmatmul.mubr.msk.f32.gmra.mrb[2].mxu1 %vm403_vm0, %v246_v44  ;;  %5461 = vmatprep.mubr.msk.f32.mxu0 %vm403_vm0, %v215_v45  ;;  %v272_v44 = vld [vmem:[%s6695_s21 + $0x1e8] sm:$0xff]  ;;  %v241_v45 = vld [vmem:[%s6695_s21 + $0xf0] sm:$0xff] }
  0x3b   : > { %5525 = vmatprep.mubr.msk.f32.mxu1 %vm403_vm0, %v247_v46  ;;  %v273_v46 = vld [vmem:[%s6695_s21 + $0x1f0] sm:$0xff] }
  0x3d   : > { %5462 = vmatmul.mubr.msk.f32.gmra.mrb[4].mxu0 %vm403_vm0, %v216_v49  ;;  %v275_v49 = vld [vmem:[%s6695_s21 + $0x200] sm:$0xff] }
  0x3e   : > { %5526 = vmatmul.mubr.msk.f32.gmra.mrb[4].mxu1 %vm403_vm0, %v248_v52  ;;  %5464 = vmatprep.mubr.msk.f32.mxu0 %vm403_vm0, %v217_v53  ;;  %v308_v52 = vld [vmem:[%s6695_s21 + $0x308] sm:$0xff]  ;;  %v277_v53 = vld [vmem:[%s6695_s21 + $0x210] sm:$0xff] }
  0x3f   : > { %5528 = vmatprep.mubr.msk.f32.mxu1 %vm403_vm0, %v249_v54  ;;  %6010 = vmatpush3.bf16.xpose.msk.msra.mxu0 %vm6680_vm1, %v6005_v41  ;;  %v239_v41 = vld [vmem:[%s6695_s21 + $0xe0] sm:$0xff]  ;;  %v309_v54 = vld [vmem:[%s6695_s21 + $0x310] sm:$0xff] }
  0x40   : > { %6034 = vmatpush3.bf16.xpose.msk.msra.mxu1 %vm6680_vm1, %v6029_v42  ;;  %6013 = vmatprep.subr.msk.bf16.mxu0 %vm6680_vm1, %v6011_v55  ;;  %v271_v42 = vld [vmem:[%s6695_s21 + $0x1e0] sm:$0xff] }
  0x41   : > { %5465 = vmatmul.mubr.msk.f32.gmra.mrb[6].mxu0 %vm403_vm0, %v218_v57  ;;  %6037 = vmatprep.subr.msk.bf16.mxu1 %vm6680_vm1, %v6035_v56  ;;  %v279_v57 = vld [vmem:[%s6695_s21 + $0x220] sm:$0xff] }
  0x42   : > { %5529 = vmatmul.mubr.msk.f32.gmra.mrb[6].mxu1 %vm403_vm0, %v250_v58  ;;  %5467 = vmatprep.mubr.msk.f32.mxu0 %vm403_vm0, %v219_v59  ;;  %v311_v58 = vld [vmem:[%s6695_s21 + $0x320] sm:$0xff]  ;;  %v280_v59 = vld [vmem:[%s6695_s21 + $0x228] sm:$0xff] }
  0x43   : > { %5531 = vmatprep.mubr.msk.f32.mxu1 %vm403_vm0, %v251_v60  ;;  %v312_v60 = vld [vmem:[%s6695_s21 + $0x328] sm:$0xff] }
  0x45   : > { %5468 = vmatmul.mubr.msk.f32.gmra.mrb[8].mxu0 %vm403_vm0, %v220_v63  ;;  %v282_v63 = vld [vmem:[%s6695_s21 + $0x238] sm:$0xff] }
  0x46   : > { %5532 = vmatmul.mubr.msk.f32.gmra.mrb[8].mxu1 %vm403_vm0, %v252_v3  ;;  %5470 = vmatprep.mubr.msk.f32.mxu0 %vm403_vm0, %v221_v4  ;;  %v315_v3 = vld [vmem:[%s6695_s21 + $0x340] sm:$0xff]  ;;  %v284_v4 = vld [vmem:[%s6695_s21 + $0x248] sm:$0xff] }
  0x47   : > { %5534 = vmatprep.mubr.msk.f32.mxu1 %vm403_vm0, %v253_v5  ;;  %6016 = vmatpush3.bf16.xpose.msk.msra.mxu0 %vm6680_vm1, %v6011_v55  ;;  %v278_v55 = vld [vmem:[%s6695_s21 + $0x218] sm:$0xff]  ;;  %v316_v5 = vld [vmem:[%s6695_s21 + $0x348] sm:$0xff] }
  0x48   : > { %6040 = vmatpush3.bf16.xpose.msk.msra.mxu1 %vm6680_vm1, %v6035_v56  ;;  %6019 = vmatprep.subr.msk.bf16.mxu0 %vm6680_vm1, %v6017_v6  ;;  %v310_v56 = vld [vmem:[%s6695_s21 + $0x318] sm:$0xff] }
  0x49   : > { %5471 = vmatmul.mubr.msk.f32.gmra.mrb[10].mxu0 %vm403_vm0, %v222_v8  ;;  %6043 = vmatprep.subr.msk.bf16.mxu1 %vm6680_vm1, %v6041_v7  ;;  %v286_v8 = vld [vmem:[%s6695_s21 + $0x258] sm:$0xff] }
  0x4a   : > { %5535 = vmatmul.mubr.msk.f32.gmra.mrb[10].mxu1 %vm403_vm0, %v254_v9  ;;  %5473 = vmatprep.mubr.msk.f32.mxu0 %vm403_vm0, %v223_v10  ;;  %v318_v9 = vld [vmem:[%s6695_s21 + $0x358] sm:$0xff]  ;;  %v287_v10 = vld [vmem:[%s6695_s21 + $0x260] sm:$0xff] }
  0x4b   : > { %5537 = vmatprep.mubr.msk.f32.mxu1 %vm403_vm0, %v255_v11  ;;  %v319_v11 = vld [vmem:[%s6695_s21 + $0x360] sm:$0xff] }
  0x4d   : > { %5474 = vmatmul.mubr.msk.f32.gmra.mrb[12].mxu0 %vm403_vm0, %v224_v12  ;;  %v288_v12 = vld [vmem:[%s6695_s21 + $0x268] sm:$0xff] }
  0x4e   : > { %5538 = vmatmul.mubr.msk.f32.gmra.mrb[12].mxu1 %vm403_vm0, %v256_v13  ;;  %5476 = vmatprep.mubr.msk.f32.mxu0 %vm403_vm0, %v225_v14  ;;  %v320_v13 = vld [vmem:[%s6695_s21 + $0x368] sm:$0xff]  ;;  %v289_v14 = vld [vmem:[%s6695_s21 + $0x270] sm:$0xff] }
  0x4f   : > { %5540 = vmatprep.mubr.msk.f32.mxu1 %vm403_vm0, %v257_v15  ;;  %6022 = vmatpush3.bf16.xpose.msk.msra.mxu0 %vm6680_vm1, %v6017_v6  ;;  %v285_v6 = vld [vmem:[%s6695_s21 + $0x250] sm:$0xff] }
  0x50   : > { %6046 = vmatpush3.bf16.xpose.msk.msra.mxu1 %vm6680_vm1, %v6041_v7  ;;  %v317_v7 = vld [vmem:[%s6695_s21 + $0x350] sm:$0xff] }
  0x51   : > { %5477 = vmatmul.mubr.msk.f32.gmra.mrb[14].mxu0 %vm403_vm0, %v226_v16  ;;  %v321_v15 = vld [vmem:[%s6695_s21 + $0x370] sm:$0xff]  ;;  %v290_v16 = vld [vmem:[%s6695_s21 + $0x278] sm:$0xff] }
  0x52   : > { %5541 = vmatmul.mubr.msk.f32.gmra.mrb[14].mxu1 %vm403_vm0, %v258_v17  ;;  %5479 = vmatprep.mubr.msk.f32.mxu0 %vm403_vm0, %v227_v18  ;;  %v322_v17 = vld [vmem:[%s6695_s21 + $0x378] sm:$0xff]  ;;  %v291_v18 = vld [vmem:[%s6695_s21 + $0x280] sm:$0xff] }
  0x53   : > { %5543 = vmatprep.mubr.msk.f32.mxu1 %vm403_vm0, %v259_v19  ;;  %v323_v19 = vld [vmem:[%s6695_s21 + $0x380] sm:$0xff] }
  0x55   : > { %5480 = vmatmul.mubr.msk.f32.gmra.mrb[16].mxu0 %vm403_vm0, %v228_v20  ;;  %v292_v20 = vld [vmem:[%s6695_s21 + $0x288] sm:$0xff] }
  0x56   : > { %5544 = vmatmul.mubr.msk.f32.gmra.mrb[16].mxu1 %vm403_vm0, %v260_v21  ;;  %5482 = vmatprep.mubr.msk.f32.mxu0 %vm403_vm0, %v229_v22  ;;  %v324_v21 = vld [vmem:[%s6695_s21 + $0x388] sm:$0xff]  ;;  %v293_v22 = vld [vmem:[%s6695_s21 + $0x290] sm:$0xff] }
  0x57   : > { %5546 = vmatprep.mubr.msk.f32.mxu1 %vm403_vm0, %v261_v23  ;;  %v325_v23 = vld [vmem:[%s6695_s21 + $0x390] sm:$0xff] }
  0x59   : > { %5483 = vmatmul.mubr.msk.f32.gmra.mrb[18].mxu0 %vm403_vm0, %v230_v0  ;;  %v294_v0 = vld [vmem:[%s6695_s21 + $0x298] sm:$0xff] }
  0x5a   : > { %5547 = vmatmul.mubr.msk.f32.gmra.mrb[18].mxu1 %vm403_vm0, %v262_v24  ;;  %5485 = vmatprep.mubr.msk.f32.mxu0 %vm403_vm0, %v231_v25  ;;  %v326_v24 = vld [vmem:[%s6695_s21 + $0x398] sm:$0xff]  ;;  %v295_v25 = vld [vmem:[%s6695_s21 + $0x2a0] sm:$0xff] }
  0x5b   : > { %5549 = vmatprep.mubr.msk.f32.mxu1 %vm403_vm0, %v263_v26  ;;  %v327_v26 = vld [vmem:[%s6695_s21 + $0x3a0] sm:$0xff] }
  0x5d   : > { %5486 = vmatmul.mubr.msk.f32.gmra.mrb[20].mxu0 %vm403_vm0, %v232_v27  ;;  %v296_v27 = vld [vmem:[%s6695_s21 + $0x2a8] sm:$0xff] }
  0x5e   : > { %5550 = vmatmul.mubr.msk.f32.gmra.mrb[20].mxu1 %vm403_vm0, %v264_v28  ;;  %5488 = vmatprep.mubr.msk.f32.mxu0 %vm403_vm0, %v233_v29  ;;  %v328_v28 = vld [vmem:[%s6695_s21 + $0x3a8] sm:$0xff]  ;;  %v297_v29 = vld [vmem:[%s6695_s21 + $0x2b0] sm:$0xff] }
  0x5f   : > { %5552 = vmatprep.mubr.msk.f32.mxu1 %vm403_vm0, %v265_v30  ;;  %v329_v30 = vld [vmem:[%s6695_s21 + $0x3b0] sm:$0xff] }
  0x61   : > { %5489 = vmatmul.mubr.msk.f32.gmra.mrb[22].mxu0 %vm403_vm0, %v234_v31  ;;  %v298_v31 = vld [vmem:[%s6695_s21 + $0x2b8] sm:$0xff] }
  0x62   : > { %5553 = vmatmul.mubr.msk.f32.gmra.mrb[22].mxu1 %vm403_vm0, %v266_v32  ;;  %5491 = vmatprep.mubr.msk.f32.mxu0 %vm403_vm0, %v235_v33  ;;  %v330_v32 = vld [vmem:[%s6695_s21 + $0x3b8] sm:$0xff]  ;;  %v299_v33 = vld [vmem:[%s6695_s21 + $0x2c0] sm:$0xff] }
  0x63   : > { %5555 = vmatprep.mubr.msk.f32.mxu1 %vm403_vm0, %v267_v34  ;;  %v331_v34 = vld [vmem:[%s6695_s21 + $0x3c0] sm:$0xff] }
  0x65   : > { %5492 = vmatmul.mubr.msk.f32.gmra.mrb[24].mxu0 %vm403_vm0, %v236_v35  ;;  %v300_v35 = vld [vmem:[%s6695_s21 + $0x2c8] sm:$0xff] }
  0x66   : > { %5556 = vmatmul.mubr.msk.f32.gmra.mrb[24].mxu1 %vm403_vm0, %v268_v36  ;;  %5494 = vmatprep.mubr.msk.f32.mxu0 %vm403_vm0, %v237_v37  ;;  %v332_v36 = vld [vmem:[%s6695_s21 + $0x3c8] sm:$0xff]  ;;  %v301_v37 = vld [vmem:[%s6695_s21 + $0x2d0] sm:$0xff] }
  0x67   : > { %5558 = vmatprep.mubr.msk.f32.mxu1 %vm403_vm0, %v269_v38  ;;  %v333_v38 = vld [vmem:[%s6695_s21 + $0x3d0] sm:$0xff] }
  0x69   : > { %5495 = vmatmul.mubr.msk.f32.gmra.mrb[26].mxu0 %vm403_vm0, %v238_v39  ;;  %v302_v39 = vld [vmem:[%s6695_s21 + $0x2d8] sm:$0xff] }
  0x6a   : > { %5559 = vmatmul.mubr.msk.f32.gmra.mrb[26].mxu1 %vm403_vm0, %v270_v40  ;;  %5497 = vmatprep.mubr.msk.f32.mxu0 %vm403_vm0, %v239_v41  ;;  %v334_v40 = vld [vmem:[%s6695_s21 + $0x3d8] sm:$0xff]  ;;  %v303_v41 = vld [vmem:[%s6695_s21 + $0x2e0] sm:$0xff] }
  0x6b   : > { %5561 = vmatprep.mubr.msk.f32.mxu1 %vm403_vm0, %v271_v42  ;;  %v335_v42 = vld [vmem:[%s6695_s21 + $0x3e0] sm:$0xff] }
  0x6d   : > { %5498 = vmatmul.mubr.msk.f32.gmra.mrb[28].mxu0 %vm403_vm0, %v240_v43  ;;  %v304_v43 = vld [vmem:[%s6695_s21 + $0x2e8] sm:$0xff] }
  0x6e   : > { %5562 = vmatmul.mubr.msk.f32.gmra.mrb[28].mxu1 %vm403_vm0, %v272_v44  ;;  %5500 = vmatprep.mubr.msk.f32.mxu0 %vm403_vm0, %v241_v45  ;;  %v336_v44 = vld [vmem:[%s6695_s21 + $0x3e8] sm:$0xff]  ;;  %v305_v45 = vld [vmem:[%s6695_s21 + $0x2f0] sm:$0xff] }
  0x6f   : > { %5564 = vmatprep.mubr.msk.f32.mxu1 %vm403_vm0, %v273_v46  ;;  %v337_v46 = vld [vmem:[%s6695_s21 + $0x3f0] sm:$0xff] }
  0x71   : > { %5501 = vmatmul.mubr.msk.f32.gmra.mrb[30].mxu0 %vm403_vm0, %v242_v47  ;;  %v306_v47 = vld [vmem:[%s6695_s21 + $0x2f8] sm:$0xff] }
  0x72   : > { %5565 = vmatmul.mubr.msk.f32.gmra.mrb[30].mxu1 %vm403_vm0, %v274_v48  ;;  %5583 = vmatprep.mubr.msk.f32.mxu0 %vm403_vm0, %v275_v49  ;;  %v338_v48 = vld [vmem:[%s6695_s21 + $0x3f8] sm:$0xff] }
  0x73   : > { %5647 = vmatprep.mubr.msk.f32.mxu1 %vm403_vm0, %v307_v50 }
  0x75   : > { %5584 = vmatmul.mubr.msk.f32.vlgmr.msra.gmra.mrb[32].mxu0 %vm403_vm0, %v276_v51 }
  0x76   : > { %5648 = vmatmul.mubr.msk.f32.vlgmr.msra.gmra.mrb[32].mxu1 %vm403_vm0, %v308_v52  ;;  %5586 = vmatprep.mubr.msk.f32.mxu0 %vm403_vm0, %v277_v53 }
  0x77   : > { %5650 = vmatprep.mubr.msk.f32.mxu1 %vm403_vm0, %v309_v54 }
  0x79   : > { %5587 = vmatmul.mubr.msk.f32.gmra.mrb[34].mxu0 %vm403_vm0, %v278_v55 }
  0x7a   : > { %5651 = vmatmul.mubr.msk.f32.gmra.mrb[34].mxu1 %vm403_vm0, %v310_v56  ;;  %5589 = vmatprep.mubr.msk.f32.mxu0 %vm403_vm0, %v279_v57 }
  0x7b   : > { %5653 = vmatprep.mubr.msk.f32.mxu1 %vm403_vm0, %v311_v58 }
  0x7d   : > { %5590 = vmatmul.mubr.msk.f32.gmra.mrb[36].mxu0 %vm403_vm0, %v280_v59 }
  0x7e   : > { %5654 = vmatmul.mubr.msk.f32.gmra.mrb[36].mxu1 %vm403_vm0, %v312_v60  ;;  %5592 = vmatprep.mubr.msk.f32.mxu0 %vm403_vm0, %v281_v61 }
  0x7f   : > { %5656 = vmatprep.mubr.msk.f32.mxu1 %vm403_vm0, %v313_v62 }
  0x81   : > { %5593 = vmatmul.mubr.msk.f32.gmra.mrb[38].mxu0 %vm403_vm0, %v282_v63 }
  0x82   : > { %5657 = vmatmul.mubr.msk.f32.gmra.mrb[38].mxu1 %vm403_vm0, %v314_v1  ;;  %5595 = vmatprep.mubr.msk.f32.mxu0 %vm403_vm0, %v283_v2 }
  0x83   : > { %5659 = vmatprep.mubr.msk.f32.mxu1 %vm403_vm0, %v315_v3 }
  0x85   : > { %5596 = vmatmul.mubr.msk.f32.gmra.mrb[40].mxu0 %vm403_vm0, %v284_v4 }
  0x86   : > { %5660 = vmatmul.mubr.msk.f32.gmra.mrb[40].mxu1 %vm403_vm0, %v316_v5  ;;  %5598 = vmatprep.mubr.msk.f32.mxu0 %vm403_vm0, %v285_v6 }
  0x87   : > { %5662 = vmatprep.mubr.msk.f32.mxu1 %vm403_vm0, %v317_v7 }
  0x89   : > { %5599 = vmatmul.mubr.msk.f32.gmra.mrb[42].mxu0 %vm403_vm0, %v286_v8 }
  0x8a   : > { %5663 = vmatmul.mubr.msk.f32.gmra.mrb[42].mxu1 %vm403_vm0, %v318_v9  ;;  %5601 = vmatprep.mubr.msk.f32.mxu0 %vm403_vm0, %v287_v10 }
  0x8b   : > { %5665 = vmatprep.mubr.msk.f32.mxu1 %vm403_vm0, %v319_v11 }
  0x8d   : > { %5602 = vmatmul.mubr.msk.f32.gmra.mrb[44].mxu0 %vm403_vm0, %v288_v12 }
  0x8e   : > { %5666 = vmatmul.mubr.msk.f32.gmra.mrb[44].mxu1 %vm403_vm0, %v320_v13  ;;  %5604 = vmatprep.mubr.msk.f32.mxu0 %vm403_vm0, %v289_v14 }
  0x8f   : > { %5668 = vmatprep.mubr.msk.f32.mxu1 %vm403_vm0, %v321_v15 }
  0x91   : > { %5605 = vmatmul.mubr.msk.f32.gmra.mrb[46].mxu0 %vm403_vm0, %v290_v16 }
  0x92   : > { %5669 = vmatmul.mubr.msk.f32.gmra.mrb[46].mxu1 %vm403_vm0, %v322_v17  ;;  %5607 = vmatprep.mubr.msk.f32.mxu0 %vm403_vm0, %v291_v18 }
  0x93   : > { %5671 = vmatprep.mubr.msk.f32.mxu1 %vm403_vm0, %v323_v19 }
  0x95   : > { %5608 = vmatmul.mubr.msk.f32.gmra.mrb[48].mxu0 %vm403_vm0, %v292_v20 }
  0x96   : > { %5672 = vmatmul.mubr.msk.f32.gmra.mrb[48].mxu1 %vm403_vm0, %v324_v21  ;;  %5610 = vmatprep.mubr.msk.f32.mxu0 %vm403_vm0, %v293_v22 }
  0x97   : > { %5674 = vmatprep.mubr.msk.f32.mxu1 %vm403_vm0, %v325_v23 }
  0x99   : > { %5611 = vmatmul.mubr.msk.f32.gmra.mrb[50].mxu0 %vm403_vm0, %v294_v0 }
  0x9a   : > { %5675 = vmatmul.mubr.msk.f32.gmra.mrb[50].mxu1 %vm403_vm0, %v326_v24  ;;  %5613 = vmatprep.mubr.msk.f32.mxu0 %vm403_vm0, %v295_v25 }
  0x9b   : > { %5677 = vmatprep.mubr.msk.f32.mxu1 %vm403_vm0, %v327_v26 }
  0x9d   : > { %5614 = vmatmul.mubr.msk.f32.gmra.mrb[52].mxu0 %vm403_vm0, %v296_v27 }
  0x9e   : > { %5678 = vmatmul.mubr.msk.f32.gmra.mrb[52].mxu1 %vm403_vm0, %v328_v28  ;;  %5616 = vmatprep.mubr.msk.f32.mxu0 %vm403_vm0, %v297_v29  ;;  %v371_v28 = vld [vmem:[%s7084_s24] sm:$0xff]  ;;  %v372_v29 = vld [vmem:[%s7084_s24 + $0x8] sm:$0xff] }
  0x9f   : > { %5680 = vmatprep.mubr.msk.f32.mxu1 %vm403_vm0, %v329_v30 }
  0xa1   : > { %5617 = vmatmul.mubr.msk.f32.gmra.mrb[54].mxu0 %vm403_vm0, %v298_v31 }
  0xa2   : > { %5681 = vmatmul.mubr.msk.f32.gmra.mrb[54].mxu1 %vm403_vm0, %v330_v32  ;;  %5619 = vmatprep.mubr.msk.f32.mxu0 %vm403_vm0, %v299_v33 }
  0xa3   : > { %5683 = vmatprep.mubr.msk.f32.mxu1 %vm403_vm0, %v331_v34  ;;  %v6047_v34 = vpack.c.bf16 %v372_v29, %v371_v28 }
  0xa5   : > { %5620 = vmatmul.mubr.msk.f32.gmra.mrb[56].mxu0 %vm403_vm0, %v300_v35  ;;  %6048 = vmatprep.subr.bf16.mxu0 %v6047_v34 }
  0xa6   : > { %5684 = vmatmul.mubr.msk.f32.gmra.mrb[56].mxu1 %vm403_vm0, %v332_v36  ;;  %5622 = vmatprep.mubr.msk.f32.mxu0 %vm403_vm0, %v301_v37 }
  0xa7   : > { %5686 = vmatprep.mubr.msk.f32.mxu1 %vm403_vm0, %v333_v38  ;;  %6050 = vmatpush3.bf16.msra.mxu0 %v6047_v34  ;;  %v385_v34 = vld [vmem:[%s7084_s24 + $0x70] sm:$0xff] }
  0xa9   : > { %5623 = vmatmul.mubr.msk.f32.gmra.mrb[58].mxu0 %vm403_vm0, %v302_v39  ;;  %v373_v39 = vld [vmem:[%s7084_s24 + $0x10] sm:$0xff] }
  0xaa   : > { %5687 = vmatmul.mubr.msk.f32.gmra.mrb[58].mxu1 %vm403_vm0, %v334_v40  ;;  %5625 = vmatprep.mubr.msk.f32.mxu0 %vm403_vm0, %v303_v41  ;;  %v374_v40 = vld [vmem:[%s7084_s24 + $0x18] sm:$0xff]  ;;  %v379_v41 = vld [vmem:[%s7084_s24 + $0x40] sm:$0xff] }
  0xab   : > { %5689 = vmatprep.mubr.msk.f32.mxu1 %vm403_vm0, %v335_v42 }
  0xad   : > { %5626 = vmatmul.mubr.msk.f32.gmra.mrb[60].mxu0 %vm403_vm0, %v304_v43 }
  0xae   : > { %5690 = vmatmul.mubr.msk.f32.gmra.mrb[60].mxu1 %vm403_vm0, %v336_v44  ;;  %5628 = vmatprep.mubr.msk.f32.mxu0 %vm403_vm0, %v305_v45 }
  0xaf   : > { %5692 = vmatprep.mubr.msk.f32.mxu1 %vm403_vm0, %v337_v46  ;;  %v6051_v46 = vpack.c.bf16 %v374_v40, %v373_v39 }
  0xb1   : > { %5629 = vmatmul.mubr.msk.f32.gmra.mrb[62].mxu0 %vm403_vm0, %v306_v47  ;;  %v380_v47 = vld [vmem:[%s7084_s24 + $0x48] sm:$0xff]  ;;  %6052 = vmatprep.subr.bf16.mxu0 %v6051_v46 }
  0xb2   : > { %5693 = vmatmul.mubr.msk.f32.gmra.mrb[62].mxu1 %vm403_vm0, %v338_v48  ;;  %6054 = vmatpush3.bf16.msra.mxu0 %v6051_v46 }
 0x108   : > { %v5457_v49 = vpop.f32.mrb[0].mxu0 }
 0x109   : > { %v7043_v50 = vmul.f32 0.35355338, %v5457_v49  ;;  %v5521_v51 = vpop.f32.mrb[0].mxu1  ;;  %v590_v52 = vpop.f32.mrb[1].mxu0 }
 0x10a   : > { %v7045_v53 = vmul.f32 0.35355338, %v5521_v51  ;;  %v935_v54 = vpop.f32.mrb[1].mxu1  ;;  %v7047_v55 = vmul.f32 0.35355338, %v590_v52  ;;  %v6063_v52 = vpack.c.bf16 %v380_v47, %v379_v41 }
 0x10b   : > { %v1916_v56 = vsel %vm1912_vm2, %v7043_v50, -inf  ;;  %v7057_v1 = vmul.f32 0.35355338, %v935_v54 }
 0x10c   : > { %v2012_v57 = vsel %vm1912_vm2, %v7045_v53, -inf  ;;  %1917 = vmax.xlane.f32.xlu0 %v1916_v56  ;;  %v5460_v58 = vpop.f32.mrb[2].mxu0  ;;  %v1913_v2 = vsel %vm1912_vm2, %v7047_v55, -inf  ;;  %6064 = vmatprep.subr.bf16.mxu1 %v6063_v52  ;;  %v375_v56 = vld [vmem:[%s7084_s24 + $0x20] sm:$0xff] }
 0x10d   : > { %2013 = vmax.xlane.f32.xlu1 %v2012_v57  ;;  %v7053_v59 = vmul.f32 0.35355338, %v5460_v58  ;;  %v600_v60 = vpop.f32.mrb[3].mxu0  ;;  %v5524_v61 = vpop.f32.mrb[2].mxu1  ;;  %v2009_v10 = vsel %vm1912_vm2, %v7057_v1, -inf  ;;  %v376_v57 = vld [vmem:[%s7084_s24 + $0x28] sm:$0xff]  ;;  %6066 = vmatpush3.bf16.msra.mxu1 %v6063_v52 }
 0x10e   : > { %v7055_v62 = vmul.f32 0.35355338, %v5524_v61  ;;  %v945_v63 = vpop.f32.mrb[3].mxu1  ;;  %v7069_v11 = vmul.f32 0.35355338, %v600_v60  ;;  %v381_v58 = vld [vmem:[%s7084_s24 + $0x50] sm:$0xff] }
 0x10f   : > { %v1922_v3 = vsel %vm1912_vm2, %v7053_v59, -inf  ;;  %v7065_v9 = vmul.f32 0.35355338, %v945_v63 }
 0x110   : > { %1914 = vmax.xlane.f32.xlu0 %v1913_v2  ;;  %v5463_v4 = vpop.f32.mrb[4].mxu0  ;;  %v2018_v7 = vsel %vm1912_vm2, %v7055_v62, -inf  ;;  %v1919_v19 = vsel %vm1912_vm2, %v7069_v11, -inf }
 0x111   : > { %1923 = vmax.xlane.f32.xlu1 %v1922_v3  ;;  %v610_v5 = vpop.f32.mrb[5].mxu0  ;;  %v5527_v6 = vpop.f32.mrb[4].mxu1  ;;  %v7073_v16 = vmul.f32 0.35355338, %v5463_v4  ;;  %v2015_v18 = vsel %vm1912_vm2, %v7065_v9, -inf  ;;  %v6055_v3 = vpack.c.bf16 %v376_v57, %v375_v56  ;;  %v382_v4 = vld [vmem:[%s7084_s24 + $0x58] sm:$0xff] }
 0x112   : > { %v955_v8 = vpop.f32.mrb[5].mxu1  ;;  %v7071_v13 = vmul.f32 0.35355338, %v610_v5  ;;  %v7092_v24 = vmul.f32 0.35355338, %v5527_v6 }
 0x113   : > { %v7086_v21 = vmul.f32 0.35355338, %v955_v8  ;;  %v1928_v25 = vsel %vm1912_vm2, %v7073_v16, -inf  ;;  %v6067_v8 = vpack.c.bf16 %v382_v4, %v381_v58  ;;  %6056 = vmatprep.subr.bf16.mxu0 %v6055_v3 }
 0x114   : > { %2010 = vmax.xlane.f32.xlu0 %v2009_v10  ;;  %v5466_v12 = vpop.f32.mrb[6].mxu0  ;;  %v1925_v22 = vsel %vm1912_vm2, %v7071_v13, -inf  ;;  %v2024_v36 = vsel %vm1912_vm2, %v7092_v24, -inf  ;;  %6058 = vmatpush3.bf16.msra.mxu0 %v6055_v3 }
 0x115   : > { %2019 = vmax.xlane.f32.xlu1 %v2018_v7  ;;  %v620_v14 = vpop.f32.mrb[7].mxu0  ;;  %v5530_v15 = vpop.f32.mrb[6].mxu1  ;;  %v2021_v31 = vsel %vm1912_vm2, %v7086_v21, -inf  ;;  %v7108_v35 = vmul.f32 0.35355338, %v5466_v12  ;;  %6068 = vmatprep.subr.bf16.mxu1 %v6067_v8  ;;  %v377_v12 = vld [vmem:[%s7084_s24 + $0x30] sm:$0xff] }
 0x116   : > { %v965_v17 = vpop.f32.mrb[7].mxu1  ;;  %v7100_v30 = vmul.f32 0.35355338, %v620_v14  ;;  %v7128_v48 = vmul.f32 0.35355338, %v5530_v15  ;;  %v378_v14 = vld [vmem:[%s7084_s24 + $0x38] sm:$0xff]  ;;  %6070 = vmatpush3.bf16.msra.mxu1 %v6067_v8 }
 0x117   : > { %9615 = vst [vmem:[#allocation3_spill] sm:$0xff] %v7108_v35  ;;  %v7119_v42 = vmul.f32 0.35355338, %v965_v17  ;;  %v1934_v49 = vsel %vm1912_vm2, %v7108_v35, -inf  ;;  %v383_v15 = vld [vmem:[%s7084_s24 + $0x60] sm:$0xff] }
 0x118   : > { %2016 = vmax.xlane.f32.xlu0 %v2015_v18  ;;  %v5469_v20 = vpop.f32.mrb[8].mxu0  ;;  %9614 = vst [vmem:[#allocation2_spill] sm:$0xff] %v7100_v30  ;;  %v1931_v43 = vsel %vm1912_vm2, %v7100_v30, -inf  ;;  %9617 = vst [vmem:[#allocation5_spill] sm:$0xff] %v7128_v48  ;;  %v2030_v6 = vsel %vm1912_vm2, %v7128_v48, -inf }
 0x119   : > { %1920 = vmax.xlane.f32.xlu1 %v1919_v19  ;;  %v630_v23 = vpop.f32.mrb[9].mxu0  ;;  %v7090_v0 = vpop.f32.mrb[8].mxu1  ;;  %9616 = vst [vmem:[#allocation4_spill] sm:$0xff] %v7119_v42  ;;  %v2027_v61 = vsel %vm1912_vm2, %v7119_v42, -inf  ;;  %v7148_v5 = vmul.f32 0.35355338, %v5469_v20 }
 0x11a   : > { %v975_v26 = vpop.f32.mrb[9].mxu1  ;;  %v7139_v60 = vmul.f32 0.35355338, %v630_v23  ;;  %v384_v23 = vld [vmem:[%s7084_s24 + $0x68] sm:$0xff] }
 0x11b   : > { %9619 = vst [vmem:[#allocation7_spill] sm:$0xff] %v7148_v5  ;;  %v7159_v17 = vmul.f32 0.35355338, %v975_v26  ;;  %v1940_v28 = vsel %vm1912_vm2, %v7148_v5, -inf  ;;  %v6071_v29 = vpack.c.bf16 %v384_v23, %v383_v15 }
 0x11c   : > { %1926 = vmax.xlane.f32.xlu0 %v1925_v22  ;;  %v7096_v27 = vpop.f32.mrb[10].mxu0  ;;  %9618 = vst [vmem:[#allocation6_spill] sm:$0xff] %v7139_v60  ;;  %v1937_v18 = vsel %vm1912_vm2, %v7139_v60, -inf  ;;  %v6059_v22 = vpack.c.bf16 %v378_v14, %v377_v12 }
 0x11d   : > { %1929 = vmax.xlane.f32.xlu1 %v1928_v25  ;;  %v7104_v32 = vpop.f32.mrb[11].mxu0  ;;  %v7106_v33 = vpop.f32.mrb[10].mxu1  ;;  %9620 = vst [vmem:[#allocation8_spill] sm:$0xff] %v7159_v17  ;;  %v7169_v25 = vmul.f32 0.35355338, %v7090_v0  ;;  %6072 = vmatprep.subr.bf16.mxu1 %v6071_v29  ;;  %v2033_v0 = vsel %vm1912_vm2, %v7159_v17, -inf }
 0x11e   : > { %v7112_v37 = vpop.f32.mrb[11].mxu1  ;;  %6060 = vmatprep.subr.bf16.mxu0 %v6059_v22  ;;  %v7180_v39 = vmul.f32 0.35355338, %v7104_v32  ;;  %v7189_v46 = vmul.f32 0.35355338, %v7096_v27  ;;  %6074 = vmatpush3.bf16.msra.mxu1 %v6071_v29 }
 0x11f   : > { %9621 = vst [vmem:[#allocation9_spill] sm:$0xff] %v7169_v25  ;;  %6062 = vmatpush3.bf16.msra.mxu0 %v6059_v22  ;;  %v2036_v47 = vsel %vm1912_vm2, %v7169_v25, -inf  ;;  %v7198_v52 = vmul.f32 0.35355338, %v7112_v37  ;;  %v7207_v58 = vmul.f32 0.35355338, %v7106_v33 }
 0x120   : > { %2022 = vmax.xlane.f32.xlu0 %v2021_v31  ;;  %v7114_v38 = vpop.f32.mrb[12].mxu0  ;;  %9622 = vst [vmem:[#allocation10_spill] sm:$0xff] %v7180_v39  ;;  %9623 = vst [vmem:[#allocation11_spill] sm:$0xff] %v7189_v46  ;;  %v1943_v56 = vsel %vm1912_vm2, %v7180_v39, -inf }
 0x121   : > { %2025 = vmax.xlane.f32.xlu1 %v2024_v36  ;;  %v7123_v44 = vpop.f32.mrb[13].mxu0  ;;  %v7125_v45 = vpop.f32.mrb[12].mxu1  ;;  %v386_v36 = vld [vmem:[%s7084_s24 + $0x78] sm:$0xff]  ;;  %9624 = vst [vmem:[#allocation12_spill] sm:$0xff] %v7198_v52  ;;  %9625 = vst [vmem:[#allocation13_spill] sm:$0xff] %v7207_v58  ;;  %v2042_v14 = vsel %vm1912_vm2, %v7207_v58, -inf }
 0x122   : > { %v7132_v51 = vpop.f32.mrb[13].mxu1  ;;  %v7216_v37 = vmul.f32 0.35355338, %v7123_v44  ;;  %v7225_v12 = vmul.f32 0.35355338, %v7114_v38 }
 0x123   : > { %v7234_v44 = vmul.f32 0.35355338, %v7132_v51  ;;  %v7243_v38 = vmul.f32 0.35355338, %v7125_v45 }
 0x124   : > { %1932 = vmax.xlane.f32.xlu0 %v1931_v43  ;;  %v7134_v54 = vpop.f32.mrb[14].mxu0  ;;  %v6075_v43 = vpack.c.bf16 %v386_v36, %v385_v34  ;;  %9626 = vst [vmem:[#allocation14_spill] sm:$0xff] %v7216_v37  ;;  %9627 = vst [vmem:[#allocation15_spill] sm:$0xff] %v7225_v12  ;;  %v1949_v22 = vsel %vm1912_vm2, %v7216_v37, -inf  ;;  %v1952_v29 = vsel %vm1912_vm2, %v7225_v12, -inf }
 0x125   : > { %1935 = vmax.xlane.f32.xlu1 %v1934_v49  ;;  %v7143_v63 = vpop.f32.mrb[15].mxu0  ;;  %v7145_v2 = vpop.f32.mrb[14].mxu1  ;;  %9628 = vst [vmem:[#allocation16_spill] sm:$0xff] %v7234_v44  ;;  %9629 = vst [vmem:[#allocation17_spill] sm:$0xff] %v7243_v38  ;;  %v7261_v45 = vmul.f32 0.35355338, %v7134_v54 }
 0x126   : > { %v7152_v7 = vpop.f32.mrb[15].mxu1  ;;  %6076 = vmatprep.subr.bf16.mxu1 %v6075_v43  ;;  %v7252_v51 = vmul.f32 0.35355338, %v7143_v63  ;;  %v7279_v54 = vmul.f32 0.35355338, %v7145_v2 }
 0x127   : > { %6078 = vmatpush3.bf16.msra.mxu1 %v6075_v43  ;;  %9631 = vst [vmem:[#allocation19_spill] sm:$0xff] %v7261_v45  ;;  %v7270_v63 = vmul.f32 0.35355338, %v7152_v7 }
 0x128   : > { %2028 = vmax.xlane.f32.xlu0 %v2027_v61  ;;  %v7154_v10 = vpop.f32.mrb[16].mxu0  ;;  %v1946_v61 = vsel %vm1912_vm2, %v7189_v46, -inf  ;;  %9630 = vst [vmem:[#allocation18_spill] sm:$0xff] %v7252_v51  ;;  %9633 = vst [vmem:[#allocation21_spill] sm:$0xff] %v7279_v54 }
 0x129   : > { %2031 = vmax.xlane.f32.xlu1 %v2030_v6  ;;  %v7163_v19 = vpop.f32.mrb[17].mxu0  ;;  %v7165_v20 = vpop.f32.mrb[16].mxu1  ;;  %v2039_v6 = vsel %vm1912_vm2, %v7198_v52, -inf  ;;  %9632 = vst [vmem:[#allocation20_spill] sm:$0xff] %v7270_v63  ;;  %v7297_v2 = vmul.f32 0.35355338, %v7154_v10 }
 0x12a   : > { %v7173_v26 = vpop.f32.mrb[17].mxu1  ;;  %v7288_v7 = vmul.f32 0.35355338, %v7163_v19  ;;  %v7315_v10 = vmul.f32 0.35355338, %v7165_v20 }
 0x12b   : > { %9635 = vst [vmem:[#allocation23_spill] sm:$0xff] %v7297_v2  ;;  %v7306_v19 = vmul.f32 0.35355338, %v7173_v26 }
 0x12c   : > { %1938 = vmax.xlane.f32.xlu0 %v1937_v18  ;;  %v7175_v31 = vpop.f32.mrb[18].mxu0  ;;  %9634 = vst [vmem:[#allocation22_spill] sm:$0xff] %v7288_v7  ;;  %9637 = vst [vmem:[#allocation25_spill] sm:$0xff] %v7315_v10 }
 0x12d   : > { %1941 = vmax.xlane.f32.xlu1 %v1940_v28  ;;  %v7184_v40 = vpop.f32.mrb[19].mxu0  ;;  %v7186_v41 = vpop.f32.mrb[18].mxu1  ;;  %9636 = vst [vmem:[#allocation24_spill] sm:$0xff] %v7306_v19  ;;  %v7333_v20 = vmul.f32 0.35355338, %v7175_v31 }
 0x12e   : > { %v7193_v49 = vpop.f32.mrb[19].mxu1  ;;  %v7324_v26 = vmul.f32 0.35355338, %v7184_v40  ;;  %v7351_v31 = vmul.f32 0.35355338, %v7186_v41 }
 0x12f   : > { %9639 = vst [vmem:[#allocation27_spill] sm:$0xff] %v7333_v20  ;;  %v7342_v40 = vmul.f32 0.35355338, %v7193_v49 }
 0x130   : > { %2034 = vmax.xlane.f32.xlu0 %v2033_v0  ;;  %v7195_v32 = vpop.f32.mrb[20].mxu0  ;;  %v2045_v0 = vsel %vm1912_vm2, %v7234_v44, -inf  ;;  %9638 = vst [vmem:[#allocation26_spill] sm:$0xff] %v7324_v26  ;;  %9641 = vst [vmem:[#allocation29_spill] sm:$0xff] %v7351_v31 }
 0x131   : > { %2037 = vmax.xlane.f32.xlu1 %v2036_v47  ;;  %v7202_v57 = vpop.f32.mrb[21].mxu0  ;;  %v7204_v27 = vpop.f32.mrb[20].mxu1  ;;  %9640 = vst [vmem:[#allocation28_spill] sm:$0xff] %v7342_v40  ;;  %v7369_v41 = vmul.f32 0.35355338, %v7195_v32 }
 0x132   : > { %v7211_v3 = vpop.f32.mrb[21].mxu1  ;;  %v7360_v49 = vmul.f32 0.35355338, %v7202_v57  ;;  %v7387_v32 = vmul.f32 0.35355338, %v7204_v27 }
 0x133   : > { %9643 = vst [vmem:[#allocation31_spill] sm:$0xff] %v7369_v41  ;;  %v7378_v57 = vmul.f32 0.35355338, %v7211_v3 }
 0x134   : > { %1944 = vmax.xlane.f32.xlu0 %v1943_v56  ;;  %v7213_v4 = vpop.f32.mrb[22].mxu0  ;;  %v2048_v56 = vsel %vm1912_vm2, %v7243_v38, -inf  ;;  %v1958_v38 = vsel %vm1912_vm2, %v7261_v45, -inf  ;;  %v2054_v45 = vsel %vm1912_vm2, %v7279_v54, -inf  ;;  %v1964_v54 = vsel %vm1912_vm2, %v7297_v2, -inf  ;;  %9642 = vst [vmem:[#allocation30_spill] sm:$0xff] %v7360_v49 }
 0x135   : > { %1947 = vmax.xlane.f32.xlu1 %v1946_v61  ;;  %v7220_v8 = vpop.f32.mrb[23].mxu0  ;;  %v7222_v33 = vpop.f32.mrb[22].mxu1  ;;  %v2060_v2 = vsel %vm1912_vm2, %v7315_v10, -inf  ;;  %v1970_v10 = vsel %vm1912_vm2, %v7333_v20, -inf  ;;  %v2066_v20 = vsel %vm1912_vm2, %v7351_v31, -inf  ;;  %9644 = vst [vmem:[#allocation32_spill] sm:$0xff] %v7378_v57 }
 0x136   : > { %v7229_v15 = vpop.f32.mrb[23].mxu1  ;;  %9645 = vst [vmem:[#allocation33_spill] sm:$0xff] %v7387_v32  ;;  %v1976_v31 = vsel %vm1912_vm2, %v7369_v41, -inf  ;;  %v7396_v3 = vmul.f32 0.35355338, %v7220_v8  ;;  %v2072_v41 = vsel %vm1912_vm2, %v7387_v32, -inf }
 0x137   : > { %v7405_v27 = vmul.f32 0.35355338, %v7213_v4  ;;  %v7414_v8 = vmul.f32 0.35355338, %v7229_v15  ;;  %v7423_v4 = vmul.f32 0.35355338, %v7222_v33 }
 0x138   : > { %2040 = vmax.xlane.f32.xlu0 %v2039_v6  ;;  %v7231_v18 = vpop.f32.mrb[24].mxu0  ;;  %9646 = vst [vmem:[#allocation34_spill] sm:$0xff] %v7396_v3 }
 0x139   : > { %2043 = vmax.xlane.f32.xlu1 %v2042_v14  ;;  %v7238_v23 = vpop.f32.mrb[25].mxu0  ;;  %v7240_v28 = vpop.f32.mrb[24].mxu1  ;;  %v1955_v14 = vsel %vm1912_vm2, %v7252_v51, -inf  ;;  %v2051_v51 = vsel %vm1912_vm2, %v7270_v63, -inf  ;;  %v1961_v63 = vsel %vm1912_vm2, %v7288_v7, -inf  ;;  %v2057_v7 = vsel %vm1912_vm2, %v7306_v19, -inf }
 0x13a   : > { %v7247_v34 = vpop.f32.mrb[25].mxu1  ;;  %v1967_v19 = vsel %vm1912_vm2, %v7324_v26, -inf  ;;  %v2063_v26 = vsel %vm1912_vm2, %v7342_v40, -inf  ;;  %v1973_v40 = vsel %vm1912_vm2, %v7360_v49, -inf  ;;  %v2069_v49 = vsel %vm1912_vm2, %v7378_v57, -inf  ;;  %9648 = vst [vmem:[#allocation36_spill] sm:$0xff] %v7405_v27 }
 0x13b   : > { %9649 = vst [vmem:[#allocation37_spill] sm:$0xff] %v7414_v8  ;;  %v1979_v57 = vsel %vm1912_vm2, %v7396_v3, -inf  ;;  %9652 = vst [vmem:[#allocation40_spill] sm:$0xff] %v7423_v4  ;;  %v1982_v32 = vsel %vm1912_vm2, %v7405_v27, -inf  ;;  %v7432_v15 = vmul.f32 0.35355338, %v7238_v23 }
 0x13c   : > { %1950 = vmax.xlane.f32.xlu0 %v1949_v22  ;;  %v7249_v36 = vpop.f32.mrb[26].mxu0  ;;  %v2075_v3 = vsel %vm1912_vm2, %v7414_v8, -inf  ;;  %v7441_v33 = vmul.f32 0.35355338, %v7231_v18  ;;  %v2078_v27 = vsel %vm1912_vm2, %v7423_v4, -inf }
 0x13d   : > { %1953 = vmax.xlane.f32.xlu1 %v1952_v29  ;;  %v7256_v43 = vpop.f32.mrb[27].mxu0  ;;  %v7258_v47 = vpop.f32.mrb[26].mxu1  ;;  %9653 = vst [vmem:[#allocation41_spill] sm:$0xff] %v7432_v15  ;;  %v7450_v23 = vmul.f32 0.35355338, %v7247_v34  ;;  %v1985_v8 = vsel %vm1912_vm2, %v7432_v15, -inf }
 0x13e   : > { %v7265_v61 = vpop.f32.mrb[27].mxu1  ;;  %9656 = vst [vmem:[#allocation44_spill] sm:$0xff] %v7441_v33  ;;  %v7459_v18 = vmul.f32 0.35355338, %v7240_v28  ;;  %v1988_v4 = vsel %vm1912_vm2, %v7441_v33, -inf }
 0x13f   : > { %9657 = vst [vmem:[#allocation45_spill] sm:$0xff] %v7450_v23  ;;  %v7468_v34 = vmul.f32 0.35355338, %v7256_v43  ;;  %v2081_v15 = vsel %vm1912_vm2, %v7450_v23, -inf  ;;  %v7477_v28 = vmul.f32 0.35355338, %v7249_v36 }
 0x140   : > { %2046 = vmax.xlane.f32.xlu0 %v2045_v0  ;;  %v7267_v6 = vpop.f32.mrb[28].mxu0  ;;  %9660 = vst [vmem:[#allocation48_spill] sm:$0xff] %v7459_v18  ;;  %v2084_v33 = vsel %vm1912_vm2, %v7459_v18, -inf  ;;  %v7486_v43 = vmul.f32 0.35355338, %v7265_v61 }
 0x141   : > { %2049 = vmax.xlane.f32.xlu1 %v2048_v56  ;;  %v7274_v22 = vpop.f32.mrb[29].mxu0  ;;  %v7276_v29 = vpop.f32.mrb[28].mxu1  ;;  %9661 = vst [vmem:[#allocation49_spill] sm:$0xff] %v7468_v34  ;;  %9664 = vst [vmem:[#allocation52_spill] sm:$0xff] %v7477_v28  ;;  %v1991_v23 = vsel %vm1912_vm2, %v7468_v34, -inf  ;;  %v1994_v18 = vsel %vm1912_vm2, %v7477_v28, -inf }
 0x142   : > { %v7283_v0 = vpop.f32.mrb[29].mxu1  ;;  %9665 = vst [vmem:[#allocation53_spill] sm:$0xff] %v7486_v43  ;;  %v7495_v36 = vmul.f32 0.35355338, %v7258_v47  ;;  %v7504_v61 = vmul.f32 0.35355338, %v7274_v22 }
 0x143   : > { %v2087_v34 = vsel %vm1912_vm2, %v7486_v43, -inf  ;;  %v7513_v47 = vmul.f32 0.35355338, %v7267_v6  ;;  %v7522_v22 = vmul.f32 0.35355338, %v7283_v0 }
 0x144   : > { %1956 = vmax.xlane.f32.xlu0 %v1955_v14  ;;  %v7285_v56 = vpop.f32.mrb[30].mxu0  ;;  %9668 = vst [vmem:[#allocation56_spill] sm:$0xff] %v7495_v36  ;;  %9669 = vst [vmem:[#allocation57_spill] sm:$0xff] %v7504_v61  ;;  %v2090_v28 = vsel %vm1912_vm2, %v7495_v36, -inf  ;;  %v1997_v43 = vsel %vm1912_vm2, %v7504_v61, -inf }
 0x145   : > { %1959 = vmax.xlane.f32.xlu1 %v1958_v38  ;;  %v7292_v44 = vpop.f32.mrb[31].mxu0  ;;  %v7294_v12 = vpop.f32.mrb[30].mxu1  ;;  %9672 = vst [vmem:[#allocation60_spill] sm:$0xff] %v7513_v47  ;;  %9673 = vst [vmem:[#allocation61_spill] sm:$0xff] %v7522_v22  ;;  %v7531_v6 = vmul.f32 0.35355338, %v7276_v29 }
 0x146   : > { %v7301_v14 = vpop.f32.mrb[31].mxu1  ;;  %v2000_v36 = vsel %vm1912_vm2, %v7513_v47, -inf  ;;  %v7540_v0 = vmul.f32 0.35355338, %v7292_v44  ;;  %v2093_v61 = vsel %vm1912_vm2, %v7522_v22, -inf }
 0x147   : > { %9676 = vst [vmem:[#allocation64_spill] sm:$0xff] %v7531_v6  ;;  %v7549_v29 = vmul.f32 0.35355338, %v7285_v56  ;;  %v2096_v47 = vsel %vm1912_vm2, %v7531_v6, -inf  ;;  %v7558_v44 = vmul.f32 0.35355338, %v7301_v14 }
 0x148   : > { %2052 = vmax.xlane.f32.xlu0 %v2051_v51  ;;  %v7303_v38 = vpop.f32.mrb[32].mxu0  ;;  %9677 = vst [vmem:[#allocation65_spill] sm:$0xff] %v7540_v0  ;;  %v2003_v22 = vsel %vm1912_vm2, %v7540_v0, -inf  ;;  %v7567_v56 = vmul.f32 0.35355338, %v7294_v12 }
 0x149   : > { %2055 = vmax.xlane.f32.xlu1 %v2054_v45  ;;  %v7310_v37 = vpop.f32.mrb[32].mxu1  ;;  %v7312_v58 = vpop.f32.mrb[33].mxu0  ;;  %9680 = vst [vmem:[#allocation68_spill] sm:$0xff] %v7549_v29  ;;  %9681 = vst [vmem:[#allocation69_spill] sm:$0xff] %v7558_v44  ;;  %v2006_v6 = vsel %vm1912_vm2, %v7549_v29, -inf  ;;  %v2099_v0 = vsel %vm1912_vm2, %v7558_v44, -inf }
 0x14a   : > { %v7319_v51 = vpop.f32.mrb[33].mxu1  ;;  %v7576_v14 = vmul.f32 0.35355338, %v7310_v37  ;;  %v7585_v12 = vmul.f32 0.35355338, %v7303_v38  ;;  %v2102_v29 = vsel %vm1912_vm2, %v7567_v56, -inf }
 0x14b   : > { %v7596_v44 = vmul.f32 0.35355338, %v7312_v58 }
 0x14c   : > { %1962 = vmax.xlane.f32.xlu0 %v1961_v63  ;;  %v7321_v45 = vpop.f32.mrb[34].mxu0  ;;  %9684 = vst [vmem:[#allocation72_spill] sm:$0xff] %v7576_v14  ;;  %v2204_v37 = vsel %vm1912_vm2, %v7576_v14, -inf }
 0x14d   : > { %1965 = vmax.xlane.f32.xlu1 %v1964_v54  ;;  %v7328_v52 = vpop.f32.mrb[34].mxu1  ;;  %v7330_v46 = vpop.f32.mrb[35].mxu0 }
 0x14e   : > { %v7337_v63 = vpop.f32.mrb[35].mxu1  ;;  %v7602_v38 = vmul.f32 0.35355338, %v7328_v52  ;;  %v7616_v52 = vmul.f32 0.35355338, %v7330_v46 }
 0x150   : > { %2058 = vmax.xlane.f32.xlu0 %v2057_v7  ;;  %v7339_v54 = vpop.f32.mrb[36].mxu0  ;;  %9687 = vst [vmem:[#allocation75_spill] sm:$0xff] %v7602_v38  ;;  %v2210_v58 = vsel %vm1912_vm2, %v7602_v38, -inf  ;;  %9689 = vst [vmem:[#allocation77_spill] sm:$0xff] %v7616_v52 }
 0x151   : > { %2061 = vmax.xlane.f32.xlu1 %v2060_v2  ;;  %v7346_v39 = vpop.f32.mrb[36].mxu1  ;;  %v7348_v25 = vpop.f32.mrb[37].mxu0 }
 0x152   : > { %v7355_v7 = vpop.f32.mrb[37].mxu1 }
 0x154   : > { %1968 = vmax.xlane.f32.xlu0 %v1967_v19  ;;  %v7357_v2 = vpop.f32.mrb[38].mxu0 }
 0x155   : > { %1971 = vmax.xlane.f32.xlu1 %v1970_v10  ;;  %v7364_v17 = vpop.f32.mrb[38].mxu1  ;;  %v7366_v5 = vpop.f32.mrb[39].mxu0 }
 0x156   : > { %v7373_v19 = vpop.f32.mrb[39].mxu1 }
 0x158   : > { %2064 = vmax.xlane.f32.xlu0 %v2063_v26  ;;  %v7375_v10 = vpop.f32.mrb[40].mxu0 }
 0x159   : > { %2067 = vmax.xlane.f32.xlu1 %v2066_v20  ;;  %v7382_v60 = vpop.f32.mrb[40].mxu1  ;;  %v7384_v48 = vpop.f32.mrb[41].mxu0 }
 0x15a   : > { %v7391_v26 = vpop.f32.mrb[41].mxu1 }
 0x15c   : > { %1974 = vmax.xlane.f32.xlu0 %v1973_v40  ;;  %v7393_v20 = vpop.f32.mrb[42].mxu0 }
 0x15d   : > { %1977 = vmax.xlane.f32.xlu1 %v1976_v31  ;;  %v7400_v42 = vpop.f32.mrb[42].mxu1  ;;  %v7402_v35 = vpop.f32.mrb[43].mxu0 }
 0x15e   : > { %9647 = vst [vmem:[#allocation35_spill] sm:$0xff] %v7402_v35  ;;  %v7409_v40 = vpop.f32.mrb[43].mxu1 }
 0x160   : > { %2070 = vmax.xlane.f32.xlu0 %v2069_v49  ;;  %v7411_v31 = vpop.f32.mrb[44].mxu0 }
 0x161   : > { %2073 = vmax.xlane.f32.xlu1 %v2072_v41  ;;  %v7418_v30 = vpop.f32.mrb[44].mxu1  ;;  %v7420_v35 = vpop.f32.mrb[45].mxu0 }
 0x162   : > { %9650 = vst [vmem:[#allocation38_spill] sm:$0xff] %v7418_v30  ;;  %9651 = vst [vmem:[#allocation39_spill] sm:$0xff] %v7420_v35  ;;  %v7427_v49 = vpop.f32.mrb[45].mxu1 }
 0x164   : > { %1980 = vmax.xlane.f32.xlu0 %v1979_v57  ;;  %v7429_v41 = vpop.f32.mrb[46].mxu0 }
 0x165   : > { %1983 = vmax.xlane.f32.xlu1 %v1982_v32  ;;  %v7436_v30 = vpop.f32.mrb[46].mxu1  ;;  %v7438_v35 = vpop.f32.mrb[47].mxu0 }
 0x166   : > { %9654 = vst [vmem:[#allocation42_spill] sm:$0xff] %v7436_v30  ;;  %9655 = vst [vmem:[#allocation43_spill] sm:$0xff] %v7438_v35  ;;  %v7445_v57 = vpop.f32.mrb[47].mxu1 }
 0x168   : > { %2076 = vmax.xlane.f32.xlu0 %v2075_v3  ;;  %v7447_v32 = vpop.f32.mrb[48].mxu0 }
 0x169   : > { %2079 = vmax.xlane.f32.xlu1 %v2078_v27  ;;  %v7454_v30 = vpop.f32.mrb[48].mxu1  ;;  %v7456_v35 = vpop.f32.mrb[49].mxu0 }
 0x16a   : > { %9658 = vst [vmem:[#allocation46_spill] sm:$0xff] %v7454_v30  ;;  %9659 = vst [vmem:[#allocation47_spill] sm:$0xff] %v7456_v35  ;;  %v7463_v3 = vpop.f32.mrb[49].mxu1 }
 0x16c   : > { %1986 = vmax.xlane.f32.xlu0 %v1985_v8  ;;  %v7465_v27 = vpop.f32.mrb[50].mxu0 }
 0x16d   : > { %1989 = vmax.xlane.f32.xlu1 %v1988_v4  ;;  %v7472_v30 = vpop.f32.mrb[50].mxu1  ;;  %v7474_v35 = vpop.f32.mrb[51].mxu0 }
 0x16e   : > { %9662 = vst [vmem:[#allocation50_spill] sm:$0xff] %v7472_v30  ;;  %9663 = vst [vmem:[#allocation51_spill] sm:$0xff] %v7474_v35  ;;  %v7481_v8 = vpop.f32.mrb[51].mxu1 }
 0x170   : > { %2082 = vmax.xlane.f32.xlu0 %v2081_v15  ;;  %v7483_v4 = vpop.f32.mrb[52].mxu0 }
 0x171   : > { %2085 = vmax.xlane.f32.xlu1 %v2084_v33  ;;  %v7490_v30 = vpop.f32.mrb[52].mxu1  ;;  %v7492_v35 = vpop.f32.mrb[53].mxu0 }
 0x172   : > { %9666 = vst [vmem:[#allocation54_spill] sm:$0xff] %v7490_v30  ;;  %9667 = vst [vmem:[#allocation55_spill] sm:$0xff] %v7492_v35  ;;  %v7499_v15 = vpop.f32.mrb[53].mxu1 }
 0x174   : > { %1992 = vmax.xlane.f32.xlu0 %v1991_v23  ;;  %v7501_v33 = vpop.f32.mrb[54].mxu0 }
 0x175   : > { %1995 = vmax.xlane.f32.xlu1 %v1994_v18  ;;  %v7508_v30 = vpop.f32.mrb[54].mxu1  ;;  %v7510_v35 = vpop.f32.mrb[55].mxu0 }
 0x176   : > { %9670 = vst [vmem:[#allocation58_spill] sm:$0xff] %v7508_v30  ;;  %9671 = vst [vmem:[#allocation59_spill] sm:$0xff] %v7510_v35  ;;  %v7517_v23 = vpop.f32.mrb[55].mxu1 }
 0x178   : > { %2088 = vmax.xlane.f32.xlu0 %v2087_v34  ;;  %v7519_v18 = vpop.f32.mrb[56].mxu0 }
 0x179   : > { %2091 = vmax.xlane.f32.xlu1 %v2090_v28  ;;  %v7526_v30 = vpop.f32.mrb[56].mxu1  ;;  %v7528_v35 = vpop.f32.mrb[57].mxu0 }
 0x17a   : > { %9674 = vst [vmem:[#allocation62_spill] sm:$0xff] %v7526_v30  ;;  %9675 = vst [vmem:[#allocation63_spill] sm:$0xff] %v7528_v35  ;;  %v7535_v34 = vpop.f32.mrb[57].mxu1 }
 0x17c   : > { %1998 = vmax.xlane.f32.xlu0 %v1997_v43  ;;  %v7537_v28 = vpop.f32.mrb[58].mxu0 }
 0x17d   : > { %2001 = vmax.xlane.f32.xlu1 %v2000_v36  ;;  %v7544_v30 = vpop.f32.mrb[58].mxu1  ;;  %v7546_v35 = vpop.f32.mrb[59].mxu0 }
 0x17e   : > { %9678 = vst [vmem:[#allocation66_spill] sm:$0xff] %v7544_v30  ;;  %9679 = vst [vmem:[#allocation67_spill] sm:$0xff] %v7546_v35  ;;  %v7553_v43 = vpop.f32.mrb[59].mxu1 }
 0x180   : > { %2094 = vmax.xlane.f32.xlu0 %v2093_v61  ;;  %v7555_v36 = vpop.f32.mrb[60].mxu0 }
 0x181   : > { %2097 = vmax.xlane.f32.xlu1 %v2096_v47  ;;  %v7562_v30 = vpop.f32.mrb[60].mxu1  ;;  %v7564_v35 = vpop.f32.mrb[61].mxu0 }
 0x182   : > { %9682 = vst [vmem:[#allocation70_spill] sm:$0xff] %v7562_v30  ;;  %9683 = vst [vmem:[#allocation71_spill] sm:$0xff] %v7564_v35  ;;  %v7571_v61 = vpop.f32.mrb[61].mxu1 }
 0x184   : > { %2004 = vmax.xlane.f32.xlu0 %v2003_v22  ;;  %v7573_v47 = vpop.f32.mrb[62].mxu0 }
 0x185   : > { %2007 = vmax.xlane.f32.xlu1 %v2006_v6  ;;  %v7580_v30 = vpop.f32.mrb[62].mxu1  ;;  %v7582_v35 = vpop.f32.mrb[63].mxu0  ;;  %v2108_v6 = vsel %vm1912_vm2, %v7585_v12, -inf }
 0x186   : > { %9685 = vst [vmem:[#allocation73_spill] sm:$0xff] %v7582_v35  ;;  %v7589_v22 = vpop.f32.mrb[63].mxu1  ;;  %v7599_v35 = vmul.f32 0.35355338, %v7319_v51 }
 0x188   : > { %2100 = vmax.xlane.f32.xlu0 %v2099_v0  ;;  %9686 = vst [vmem:[#allocation74_spill] sm:$0xff] %v7599_v35  ;;  %v7605_v0 = vmul.f32 0.35355338, %v7321_v45  ;;  %v2201_v14 = vsel %vm1912_vm2, %v7599_v35, -inf  ;;  %v7619_v45 = vmul.f32 0.35355338, %v7337_v63 }
 0x189   : > { %2103 = vmax.xlane.f32.xlu1 %v2102_v29  ;;  %v2105_v29 = vsel %vm1912_vm2, %v7596_v44, -inf }
 0x18a   : > { %9688 = vst [vmem:[#allocation76_spill] sm:$0xff] %v7605_v0  ;;  %v2114_v51 = vsel %vm1912_vm2, %v7605_v0, -inf  ;;  %9690 = vst [vmem:[#allocation78_spill] sm:$0xff] %v7619_v45  ;;  %v2207_v46 = vsel %vm1912_vm2, %v7619_v45, -inf  ;;  %v395_v45 = vld [vmem:[%s7084_s24 + $0xc0] sm:$0xff] }
 0x18c   : > { %2205 = vmax.xlane.f32.xlu0 %v2204_v37  ;;  %v7622_v37 = vmul.f32 0.35355338, %v7346_v39 }
 0x18d   : > { %2109 = vmax.xlane.f32.xlu1 %v2108_v6  ;;  %v2111_v6 = vsel %vm1912_vm2, %v7616_v52, -inf  ;;  %v7640_v52 = vmul.f32 0.35355338, %v7355_v7 }
 0x18e   : > { %9691 = vst [vmem:[#allocation79_spill] sm:$0xff] %v7622_v37 }
 0x190   : > { %2106 = vmax.xlane.f32.xlu0 %v2105_v29  ;;  %v2216_v29 = vsel %vm1912_vm2, %v7622_v37, -inf  ;;  %v7646_v37 = vmul.f32 0.35355338, %v7364_v17 }
 0x191   : > { %2202 = vmax.xlane.f32.xlu1 %v2201_v14  ;;  %v7625_v14 = vmul.f32 0.35355338, %v7339_v54  ;;  %v7636_v54 = vmul.f32 0.35355338, %v7348_v25 }
 0x193   : > { %9692 = vst [vmem:[#allocation80_spill] sm:$0xff] %v7625_v14  ;;  %v2120_v39 = vsel %vm1912_vm2, %v7625_v14, -inf  ;;  %v396_v14 = vld [vmem:[%s7084_s24 + $0xc8] sm:$0xff] }
 0x194   : > { %2211 = vmax.xlane.f32.xlu0 %v2210_v58  ;;  %v7655_v7 = vpack.c.bf16 %v396_v14, %v395_v45 }
 0x195   : > { %2115 = vmax.xlane.f32.xlu1 %v2114_v51 }
 0x196   : > { %6096 = vmatprep.subr.bf16.mxu1 %v7655_v7 }
 0x198   : > { %2112 = vmax.xlane.f32.xlu0 %v2111_v6  ;;  %v387_v6 = vld [vmem:[%s7084_s24 + $0x80] sm:$0xff] }
 0x199   : > { %2208 = vmax.xlane.f32.xlu1 %v2207_v46  ;;  %v1918_v63 = vpop.xlane.xlu0 %1917  ;;  %v388_v46 = vld [vmem:[%s7084_s24 + $0x88] sm:$0xff] }
 0x19a   : > { %v2014_v58 = vpop.xlane.xlu1 %2013  ;;  %v2298_v51 = vsub.f32 %v7043_v50, %v1918_v63  ;;  %v7648_v0 = vpack.c.bf16 %v388_v46, %v387_v6  ;;  %v7653_v50 = vmul.f32 0.35355338, %v7357_v2  ;;  %v2213_v6 = vsel %vm1912_vm2, %v7640_v52, -inf }
 0x19b   : > { %v2330_v63 = vsub.f32 %v7045_v53, %v2014_v58  ;;  %v2222_v2 = vsel %vm1912_vm2, %v7646_v37, -inf  ;;  %v7670_v58 = vmul.f32 0.35355338, %v7366_v5 }
 0x19c   : > { %2217 = vmax.xlane.f32.xlu0 %v2216_v29  ;;  %v2427_v29 = vmul.f32 1.442695, %v2298_v51  ;;  %6080 = vmatprep.subr.bf16.mxu0 %v7648_v0  ;;  %v2126_v45 = vsel %vm1912_vm2, %v7653_v50, -inf }
 0x19d   : > { %2121 = vmax.xlane.f32.xlu1 %v2120_v39  ;;  %v1915_v38 = vpop.xlane.xlu0 %1914  ;;  %v2117_v39 = vsel %vm1912_vm2, %v7636_v54, -inf  ;;  %v2491_v14 = vmul.f32 1.442695, %v2330_v63 }
 0x19e   : > { %v2297_v25 = vsub.f32 %v7047_v55, %v1915_v38  ;;  %v1924_v35 = vpop.xlane.xlu1 %1923 }
 0x19f   : > { %v2300_v46 = vsub.f32 %v7053_v59, %v1924_v35  ;;  %v2123_v35 = vsel %vm1912_vm2, %v7670_v58, -inf }
 0x1a0   : > { %v2425_v17 = vmul.f32 1.442695, %v2297_v25  ;;  %2118 = vmax.xlane.f32.xlu0 %v2117_v39  ;;  %v7675_v25 = vmul.f32 0.35355338, %v7373_v19 }
 0x1a1   : > { %2214 = vmax.xlane.f32.xlu1 %v2213_v6  ;;  %v2011_v55 = vpop.xlane.xlu0 %2010  ;;  %v7678_v6 = vmul.f32 0.35355338, %v7382_v60  ;;  %v2431_v19 = vmul.f32 1.442695, %v2300_v46 }
 0x1a2   : > { %6119 = vpow2.f32 %v2425_v17  ;;  %v2329_v53 = vsub.f32 %v7057_v1, %v2011_v55  ;;  %v2020_v38 = vpop.xlane.xlu1 %2019  ;;  %v2219_v60 = vsel %vm1912_vm2, %v7675_v25, -inf }
 0x1a3   : > { %6121 = vpow2.f32 %v2427_v29  ;;  %v2332_v51 = vsub.f32 %v7055_v62, %v2020_v38  ;;  %v7682_v62 = vmul.f32 0.35355338, %v7375_v10  ;;  %v2228_v10 = vsel %vm1912_vm2, %v7678_v6, -inf }
 0x1a4   : > { %v2489_v39 = vmul.f32 1.442695, %v2329_v53  ;;  %2223 = vmax.xlane.f32.xlu0 %v2222_v2  ;;  %v389_v2 = vld [vmem:[%s7084_s24 + $0x90] sm:$0xff]  ;;  %v390_v53 = vld [vmem:[%s7084_s24 + $0x98] sm:$0xff] }
 0x1a5   : > { %v2495_v17 = vmul.f32 1.442695, %v2332_v51  ;;  %2127 = vmax.xlane.f32.xlu1 %v2126_v45  ;;  %v2017_v1 = vpop.xlane.xlu0 %2016  ;;  %v2132_v45 = vsel %vm1912_vm2, %v7682_v62, -inf }
 0x1a6   : > { %6123 = vpow2.f32 %v2489_v39  ;;  %v2331_v5 = vsub.f32 %v7065_v9, %v2017_v1  ;;  %v1921_v63 = vpop.xlane.xlu1 %1920  ;;  %v7703_v39 = vmul.f32 0.35355338, %v7391_v26 }
 0x1a7   : > { %6125 = vpow2.f32 %v2491_v14  ;;  %v2299_v59 = vsub.f32 %v7069_v11, %v1921_v63  ;;  %v7697_v14 = vmul.f32 0.35355338, %v7384_v48  ;;  %v7710_v63 = vmul.f32 0.35355338, %v7393_v20 }
 0x1a8   : > { %v2493_v29 = vmul.f32 1.442695, %v2331_v5  ;;  %2124 = vmax.xlane.f32.xlu0 %v2123_v35  ;;  %6127 = vpow2.f32 %v2495_v17  ;;  %9694 = vst [vmem:[#allocation82_spill] sm:$0xff] %v7703_v39 }
 0x1a9   : > { %v2429_v55 = vmul.f32 1.442695, %v2299_v59  ;;  %2220 = vmax.xlane.f32.xlu1 %v2219_v60  ;;  %v1927_v9 = vpop.xlane.xlu0 %1926  ;;  %9693 = vst [vmem:[#allocation81_spill] sm:$0xff] %v7697_v14  ;;  %9695 = vst [vmem:[#allocation83_spill] sm:$0xff] %v7710_v63  ;;  %v398_v59 = vld [vmem:[%s7084_s24 + $0xd8] sm:$0xff]  ;;  %v2129_v20 = vsel %vm1912_vm2, %v7697_v14, -inf }
 0x1aa   : > { %6129 = vpow2.f32 %v2493_v29  ;;  %v1930_v11 = vpop.xlane.xlu1 %1929  ;;  %v2301_v38 = vsub.f32 %v7071_v13, %v1927_v9  ;;  %v6083_v13 = vpack.c.bf16 %v390_v53, %v389_v2  ;;  %v391_v2 = vld [vmem:[%s7084_s24 + $0xa0] sm:$0xff]  ;;  %v392_v53 = vld [vmem:[%s7084_s24 + $0xa8] sm:$0xff] }
 0x1ab   : > { %6131 = vpow2.f32 %v2429_v55  ;;  %v2302_v51 = vsub.f32 %v7073_v16, %v1930_v11  ;;  %v397_v16 = vld [vmem:[%s7084_s24 + $0xd0] sm:$0xff] }
 0x1ac   : > { %v7700_v46 = vpop.eup %6119  ;;  %6133 = vpow2.f32 %v2431_v19  ;;  %v2433_v17 = vmul.f32 1.442695, %v2301_v38  ;;  %2229 = vmax.xlane.f32.xlu0 %v2228_v10  ;;  %v7718_v19 = vmul.f32 0.35355338, %v7400_v42  ;;  %v6099_v42 = vpack.c.bf16 %v398_v59, %v397_v16  ;;  %v9697_v38 = vld [vmem:[#allocation2_spill] sm:$0xff]  ;;  %v9700_v16 = vld [vmem:[#allocation3_spill] sm:$0xff] }
 0x1ad   : > { %v7705_v1 = vpop.eup %6121  ;;  %v2435_v5 = vmul.f32 1.442695, %v2302_v51  ;;  %2133 = vmax.xlane.f32.xlu1 %v2132_v45  ;;  %5711 = vmatprep.mubr.msk.f32.mxu0 %vm1912_vm2, %v7700_v46  ;;  %v2023_v48 = vpop.xlane.xlu0 %2022 }
 0x1ae   : > { %6135 = vpow2.f32 %v2433_v17  ;;  %v2026_v35 = vpop.xlane.xlu1 %2025  ;;  %v2333_v26 = vsub.f32 %v7086_v21, %v2023_v48  ;;  %5712 = vmatmul.mubr.msk.f32.vlgmr.msra.gmra.mrb[64].mxu0 %vm1912_vm2, %v7705_v1  ;;  %9696 = vst [vmem:[#allocation84_spill] sm:$0xff] %v7718_v19  ;;  %v2225_v21 = vsel %vm1912_vm2, %v7703_v39, -inf  ;;  %v2234_v51 = vsel %vm1912_vm2, %v7718_v19, -inf  ;;  %v402_v19 = vld [vmem:[%s7084_s24 + $0xf8] sm:$0xff] }
 0x1af   : > { %6137 = vpow2.f32 %v2435_v5  ;;  %v2334_v29 = vsub.f32 %v7092_v24, %v2026_v35  ;;  %6082 = vmatpush3.bf16.msra.mxu0 %v7648_v0  ;;  %v2138_v0 = vsel %vm1912_vm2, %v7710_v63, -inf  ;;  %v9698_v5 = vld [vmem:[#allocation35_spill] sm:$0xff]  ;;  %v399_v35 = vld [vmem:[%s7084_s24 + $0xe0] sm:$0xff] }
 0x1b0   : > { %v7724_v60 = vpop.eup %6123  ;;  %v2497_v55 = vmul.f32 1.442695, %v2333_v26  ;;  %2130 = vmax.xlane.f32.xlu0 %v2129_v20  ;;  %6084 = vmatprep.subr.bf16.mxu0 %v6083_v13  ;;  %v7744_v48 = vmul.f32 0.35355338, %v9698_v5  ;;  %v400_v26 = vld [vmem:[%s7084_s24 + $0xe8] sm:$0xff]  ;;  %v9706_v5 = vld [vmem:[#allocation5_spill] sm:$0xff] }
 0x1b1   : > { %v7728_v9 = vpop.eup %6125  ;;  %v2499_v10 = vmul.f32 1.442695, %v2334_v29  ;;  %2226 = vmax.xlane.f32.xlu1 %v2225_v21  ;;  %5775 = vmatprep.mubr.msk.f32.mxu1 %vm1912_vm2, %v7724_v60  ;;  %v1933_v24 = vpop.xlane.xlu0 %1932  ;;  %v7753_v20 = vmul.f32 0.35355338, %v7409_v40  ;;  %v6087_v21 = vpack.c.bf16 %v392_v53, %v391_v2  ;;  %v394_v40 = vld [vmem:[%s7084_s24 + $0xb8] sm:$0xff]  ;;  %v9703_v2 = vld [vmem:[#allocation4_spill] sm:$0xff] }
 0x1b2   : > { %6139 = vpow2.f32 %v2497_v55  ;;  %v1936_v11 = vpop.xlane.xlu1 %1935  ;;  %v2303_v45 = vsub.f32 %v9697_v38, %v1933_v24  ;;  %5776 = vmatmul.mubr.msk.f32.vlgmr.msra.gmra.mrb[64].mxu1 %vm1912_vm2, %v7728_v9  ;;  %v7741_v17 = vpop.eup %6127  ;;  %9699 = vst [vmem:[#allocation2_spill] sm:$0xff] %v7744_v48 }
 0x1b3   : > { %6141 = vpow2.f32 %v2499_v10  ;;  %v2304_v59 = vsub.f32 %v9700_v16, %v1936_v11  ;;  %6098 = vmatpush3.bf16.msra.mxu1 %v7655_v7  ;;  %6086 = vmatpush3.bf16.msra.mxu0 %v6083_v13  ;;  %9701 = vst [vmem:[#allocation35_spill] sm:$0xff] %v7753_v20  ;;  %v7760_v13 = vmul.f32 0.35355338, %v7411_v31  ;;  %v393_v11 = vld [vmem:[%s7084_s24 + $0xb0] sm:$0xff]  ;;  %v6103_v31 = vpack.c.bf16 %v400_v26, %v399_v35 }
 0x1b4   : > { %v7750_v29 = vpop.eup %6129  ;;  %v2437_v55 = vmul.f32 1.442695, %v2303_v45  ;;  %2139 = vmax.xlane.f32.xlu0 %v2138_v0  ;;  %6100 = vmatprep.subr.bf16.mxu1 %v6099_v42  ;;  %v9704_v45 = vld [vmem:[#allocation38_spill] sm:$0xff]  ;;  %v6091_v35 = vpack.c.bf16 %v394_v40, %v393_v11  ;;  %v9708_v40 = vld [vmem:[#allocation39_spill] sm:$0xff] }
 0x1b5   : > { %v7755_v10 = vpop.eup %6131  ;;  %v2439_v24 = vmul.f32 1.442695, %v2304_v59  ;;  %2235 = vmax.xlane.f32.xlu1 %v2234_v51  ;;  %5778 = vmatprep.mubr.msk.f32.mxu1 %vm1912_vm2, %v7750_v29  ;;  %v2029_v7 = vpop.xlane.xlu0 %2028  ;;  %9702 = vst [vmem:[#allocation3_spill] sm:$0xff] %v7760_v13  ;;  %v7772_v51 = vmul.f32 0.35355338, %v9704_v45  ;;  %v2135_v59 = vsel %vm1912_vm2, %v7744_v48, -inf }
 0x1b6   : > { %v7764_v38 = vpop.eup %6133  ;;  %6143 = vpow2.f32 %v2437_v55  ;;  %5714 = vmatprep.mubr.msk.f32.mxu0 %vm1912_vm2, %v7755_v10  ;;  %v2032_v0 = vpop.xlane.xlu1 %2031  ;;  %v2335_v53 = vsub.f32 %v9703_v2, %v2029_v7  ;;  %5779 = vmatmul.mubr.msk.f32.gmra.mrb[66].mxu1 %vm1912_vm2, %v7741_v17  ;;  %v401_v55 = vld [vmem:[%s7084_s24 + $0xf0] sm:$0xff]  ;;  %v2231_v45 = vsel %vm1912_vm2, %v7753_v20, -inf }
 0x1b7   : > { %9705 = vst [vmem:[#allocation4_spill] sm:$0xff] %v7772_v51  ;;  %6145 = vpow2.f32 %v2439_v24  ;;  %v2336_v16 = vsub.f32 %v9706_v5, %v2032_v0  ;;  %5715 = vmatmul.mubr.msk.f32.gmra.mrb[66].mxu0 %vm1912_vm2, %v7764_v38  ;;  %6102 = vmatpush3.bf16.msra.mxu1 %v6099_v42  ;;  %v2144_v42 = vsel %vm1912_vm2, %v7760_v13, -inf  ;;  %v6107_v11 = vpack.c.bf16 %v402_v19, %v401_v55 }
 0x1b8   : > { %v7781_v7 = vpop.eup %6135  ;;  %v2501_v2 = vmul.f32 1.442695, %v2335_v53  ;;  %2136 = vmax.xlane.f32.xlu0 %v2135_v59  ;;  %6088 = vmatprep.subr.bf16.mxu0 %v6087_v21  ;;  %v9707_v53 = vld [vmem:[#allocation6_spill] sm:$0xff]  ;;  %v2240_v59 = vsel %vm1912_vm2, %v7772_v51, -inf }
 0x1b9   : > { %v7785_v26 = vpop.eup %6137  ;;  %v2503_v24 = vmul.f32 1.442695, %v2336_v16  ;;  %2232 = vmax.xlane.f32.xlu1 %v2231_v45  ;;  %5717 = vmatprep.mubr.msk.f32.mxu0 %vm1912_vm2, %v7781_v7  ;;  %v1939_v0 = vpop.xlane.xlu0 %1938  ;;  %v7795_v16 = vmul.f32 0.35355338, %v9708_v40  ;;  %v9710_v45 = vld [vmem:[#allocation7_spill] sm:$0xff] }
 0x1ba   : > { %6147 = vpow2.f32 %v2501_v2  ;;  %v1942_v5 = vpop.xlane.xlu1 %1941  ;;  %v2305_v48 = vsub.f32 %v9707_v53, %v1939_v0  ;;  %6104 = vmatprep.subr.bf16.mxu1 %v6103_v31  ;;  %6090 = vmatpush3.bf16.msra.mxu0 %v6087_v21  ;;  %v7803_v0 = vmul.f32 0.35355338, %v7427_v49  ;;  %v9714_v49 = vld [vmem:[#allocation42_spill] sm:$0xff] }
 0x1bb   : > { %6149 = vpow2.f32 %v2503_v24  ;;  %9709 = vst [vmem:[#allocation38_spill] sm:$0xff] %v7795_v16  ;;  %v2306_v20 = vsub.f32 %v9710_v45, %v1942_v5  ;;  %5718 = vmatmul.mubr.msk.f32.gmra.mrb[68].mxu0 %vm1912_vm2, %v7785_v26  ;;  %6106 = vmatpush3.bf16.msra.mxu1 %v6103_v31  ;;  %v7810_v24 = vmul.f32 0.35355338, %v7429_v41  ;;  %v9713_v5 = vld [vmem:[#allocation8_spill] sm:$0xff] }
 0x1bc   : > { %v7800_v2 = vpop.eup %6139  ;;  %9711 = vst [vmem:[#allocation5_spill] sm:$0xff] %v7803_v0  ;;  %v2441_v53 = vmul.f32 1.442695, %v2305_v48  ;;  %2145 = vmax.xlane.f32.xlu0 %v2144_v42  ;;  %6092 = vmatprep.subr.bf16.mxu0 %v6091_v35  ;;  %v7816_v48 = vmul.f32 0.35355338, %v9714_v49 }
 0x1bd   : > { %v7805_v21 = vpop.eup %6141  ;;  %v2443_v19 = vmul.f32 1.442695, %v2306_v20  ;;  %2241 = vmax.xlane.f32.xlu1 %v2240_v59  ;;  %5781 = vmatprep.mubr.msk.f32.mxu1 %vm1912_vm2, %v7800_v2  ;;  %v2035_v55 = vpop.xlane.xlu0 %2034  ;;  %9712 = vst [vmem:[#allocation6_spill] sm:$0xff] %v7810_v24  ;;  %v9716_v20 = vld [vmem:[#allocation9_spill] sm:$0xff]  ;;  %v2141_v59 = vsel %vm1912_vm2, %v7795_v16, -inf }
 0x1be   : > { %6151 = vpow2.f32 %v2441_v53  ;;  %v2038_v31 = vpop.xlane.xlu1 %2037  ;;  %v2337_v40 = vsub.f32 %v9713_v5, %v2035_v55  ;;  %5782 = vmatmul.mubr.msk.f32.gmra.mrb[68].mxu1 %vm1912_vm2, %v7805_v21  ;;  %9715 = vst [vmem:[#allocation39_spill] sm:$0xff] %v7816_v48  ;;  %6108 = vmatprep.subr.bf16.mxu1 %v6107_v11  ;;  %v2237_v53 = vsel %vm1912_vm2, %v7803_v0, -inf }
 0x1bf   : > { %6153 = vpow2.f32 %v2443_v19  ;;  %v2338_v42 = vsub.f32 %v9716_v20, %v2038_v31  ;;  %6094 = vmatpush3.bf16.msra.mxu0 %v6091_v35  ;;  %6110 = vmatpush3.bf16.msra.mxu1 %v6107_v11  ;;  %v2150_v31 = vsel %vm1912_vm2, %v7810_v24, -inf  ;;  %v9717_v11 = vld [vmem:[#allocation10_spill] sm:$0xff]  ;;  %v9718_v20 = vld [vmem:[#allocation43_spill] sm:$0xff]  ;;  %v7843_v24 = vmul.f32 0.35355338, %v7445_v57 }
 0x1c0   : > { %v7821_v41 = vpop.eup %6143  ;;  %v2505_v45 = vmul.f32 1.442695, %v2337_v40  ;;  %2142 = vmax.xlane.f32.xlu0 %v2141_v59  ;;  %v2246_v40 = vsel %vm1912_vm2, %v7816_v48, -inf  ;;  %v9720_v59 = vld [vmem:[#allocation11_spill] sm:$0xff]  ;;  %v9724_v57 = vld [vmem:[#allocation46_spill] sm:$0xff] }
 0x1c1   : > { %v7825_v55 = vpop.eup %6145  ;;  %v2507_v5 = vmul.f32 1.442695, %v2338_v42  ;;  %2238 = vmax.xlane.f32.xlu1 %v2237_v53  ;;  %5720 = vmatprep.mubr.msk.f32.mxu0 %vm1912_vm2, %v7821_v41  ;;  %v1945_v19 = vpop.xlane.xlu0 %1944  ;;  %v7837_v42 = vmul.f32 0.35355338, %v9718_v20  ;;  %9721 = vst [vmem:[#allocation8_spill] sm:$0xff] %v7843_v24 }
 0x1c2   : > { %6155 = vpow2.f32 %v2505_v45  ;;  %v1948_v35 = vpop.xlane.xlu1 %1947  ;;  %v2307_v49 = vsub.f32 %v9717_v11, %v1945_v19  ;;  %5721 = vmatmul.mubr.msk.f32.gmra.mrb[70].mxu0 %vm1912_vm2, %v7825_v55  ;;  %v7850_v20 = vmul.f32 0.35355338, %v7447_v32 }
 0x1c3   : > { %6157 = vpow2.f32 %v2507_v5  ;;  %9719 = vst [vmem:[#allocation7_spill] sm:$0xff] %v7837_v42  ;;  %v2308_v53 = vsub.f32 %v9720_v59, %v1948_v35  ;;  %v9723_v59 = vld [vmem:[#allocation12_spill] sm:$0xff] }
 0x1c4   : > { %v7840_v0 = vpop.eup %6147  ;;  %v2445_v45 = vmul.f32 1.442695, %v2307_v49  ;;  %2151 = vmax.xlane.f32.xlu0 %v2150_v31  ;;  %9722 = vst [vmem:[#allocation42_spill] sm:$0xff] %v7850_v20  ;;  %v7856_v31 = vmul.f32 0.35355338, %v9724_v57  ;;  %v9726_v49 = vld [vmem:[#allocation13_spill] sm:$0xff] }
 0x1c5   : > { %v7845_v19 = vpop.eup %6149  ;;  %v2447_v11 = vmul.f32 1.442695, %v2308_v53  ;;  %2247 = vmax.xlane.f32.xlu1 %v2246_v40  ;;  %5784 = vmatprep.mubr.msk.f32.mxu1 %vm1912_vm2, %v7840_v0  ;;  %v2041_v5 = vpop.xlane.xlu0 %2040  ;;  %v2147_v53 = vsel %vm1912_vm2, %v7837_v42, -inf }
 0x1c6   : > { %6159 = vpow2.f32 %v2445_v45  ;;  %v2044_v35 = vpop.xlane.xlu1 %2043  ;;  %v2339_v48 = vsub.f32 %v9723_v59, %v2041_v5  ;;  %5785 = vmatmul.mubr.msk.f32.gmra.mrb[70].mxu1 %vm1912_vm2, %v7845_v19  ;;  %9725 = vst [vmem:[#allocation9_spill] sm:$0xff] %v7856_v31  ;;  %v2243_v45 = vsel %vm1912_vm2, %v7843_v24, -inf }
 0x1c7   : > { %6161 = vpow2.f32 %v2447_v11  ;;  %v2340_v40 = vsub.f32 %v9726_v49, %v2044_v35  ;;  %v2156_v35 = vsel %vm1912_vm2, %v7850_v20, -inf  ;;  %v9727_v49 = vld [vmem:[#allocation14_spill] sm:$0xff]  ;;  %v7883_v20 = vmul.f32 0.35355338, %v7463_v3 }
 0x1c8   : > { %v7861_v16 = vpop.eup %6151  ;;  %v2509_v32 = vmul.f32 1.442695, %v2339_v48  ;;  %2148 = vmax.xlane.f32.xlu0 %v2147_v53  ;;  %v2252_v48 = vsel %vm1912_vm2, %v7856_v31, -inf  ;;  %v9734_v3 = vld [vmem:[#allocation50_spill] sm:$0xff] }
 0x1c9   : > { %v7865_v5 = vpop.eup %6153  ;;  %v2511_v59 = vmul.f32 1.442695, %v2340_v40  ;;  %2244 = vmax.xlane.f32.xlu1 %v2243_v45  ;;  %5723 = vmatprep.mubr.msk.f32.mxu0 %vm1912_vm2, %v7861_v16  ;;  %v1951_v11 = vpop.xlane.xlu0 %1950  ;;  %v9728_v40 = vld [vmem:[#allocation47_spill] sm:$0xff]  ;;  %9731 = vst [vmem:[#allocation43_spill] sm:$0xff] %v7883_v20 }
 0x1ca   : > { %6163 = vpow2.f32 %v2509_v32  ;;  %v1954_v57 = vpop.xlane.xlu1 %1953  ;;  %v2309_v42 = vsub.f32 %v9727_v49, %v1951_v11  ;;  %5724 = vmatmul.mubr.msk.f32.gmra.mrb[72].mxu0 %vm1912_vm2, %v7865_v5  ;;  %v7877_v53 = vmul.f32 0.35355338, %v9728_v40  ;;  %v9730_v45 = vld [vmem:[#allocation15_spill] sm:$0xff]  ;;  %v7890_v40 = vmul.f32 0.35355338, %v7465_v27 }
 0x1cb   : > { %6165 = vpow2.f32 %v2511_v59  ;;  %v2310_v24 = vsub.f32 %v9730_v45, %v1954_v57  ;;  %v9733_v45 = vld [vmem:[#allocation16_spill] sm:$0xff] }
 0x1cc   : > { %9729 = vst [vmem:[#allocation10_spill] sm:$0xff] %v7877_v53  ;;  %v7880_v51 = vpop.eup %6155  ;;  %v2449_v32 = vmul.f32 1.442695, %v2309_v42  ;;  %2157 = vmax.xlane.f32.xlu0 %v2156_v35  ;;  %9732 = vst [vmem:[#allocation11_spill] sm:$0xff] %v7890_v40  ;;  %v7896_v42 = vmul.f32 0.35355338, %v9734_v3 }
 0x1cd   : > { %v7885_v11 = vpop.eup %6157  ;;  %v2451_v49 = vmul.f32 1.442695, %v2310_v24  ;;  %2253 = vmax.xlane.f32.xlu1 %v2252_v48  ;;  %5787 = vmatprep.mubr.msk.f32.mxu1 %vm1912_vm2, %v7880_v51  ;;  %v2047_v59 = vpop.xlane.xlu0 %2046  ;;  %v9736_v24 = vld [vmem:[#allocation17_spill] sm:$0xff]  ;;  %v2153_v48 = vsel %vm1912_vm2, %v7877_v53, -inf }
 0x1ce   : > { %6167 = vpow2.f32 %v2449_v32  ;;  %v2050_v57 = vpop.xlane.xlu1 %2049  ;;  %v2341_v31 = vsub.f32 %v9733_v45, %v2047_v59  ;;  %5788 = vmatmul.mubr.msk.f32.gmra.mrb[72].mxu1 %vm1912_vm2, %v7885_v11  ;;  %9735 = vst [vmem:[#allocation12_spill] sm:$0xff] %v7896_v42  ;;  %v2249_v32 = vsel %vm1912_vm2, %v7883_v20, -inf }
 0x1cf   : > { %6169 = vpow2.f32 %v2451_v49  ;;  %v2342_v35 = vsub.f32 %v9736_v24, %v2050_v57  ;;  %v2162_v57 = vsel %vm1912_vm2, %v7890_v40, -inf  ;;  %v9737_v24 = vld [vmem:[#allocation18_spill] sm:$0xff]  ;;  %v7923_v40 = vmul.f32 0.35355338, %v7481_v8 }
 0x1d0   : > { %v7901_v13 = vpop.eup %6159  ;;  %v2513_v27 = vmul.f32 1.442695, %v2341_v31  ;;  %2154 = vmax.xlane.f32.xlu0 %v2153_v48  ;;  %v2258_v31 = vsel %vm1912_vm2, %v7896_v42, -inf  ;;  %v9744_v8 = vld [vmem:[#allocation54_spill] sm:$0xff] }
 0x1d1   : > { %v7905_v59 = vpop.eup %6161  ;;  %v2515_v45 = vmul.f32 1.442695, %v2342_v35  ;;  %2250 = vmax.xlane.f32.xlu1 %v2249_v32  ;;  %5726 = vmatprep.mubr.msk.f32.mxu0 %vm1912_vm2, %v7901_v13  ;;  %v1957_v49 = vpop.xlane.xlu0 %1956  ;;  %v9738_v35 = vld [vmem:[#allocation51_spill] sm:$0xff]  ;;  %9741 = vst [vmem:[#allocation13_spill] sm:$0xff] %v7923_v40 }
 0x1d2   : > { %6171 = vpow2.f32 %v2513_v27  ;;  %v1960_v3 = vpop.xlane.xlu1 %1959  ;;  %v2311_v53 = vsub.f32 %v9737_v24, %v1957_v49  ;;  %5727 = vmatmul.mubr.msk.f32.gmra.mrb[74].mxu0 %vm1912_vm2, %v7905_v59  ;;  %v7917_v48 = vmul.f32 0.35355338, %v9738_v35  ;;  %v9740_v32 = vld [vmem:[#allocation19_spill] sm:$0xff]  ;;  %v7930_v35 = vmul.f32 0.35355338, %v7483_v4 }
 0x1d3   : > { %6173 = vpow2.f32 %v2515_v45  ;;  %v2312_v20 = vsub.f32 %v9740_v32, %v1960_v3  ;;  %v9743_v32 = vld [vmem:[#allocation20_spill] sm:$0xff] }
 0x1d4   : > { %9739 = vst [vmem:[#allocation46_spill] sm:$0xff] %v7917_v48  ;;  %v7920_v63 = vpop.eup %6163  ;;  %v2453_v27 = vmul.f32 1.442695, %v2311_v53  ;;  %2163 = vmax.xlane.f32.xlu0 %v2162_v57  ;;  %9742 = vst [vmem:[#allocation14_spill] sm:$0xff] %v7930_v35  ;;  %v7936_v53 = vmul.f32 0.35355338, %v9744_v8 }
 0x1d5   : > { %v7925_v49 = vpop.eup %6165  ;;  %v2455_v24 = vmul.f32 1.442695, %v2312_v20  ;;  %2259 = vmax.xlane.f32.xlu1 %v2258_v31  ;;  %5790 = vmatprep.mubr.msk.f32.mxu1 %vm1912_vm2, %v7920_v63  ;;  %v2053_v45 = vpop.xlane.xlu0 %2052  ;;  %v9746_v20 = vld [vmem:[#allocation21_spill] sm:$0xff]  ;;  %v2159_v31 = vsel %vm1912_vm2, %v7917_v48, -inf }
 0x1d6   : > { %6175 = vpow2.f32 %v2453_v27  ;;  %v2056_v3 = vpop.xlane.xlu1 %2055  ;;  %v2343_v42 = vsub.f32 %v9743_v32, %v2053_v45  ;;  %5791 = vmatmul.mubr.msk.f32.gmra.mrb[74].mxu1 %vm1912_vm2, %v7925_v49  ;;  %9745 = vst [vmem:[#allocation47_spill] sm:$0xff] %v7936_v53  ;;  %v2255_v27 = vsel %vm1912_vm2, %v7923_v40, -inf }
 0x1d7   : > { %6177 = vpow2.f32 %v2455_v24  ;;  %v2344_v57 = vsub.f32 %v9746_v20, %v2056_v3  ;;  %v2168_v3 = vsel %vm1912_vm2, %v7930_v35, -inf  ;;  %v9747_v20 = vld [vmem:[#allocation22_spill] sm:$0xff]  ;;  %v7963_v35 = vmul.f32 0.35355338, %v7499_v15 }
 0x1d8   : > { %v7941_v39 = vpop.eup %6167  ;;  %v2517_v4 = vmul.f32 1.442695, %v2343_v42  ;;  %2160 = vmax.xlane.f32.xlu0 %v2159_v31  ;;  %v2264_v42 = vsel %vm1912_vm2, %v7936_v53, -inf  ;;  %v9755_v15 = vld [vmem:[#allocation58_spill] sm:$0xff] }
 0x1d9   : > { %v7945_v45 = vpop.eup %6169  ;;  %v2519_v32 = vmul.f32 1.442695, %v2344_v57  ;;  %2256 = vmax.xlane.f32.xlu1 %v2255_v27  ;;  %5729 = vmatprep.mubr.msk.f32.mxu0 %vm1912_vm2, %v7941_v39  ;;  %v1963_v24 = vpop.xlane.xlu0 %1962  ;;  %v9748_v57 = vld [vmem:[#allocation55_spill] sm:$0xff]  ;;  %9752 = vst [vmem:[#allocation50_spill] sm:$0xff] %v7963_v35 }
 0x1da   : > { %6179 = vpow2.f32 %v2517_v4  ;;  %v1966_v8 = vpop.xlane.xlu1 %1965  ;;  %v2313_v48 = vsub.f32 %v9747_v20, %v1963_v24  ;;  %5730 = vmatmul.mubr.msk.f32.gmra.mrb[76].mxu0 %vm1912_vm2, %v7945_v45  ;;  %v7957_v31 = vmul.f32 0.35355338, %v9748_v57  ;;  %v9750_v27 = vld [vmem:[#allocation23_spill] sm:$0xff]  ;;  %v7970_v57 = vmul.f32 0.35355338, %v7501_v33 }
 0x1db   : > { %6181 = vpow2.f32 %v2519_v32  ;;  %v2314_v40 = vsub.f32 %v9750_v27, %v1966_v8  ;;  %v9754_v27 = vld [vmem:[#allocation24_spill] sm:$0xff] }
 0x1dc   : > { %9749 = vst [vmem:[#allocation15_spill] sm:$0xff] %v7957_v31  ;;  %v7960_v14 = vpop.eup %6171  ;;  %v2457_v4 = vmul.f32 1.442695, %v2313_v48  ;;  %2169 = vmax.xlane.f32.xlu0 %v2168_v3  ;;  %9753 = vst [vmem:[#allocation17_spill] sm:$0xff] %v7970_v57  ;;  %v7976_v48 = vmul.f32 0.35355338, %v9755_v15 }
 0x1dd   : > { %9751 = vst [vmem:[#allocation16_spill] sm:$0xff] %v7960_v14  ;;  %v7965_v24 = vpop.eup %6173  ;;  %v2459_v20 = vmul.f32 1.442695, %v2314_v40  ;;  %2265 = vmax.xlane.f32.xlu1 %v2264_v42  ;;  %5793 = vmatprep.mubr.msk.f32.mxu1 %vm1912_vm2, %v7960_v14  ;;  %v2059_v32 = vpop.xlane.xlu0 %2058  ;;  %v9757_v40 = vld [vmem:[#allocation25_spill] sm:$0xff]  ;;  %v2165_v42 = vsel %vm1912_vm2, %v7957_v31, -inf }
 0x1de   : > { %6183 = vpow2.f32 %v2457_v4  ;;  %v2062_v8 = vpop.xlane.xlu1 %2061  ;;  %v2345_v53 = vsub.f32 %v9754_v27, %v2059_v32  ;;  %5794 = vmatmul.mubr.msk.f32.gmra.mrb[76].mxu1 %vm1912_vm2, %v7965_v24  ;;  %9756 = vst [vmem:[#allocation18_spill] sm:$0xff] %v7976_v48  ;;  %v2261_v4 = vsel %vm1912_vm2, %v7963_v35, -inf }
 0x1df   : > { %6185 = vpow2.f32 %v2459_v20  ;;  %v2346_v3 = vsub.f32 %v9757_v40, %v2062_v8  ;;  %v2174_v8 = vsel %vm1912_vm2, %v7970_v57, -inf  ;;  %v9759_v40 = vld [vmem:[#allocation26_spill] sm:$0xff]  ;;  %v8003_v57 = vmul.f32 0.35355338, %v7517_v23 }
 0x1e0   : > { %v7981_v14 = vpop.eup %6175  ;;  %v2521_v33 = vmul.f32 1.442695, %v2345_v53  ;;  %2166 = vmax.xlane.f32.xlu0 %v2165_v42  ;;  %v2270_v53 = vsel %vm1912_vm2, %v7976_v48, -inf  ;;  %v9767_v23 = vld [vmem:[#allocation62_spill] sm:$0xff] }
 0x1e1   : > { %9758 = vst [vmem:[#allocation51_spill] sm:$0xff] %v7981_v14  ;;  %v7985_v32 = vpop.eup %6177  ;;  %v2523_v27 = vmul.f32 1.442695, %v2346_v3  ;;  %2262 = vmax.xlane.f32.xlu1 %v2261_v4  ;;  %5732 = vmatprep.mubr.msk.f32.mxu0 %vm1912_vm2, %v7981_v14  ;;  %v1969_v20 = vpop.xlane.xlu0 %1968  ;;  %v9760_v3 = vld [vmem:[#allocation59_spill] sm:$0xff]  ;;  %9764 = vst [vmem:[#allocation54_spill] sm:$0xff] %v8003_v57 }
 0x1e2   : > { %6187 = vpow2.f32 %v2521_v33  ;;  %v1972_v15 = vpop.xlane.xlu1 %1971  ;;  %v2315_v31 = vsub.f32 %v9759_v40, %v1969_v20  ;;  %5733 = vmatmul.mubr.msk.f32.gmra.mrb[78].mxu0 %vm1912_vm2, %v7985_v32  ;;  %v7997_v42 = vmul.f32 0.35355338, %v9760_v3  ;;  %v9762_v4 = vld [vmem:[#allocation27_spill] sm:$0xff]  ;;  %v8010_v3 = vmul.f32 0.35355338, %v7519_v18 }
 0x1e3   : > { %6189 = vpow2.f32 %v2523_v27  ;;  %v2316_v35 = vsub.f32 %v9762_v4, %v1972_v15  ;;  %v9766_v4 = vld [vmem:[#allocation28_spill] sm:$0xff] }
 0x1e4   : > { %9761 = vst [vmem:[#allocation19_spill] sm:$0xff] %v7997_v42  ;;  %v8000_v14 = vpop.eup %6179  ;;  %v2461_v33 = vmul.f32 1.442695, %v2315_v31  ;;  %2175 = vmax.xlane.f32.xlu0 %v2174_v8  ;;  %9765 = vst [vmem:[#allocation21_spill] sm:$0xff] %v8010_v3  ;;  %v8016_v31 = vmul.f32 0.35355338, %v9767_v23 }
 0x1e5   : > { %9763 = vst [vmem:[#allocation20_spill] sm:$0xff] %v8000_v14  ;;  %v8005_v20 = vpop.eup %6181  ;;  %v2463_v40 = vmul.f32 1.442695, %v2316_v35  ;;  %2271 = vmax.xlane.f32.xlu1 %v2270_v53  ;;  %5796 = vmatprep.mubr.msk.f32.mxu1 %vm1912_vm2, %v8000_v14  ;;  %v2065_v27 = vpop.xlane.xlu0 %2064  ;;  %v9769_v35 = vld [vmem:[#allocation29_spill] sm:$0xff]  ;;  %v2171_v53 = vsel %vm1912_vm2, %v7997_v42, -inf }
 0x1e6   : > { %6191 = vpow2.f32 %v2461_v33  ;;  %v2068_v15 = vpop.xlane.xlu1 %2067  ;;  %v2347_v48 = vsub.f32 %v9766_v4, %v2065_v27  ;;  %5797 = vmatmul.mubr.msk.f32.gmra.mrb[78].mxu1 %vm1912_vm2, %v8005_v20  ;;  %9768 = vst [vmem:[#allocation22_spill] sm:$0xff] %v8016_v31  ;;  %v2267_v33 = vsel %vm1912_vm2, %v8003_v57, -inf }
 0x1e7   : > { %6193 = vpow2.f32 %v2463_v40  ;;  %v2348_v8 = vsub.f32 %v9769_v35, %v2068_v15  ;;  %v2180_v15 = vsel %vm1912_vm2, %v8010_v3, -inf  ;;  %v9771_v35 = vld [vmem:[#allocation30_spill] sm:$0xff]  ;;  %v8043_v3 = vmul.f32 0.35355338, %v7535_v34 }
 0x1e8   : > { %v8021_v14 = vpop.eup %6183  ;;  %v2525_v18 = vmul.f32 1.442695, %v2347_v48  ;;  %2172 = vmax.xlane.f32.xlu0 %v2171_v53  ;;  %v2276_v48 = vsel %vm1912_vm2, %v8016_v31, -inf  ;;  %v9779_v34 = vld [vmem:[#allocation66_spill] sm:$0xff] }
 0x1e9   : > { %9770 = vst [vmem:[#allocation55_spill] sm:$0xff] %v8021_v14  ;;  %v8025_v27 = vpop.eup %6185  ;;  %v2527_v4 = vmul.f32 1.442695, %v2348_v8  ;;  %2268 = vmax.xlane.f32.xlu1 %v2267_v33  ;;  %5735 = vmatprep.mubr.msk.f32.mxu0 %vm1912_vm2, %v8021_v14  ;;  %v1975_v40 = vpop.xlane.xlu0 %1974  ;;  %v9772_v8 = vld [vmem:[#allocation63_spill] sm:$0xff]  ;;  %9776 = vst [vmem:[#allocation58_spill] sm:$0xff] %v8043_v3 }
 0x1ea   : > { %6195 = vpow2.f32 %v2525_v18  ;;  %v1978_v23 = vpop.xlane.xlu1 %1977  ;;  %v2317_v42 = vsub.f32 %v9771_v35, %v1975_v40  ;;  %5736 = vmatmul.mubr.msk.f32.gmra.mrb[80].mxu0 %vm1912_vm2, %v8025_v27  ;;  %v8037_v53 = vmul.f32 0.35355338, %v9772_v8  ;;  %v9774_v33 = vld [vmem:[#allocation31_spill] sm:$0xff]  ;;  %v8050_v8 = vmul.f32 0.35355338, %v7537_v28 }
 0x1eb   : > { %6197 = vpow2.f32 %v2527_v4  ;;  %v2318_v57 = vsub.f32 %v9774_v33, %v1978_v23  ;;  %v9778_v33 = vld [vmem:[#allocation32_spill] sm:$0xff] }
 0x1ec   : > { %9773 = vst [vmem:[#allocation23_spill] sm:$0xff] %v8037_v53  ;;  %v8040_v14 = vpop.eup %6187  ;;  %v2465_v18 = vmul.f32 1.442695, %v2317_v42  ;;  %2181 = vmax.xlane.f32.xlu0 %v2180_v15  ;;  %9777 = vst [vmem:[#allocation25_spill] sm:$0xff] %v8050_v8  ;;  %v8056_v42 = vmul.f32 0.35355338, %v9779_v34 }
 0x1ed   : > { %9775 = vst [vmem:[#allocation24_spill] sm:$0xff] %v8040_v14  ;;  %v8045_v40 = vpop.eup %6189  ;;  %v2467_v35 = vmul.f32 1.442695, %v2318_v57  ;;  %2277 = vmax.xlane.f32.xlu1 %v2276_v48  ;;  %5799 = vmatprep.mubr.msk.f32.mxu1 %vm1912_vm2, %v8040_v14  ;;  %v2071_v4 = vpop.xlane.xlu0 %2070  ;;  %v9781_v57 = vld [vmem:[#allocation33_spill] sm:$0xff]  ;;  %v2177_v48 = vsel %vm1912_vm2, %v8037_v53, -inf }
 0x1ee   : > { %6199 = vpow2.f32 %v2465_v18  ;;  %v2074_v23 = vpop.xlane.xlu1 %2073  ;;  %v2349_v31 = vsub.f32 %v9778_v33, %v2071_v4  ;;  %5800 = vmatmul.mubr.msk.f32.gmra.mrb[80].mxu1 %vm1912_vm2, %v8045_v40  ;;  %9780 = vst [vmem:[#allocation26_spill] sm:$0xff] %v8056_v42  ;;  %v2273_v18 = vsel %vm1912_vm2, %v8043_v3, -inf }
 0x1ef   : > { %6201 = vpow2.f32 %v2467_v35  ;;  %v2350_v15 = vsub.f32 %v9781_v57, %v2074_v23  ;;  %v2186_v23 = vsel %vm1912_vm2, %v8050_v8, -inf  ;;  %v9783_v57 = vld [vmem:[#allocation34_spill] sm:$0xff]  ;;  %v8083_v8 = vmul.f32 0.35355338, %v7553_v43 }
 0x1f0   : > { %v8061_v14 = vpop.eup %6191  ;;  %v2529_v28 = vmul.f32 1.442695, %v2349_v31  ;;  %2178 = vmax.xlane.f32.xlu0 %v2177_v48  ;;  %v2282_v31 = vsel %vm1912_vm2, %v8056_v42, -inf  ;;  %v9791_v43 = vld [vmem:[#allocation70_spill] sm:$0xff] }
 0x1f1   : > { %9782 = vst [vmem:[#allocation59_spill] sm:$0xff] %v8061_v14  ;;  %v8065_v4 = vpop.eup %6193  ;;  %v2531_v33 = vmul.f32 1.442695, %v2350_v15  ;;  %2274 = vmax.xlane.f32.xlu1 %v2273_v18  ;;  %5738 = vmatprep.mubr.msk.f32.mxu0 %vm1912_vm2, %v8061_v14  ;;  %v1981_v35 = vpop.xlane.xlu0 %1980  ;;  %v9784_v15 = vld [vmem:[#allocation67_spill] sm:$0xff]  ;;  %v9786_v18 = vld [vmem:[#allocation36_spill] sm:$0xff]  ;;  %9788 = vst [vmem:[#allocation62_spill] sm:$0xff] %v8083_v8 }
 0x1f2   : > { %6203 = vpow2.f32 %v2529_v28  ;;  %v1984_v34 = vpop.xlane.xlu1 %1983  ;;  %v2319_v53 = vsub.f32 %v9783_v57, %v1981_v35  ;;  %5739 = vmatmul.mubr.msk.f32.gmra.mrb[82].mxu0 %vm1912_vm2, %v8065_v4  ;;  %v8077_v48 = vmul.f32 0.35355338, %v9784_v15  ;;  %v8090_v15 = vmul.f32 0.35355338, %v7555_v36 }
 0x1f3   : > { %6205 = vpow2.f32 %v2531_v33  ;;  %v2320_v3 = vsub.f32 %v9786_v18, %v1984_v34  ;;  %v9790_v18 = vld [vmem:[#allocation37_spill] sm:$0xff] }
 0x1f4   : > { %9785 = vst [vmem:[#allocation27_spill] sm:$0xff] %v8077_v48  ;;  %v8080_v14 = vpop.eup %6195  ;;  %v2469_v28 = vmul.f32 1.442695, %v2319_v53  ;;  %2187 = vmax.xlane.f32.xlu0 %v2186_v23  ;;  %9789 = vst [vmem:[#allocation29_spill] sm:$0xff] %v8090_v15  ;;  %v8096_v53 = vmul.f32 0.35355338, %v9791_v43 }
 0x1f5   : > { %9787 = vst [vmem:[#allocation28_spill] sm:$0xff] %v8080_v14  ;;  %v8085_v35 = vpop.eup %6197  ;;  %v2471_v57 = vmul.f32 1.442695, %v2320_v3  ;;  %2283 = vmax.xlane.f32.xlu1 %v2282_v31  ;;  %5802 = vmatprep.mubr.msk.f32.mxu1 %vm1912_vm2, %v8080_v14  ;;  %v2077_v33 = vpop.xlane.xlu0 %2076  ;;  %v9793_v3 = vld [vmem:[#allocation40_spill] sm:$0xff]  ;;  %v2183_v31 = vsel %vm1912_vm2, %v8077_v48, -inf }
 0x1f6   : > { %6207 = vpow2.f32 %v2469_v28  ;;  %v2080_v34 = vpop.xlane.xlu1 %2079  ;;  %v2351_v42 = vsub.f32 %v9790_v18, %v2077_v33  ;;  %5803 = vmatmul.mubr.msk.f32.gmra.mrb[82].mxu1 %vm1912_vm2, %v8085_v35  ;;  %9792 = vst [vmem:[#allocation30_spill] sm:$0xff] %v8096_v53  ;;  %v2279_v28 = vsel %vm1912_vm2, %v8083_v8, -inf }
 0x1f7   : > { %6209 = vpow2.f32 %v2471_v57  ;;  %v2352_v23 = vsub.f32 %v9793_v3, %v2080_v34  ;;  %v2192_v34 = vsel %vm1912_vm2, %v8090_v15, -inf  ;;  %v9795_v3 = vld [vmem:[#allocation41_spill] sm:$0xff]  ;;  %v8123_v15 = vmul.f32 0.35355338, %v7571_v61 }
 0x1f8   : > { %v8101_v14 = vpop.eup %6199  ;;  %v2533_v36 = vmul.f32 1.442695, %v2351_v42  ;;  %2184 = vmax.xlane.f32.xlu0 %v2183_v31  ;;  %v2288_v42 = vsel %vm1912_vm2, %v8096_v53, -inf  ;;  %v8136_v61 = vmul.f32 0.35355338, %v7580_v30 }
 0x1f9   : > { %9794 = vst [vmem:[#allocation63_spill] sm:$0xff] %v8101_v14  ;;  %v8105_v33 = vpop.eup %6201  ;;  %v2535_v18 = vmul.f32 1.442695, %v2352_v23  ;;  %2280 = vmax.xlane.f32.xlu1 %v2279_v28  ;;  %5741 = vmatprep.mubr.msk.f32.mxu0 %vm1912_vm2, %v8101_v14  ;;  %v1987_v57 = vpop.xlane.xlu0 %1986  ;;  %v9796_v23 = vld [vmem:[#allocation71_spill] sm:$0xff]  ;;  %v9798_v28 = vld [vmem:[#allocation44_spill] sm:$0xff]  ;;  %9799 = vst [vmem:[#allocation32_spill] sm:$0xff] %v8123_v15 }
 0x1fa   : > { %6211 = vpow2.f32 %v2533_v36  ;;  %v1990_v43 = vpop.xlane.xlu1 %1989  ;;  %v2321_v48 = vsub.f32 %v9795_v3, %v1987_v57  ;;  %5742 = vmatmul.mubr.msk.f32.gmra.mrb[84].mxu0 %vm1912_vm2, %v8105_v33  ;;  %v8117_v31 = vmul.f32 0.35355338, %v9796_v23  ;;  %v8130_v23 = vmul.f32 0.35355338, %v7573_v47  ;;  %9802 = vst [vmem:[#allocation33_spill] sm:$0xff] %v8136_v61 }
 0x1fb   : > { %6213 = vpow2.f32 %v2535_v18  ;;  %v2322_v8 = vsub.f32 %v9798_v28, %v1990_v43  ;;  %v9801_v28 = vld [vmem:[#allocation45_spill] sm:$0xff] }
 0x1fc   : > { %9797 = vst [vmem:[#allocation31_spill] sm:$0xff] %v8117_v31  ;;  %v8120_v14 = vpop.eup %6203  ;;  %v2473_v36 = vmul.f32 1.442695, %v2321_v48  ;;  %2193 = vmax.xlane.f32.xlu0 %v2192_v34  ;;  %9800 = vst [vmem:[#allocation66_spill] sm:$0xff] %v8130_v23  ;;  %v2189_v34 = vsel %vm1912_vm2, %v8117_v31, -inf }
 0x1fd   : > { %v8125_v57 = vpop.eup %6205  ;;  %v2475_v3 = vmul.f32 1.442695, %v2322_v8  ;;  %2289 = vmax.xlane.f32.xlu1 %v2288_v42  ;;  %5805 = vmatprep.mubr.msk.f32.mxu1 %vm1912_vm2, %v8120_v14  ;;  %v2083_v18 = vpop.xlane.xlu0 %2082  ;;  %v9803_v8 = vld [vmem:[#allocation48_spill] sm:$0xff] }
 0x1fe   : > { %6215 = vpow2.f32 %v2473_v36  ;;  %v2086_v43 = vpop.xlane.xlu1 %2085  ;;  %v2353_v53 = vsub.f32 %v9801_v28, %v2083_v18  ;;  %5806 = vmatmul.mubr.msk.f32.gmra.mrb[84].mxu1 %vm1912_vm2, %v8125_v57  ;;  %v2285_v36 = vsel %vm1912_vm2, %v8123_v15, -inf }
 0x1ff   : > { %6217 = vpow2.f32 %v2475_v3  ;;  %v2354_v48 = vsub.f32 %v9803_v8, %v2086_v43  ;;  %v2198_v3 = vsel %vm1912_vm2, %v8130_v23, -inf  ;;  %v9806_v8 = vld [vmem:[#allocation49_spill] sm:$0xff]  ;;  %v8163_v23 = vmul.f32 0.35355338, %v7589_v22  ;;  %v9812_v22 = vld [vmem:[#allocation56_spill] sm:$0xff] }
 0x200   : > { %v8141_v42 = vpop.eup %6207  ;;  %v2537_v47 = vmul.f32 1.442695, %v2353_v53  ;;  %2190 = vmax.xlane.f32.xlu0 %v2189_v34  ;;  %v2294_v53 = vsel %vm1912_vm2, %v8136_v61, -inf  ;;  %v9811_v61 = vld [vmem:[#allocation53_spill] sm:$0xff] }
 0x201   : > { %9804 = vst [vmem:[#allocation34_spill] sm:$0xff] %v8141_v42  ;;  %v8145_v18 = vpop.eup %6209  ;;  %v2539_v28 = vmul.f32 1.442695, %v2354_v48  ;;  %2286 = vmax.xlane.f32.xlu1 %v2285_v36  ;;  %5744 = vmatprep.mubr.msk.f32.mxu0 %vm1912_vm2, %v8141_v42  ;;  %v1993_v30 = vpop.xlane.xlu0 %1992  ;;  %v9807_v48 = vld [vmem:[#allocation73_spill] sm:$0xff]  ;;  %v9809_v36 = vld [vmem:[#allocation52_spill] sm:$0xff]  ;;  %9810 = vst [vmem:[#allocation37_spill] sm:$0xff] %v8163_v23 }
 0x202   : > { %9805 = vst [vmem:[#allocation67_spill] sm:$0xff] %v8145_v18  ;;  %6219 = vpow2.f32 %v2537_v47  ;;  %v1996_v43 = vpop.xlane.xlu1 %1995  ;;  %v2323_v31 = vsub.f32 %v9806_v8, %v1993_v30  ;;  %5745 = vmatmul.mubr.msk.f32.gmra.mrb[86].mxu0 %vm1912_vm2, %v8145_v18  ;;  %v8157_v34 = vmul.f32 0.35355338, %v9807_v48 }
 0x203   : > { %6221 = vpow2.f32 %v2539_v28  ;;  %v2324_v15 = vsub.f32 %v9809_v36, %v1996_v43 }
 0x204   : > { %9808 = vst [vmem:[#allocation36_spill] sm:$0xff] %v8157_v34  ;;  %v8160_v42 = vpop.eup %6211  ;;  %v2477_v47 = vmul.f32 1.442695, %v2323_v31  ;;  %2199 = vmax.xlane.f32.xlu0 %v2198_v3  ;;  %v2195_v31 = vsel %vm1912_vm2, %v8157_v34, -inf }
 0x205   : > { %v8165_v30 = vpop.eup %6213  ;;  %v2479_v8 = vmul.f32 1.442695, %v2324_v15  ;;  %2295 = vmax.xlane.f32.xlu1 %v2294_v53  ;;  %5808 = vmatprep.mubr.msk.f32.mxu1 %vm1912_vm2, %v8160_v42  ;;  %v2089_v28 = vpop.xlane.xlu0 %2088  ;;  %v2291_v53 = vsel %vm1912_vm2, %v8163_v23, -inf }
 0x206   : > { %6223 = vpow2.f32 %v2477_v47  ;;  %v2092_v48 = vpop.xlane.xlu1 %2091  ;;  %v2355_v18 = vsub.f32 %v9811_v61, %v2089_v28  ;;  %5809 = vmatmul.mubr.msk.f32.gmra.mrb[86].mxu1 %vm1912_vm2, %v8165_v30  ;;  %v9813_v28 = vld [vmem:[#allocation57_spill] sm:$0xff] }
 0x207   : > { %6225 = vpow2.f32 %v2479_v8  ;;  %v2356_v43 = vsub.f32 %v9812_v22, %v2092_v48 }
 0x208   : > { %v8175_v3 = vpop.eup %6215  ;;  %v2541_v15 = vmul.f32 1.442695, %v2355_v18  ;;  %2196 = vmax.xlane.f32.xlu0 %v2195_v31  ;;  %v9814_v18 = vld [vmem:[#allocation60_spill] sm:$0xff]  ;;  %v3965_v31 = vsel %vm1912_vm2, %v7700_v46, 0.0 }
 0x209   : > { %v8179_v36 = vpop.eup %6217  ;;  %v2543_v47 = vmul.f32 1.442695, %v2356_v43  ;;  %2292 = vmax.xlane.f32.xlu1 %v2291_v53  ;;  %5747 = vmatprep.mubr.msk.f32.mxu0 %vm1912_vm2, %v8175_v3  ;;  %v1999_v61 = vpop.xlane.xlu0 %1998  ;;  %v3968_v53 = vsel %vm1912_vm2, %v7705_v1, 0.0  ;;  %v9816_v46 = vld [vmem:[#allocation64_spill] sm:$0xff]  ;;  %v4061_v1 = vsel %vm1912_vm2, %v7724_v60, 0.0 }
 0x20a   : > { %6227 = vpow2.f32 %v2541_v15  ;;  %v2002_v8 = vpop.xlane.xlu1 %2001  ;;  %v2325_v48 = vsub.f32 %v9813_v28, %v1999_v61  ;;  %5748 = vmatmul.mubr.msk.f32.gmra.mrb[88].mxu0 %vm1912_vm2, %v8179_v36  ;;  %v9818_v60 = vld [vmem:[#allocation68_spill] sm:$0xff] }
 0x20b   : > { %6229 = vpow2.f32 %v2543_v47  ;;  %v2326_v22 = vsub.f32 %v9814_v18, %v2002_v8  ;;  %v9815_v8 = vld [vmem:[#allocation61_spill] sm:$0xff] }
 0x20c   : > { %v8189_v23 = vpop.eup %6219  ;;  %v2481_v43 = vmul.f32 1.442695, %v2325_v48  ;;  %3966 = vadd.xlane.f32.xlu0 %v3965_v31  ;;  %v4064_v31 = vsel %vm1912_vm2, %v7728_v9, 0.0  ;;  %v3971_v9 = vsel %vm1912_vm2, %v7755_v10, 0.0 }
 0x20d   : > { %v8193_v15 = vpop.eup %6221  ;;  %v2483_v34 = vmul.f32 1.442695, %v2326_v22  ;;  %3969 = vadd.xlane.f32.xlu1 %v3968_v53  ;;  %5811 = vmatprep.mubr.msk.f32.mxu1 %vm1912_vm2, %v8189_v23  ;;  %v2095_v47 = vpop.xlane.xlu0 %2094 }
 0x20e   : > { %6231 = vpow2.f32 %v2481_v43  ;;  %v2098_v61 = vpop.xlane.xlu1 %2097  ;;  %v2357_v28 = vsub.f32 %v9815_v8, %v2095_v47  ;;  %5812 = vmatmul.mubr.msk.f32.gmra.mrb[88].mxu1 %vm1912_vm2, %v8193_v15 }
 0x20f   : > { %6233 = vpow2.f32 %v2483_v34  ;;  %v2358_v48 = vsub.f32 %v9816_v46, %v2098_v61  ;;  %v9817_v61 = vld [vmem:[#allocation65_spill] sm:$0xff] }
 0x210   : > { %v8203_v18 = vpop.eup %6223  ;;  %v2545_v22 = vmul.f32 1.442695, %v2357_v28  ;;  %4062 = vadd.xlane.f32.xlu0 %v4061_v1  ;;  %v3974_v1 = vsel %vm1912_vm2, %v7764_v38, 0.0  ;;  %v4067_v38 = vsel %vm1912_vm2, %v7750_v29, 0.0 }
 0x211   : > { %v8207_v43 = vpop.eup %6225  ;;  %v2547_v53 = vmul.f32 1.442695, %v2358_v48  ;;  %4065 = vadd.xlane.f32.xlu1 %v4064_v31  ;;  %5750 = vmatprep.mubr.msk.f32.mxu0 %vm1912_vm2, %v8203_v18  ;;  %v2005_v34 = vpop.xlane.xlu0 %2004 }
 0x212   : > { %6235 = vpow2.f32 %v2545_v22  ;;  %v2008_v47 = vpop.xlane.xlu1 %2007  ;;  %v2327_v8 = vsub.f32 %v9817_v61, %v2005_v34  ;;  %5751 = vmatmul.mubr.msk.f32.gmra.mrb[90].mxu0 %vm1912_vm2, %v8207_v43 }
 0x213   : > { %6237 = vpow2.f32 %v2547_v53  ;;  %v2328_v28 = vsub.f32 %v9818_v60, %v2008_v47  ;;  %v9819_v47 = vld [vmem:[#allocation69_spill] sm:$0xff] }
 0x214   : > { %v8217_v46 = vpop.eup %6227  ;;  %v2485_v48 = vmul.f32 1.442695, %v2327_v8  ;;  %3972 = vadd.xlane.f32.xlu0 %v3971_v9 }
 0x215   : > { %v8221_v22 = vpop.eup %6229  ;;  %v2487_v31 = vmul.f32 1.442695, %v2328_v28  ;;  %3975 = vadd.xlane.f32.xlu1 %v3974_v1  ;;  %5814 = vmatprep.mubr.msk.f32.mxu1 %vm1912_vm2, %v8217_v46  ;;  %v2101_v53 = vpop.xlane.xlu0 %2100  ;;  %v4070_v28 = vsel %vm1912_vm2, %v7741_v17, 0.0  ;;  %v3977_v17 = vsel %vm1912_vm2, %v7781_v7, 0.0  ;;  %v9821_v7 = vld [vmem:[#allocation74_spill] sm:$0xff] }
 0x216   : > { %6239 = vpow2.f32 %v2485_v48  ;;  %v2104_v34 = vpop.xlane.xlu1 %2103  ;;  %v2359_v61 = vsub.f32 %v9819_v47, %v2101_v53  ;;  %5815 = vmatmul.mubr.msk.f32.gmra.mrb[90].mxu1 %vm1912_vm2, %v8221_v22  ;;  %v9820_v53 = vld [vmem:[#allocation72_spill] sm:$0xff]  ;;  %v3980_v47 = vsel %vm1912_vm2, %v7785_v26, 0.0  ;;  %v4073_v26 = vsel %vm1912_vm2, %v7800_v2, 0.0 }
 0x217   : > { %6241 = vpow2.f32 %v2487_v31  ;;  %v2360_v10 = vsub.f32 %v7567_v56, %v2104_v34  ;;  %v9822_v2 = vld [vmem:[#allocation76_spill] sm:$0xff] }
 0x218   : > { %v8231_v8 = vpop.eup %6231  ;;  %v2549_v60 = vmul.f32 1.442695, %v2359_v61  ;;  %4068 = vadd.xlane.f32.xlu0 %v4067_v38 }
 0x219   : > { %v8235_v9 = vpop.eup %6233  ;;  %v2551_v48 = vmul.f32 1.442695, %v2360_v10  ;;  %4071 = vadd.xlane.f32.xlu1 %v4070_v28  ;;  %5753 = vmatprep.mubr.msk.f32.mxu0 %vm1912_vm2, %v8231_v8  ;;  %v2206_v1 = vpop.xlane.xlu0 %2205 }
 0x21a   : > { %6243 = vpow2.f32 %v2549_v60  ;;  %v2110_v56 = vpop.xlane.xlu1 %2109  ;;  %5754 = vmatmul.mubr.msk.f32.gmra.mrb[92].mxu0 %vm1912_vm2, %v8235_v9  ;;  %v2394_v34 = vsub.f32 %v9820_v53, %v2206_v1 }
 0x21b   : > { %6245 = vpow2.f32 %v2551_v48  ;;  %v2362_v29 = vsub.f32 %v7585_v12, %v2110_v56 }
 0x21c   : > { %v8244_v31 = vpop.eup %6235  ;;  %3978 = vadd.xlane.f32.xlu0 %v3977_v17  ;;  %v2619_v1 = vmul.f32 1.442695, %v2394_v34 }
 0x21d   : > { %v8249_v61 = vpop.eup %6237  ;;  %v2555_v10 = vmul.f32 1.442695, %v2362_v29  ;;  %3981 = vadd.xlane.f32.xlu1 %v3980_v47  ;;  %5817 = vmatprep.mubr.msk.f32.mxu1 %vm1912_vm2, %v8244_v31  ;;  %v2107_v38 = vpop.xlane.xlu0 %2106  ;;  %v4076_v29 = vsel %vm1912_vm2, %v7805_v21, 0.0  ;;  %v3983_v21 = vsel %vm1912_vm2, %v7821_v41, 0.0 }
 0x21e   : > { %v2203_v12 = vpop.xlane.xlu1 %2202  ;;  %v2361_v60 = vsub.f32 %v7596_v44, %v2107_v38  ;;  %5818 = vmatmul.mubr.msk.f32.gmra.mrb[92].mxu1 %vm1912_vm2, %v8249_v61 }
 0x21f   : > { %v2393_v28 = vsub.f32 %v9821_v7, %v2203_v12  ;;  %6247 = vpow2.f32 %v2555_v10  ;;  %v9823_v10 = vld [vmem:[#allocation75_spill] sm:$0xff] }
 0x220   : > { %v8259_v48 = vpop.eup %6239  ;;  %v2553_v56 = vmul.f32 1.442695, %v2361_v60  ;;  %4074 = vadd.xlane.f32.xlu0 %v4073_v26  ;;  %v3986_v60 = vsel %vm1912_vm2, %v7825_v55, 0.0  ;;  %v4079_v55 = vsel %vm1912_vm2, %v7840_v0, 0.0  ;;  %v3989_v0 = vsel %vm1912_vm2, %v7861_v16, 0.0 }
 0x221   : > { %v8263_v17 = vpop.eup %6241  ;;  %v2617_v44 = vmul.f32 1.442695, %v2393_v28  ;;  %4077 = vadd.xlane.f32.xlu1 %v4076_v29  ;;  %5756 = vmatprep.mubr.msk.f32.mxu0 %vm1912_vm2, %v8259_v48  ;;  %v2212_v53 = vpop.xlane.xlu0 %2211  ;;  %v9824_v29 = vld [vmem:[#allocation77_spill] sm:$0xff] }
 0x222   : > { %6249 = vpow2.f32 %v2553_v56  ;;  %v2116_v47 = vpop.xlane.xlu1 %2115  ;;  %5757 = vmatmul.mubr.msk.f32.gmra.mrb[94].mxu0 %vm1912_vm2, %v8263_v17  ;;  %v2396_v12 = vsub.f32 %v9823_v10, %v2212_v53 }
 0x223   : > { %6251 = vpow2.f32 %v2617_v44  ;;  %v2364_v34 = vsub.f32 %v9822_v2, %v2116_v47  ;;  %v4082_v2 = vsel %vm1912_vm2, %v7845_v19, 0.0 }
 0x224   : > { %v8272_v38 = vpop.eup %6243  ;;  %6253 = vpow2.f32 %v2619_v1  ;;  %3984 = vadd.xlane.f32.xlu0 %v3983_v21  ;;  %v9825_v1 = vld [vmem:[#allocation78_spill] sm:$0xff]  ;;  %v2623_v53 = vmul.f32 1.442695, %v2396_v12 }
 0x225   : > { %v8277_v7 = vpop.eup %6245  ;;  %v2559_v28 = vmul.f32 1.442695, %v2364_v34  ;;  %3987 = vadd.xlane.f32.xlu1 %v3986_v60  ;;  %5820 = vmatprep.mubr.msk.f32.mxu1 %vm1912_vm2, %v8272_v38  ;;  %v2113_v26 = vpop.xlane.xlu0 %2112 }
 0x226   : > { %v2209_v56 = vpop.xlane.xlu1 %2208  ;;  %v2363_v41 = vsub.f32 %v9824_v29, %v2113_v26  ;;  %5821 = vmatmul.mubr.msk.f32.gmra.mrb[94].mxu1 %vm1912_vm2, %v8277_v7  ;;  %v9826_v26 = vld [vmem:[#allocation80_spill] sm:$0xff]  ;;  %v9827_v29 = vld [vmem:[#allocation79_spill] sm:$0xff] }
 0x227   : > { %v2395_v44 = vsub.f32 %v9825_v1, %v2209_v56  ;;  %6255 = vpow2.f32 %v2559_v28  ;;  %v3992_v28 = vsel %vm1912_vm2, %v7865_v5, 0.0 }
 0x228   : > { %v2557_v47 = vmul.f32 1.442695, %v2363_v41  ;;  %4080 = vadd.xlane.f32.xlu0 %v4079_v55 }
 0x229   : > { %v2621_v34 = vmul.f32 1.442695, %v2395_v44  ;;  %4083 = vadd.xlane.f32.xlu1 %v4082_v2  ;;  %v2218_v21 = vpop.xlane.xlu0 %2217  ;;  %v8289_v60 = vpop.eup %6247 }
 0x22a   : > { %6257 = vpow2.f32 %v2557_v47  ;;  %v2122_v10 = vpop.xlane.xlu1 %2121  ;;  %v2398_v19 = vsub.f32 %v9827_v29, %v2218_v21  ;;  %v4085_v47 = vsel %vm1912_vm2, %v7880_v51, 0.0  ;;  %v4088_v21 = vsel %vm1912_vm2, %v7885_v11, 0.0 }
 0x22b   : > { %6259 = vpow2.f32 %v2621_v34  ;;  %v2366_v56 = vsub.f32 %v9826_v26, %v2122_v10  ;;  %v3995_v51 = vsel %vm1912_vm2, %v7901_v13, 0.0  ;;  %v3998_v29 = vsel %vm1912_vm2, %v7905_v59, 0.0 }
 0x22c   : > { %v8294_v12 = vpop.eup %6249  ;;  %6261 = vpow2.f32 %v2623_v53  ;;  %3990 = vadd.xlane.f32.xlu0 %v3989_v0  ;;  %v2627_v2 = vmul.f32 1.442695, %v2398_v19 }
 0x22d   : > { %v8299_v41 = vpop.eup %6251  ;;  %v2563_v1 = vmul.f32 1.442695, %v2366_v56  ;;  %3993 = vadd.xlane.f32.xlu1 %v3992_v28  ;;  %5839 = vmatprep.mubr.msk.f32.mxu0 %vm1912_vm2, %v8294_v12  ;;  %v2119_v44 = vpop.xlane.xlu0 %2118 }
 0x22e   : > { %v8303_v55 = vpop.eup %6253  ;;  %5903 = vmatprep.mubr.msk.f32.mxu1 %vm1912_vm2, %v8299_v41  ;;  %v2215_v16 = vpop.xlane.xlu1 %2214  ;;  %v2365_v53 = vsub.f32 %v7636_v54, %v2119_v44  ;;  %5840 = vmatmul.mubr.msk.f32.vlgmr.msra.gmra.mrb[96].mxu0 %vm1912_vm2, %v8289_v60  ;;  %v4091_v44 = vsel %vm1912_vm2, %v7920_v63, 0.0  ;;  %v4001_v63 = vsel %vm1912_vm2, %v7941_v39, 0.0 }
 0x22f   : > { %v2397_v5 = vsub.f32 %v7640_v52, %v2215_v16  ;;  %5904 = vmatmul.mubr.msk.f32.vlgmr.msra.gmra.mrb[96].mxu1 %vm1912_vm2, %v8303_v55  ;;  %6263 = vpow2.f32 %v2563_v1 }
 0x230   : > { %v2561_v34 = vmul.f32 1.442695, %v2365_v53  ;;  %4086 = vadd.xlane.f32.xlu0 %v4085_v47 }
 0x231   : > { %v2625_v10 = vmul.f32 1.442695, %v2397_v5  ;;  %4089 = vadd.xlane.f32.xlu1 %v4088_v21  ;;  %v2224_v54 = vpop.xlane.xlu0 %2223  ;;  %v8317_v56 = vpop.eup %6255  ;;  %v4094_v5 = vsel %vm1912_vm2, %v7925_v49, 0.0 }
 0x232   : > { %6265 = vpow2.f32 %v2561_v34  ;;  %v2128_v26 = vpop.xlane.xlu1 %2127  ;;  %v2400_v11 = vsub.f32 %v7646_v37, %v2224_v54 }
 0x233   : > { %6267 = vpow2.f32 %v2625_v10  ;;  %v2368_v52 = vsub.f32 %v7653_v50, %v2128_v26  ;;  %v4004_v10 = vsel %vm1912_vm2, %v7945_v45, 0.0  ;;  %v9829_v45 = vld [vmem:[#allocation82_spill] sm:$0xff] }
 0x234   : > { %v8322_v0 = vpop.eup %6257  ;;  %6269 = vpow2.f32 %v2627_v2  ;;  %3996 = vadd.xlane.f32.xlu0 %v3995_v51  ;;  %v2631_v16 = vmul.f32 1.442695, %v2400_v11  ;;  %v9828_v51 = vld [vmem:[#allocation81_spill] sm:$0xff] }
 0x235   : > { %v8327_v19 = vpop.eup %6259  ;;  %v2567_v28 = vmul.f32 1.442695, %v2368_v52  ;;  %3999 = vadd.xlane.f32.xlu1 %v3998_v29  ;;  %5842 = vmatprep.mubr.msk.f32.mxu0 %vm1912_vm2, %v8322_v0  ;;  %v2125_v50 = vpop.xlane.xlu0 %2124  ;;  %v9830_v29 = vld [vmem:[#allocation16_spill] sm:$0xff] }
 0x236   : > { %v8331_v1 = vpop.eup %6261  ;;  %5906 = vmatprep.mubr.msk.f32.mxu1 %vm1912_vm2, %v8327_v19  ;;  %v2221_v13 = vpop.xlane.xlu1 %2220  ;;  %v2367_v37 = vsub.f32 %v7670_v58, %v2125_v50  ;;  %5843 = vmatmul.mubr.msk.f32.gmra.mrb[98].mxu0 %vm1912_vm2, %v8317_v56 }
 0x237   : > { %v2399_v59 = vsub.f32 %v7675_v25, %v2221_v13  ;;  %5907 = vmatmul.mubr.msk.f32.gmra.mrb[98].mxu1 %vm1912_vm2, %v8331_v1  ;;  %6271 = vpow2.f32 %v2567_v28  ;;  %v4097_v28 = vsel %vm1912_vm2, %v9830_v29, 0.0  ;;  %v9836_v29 = vld [vmem:[#allocation20_spill] sm:$0xff] }
 0x238   : > { %v2565_v53 = vmul.f32 1.442695, %v2367_v37  ;;  %4092 = vadd.xlane.f32.xlu0 %v4091_v44  ;;  %v4100_v37 = vsel %vm1912_vm2, %v7965_v24, 0.0 }
 0x239   : > { %v2629_v47 = vmul.f32 1.442695, %v2399_v59  ;;  %4095 = vadd.xlane.f32.xlu1 %v4094_v5  ;;  %v2230_v58 = vpop.xlane.xlu0 %2229  ;;  %v8345_v34 = vpop.eup %6263 }
 0x23a   : > { %6273 = vpow2.f32 %v2565_v53  ;;  %v2134_v2 = vpop.xlane.xlu1 %2133  ;;  %v2402_v49 = vsub.f32 %v7678_v6, %v2230_v58  ;;  %v9831_v53 = vld [vmem:[#allocation83_spill] sm:$0xff] }
 0x23b   : > { %6275 = vpow2.f32 %v2629_v47  ;;  %v2370_v25 = vsub.f32 %v7682_v62, %v2134_v2  ;;  %v9832_v58 = vld [vmem:[#allocation51_spill] sm:$0xff] }
 0x23c   : > { %v8350_v21 = vpop.eup %6265  ;;  %6277 = vpow2.f32 %v2631_v16  ;;  %4002 = vadd.xlane.f32.xlu0 %v4001_v63  ;;  %v2635_v50 = vmul.f32 1.442695, %v2402_v49  ;;  %v4007_v2 = vsel %vm1912_vm2, %v9832_v58, 0.0  ;;  %v9833_v63 = vld [vmem:[#allocation84_spill] sm:$0xff]  ;;  %v4010_v49 = vsel %vm1912_vm2, %v7985_v32, 0.0  ;;  %v9835_v32 = vld [vmem:[#allocation35_spill] sm:$0xff] }
 0x23d   : > { %v8355_v54 = vpop.eup %6267  ;;  %v2571_v26 = vmul.f32 1.442695, %v2370_v25  ;;  %4005 = vadd.xlane.f32.xlu1 %v4004_v10  ;;  %5845 = vmatprep.mubr.msk.f32.mxu0 %vm1912_vm2, %v8350_v21  ;;  %v2131_v62 = vpop.xlane.xlu0 %2130 }
 0x23e   : > { %v8359_v52 = vpop.eup %6269  ;;  %5909 = vmatprep.mubr.msk.f32.mxu1 %vm1912_vm2, %v8355_v54  ;;  %v2227_v39 = vpop.xlane.xlu1 %2226  ;;  %v2369_v6 = vsub.f32 %v9828_v51, %v2131_v62  ;;  %5846 = vmatmul.mubr.msk.f32.gmra.mrb[100].mxu0 %vm1912_vm2, %v8345_v34 }
 0x23f   : > { %v2401_v11 = vsub.f32 %v9829_v45, %v2227_v39  ;;  %5910 = vmatmul.mubr.msk.f32.gmra.mrb[100].mxu1 %vm1912_vm2, %v8359_v52  ;;  %6279 = vpow2.f32 %v2571_v26 }
 0x240   : > { %v2569_v13 = vmul.f32 1.442695, %v2369_v6  ;;  %4098 = vadd.xlane.f32.xlu0 %v4097_v28  ;;  %v9834_v6 = vld [vmem:[#allocation2_spill] sm:$0xff]  ;;  %v4103_v28 = vsel %vm1912_vm2, %v9836_v29, 0.0 }
 0x241   : > { %v2633_v59 = vmul.f32 1.442695, %v2401_v11  ;;  %4101 = vadd.xlane.f32.xlu1 %v4100_v37  ;;  %v2140_v44 = vpop.xlane.xlu0 %2139  ;;  %v8374_v47 = vpop.eup %6271  ;;  %v4106_v37 = vsel %vm1912_vm2, %v8005_v20, 0.0 }
 0x242   : > { %6281 = vpow2.f32 %v2569_v13  ;;  %v2236_v16 = vpop.xlane.xlu1 %2235  ;;  %v2372_v5 = vsub.f32 %v9831_v53, %v2140_v44  ;;  %v9837_v53 = vld [vmem:[#allocation3_spill] sm:$0xff] }
 0x243   : > { %6283 = vpow2.f32 %v2633_v59  ;;  %v2404_v24 = vsub.f32 %v9833_v63, %v2236_v16 }
 0x244   : > { %v8378_v25 = vpop.eup %6273  ;;  %6285 = vpow2.f32 %v2635_v50  ;;  %4008 = vadd.xlane.f32.xlu0 %v4007_v2  ;;  %v2575_v26 = vmul.f32 1.442695, %v2372_v5  ;;  %v9838_v2 = vld [vmem:[#allocation55_spill] sm:$0xff] }
 0x245   : > { %v8383_v10 = vpop.eup %6275  ;;  %4011 = vadd.xlane.f32.xlu1 %v4010_v49  ;;  %5848 = vmatprep.mubr.msk.f32.mxu0 %vm1912_vm2, %v8378_v25  ;;  %v2137_v62 = vpop.xlane.xlu0 %2136  ;;  %v2639_v50 = vmul.f32 1.442695, %v2404_v24  ;;  %v4013_v63 = vsel %vm1912_vm2, %v9838_v2, 0.0  ;;  %v9839_v49 = vld [vmem:[#allocation4_spill] sm:$0xff]  ;;  %v9843_v2 = vld [vmem:[#allocation6_spill] sm:$0xff] }
 0x246   : > { %v8387_v39 = vpop.eup %6277  ;;  %5912 = vmatprep.mubr.msk.f32.mxu1 %vm1912_vm2, %v8383_v10  ;;  %v2233_v51 = vpop.xlane.xlu1 %2232  ;;  %v2371_v45 = vsub.f32 %v9834_v6, %v2137_v62  ;;  %5849 = vmatmul.mubr.msk.f32.gmra.mrb[102].mxu0 %vm1912_vm2, %v8374_v47  ;;  %6287 = vpow2.f32 %v2575_v26  ;;  %v4016_v26 = vsel %vm1912_vm2, %v8025_v27, 0.0  ;;  %v9841_v27 = vld [vmem:[#allocation5_spill] sm:$0xff] }
 0x247   : > { %v2403_v11 = vsub.f32 %v9835_v32, %v2233_v51  ;;  %5913 = vmatmul.mubr.msk.f32.gmra.mrb[102].mxu1 %vm1912_vm2, %v8387_v39 }
 0x248   : > { %v2573_v13 = vmul.f32 1.442695, %v2371_v45  ;;  %4104 = vadd.xlane.f32.xlu0 %v4103_v28 }
 0x249   : > { %v2637_v59 = vmul.f32 1.442695, %v2403_v11  ;;  %4107 = vadd.xlane.f32.xlu1 %v4106_v37  ;;  %v2146_v44 = vpop.xlane.xlu0 %2145  ;;  %v8402_v58 = vpop.eup %6279  ;;  %v9840_v11 = vld [vmem:[#allocation38_spill] sm:$0xff] }
 0x24a   : > { %6289 = vpow2.f32 %v2573_v13  ;;  %v2242_v16 = vpop.xlane.xlu1 %2241  ;;  %v2374_v5 = vsub.f32 %v9837_v53, %v2146_v44  ;;  %v4112_v44 = vsel %vm1912_vm2, %v8045_v40, 0.0 }
 0x24b   : > { %6291 = vpow2.f32 %v2637_v59  ;;  %v2406_v20 = vsub.f32 %v9839_v49, %v2242_v16 }
 0x24c   : > { %v8406_v24 = vpop.eup %6281  ;;  %6293 = vpow2.f32 %v2639_v50  ;;  %4014 = vadd.xlane.f32.xlu0 %v4013_v63  ;;  %v2579_v51 = vmul.f32 1.442695, %v2374_v5  ;;  %v9842_v50 = vld [vmem:[#allocation24_spill] sm:$0xff] }
 0x24d   : > { %v8411_v62 = vpop.eup %6283  ;;  %4017 = vadd.xlane.f32.xlu1 %v4016_v26  ;;  %5851 = vmatprep.mubr.msk.f32.mxu0 %vm1912_vm2, %v8406_v24  ;;  %v2143_v6 = vpop.xlane.xlu0 %2142  ;;  %v4109_v13 = vsel %vm1912_vm2, %v9842_v50, 0.0  ;;  %v2643_v37 = vmul.f32 1.442695, %v2406_v20  ;;  %v9844_v26 = vld [vmem:[#allocation59_spill] sm:$0xff] }
 0x24e   : > { %v8415_v45 = vpop.eup %6285  ;;  %5915 = vmatprep.mubr.msk.f32.mxu1 %vm1912_vm2, %v8411_v62  ;;  %v2239_v32 = vpop.xlane.xlu1 %2238  ;;  %v2373_v29 = vsub.f32 %v9840_v11, %v2143_v6  ;;  %5852 = vmatmul.mubr.msk.f32.gmra.mrb[104].mxu0 %vm1912_vm2, %v8402_v58  ;;  %6295 = vpow2.f32 %v2579_v51  ;;  %v4019_v6 = vsel %vm1912_vm2, %v9844_v26, 0.0  ;;  %v4022_v51 = vsel %vm1912_vm2, %v8065_v4, 0.0  ;;  %v9847_v4 = vld [vmem:[#allocation8_spill] sm:$0xff] }
 0x24f   : > { %v2405_v28 = vsub.f32 %v9841_v27, %v2239_v32  ;;  %5916 = vmatmul.mubr.msk.f32.gmra.mrb[104].mxu1 %vm1912_vm2, %v8415_v45  ;;  %v9845_v32 = vld [vmem:[#allocation39_spill] sm:$0xff] }
 0x250   : > { %v2577_v59 = vmul.f32 1.442695, %v2373_v29  ;;  %4110 = vadd.xlane.f32.xlu0 %v4109_v13  ;;  %v8430_v49 = vpop.eup %6287  ;;  %v9846_v13 = vld [vmem:[#allocation7_spill] sm:$0xff] }
 0x251   : > { %v2641_v16 = vmul.f32 1.442695, %v2405_v28  ;;  %4113 = vadd.xlane.f32.xlu1 %v4112_v44  ;;  %v2152_v53 = vpop.xlane.xlu0 %2151  ;;  %v9848_v44 = vld [vmem:[#allocation28_spill] sm:$0xff] }
 0x252   : > { %6297 = vpow2.f32 %v2577_v59  ;;  %v2248_v5 = vpop.xlane.xlu1 %2247  ;;  %v2376_v63 = vsub.f32 %v9843_v2, %v2152_v53  ;;  %v4118_v2 = vsel %vm1912_vm2, %v8085_v35, 0.0 }
 0x253   : > { %6299 = vpow2.f32 %v2641_v16  ;;  %v2408_v40 = vsub.f32 %v9845_v32, %v2248_v5  ;;  %v4115_v16 = vsel %vm1912_vm2, %v9848_v44, 0.0  ;;  %v9849_v32 = vld [vmem:[#allocation42_spill] sm:$0xff] }
 0x254   : > { %v8434_v20 = vpop.eup %6289  ;;  %6301 = vpow2.f32 %v2643_v37  ;;  %4020 = vadd.xlane.f32.xlu0 %v4019_v6  ;;  %v2583_v29 = vmul.f32 1.442695, %v2376_v63 }
 0x255   : > { %v8439_v11 = vpop.eup %6291  ;;  %4023 = vadd.xlane.f32.xlu1 %v4022_v51  ;;  %5854 = vmatprep.mubr.msk.f32.mxu0 %vm1912_vm2, %v8434_v20  ;;  %v2149_v27 = vpop.xlane.xlu0 %2148  ;;  %v2647_v53 = vmul.f32 1.442695, %v2408_v40 }
 0x256   : > { %v8443_v28 = vpop.eup %6293  ;;  %5918 = vmatprep.mubr.msk.f32.mxu1 %vm1912_vm2, %v8439_v11  ;;  %v2245_v50 = vpop.xlane.xlu1 %2244  ;;  %v2375_v37 = vsub.f32 %v9846_v13, %v2149_v27  ;;  %5855 = vmatmul.mubr.msk.f32.gmra.mrb[106].mxu0 %vm1912_vm2, %v8430_v49  ;;  %6303 = vpow2.f32 %v2583_v29  ;;  %v4028_v29 = vsel %vm1912_vm2, %v8105_v33, 0.0  ;;  %v9853_v33 = vld [vmem:[#allocation43_spill] sm:$0xff] }
 0x257   : > { %v2407_v59 = vsub.f32 %v9847_v4, %v2245_v50  ;;  %5919 = vmatmul.mubr.msk.f32.gmra.mrb[106].mxu1 %vm1912_vm2, %v8443_v28  ;;  %v9850_v50 = vld [vmem:[#allocation63_spill] sm:$0xff] }
 0x258   : > { %v2581_v5 = vmul.f32 1.442695, %v2375_v37  ;;  %4116 = vadd.xlane.f32.xlu0 %v4115_v16  ;;  %v8458_v27 = vpop.eup %6295  ;;  %v4025_v13 = vsel %vm1912_vm2, %v9850_v50, 0.0  ;;  %v9851_v37 = vld [vmem:[#allocation9_spill] sm:$0xff] }
 0x259   : > { %v2645_v63 = vmul.f32 1.442695, %v2407_v59  ;;  %4119 = vadd.xlane.f32.xlu1 %v4118_v2  ;;  %v2158_v26 = vpop.xlane.xlu0 %2157 }
 0x25a   : > { %6305 = vpow2.f32 %v2581_v5  ;;  %v2254_v6 = vpop.xlane.xlu1 %2253  ;;  %v2378_v51 = vsub.f32 %v9849_v32, %v2158_v26  ;;  %v9852_v5 = vld [vmem:[#allocation10_spill] sm:$0xff]  ;;  %v4121_v26 = vsel %vm1912_vm2, %v8120_v14, 0.0 }
 0x25b   : > { %6307 = vpow2.f32 %v2645_v63  ;;  %v2410_v35 = vsub.f32 %v9851_v37, %v2254_v6 }
 0x25c   : > { %v8462_v40 = vpop.eup %6297  ;;  %6309 = vpow2.f32 %v2647_v53  ;;  %4026 = vadd.xlane.f32.xlu0 %v4025_v13  ;;  %v2587_v59 = vmul.f32 1.442695, %v2378_v51  ;;  %v4124_v51 = vsel %vm1912_vm2, %v8125_v57, 0.0 }
 0x25d   : > { %v8467_v4 = vpop.eup %6299  ;;  %4029 = vadd.xlane.f32.xlu1 %v4028_v29  ;;  %5857 = vmatprep.mubr.msk.f32.mxu0 %vm1912_vm2, %v8462_v40  ;;  %v2155_v44 = vpop.xlane.xlu0 %2154  ;;  %v2651_v6 = vmul.f32 1.442695, %v2410_v35  ;;  %v9854_v29 = vld [vmem:[#allocation11_spill] sm:$0xff] }
 0x25e   : > { %v8471_v16 = vpop.eup %6301  ;;  %5921 = vmatprep.mubr.msk.f32.mxu1 %vm1912_vm2, %v8467_v4  ;;  %v2251_v53 = vpop.xlane.xlu1 %2250  ;;  %v2377_v2 = vsub.f32 %v9852_v5, %v2155_v44  ;;  %5858 = vmatmul.mubr.msk.f32.gmra.mrb[108].mxu0 %vm1912_vm2, %v8458_v27  ;;  %6311 = vpow2.f32 %v2587_v59  ;;  %v9855_v5 = vld [vmem:[#allocation34_spill] sm:$0xff] }
 0x25f   : > { %v2409_v63 = vsub.f32 %v9853_v33, %v2251_v53  ;;  %5922 = vmatmul.mubr.msk.f32.gmra.mrb[108].mxu1 %vm1912_vm2, %v8471_v16  ;;  %v4031_v14 = vsel %vm1912_vm2, %v9855_v5, 0.0  ;;  %v9857_v33 = vld [vmem:[#allocation67_spill] sm:$0xff] }
 0x260   : > { %v2585_v32 = vmul.f32 1.442695, %v2377_v2  ;;  %4122 = vadd.xlane.f32.xlu0 %v4121_v26  ;;  %v8486_v53 = vpop.eup %6303  ;;  %v9856_v2 = vld [vmem:[#allocation12_spill] sm:$0xff]  ;;  %v4034_v59 = vsel %vm1912_vm2, %v9857_v33, 0.0 }
 0x261   : > { %v2649_v50 = vmul.f32 1.442695, %v2409_v63  ;;  %4125 = vadd.xlane.f32.xlu1 %v4124_v51  ;;  %v2164_v13 = vpop.xlane.xlu0 %2163 }
 0x262   : > { %6313 = vpow2.f32 %v2585_v32  ;;  %v2260_v37 = vpop.xlane.xlu1 %2259  ;;  %v2380_v44 = vsub.f32 %v9854_v29, %v2164_v13 }
 0x263   : > { %6315 = vpow2.f32 %v2649_v50  ;;  %v2412_v57 = vsub.f32 %v9856_v2, %v2260_v37  ;;  %v9858_v50 = vld [vmem:[#allocation46_spill] sm:$0xff]  ;;  %v9859_v37 = vld [vmem:[#allocation13_spill] sm:$0xff]  ;;  %v4130_v2 = vsel %vm1912_vm2, %v8165_v30, 0.0 }
 0x264   : > { %v8490_v35 = vpop.eup %6305  ;;  %6317 = vpow2.f32 %v2651_v6  ;;  %4032 = vadd.xlane.f32.xlu0 %v4031_v14  ;;  %v2591_v26 = vmul.f32 1.442695, %v2380_v44  ;;  %v4127_v44 = vsel %vm1912_vm2, %v8160_v42, 0.0  ;;  %v4037_v42 = vsel %vm1912_vm2, %v8175_v3, 0.0 }
 0x265   : > { %v8495_v63 = vpop.eup %6307  ;;  %4035 = vadd.xlane.f32.xlu1 %v4034_v59  ;;  %5860 = vmatprep.mubr.msk.f32.mxu0 %vm1912_vm2, %v8490_v35  ;;  %v2161_v32 = vpop.xlane.xlu0 %2160  ;;  %v2655_v5 = vmul.f32 1.442695, %v2412_v57 }
 0x266   : > { %v8499_v51 = vpop.eup %6309  ;;  %5924 = vmatprep.mubr.msk.f32.mxu1 %vm1912_vm2, %v8495_v63  ;;  %v2257_v6 = vpop.xlane.xlu1 %2256  ;;  %v2379_v13 = vsub.f32 %v9858_v50, %v2161_v32  ;;  %5861 = vmatmul.mubr.msk.f32.gmra.mrb[110].mxu0 %vm1912_vm2, %v8486_v53  ;;  %6319 = vpow2.f32 %v2591_v26  ;;  %v9860_v50 = vld [vmem:[#allocation14_spill] sm:$0xff]  ;;  %v4040_v26 = vsel %vm1912_vm2, %v8179_v36, 0.0 }
 0x267   : > { %v2411_v29 = vsub.f32 %v9859_v37, %v2257_v6  ;;  %5925 = vmatmul.mubr.msk.f32.gmra.mrb[110].mxu1 %vm1912_vm2, %v8499_v51  ;;  %v9863_v36 = vld [vmem:[#allocation50_spill] sm:$0xff] }
 0x268   : > { %v2589_v14 = vmul.f32 1.442695, %v2379_v13  ;;  %4128 = vadd.xlane.f32.xlu0 %v4127_v44  ;;  %v8514_v37 = vpop.eup %6311  ;;  %v9861_v13 = vld [vmem:[#allocation47_spill] sm:$0xff] }
 0x269   : > { %v2653_v33 = vmul.f32 1.442695, %v2411_v29  ;;  %4131 = vadd.xlane.f32.xlu1 %v4130_v2  ;;  %v2170_v59 = vpop.xlane.xlu0 %2169 }
 0x26a   : > { %6321 = vpow2.f32 %v2589_v14  ;;  %v2266_v32 = vpop.xlane.xlu1 %2265  ;;  %v2382_v6 = vsub.f32 %v9860_v50, %v2170_v59 }
 0x26b   : > { %6323 = vpow2.f32 %v2653_v33  ;;  %v2414_v30 = vsub.f32 %v9861_v13, %v2266_v32  ;;  %v4133_v32 = vsel %vm1912_vm2, %v8189_v23, 0.0  ;;  %v4043_v23 = vsel %vm1912_vm2, %v8203_v18, 0.0 }
 0x26c   : > { %v8518_v57 = vpop.eup %6313  ;;  %6325 = vpow2.f32 %v2655_v5  ;;  %4038 = vadd.xlane.f32.xlu0 %v4037_v42  ;;  %v2595_v44 = vmul.f32 1.442695, %v2382_v6  ;;  %v9862_v5 = vld [vmem:[#allocation15_spill] sm:$0xff]  ;;  %v4136_v42 = vsel %vm1912_vm2, %v8193_v15, 0.0 }
 0x26d   : > { %v8523_v29 = vpop.eup %6315  ;;  %4041 = vadd.xlane.f32.xlu1 %v4040_v26  ;;  %5863 = vmatprep.mubr.msk.f32.mxu0 %vm1912_vm2, %v8518_v57  ;;  %v2167_v14 = vpop.xlane.xlu0 %2166  ;;  %v2659_v50 = vmul.f32 1.442695, %v2414_v30 }
 0x26e   : > { %v8527_v2 = vpop.eup %6317  ;;  %5927 = vmatprep.mubr.msk.f32.mxu1 %vm1912_vm2, %v8523_v29  ;;  %v2263_v3 = vpop.xlane.xlu1 %2262  ;;  %v2381_v33 = vsub.f32 %v9862_v5, %v2167_v14  ;;  %5864 = vmatmul.mubr.msk.f32.gmra.mrb[112].mxu0 %vm1912_vm2, %v8514_v37  ;;  %6327 = vpow2.f32 %v2595_v44  ;;  %v9864_v5 = vld [vmem:[#allocation17_spill] sm:$0xff]  ;;  %v4046_v44 = vsel %vm1912_vm2, %v8207_v43, 0.0  ;;  %v9867_v43 = vld [vmem:[#allocation54_spill] sm:$0xff] }
 0x26f   : > { %v2413_v59 = vsub.f32 %v9863_v36, %v2263_v3  ;;  %5928 = vmatmul.mubr.msk.f32.gmra.mrb[112].mxu1 %vm1912_vm2, %v8527_v2 }
 0x270   : > { %v2593_v6 = vmul.f32 1.442695, %v2381_v33  ;;  %4134 = vadd.xlane.f32.xlu0 %v4133_v32  ;;  %v8542_v36 = vpop.eup %6319  ;;  %v9865_v33 = vld [vmem:[#allocation18_spill] sm:$0xff] }
 0x271   : > { %v2657_v13 = vmul.f32 1.442695, %v2413_v59  ;;  %4137 = vadd.xlane.f32.xlu1 %v4136_v42  ;;  %v2176_v26 = vpop.xlane.xlu0 %2175 }
 0x272   : > { %6329 = vpow2.f32 %v2593_v6  ;;  %v2272_v14 = vpop.xlane.xlu1 %2271  ;;  %v2384_v3 = vsub.f32 %v9864_v5, %v2176_v26 }
 0x273   : > { %6331 = vpow2.f32 %v2657_v13  ;;  %v2416_v15 = vsub.f32 %v9865_v33, %v2272_v14  ;;  %v4139_v14 = vsel %vm1912_vm2, %v8217_v46, 0.0  ;;  %v4049_v46 = vsel %vm1912_vm2, %v8231_v8, 0.0 }
 0x274   : > { %v8546_v30 = vpop.eup %6321  ;;  %6333 = vpow2.f32 %v2659_v50  ;;  %4044 = vadd.xlane.f32.xlu0 %v4043_v23  ;;  %v2599_v32 = vmul.f32 1.442695, %v2384_v3  ;;  %v9866_v50 = vld [vmem:[#allocation19_spill] sm:$0xff]  ;;  %v4142_v23 = vsel %vm1912_vm2, %v8221_v22, 0.0 }
 0x275   : > { %v8551_v59 = vpop.eup %6323  ;;  %4047 = vadd.xlane.f32.xlu1 %v4046_v44  ;;  %5866 = vmatprep.mubr.msk.f32.mxu0 %vm1912_vm2, %v8546_v30  ;;  %v2173_v6 = vpop.xlane.xlu0 %2172  ;;  %v2663_v5 = vmul.f32 1.442695, %v2416_v15 }
 0x276   : > { %v8555_v42 = vpop.eup %6325  ;;  %5930 = vmatprep.mubr.msk.f32.mxu1 %vm1912_vm2, %v8551_v59  ;;  %v2269_v18 = vpop.xlane.xlu1 %2268  ;;  %v2383_v13 = vsub.f32 %v9866_v50, %v2173_v6  ;;  %5867 = vmatmul.mubr.msk.f32.gmra.mrb[114].mxu0 %vm1912_vm2, %v8542_v36  ;;  %6335 = vpow2.f32 %v2599_v32  ;;  %v9868_v50 = vld [vmem:[#allocation21_spill] sm:$0xff]  ;;  %v4052_v32 = vsel %vm1912_vm2, %v8235_v9, 0.0  ;;  %v9875_v9 = vld [vmem:[#allocation58_spill] sm:$0xff] }
 0x277   : > { %v2415_v26 = vsub.f32 %v9867_v43, %v2269_v18  ;;  %5931 = vmatmul.mubr.msk.f32.gmra.mrb[114].mxu1 %vm1912_vm2, %v8555_v42 }
 0x278   : > { %v2597_v3 = vmul.f32 1.442695, %v2383_v13  ;;  %4140 = vadd.xlane.f32.xlu0 %v4139_v14  ;;  %v8570_v43 = vpop.eup %6327  ;;  %v9871_v13 = vld [vmem:[#allocation22_spill] sm:$0xff] }
 0x279   : > { %v2661_v33 = vmul.f32 1.442695, %v2415_v26  ;;  %4143 = vadd.xlane.f32.xlu1 %v4142_v23  ;;  %v2182_v44 = vpop.xlane.xlu0 %2181  ;;  %9869 = vst [vmem:[#allocation70_spill] sm:$0xff] %v8570_v43 }
 0x27a   : > { %6337 = vpow2.f32 %v2597_v3  ;;  %v2278_v6 = vpop.xlane.xlu1 %2277  ;;  %v2386_v18 = vsub.f32 %v9868_v50, %v2182_v44 }
 0x27b   : > { %6339 = vpow2.f32 %v2661_v33  ;;  %v2418_v22 = vsub.f32 %v9871_v13, %v2278_v6  ;;  %v4145_v6 = vsel %vm1912_vm2, %v8244_v31, 0.0  ;;  %v4055_v31 = vsel %vm1912_vm2, %v8259_v48, 0.0 }
 0x27c   : > { %v8574_v15 = vpop.eup %6329  ;;  %6341 = vpow2.f32 %v2663_v5  ;;  %4050 = vadd.xlane.f32.xlu0 %v4049_v46  ;;  %v2603_v14 = vmul.f32 1.442695, %v2386_v18  ;;  %v9874_v5 = vld [vmem:[#allocation23_spill] sm:$0xff]  ;;  %v4148_v46 = vsel %vm1912_vm2, %v8249_v61, 0.0 }
 0x27d   : > { %9870 = vst [vmem:[#allocation40_spill] sm:$0xff] %v8574_v15  ;;  %v8579_v26 = vpop.eup %6331  ;;  %4053 = vadd.xlane.f32.xlu1 %v4052_v32  ;;  %5869 = vmatprep.mubr.msk.f32.mxu0 %vm1912_vm2, %v8574_v15  ;;  %v2179_v3 = vpop.xlane.xlu0 %2178  ;;  %v2667_v50 = vmul.f32 1.442695, %v2418_v22  ;;  %v9879_v22 = vld [vmem:[#allocation26_spill] sm:$0xff] }
 0x27e   : > { %9872 = vst [vmem:[#allocation41_spill] sm:$0xff] %v8579_v26  ;;  %v8583_v23 = vpop.eup %6333  ;;  %5933 = vmatprep.mubr.msk.f32.mxu1 %vm1912_vm2, %v8579_v26  ;;  %v2275_v8 = vpop.xlane.xlu1 %2274  ;;  %v2385_v33 = vsub.f32 %v9874_v5, %v2179_v3  ;;  %5870 = vmatmul.mubr.msk.f32.gmra.mrb[116].mxu0 %vm1912_vm2, %v8570_v43  ;;  %6343 = vpow2.f32 %v2603_v14  ;;  %v9876_v5 = vld [vmem:[#allocation25_spill] sm:$0xff] }
 0x27f   : > { %9873 = vst [vmem:[#allocation71_spill] sm:$0xff] %v8583_v23  ;;  %v2417_v44 = vsub.f32 %v9875_v9, %v2275_v8  ;;  %5934 = vmatmul.mubr.msk.f32.gmra.mrb[116].mxu1 %vm1912_vm2, %v8583_v23 }
 0x280   : > { %v2601_v18 = vmul.f32 1.442695, %v2385_v33  ;;  %4146 = vadd.xlane.f32.xlu0 %v4145_v6  ;;  %v8602_v26 = vpop.eup %6335  ;;  %v4058_v33 = vsel %vm1912_vm2, %v8263_v17, 0.0 }
 0x281   : > { %v2665_v13 = vmul.f32 1.442695, %v2417_v44  ;;  %4149 = vadd.xlane.f32.xlu1 %v4148_v46  ;;  %v2188_v32 = vpop.xlane.xlu0 %2187  ;;  %v8597_v3 = vpop.f32.mrb[64].mxu0  ;;  %9877 = vst [vmem:[#allocation44_spill] sm:$0xff] %v8602_v26 }
 0x282   : > { %6345 = vpow2.f32 %v2601_v18  ;;  %v2284_v8 = vpop.xlane.xlu1 %2283  ;;  %v2388_v9 = vsub.f32 %v9876_v5, %v2188_v32  ;;  %v8600_v23 = vpop.f32.mrb[65].mxu0 }
 0x283   : > { %6347 = vpow2.f32 %v2665_v13  ;;  %v2420_v14 = vsub.f32 %v9879_v22, %v2284_v8  ;;  %v9882_v13 = vld [vmem:[#allocation27_spill] sm:$0xff]  ;;  %v9883_v8 = vld [vmem:[#allocation62_spill] sm:$0xff] }
 0x284   : > { %v8606_v61 = vpop.eup %6337  ;;  %6349 = vpow2.f32 %v2667_v50  ;;  %4056 = vadd.xlane.f32.xlu0 %v4055_v31  ;;  %v2607_v6 = vmul.f32 1.442695, %v2388_v9  ;;  %v4151_v9 = vsel %vm1912_vm2, %v8272_v38, 0.0 }
 0x285   : > { %9878 = vst [vmem:[#allocation45_spill] sm:$0xff] %v8606_v61  ;;  %v8611_v44 = vpop.eup %6339  ;;  %4059 = vadd.xlane.f32.xlu1 %v4058_v33  ;;  %v8613_v18 = vpop.f32.mrb[64].mxu1  ;;  %5872 = vmatprep.mubr.msk.f32.mxu0 %vm1912_vm2, %v8606_v61  ;;  %v2671_v31 = vmul.f32 1.442695, %v2420_v14  ;;  %v4154_v33 = vsel %vm1912_vm2, %v8277_v7, 0.0  ;;  %v4157_v7 = vsel %vm1912_vm2, %v8294_v12, 0.0 }
 0x286   : > { %9880 = vst [vmem:[#allocation48_spill] sm:$0xff] %v8611_v44  ;;  %v2185_v46 = vpop.xlane.xlu0 %2184  ;;  %v8617_v48 = vpop.eup %6341  ;;  %5936 = vmatprep.mubr.msk.f32.mxu1 %vm1912_vm2, %v8611_v44  ;;  %5873 = vmatmul.mubr.msk.f32.gmra.mrb[118].mxu0 %vm1912_vm2, %v8602_v26  ;;  %6351 = vpow2.f32 %v2607_v6 }
 0x287   : > { %9881 = vst [vmem:[#allocation49_spill] sm:$0xff] %v8617_v48  ;;  %v2281_v50 = vpop.xlane.xlu1 %2280  ;;  %v2387_v32 = vsub.f32 %v9882_v13, %v2185_v46  ;;  %v8622_v17 = vpop.f32.mrb[65].mxu1  ;;  %5937 = vmatmul.mubr.msk.f32.gmra.mrb[118].mxu1 %vm1912_vm2, %v8617_v48 }
 0x288   : > { %v2419_v5 = vsub.f32 %v9883_v8, %v2281_v50  ;;  %4152 = vadd.xlane.f32.xlu0 %v4151_v9  ;;  %v9884_v8 = vld [vmem:[#allocation29_spill] sm:$0xff]  ;;  %v8638_v61 = vpop.eup %6343 }
 0x289   : > { %v2605_v22 = vmul.f32 1.442695, %v2387_v32  ;;  %4155 = vadd.xlane.f32.xlu1 %v4154_v33  ;;  %v8633_v13 = vpop.f32.mrb[66].mxu1  ;;  %9885 = vst [vmem:[#allocation73_spill] sm:$0xff] %v8638_v61  ;;  %v9887_v32 = vld [vmem:[#allocation30_spill] sm:$0xff] }
 0x28a   : > { %v2669_v46 = vmul.f32 1.442695, %v2419_v5  ;;  %v2194_v44 = vpop.xlane.xlu0 %2193  ;;  %v8636_v48 = vpop.f32.mrb[66].mxu0 }
 0x28b   : > { %6353 = vpow2.f32 %v2605_v22  ;;  %v2290_v50 = vpop.xlane.xlu1 %2289  ;;  %v2390_v26 = vsub.f32 %v9884_v8, %v2194_v44  ;;  %v8640_v38 = vpop.f32.mrb[67].mxu0  ;;  %v4160_v44 = vsel %vm1912_vm2, %v8289_v60, 0.0  ;;  %v9891_v60 = vld [vmem:[#allocation32_spill] sm:$0xff] }
 0x28c   : > { %6355 = vpow2.f32 %v2669_v46  ;;  %v8642_v14 = vpop.f32.mrb[67].mxu1  ;;  %v8646_v6 = vpop.eup %6345  ;;  %v2422_v5 = vsub.f32 %v9887_v32, %v2290_v50  ;;  %4158 = vadd.xlane.f32.xlu0 %v4157_v7  ;;  %v4253_v32 = vsel %vm1912_vm2, %v8299_v41, 0.0  ;;  %v9893_v41 = vld [vmem:[#allocation33_spill] sm:$0xff] }
 0x28d   : > { %9886 = vst [vmem:[#allocation52_spill] sm:$0xff] %v8646_v6  ;;  %6357 = vpow2.f32 %v2671_v31  ;;  %v8651_v9 = vpop.eup %6347  ;;  %v2611_v22 = vmul.f32 1.442695, %v2390_v26  ;;  %4161 = vadd.xlane.f32.xlu1 %v4160_v44  ;;  %5875 = vmatprep.mubr.msk.f32.mxu0 %vm1912_vm2, %v8646_v6  ;;  %v9890_v31 = vld [vmem:[#allocation31_spill] sm:$0xff]  ;;  %v9892_v6 = vld [vmem:[#allocation66_spill] sm:$0xff] }
 0x28e   : > { %9888 = vst [vmem:[#allocation53_spill] sm:$0xff] %v8651_v9  ;;  %v2191_v33 = vpop.xlane.xlu0 %2190  ;;  %v8655_v46 = vpop.eup %6349  ;;  %5939 = vmatprep.mubr.msk.f32.mxu1 %vm1912_vm2, %v8651_v9  ;;  %5876 = vmatmul.mubr.msk.f32.gmra.mrb[120].mxu0 %vm1912_vm2, %v8638_v61  ;;  %v2675_v44 = vmul.f32 1.442695, %v2422_v5 }
 0x28f   : > { %9889 = vst [vmem:[#allocation56_spill] sm:$0xff] %v8655_v46  ;;  %v2287_v12 = vpop.xlane.xlu1 %2286  ;;  %v2389_v50 = vsub.f32 %v9890_v31, %v2191_v33  ;;  %v8660_v8 = vpop.f32.mrb[68].mxu0  ;;  %5940 = vmatmul.mubr.msk.f32.gmra.mrb[120].mxu1 %vm1912_vm2, %v8655_v46  ;;  %v4256_v33 = vsel %vm1912_vm2, %v8303_v55, 0.0  ;;  %6359 = vpow2.f32 %v2611_v22  ;;  %v4163_v55 = vsel %vm1912_vm2, %v8322_v0, 0.0 }
 0x290   : > { %v2421_v26 = vsub.f32 %v9891_v60, %v2287_v12  ;;  %v8665_v7 = vpop.f32.mrb[69].mxu0  ;;  %4254 = vadd.xlane.f32.xlu0 %v4253_v32  ;;  %v8678_v15 = vpop.eup %6351 }
 0x291   : > { %v2609_v9 = vmul.f32 1.442695, %v2389_v50  ;;  %4257 = vadd.xlane.f32.xlu1 %v4256_v33  ;;  %v8673_v61 = vpop.f32.mrb[68].mxu1 }
 0x292   : > { %v2673_v31 = vmul.f32 1.442695, %v2421_v26  ;;  %v2200_v12 = vpop.xlane.xlu0 %2199  ;;  %v8676_v46 = vpop.f32.mrb[69].mxu1 }
 0x293   : > { %6361 = vpow2.f32 %v2609_v9  ;;  %v2296_v60 = vpop.xlane.xlu1 %2295  ;;  %v2392_v43 = vsub.f32 %v9892_v6, %v2200_v12  ;;  %v4166_v9 = vsel %vm1912_vm2, %v8317_v56, 0.0  ;;  %v9896_v12 = vld [vmem:[#allocation37_spill] sm:$0xff] }
 0x294   : > { %6363 = vpow2.f32 %v2673_v31  ;;  %v2424_v5 = vsub.f32 %v9893_v41, %v2296_v60  ;;  %4164 = vadd.xlane.f32.xlu0 %v4163_v55  ;;  %v4259_v41 = vsel %vm1912_vm2, %v8327_v19, 0.0  ;;  %v4262_v55 = vsel %vm1912_vm2, %v8331_v1, 0.0 }
 0x295   : > { %v8683_v22 = vpop.eup %6353  ;;  %6365 = vpow2.f32 %v2675_v44  ;;  %v2615_v50 = vmul.f32 1.442695, %v2392_v43  ;;  %4167 = vadd.xlane.f32.xlu1 %v4166_v9  ;;  %v8689_v32 = vpop.f32.mrb[70].mxu0  ;;  %v9895_v43 = vld [vmem:[#allocation36_spill] sm:$0xff]  ;;  %v4169_v19 = vsel %vm1912_vm2, %v8350_v21, 0.0  ;;  %v4172_v1 = vsel %vm1912_vm2, %v8345_v34, 0.0 }
 0x296   : > { %v8687_v26 = vpop.eup %6355  ;;  %v2679_v6 = vmul.f32 1.442695, %v2424_v5  ;;  %5878 = vmatprep.mubr.msk.f32.mxu0 %vm1912_vm2, %v8683_v22  ;;  %v2197_v33 = vpop.xlane.xlu0 %2196  ;;  %v4265_v34 = vsel %vm1912_vm2, %v8355_v54, 0.0  ;;  %v4175_v54 = vsel %vm1912_vm2, %v8378_v25, 0.0 }
 0x297   : > { %v8693_v31 = vpop.eup %6357  ;;  %5942 = vmatprep.mubr.msk.f32.mxu1 %vm1912_vm2, %v8687_v26  ;;  %v2293_v0 = vpop.xlane.xlu1 %2292  ;;  %v2391_v44 = vsub.f32 %v9895_v43, %v2197_v33  ;;  %5879 = vmatmul.mubr.msk.f32.gmra.mrb[122].mxu0 %vm1912_vm2, %v8678_v15  ;;  %6367 = vpow2.f32 %v2615_v50 }
 0x298   : > { %9894 = vst [vmem:[#allocation57_spill] sm:$0xff] %v8693_v31  ;;  %v8698_v56 = vpop.f32.mrb[71].mxu0  ;;  %v2423_v60 = vsub.f32 %v9896_v12, %v2293_v0  ;;  %5943 = vmatmul.mubr.msk.f32.gmra.mrb[122].mxu1 %vm1912_vm2, %v8693_v31  ;;  %4260 = vadd.xlane.f32.xlu0 %v4259_v41  ;;  %6369 = vpow2.f32 %v2679_v6 }
 0x299   : > { %v2613_v5 = vmul.f32 1.442695, %v2391_v44  ;;  %4263 = vadd.xlane.f32.xlu1 %v4262_v55  ;;  %v8709_v33 = vpop.f32.mrb[70].mxu1  ;;  %v8713_v31 = vpop.eup %6359  ;;  %v4268_v55 = vsel %vm1912_vm2, %v8359_v52, 0.0  ;;  %v4178_v52 = vsel %vm1912_vm2, %v8374_v47, 0.0 }
 0x29a   : > { %v2677_v9 = vmul.f32 1.442695, %v2423_v60  ;;  %v3967_v43 = vpop.xlane.xlu0 %3966  ;;  %v8711_v12 = vpop.f32.mrb[71].mxu1 }
 0x29b   : > { %6371 = vpow2.f32 %v2613_v5  ;;  %v3970_v0 = vpop.xlane.xlu1 %3969 }
 0x29c   : > { %6373 = vpow2.f32 %v2677_v9  ;;  %4170 = vadd.xlane.f32.xlu0 %v4169_v19 }
 0x29d   : > { %v8717_v50 = vpop.eup %6361  ;;  %6375 = vrcp.f32 %v3970_v0  ;;  %4173 = vadd.xlane.f32.xlu1 %v4172_v1  ;;  %v8723_v44 = vpop.f32.mrb[72].mxu0 }
 0x29e   : > { %v8721_v6 = vpop.eup %6363  ;;  %6377 = vrcp.f32 %v3967_v43  ;;  %5881 = vmatprep.mubr.msk.f32.mxu0 %vm1912_vm2, %v8717_v50  ;;  %v4063_v60 = vpop.xlane.xlu0 %4062 }
 0x29f   : > { %v8727_v41 = vpop.eup %6365  ;;  %5945 = vmatprep.mubr.msk.f32.mxu1 %vm1912_vm2, %v8721_v6  ;;  %v4066_v21 = vpop.xlane.xlu1 %4065  ;;  %6379 = vrcp.f32 %v4063_v60  ;;  %5882 = vmatmul.mubr.msk.f32.gmra.mrb[124].mxu0 %vm1912_vm2, %v8713_v31 }
 0x2a0   : > { %9897 = vst [vmem:[#allocation60_spill] sm:$0xff] %v8727_v41  ;;  %v8731_v5 = vpop.f32.mrb[73].mxu0  ;;  %6381 = vrcp.f32 %v4066_v21  ;;  %5946 = vmatmul.mubr.msk.f32.gmra.mrb[124].mxu1 %vm1912_vm2, %v8727_v41  ;;  %4266 = vadd.xlane.f32.xlu0 %v4265_v34 }
 0x2a1   : > { %4269 = vadd.xlane.f32.xlu1 %v4268_v55  ;;  %v8741_v9 = vpop.f32.mrb[72].mxu1  ;;  %v8743_v0 = vpop.eup %6367 }
 0x2a2   : > { %v3973_v43 = vpop.xlane.xlu0 %3972  ;;  %9898 = vst [vmem:[#allocation61_spill] sm:$0xff] %v8743_v0  ;;  %v8745_v1 = vpop.f32.mrb[73].mxu1 }
 0x2a3   : > { %v3976_v19 = vpop.xlane.xlu1 %3975  ;;  %6383 = vrcp.f32 %v3973_v43  ;;  %v8747_v60 = vpop.eup %6369 }
 0x2a4   : > { %9899 = vst [vmem:[#allocation64_spill] sm:$0xff] %v8747_v60  ;;  %6385 = vrcp.f32 %v3976_v19  ;;  %4176 = vadd.xlane.f32.xlu0 %v4175_v54 }
 0x2a5   : > { %v8751_v21 = vpop.eup %6371  ;;  %4179 = vadd.xlane.f32.xlu1 %v4178_v52  ;;  %v8757_v55 = vpop.f32.mrb[74].mxu0  ;;  %v4271_v52 = vsel %vm1912_vm2, %v8383_v10, 0.0 }
 0x2a6   : > { %9900 = vst [vmem:[#allocation65_spill] sm:$0xff] %v8751_v21  ;;  %v8755_v34 = vpop.eup %6373  ;;  %5884 = vmatprep.mubr.msk.f32.mxu0 %vm1912_vm2, %v8751_v21  ;;  %v4069_v43 = vpop.xlane.xlu0 %4068  ;;  %v4274_v21 = vsel %vm1912_vm2, %v8387_v39, 0.0  ;;  %v4181_v39 = vsel %vm1912_vm2, %v8406_v24, 0.0 }
 0x2a7   : > { %9901 = vst [vmem:[#allocation68_spill] sm:$0xff] %v8755_v34  ;;  %v6376_v41 = vpop.eup %6375  ;;  %5948 = vmatprep.mubr.msk.f32.mxu1 %vm1912_vm2, %v8755_v34  ;;  %v4072_v47 = vpop.xlane.xlu1 %4071  ;;  %6387 = vrcp.f32 %v4069_v43  ;;  %5885 = vmatmul.mubr.msk.f32.gmra.mrb[126].mxu0 %vm1912_vm2, %v8743_v0 }
 0x2a8   : > { %v8770_v25 = vpop.f32.mrb[75].mxu0  ;;  %v6378_v19 = vpop.eup %6377  ;;  %v4478_v54 = vmul.f32 %v6376_v41, %v8597_v3  ;;  %6389 = vrcp.f32 %v4072_v47  ;;  %5949 = vmatmul.mubr.msk.f32.gmra.mrb[126].mxu1 %vm1912_vm2, %v8747_v60  ;;  %4272 = vadd.xlane.f32.xlu0 %v4271_v52 }
 0x2a9   : > { %v6380_v34 = vpop.eup %6379  ;;  %v4477_v43 = vmul.f32 %v6378_v19, %v8600_v23  ;;  %4275 = vadd.xlane.f32.xlu1 %v4274_v21  ;;  %v8785_v41 = vpop.f32.mrb[74].mxu1  ;;  %v4184_v21 = vsel %vm1912_vm2, %v8402_v58, 0.0  ;;  %v4277_v58 = vsel %vm1912_vm2, %v8411_v62, 0.0 }
 0x2aa   : > { %v6382_v0 = vpop.eup %6381  ;;  %4606 = vst.msk [vmem:[%s8766_s27 + $0x8] sm:$0xff] %vm403_vm0, %v4478_v54  ;;  %v4509_v3 = vmul.f32 %v6380_v34, %v8622_v17  ;;  %v3979_v47 = vpop.xlane.xlu0 %3978 }
 0x2ab   : > { %4605 = vst.msk [vmem:[%s8766_s27] sm:$0xff] %vm403_vm0, %v4477_v43  ;;  %v4510_v10 = vmul.f32 %v6382_v0, %v8613_v18  ;;  %v3982_v60 = vpop.xlane.xlu1 %3981  ;;  %6391 = vrcp.f32 %v3979_v47  ;;  %v8790_v23 = vpop.f32.mrb[75].mxu1 }
 0x2ac   : > { %4637 = vst.msk [vmem:[%s8766_s27 + $0x100] sm:$0xff] %vm403_vm0, %v4509_v3  ;;  %6393 = vrcp.f32 %v3982_v60  ;;  %4182 = vadd.xlane.f32.xlu0 %v4181_v39 }
 0x2ad   : > { %v6384_v17 = vpop.eup %6383  ;;  %4638 = vst.msk [vmem:[%s8766_s27 + $0x108] sm:$0xff] %vm403_vm0, %v4510_v10  ;;  %4185 = vadd.xlane.f32.xlu1 %v4184_v21  ;;  %v8801_v34 = vpop.f32.mrb[76].mxu0 }
 0x2ae   : > { %v6386_v18 = vpop.eup %6385  ;;  %v4479_v0 = vmul.f32 %v6384_v17, %v8640_v38  ;;  %v4075_v19 = vpop.xlane.xlu0 %4074  ;;  %v4280_v38 = vsel %vm1912_vm2, %v8415_v45, 0.0  ;;  %v4187_v45 = vsel %vm1912_vm2, %v8434_v20, 0.0 }
 0x2af   : > { %v4480_v60 = vmul.f32 %v6386_v18, %v8636_v48  ;;  %v4078_v54 = vpop.xlane.xlu1 %4077  ;;  %6395 = vrcp.f32 %v4075_v19  ;;  %v8804_v24 = vpop.f32.mrb[77].mxu0 }
 0x2b0   : > { %4607 = vst.msk [vmem:[%s8766_s27 + $0x10] sm:$0xff] %vm403_vm0, %v4479_v0  ;;  %6397 = vrcp.f32 %v4078_v54  ;;  %4278 = vadd.xlane.f32.xlu0 %v4277_v58 }
 0x2b1   : > { %v6388_v52 = vpop.eup %6387  ;;  %4608 = vst.msk [vmem:[%s8766_s27 + $0x18] sm:$0xff] %vm403_vm0, %v4480_v60  ;;  %4281 = vadd.xlane.f32.xlu1 %v4280_v38  ;;  %v8815_v3 = vpop.f32.mrb[76].mxu1 }
 0x2b2   : > { %v6390_v48 = vpop.eup %6389  ;;  %v4511_v43 = vmul.f32 %v6388_v52, %v8642_v14  ;;  %v3985_v47 = vpop.xlane.xlu0 %3984  ;;  %v4190_v14 = vsel %vm1912_vm2, %v8430_v49, 0.0  ;;  %v4283_v49 = vsel %vm1912_vm2, %v8439_v11, 0.0 }
 0x2b3   : > { %v4512_v10 = vmul.f32 %v6390_v48, %v8633_v13  ;;  %v3988_v39 = vpop.xlane.xlu1 %3987  ;;  %6399 = vrcp.f32 %v3985_v47  ;;  %v8818_v62 = vpop.f32.mrb[77].mxu1 }
 0x2b4   : > { %4639 = vst.msk [vmem:[%s8766_s27 + $0x110] sm:$0xff] %vm403_vm0, %v4511_v43  ;;  %6401 = vrcp.f32 %v3988_v39  ;;  %4188 = vadd.xlane.f32.xlu0 %v4187_v45 }
 0x2b5   : > { %v6392_v17 = vpop.eup %6391  ;;  %4640 = vst.msk [vmem:[%s8766_s27 + $0x118] sm:$0xff] %vm403_vm0, %v4512_v10  ;;  %4191 = vadd.xlane.f32.xlu1 %v4190_v14  ;;  %v8829_v18 = vpop.f32.mrb[78].mxu0 }
 0x2b6   : > { %v6394_v13 = vpop.eup %6393  ;;  %v4481_v21 = vmul.f32 %v6392_v17, %v8665_v7  ;;  %v4081_v0 = vpop.xlane.xlu0 %4080  ;;  %v4286_v7 = vsel %vm1912_vm2, %v8443_v28, 0.0  ;;  %v4193_v28 = vsel %vm1912_vm2, %v8462_v40, 0.0 }
 0x2b7   : > { %v4482_v19 = vmul.f32 %v6394_v13, %v8660_v8  ;;  %v4084_v60 = vpop.xlane.xlu1 %4083  ;;  %6403 = vrcp.f32 %v4081_v0  ;;  %v8832_v20 = vpop.f32.mrb[79].mxu0 }
 0x2b8   : > { %4609 = vst.msk [vmem:[%s8766_s27 + $0x20] sm:$0xff] %vm403_vm0, %v4481_v21  ;;  %6405 = vrcp.f32 %v4084_v60  ;;  %4284 = vadd.xlane.f32.xlu0 %v4283_v49 }
 0x2b9   : > { %v6396_v54 = vpop.eup %6395  ;;  %4610 = vst.msk [vmem:[%s8766_s27 + $0x28] sm:$0xff] %vm403_vm0, %v4482_v19  ;;  %4287 = vadd.xlane.f32.xlu1 %v4286_v7  ;;  %v8843_v52 = vpop.f32.mrb[78].mxu1 }
 0x2ba   : > { %v6398_v8 = vpop.eup %6397  ;;  %v4513_v58 = vmul.f32 %v6396_v54, %v8676_v46  ;;  %v3991_v38 = vpop.xlane.xlu0 %3990  ;;  %v4196_v46 = vsel %vm1912_vm2, %v8458_v27, 0.0  ;;  %v4289_v27 = vsel %vm1912_vm2, %v8467_v4, 0.0 }
 0x2bb   : > { %v4514_v48 = vmul.f32 %v6398_v8, %v8673_v61  ;;  %v3994_v43 = vpop.xlane.xlu1 %3993  ;;  %6407 = vrcp.f32 %v3991_v38  ;;  %v8846_v11 = vpop.f32.mrb[79].mxu1 }
 0x2bc   : > { %4641 = vst.msk [vmem:[%s8766_s27 + $0x120] sm:$0xff] %vm403_vm0, %v4513_v58  ;;  %6409 = vrcp.f32 %v3994_v43  ;;  %4194 = vadd.xlane.f32.xlu0 %v4193_v28 }
 0x2bd   : > { %v6400_v47 = vpop.eup %6399  ;;  %4642 = vst.msk [vmem:[%s8766_s27 + $0x128] sm:$0xff] %vm403_vm0, %v4514_v48  ;;  %4197 = vadd.xlane.f32.xlu1 %v4196_v46  ;;  %v8857_v39 = vpop.f32.mrb[80].mxu0 }
 0x2be   : > { %v6402_v61 = vpop.eup %6401  ;;  %v4483_v10 = vmul.f32 %v6400_v47, %v8698_v56  ;;  %v4087_v45 = vpop.xlane.xlu0 %4086  ;;  %v4292_v56 = vsel %vm1912_vm2, %v8471_v16, 0.0  ;;  %v4199_v16 = vsel %vm1912_vm2, %v8490_v35, 0.0 }
 0x2bf   : > { %v4484_v17 = vmul.f32 %v6402_v61, %v8689_v32  ;;  %v4090_v14 = vpop.xlane.xlu1 %4089  ;;  %6411 = vrcp.f32 %v4087_v45  ;;  %v8860_v40 = vpop.f32.mrb[81].mxu0 }
 0x2c0   : > { %4611 = vst.msk [vmem:[%s8766_s27 + $0x30] sm:$0xff] %vm403_vm0, %v4483_v10  ;;  %6413 = vrcp.f32 %v4090_v14  ;;  %4290 = vadd.xlane.f32.xlu0 %v4289_v27 }
 0x2c1   : > { %v6404_v13 = vpop.eup %6403  ;;  %4612 = vst.msk [vmem:[%s8766_s27 + $0x38] sm:$0xff] %vm403_vm0, %v4484_v17  ;;  %4293 = vadd.xlane.f32.xlu1 %v4292_v56  ;;  %v8871_v0 = vpop.f32.mrb[80].mxu1 }
 0x2c2   : > { %v6406_v32 = vpop.eup %6405  ;;  %v4515_v21 = vmul.f32 %v6404_v13, %v8711_v12  ;;  %v3997_v19 = vpop.xlane.xlu0 %3996  ;;  %v4202_v12 = vsel %vm1912_vm2, %v8486_v53, 0.0  ;;  %v4295_v53 = vsel %vm1912_vm2, %v8495_v63, 0.0 }
 0x2c3   : > { %v4516_v60 = vmul.f32 %v6406_v32, %v8709_v33  ;;  %v4000_v49 = vpop.xlane.xlu1 %3999  ;;  %6415 = vrcp.f32 %v3997_v19  ;;  %v8874_v4 = vpop.f32.mrb[81].mxu1 }
 0x2c4   : > { %4643 = vst.msk [vmem:[%s8766_s27 + $0x130] sm:$0xff] %vm403_vm0, %v4515_v21  ;;  %6417 = vrcp.f32 %v4000_v49  ;;  %4200 = vadd.xlane.f32.xlu0 %v4199_v16 }
 0x2c5   : > { %v6408_v54 = vpop.eup %6407  ;;  %4644 = vst.msk [vmem:[%s8766_s27 + $0x138] sm:$0xff] %vm403_vm0, %v4516_v60  ;;  %4203 = vadd.xlane.f32.xlu1 %v4202_v12  ;;  %v8885_v8 = vpop.f32.mrb[82].mxu0 }
 0x2c6   : > { %v6410_v33 = vpop.eup %6409  ;;  %v4485_v7 = vmul.f32 %v6408_v54, %v8731_v5  ;;  %v4093_v58 = vpop.xlane.xlu0 %4092  ;;  %v4298_v5 = vsel %vm1912_vm2, %v8499_v51, 0.0  ;;  %v4205_v51 = vsel %vm1912_vm2, %v8518_v57, 0.0 }
 0x2c7   : > { %v4486_v38 = vmul.f32 %v6410_v33, %v8723_v44  ;;  %v4096_v48 = vpop.xlane.xlu1 %4095  ;;  %6419 = vrcp.f32 %v4093_v58  ;;  %v8888_v35 = vpop.f32.mrb[83].mxu0 }
 0x2c8   : > { %4613 = vst.msk [vmem:[%s8766_s27 + $0x40] sm:$0xff] %vm403_vm0, %v4485_v7  ;;  %6421 = vrcp.f32 %v4096_v48  ;;  %4296 = vadd.xlane.f32.xlu0 %v4295_v53 }
 0x2c9   : > { %v6412_v43 = vpop.eup %6411  ;;  %4614 = vst.msk [vmem:[%s8766_s27 + $0x48] sm:$0xff] %vm403_vm0, %v4486_v38  ;;  %4299 = vadd.xlane.f32.xlu1 %v4298_v5  ;;  %v8899_v47 = vpop.f32.mrb[82].mxu1 }
 0x2ca   : > { %v6414_v44 = vpop.eup %6413  ;;  %v4517_v28 = vmul.f32 %v6412_v43, %v8745_v1  ;;  %v4003_v46 = vpop.xlane.xlu0 %4002  ;;  %v4208_v1 = vsel %vm1912_vm2, %v8514_v37, 0.0  ;;  %v4301_v37 = vsel %vm1912_vm2, %v8523_v29, 0.0 }
 0x2cb   : > { %v4518_v61 = vmul.f32 %v6414_v44, %v8741_v9  ;;  %v4006_v10 = vpop.xlane.xlu1 %4005  ;;  %6423 = vrcp.f32 %v4003_v46  ;;  %v8902_v63 = vpop.f32.mrb[83].mxu1  ;;  %v9902_v46 = vld [vmem:[#allocation40_spill] sm:$0xff] }
 0x2cc   : > { %4645 = vst.msk [vmem:[%s8766_s27 + $0x140] sm:$0xff] %vm403_vm0, %v4517_v28  ;;  %6425 = vrcp.f32 %v4006_v10  ;;  %4206 = vadd.xlane.f32.xlu0 %v4205_v51 }
 0x2cd   : > { %v6416_v45 = vpop.eup %6415  ;;  %4646 = vst.msk [vmem:[%s8766_s27 + $0x148] sm:$0xff] %vm403_vm0, %v4518_v61  ;;  %4209 = vadd.xlane.f32.xlu1 %v4208_v1  ;;  %v8913_v14 = vpop.f32.mrb[84].mxu0 }
 0x2ce   : > { %v6418_v9 = vpop.eup %6417  ;;  %v4487_v17 = vmul.f32 %v6416_v45, %v8770_v25  ;;  %v4099_v27 = vpop.xlane.xlu0 %4098  ;;  %v4304_v25 = vsel %vm1912_vm2, %v8527_v2, 0.0  ;;  %v4211_v2 = vsel %vm1912_vm2, %v8546_v30, 0.0 }
 0x2cf   : > { %v4488_v13 = vmul.f32 %v6418_v9, %v8757_v55  ;;  %v4102_v56 = vpop.xlane.xlu1 %4101  ;;  %6427 = vrcp.f32 %v4099_v27  ;;  %v8916_v57 = vpop.f32.mrb[85].mxu0 }
 0x2d0   : > { %4615 = vst.msk [vmem:[%s8766_s27 + $0x50] sm:$0xff] %vm403_vm0, %v4487_v17  ;;  %6429 = vrcp.f32 %v4102_v56  ;;  %4302 = vadd.xlane.f32.xlu0 %v4301_v37 }
 0x2d1   : > { %v6420_v32 = vpop.eup %6419  ;;  %4616 = vst.msk [vmem:[%s8766_s27 + $0x58] sm:$0xff] %vm403_vm0, %v4488_v13  ;;  %4305 = vadd.xlane.f32.xlu1 %v4304_v25  ;;  %v8927_v19 = vpop.f32.mrb[84].mxu1  ;;  %v9904_v13 = vld [vmem:[#allocation41_spill] sm:$0xff] }
 0x2d2   : > { %v6422_v55 = vpop.eup %6421  ;;  %v4519_v21 = vmul.f32 %v6420_v32, %v8790_v23  ;;  %v4009_v60 = vpop.xlane.xlu0 %4008  ;;  %v4214_v23 = vsel %vm1912_vm2, %v8542_v36, 0.0  ;;  %v4307_v36 = vsel %vm1912_vm2, %v8551_v59, 0.0  ;;  %v4313_v56 = vsel %vm1912_vm2, %v9904_v13, 0.0 }
 0x2d3   : > { %v4520_v49 = vmul.f32 %v6422_v55, %v8785_v41  ;;  %v4012_v16 = vpop.xlane.xlu1 %4011  ;;  %6431 = vrcp.f32 %v4009_v60  ;;  %v8930_v29 = vpop.f32.mrb[85].mxu1 }
 0x2d4   : > { %4647 = vst.msk [vmem:[%s8766_s27 + $0x150] sm:$0xff] %vm403_vm0, %v4519_v21  ;;  %6433 = vrcp.f32 %v4012_v16  ;;  %4212 = vadd.xlane.f32.xlu0 %v4211_v2  ;;  %v9906_v2 = vld [vmem:[#allocation45_spill] sm:$0xff] }
 0x2d5   : > { %v6424_v54 = vpop.eup %6423  ;;  %4648 = vst.msk [vmem:[%s8766_s27 + $0x158] sm:$0xff] %vm403_vm0, %v4520_v49  ;;  %4215 = vadd.xlane.f32.xlu1 %v4214_v23  ;;  %v8941_v33 = vpop.f32.mrb[86].mxu0 }
 0x2d6   : > { %v6426_v41 = vpop.eup %6425  ;;  %v4489_v12 = vmul.f32 %v6424_v54, %v8804_v24  ;;  %v4105_v7 = vpop.xlane.xlu0 %4104  ;;  %v4310_v24 = vsel %vm1912_vm2, %v8555_v42, 0.0  ;;  %v4217_v42 = vsel %vm1912_vm2, %v9902_v46, 0.0  ;;  %v4223_v54 = vsel %vm1912_vm2, %v9906_v2, 0.0 }
 0x2d7   : > { %v4490_v58 = vmul.f32 %v6426_v41, %v8801_v34  ;;  %v4108_v38 = vpop.xlane.xlu1 %4107  ;;  %6435 = vrcp.f32 %v4105_v7  ;;  %v8944_v30 = vpop.f32.mrb[87].mxu0 }
 0x2d8   : > { %4617 = vst.msk [vmem:[%s8766_s27 + $0x60] sm:$0xff] %vm403_vm0, %v4489_v12  ;;  %6437 = vrcp.f32 %v4108_v38  ;;  %4308 = vadd.xlane.f32.xlu0 %v4307_v36 }
 0x2d9   : > { %v6428_v48 = vpop.eup %6427  ;;  %4618 = vst.msk [vmem:[%s8766_s27 + $0x68] sm:$0xff] %vm403_vm0, %v4490_v58  ;;  %4311 = vadd.xlane.f32.xlu1 %v4310_v24  ;;  %v8955_v43 = vpop.f32.mrb[86].mxu1  ;;  %v9908_v24 = vld [vmem:[#allocation48_spill] sm:$0xff] }
 0x2da   : > { %v6430_v34 = vpop.eup %6429  ;;  %v4521_v53 = vmul.f32 %v6428_v48, %v8818_v62  ;;  %v4015_v5 = vpop.xlane.xlu0 %4014  ;;  %v9903_v62 = vld [vmem:[#allocation70_spill] sm:$0xff] }
 0x2db   : > { %v4522_v44 = vmul.f32 %v6430_v34, %v8815_v3  ;;  %v4018_v28 = vpop.xlane.xlu1 %4017  ;;  %6439 = vrcp.f32 %v4015_v5  ;;  %v8958_v59 = vpop.f32.mrb[87].mxu1  ;;  %v4220_v10 = vsel %vm1912_vm2, %v9903_v62, 0.0  ;;  %v4319_v34 = vsel %vm1912_vm2, %v9908_v24, 0.0 }
 0x2dc   : > { %4649 = vst.msk [vmem:[%s8766_s27 + $0x160] sm:$0xff] %vm403_vm0, %v4521_v53  ;;  %6441 = vrcp.f32 %v4018_v28  ;;  %4218 = vadd.xlane.f32.xlu0 %v4217_v42 }
 0x2dd   : > { %v6432_v61 = vpop.eup %6431  ;;  %4650 = vst.msk [vmem:[%s8766_s27 + $0x168] sm:$0xff] %vm403_vm0, %v4522_v44  ;;  %4221 = vadd.xlane.f32.xlu1 %v4220_v10  ;;  %v8969_v45 = vpop.f32.mrb[88].mxu0  ;;  %v9910_v10 = vld [vmem:[#allocation52_spill] sm:$0xff] }
 0x2de   : > { %v6434_v3 = vpop.eup %6433  ;;  %v4491_v51 = vmul.f32 %v6432_v61, %v8832_v20  ;;  %v4111_v1 = vpop.xlane.xlu0 %4110  ;;  %v9905_v20 = vld [vmem:[#allocation71_spill] sm:$0xff] }
 0x2df   : > { %v4492_v9 = vmul.f32 %v6434_v3, %v8829_v18  ;;  %v4114_v17 = vpop.xlane.xlu1 %4113  ;;  %6443 = vrcp.f32 %v4111_v1  ;;  %v8972_v27 = vpop.f32.mrb[89].mxu0  ;;  %v4316_v32 = vsel %vm1912_vm2, %v9905_v20, 0.0  ;;  %v4229_v3 = vsel %vm1912_vm2, %v9910_v10, 0.0 }
 0x2e0   : > { %4619 = vst.msk [vmem:[%s8766_s27 + $0x70] sm:$0xff] %vm403_vm0, %v4491_v51  ;;  %6445 = vrcp.f32 %v4114_v17  ;;  %4314 = vadd.xlane.f32.xlu0 %v4313_v56 }
 0x2e1   : > { %v6436_v37 = vpop.eup %6435  ;;  %4620 = vst.msk [vmem:[%s8766_s27 + $0x78] sm:$0xff] %vm403_vm0, %v4492_v9  ;;  %4317 = vadd.xlane.f32.xlu1 %v4316_v32  ;;  %v8983_v55 = vpop.f32.mrb[88].mxu1  ;;  %v9912_v32 = vld [vmem:[#allocation53_spill] sm:$0xff] }
 0x2e2   : > { %v6438_v18 = vpop.eup %6437  ;;  %v4523_v25 = vmul.f32 %v6436_v37, %v8846_v11  ;;  %v4021_v21 = vpop.xlane.xlu0 %4020  ;;  %v9907_v11 = vld [vmem:[#allocation44_spill] sm:$0xff] }
 0x2e3   : > { %v4524_v60 = vmul.f32 %v6438_v18, %v8843_v52  ;;  %v4024_v49 = vpop.xlane.xlu1 %4023  ;;  %6447 = vrcp.f32 %v4021_v21  ;;  %v8986_v16 = vpop.f32.mrb[89].mxu1  ;;  %v4226_v41 = vsel %vm1912_vm2, %v9907_v11, 0.0  ;;  %v4325_v18 = vsel %vm1912_vm2, %v9912_v32, 0.0 }
 0x2e4   : > { %4651 = vst.msk [vmem:[%s8766_s27 + $0x170] sm:$0xff] %vm403_vm0, %v4523_v25  ;;  %6449 = vrcp.f32 %v4024_v49  ;;  %4224 = vadd.xlane.f32.xlu0 %v4223_v54 }
 0x2e5   : > { %v6440_v23 = vpop.eup %6439  ;;  %4652 = vst.msk [vmem:[%s8766_s27 + $0x178] sm:$0xff] %vm403_vm0, %v4524_v60  ;;  %4227 = vadd.xlane.f32.xlu1 %v4226_v41  ;;  %v8997_v7 = vpop.f32.mrb[90].mxu0  ;;  %v4235_v41 = vsel %vm1912_vm2, %v8683_v22, 0.0 }
 0x2e6   : > { %v6442_v52 = vpop.eup %6441  ;;  %v4493_v12 = vmul.f32 %v6440_v23, %v8860_v40  ;;  %v4117_v58 = vpop.xlane.xlu0 %4116  ;;  %v9909_v40 = vld [vmem:[#allocation49_spill] sm:$0xff] }
 0x2e7   : > { %v4494_v38 = vmul.f32 %v6442_v52, %v8857_v39  ;;  %v4120_v36 = vpop.xlane.xlu1 %4119  ;;  %6451 = vrcp.f32 %v4117_v58  ;;  %v9000_v48 = vpop.f32.mrb[91].mxu0  ;;  %v4322_v5 = vsel %vm1912_vm2, %v9909_v40, 0.0 }
 0x2e8   : > { %4621 = vst.msk [vmem:[%s8766_s27 + $0x80] sm:$0xff] %vm403_vm0, %v4493_v12  ;;  %6453 = vrcp.f32 %v4120_v36  ;;  %4320 = vadd.xlane.f32.xlu0 %v4319_v34 }
 0x2e9   : > { %v6444_v53 = vpop.eup %6443  ;;  %4622 = vst.msk [vmem:[%s8766_s27 + $0x88] sm:$0xff] %vm403_vm0, %v4494_v38  ;;  %4323 = vadd.xlane.f32.xlu1 %v4322_v5  ;;  %v9011_v28 = vpop.f32.mrb[90].mxu1 }
 0x2ea   : > { %v6446_v39 = vpop.eup %6445  ;;  %v4525_v44 = vmul.f32 %v6444_v53, %v8874_v4  ;;  %v4027_v46 = vpop.xlane.xlu0 %4026  ;;  %v9911_v4 = vld [vmem:[#allocation73_spill] sm:$0xff] }
 0x2eb   : > { %v4526_v42 = vmul.f32 %v6446_v39, %v8871_v0  ;;  %v4030_v61 = vpop.xlane.xlu1 %4029  ;;  %6455 = vrcp.f32 %v4027_v46  ;;  %v9014_v62 = vpop.f32.mrb[91].mxu1  ;;  %v4232_v1 = vsel %vm1912_vm2, %v9911_v4, 0.0 }
 0x2ec   : > { %4653 = vst.msk [vmem:[%s8766_s27 + $0x180] sm:$0xff] %vm403_vm0, %v4525_v44  ;;  %6457 = vrcp.f32 %v4030_v61  ;;  %4230 = vadd.xlane.f32.xlu0 %v4229_v3 }
 0x2ed   : > { %v6448_v51 = vpop.eup %6447  ;;  %4654 = vst.msk [vmem:[%s8766_s27 + $0x188] sm:$0xff] %vm403_vm0, %v4526_v42  ;;  %4233 = vadd.xlane.f32.xlu1 %v4232_v1  ;;  %v9025_v17 = vpop.f32.mrb[92].mxu0  ;;  %v4241_v42 = vsel %vm1912_vm2, %v8717_v50, 0.0  ;;  %v4337_v50 = vsel %vm1912_vm2, %v8721_v6, 0.0 }
 0x2ee   : > { %v6450_v0 = vpop.eup %6449  ;;  %v4495_v9 = vmul.f32 %v6448_v51, %v8888_v35  ;;  %v4123_v13 = vpop.xlane.xlu0 %4122  ;;  %v9913_v35 = vld [vmem:[#allocation56_spill] sm:$0xff] }
 0x2ef   : > { %v4496_v56 = vmul.f32 %v6450_v0, %v8885_v8  ;;  %v4126_v37 = vpop.xlane.xlu1 %4125  ;;  %6459 = vrcp.f32 %v4123_v13  ;;  %v9028_v20 = vpop.f32.mrb[93].mxu0  ;;  %v4328_v21 = vsel %vm1912_vm2, %v9913_v35, 0.0 }
 0x2f0   : > { %4623 = vst.msk [vmem:[%s8766_s27 + $0x90] sm:$0xff] %vm403_vm0, %v4495_v9  ;;  %6461 = vrcp.f32 %v4126_v37  ;;  %4326 = vadd.xlane.f32.xlu0 %v4325_v18 }
 0x2f1   : > { %v6452_v25 = vpop.eup %6451  ;;  %4624 = vst.msk [vmem:[%s8766_s27 + $0x98] sm:$0xff] %vm403_vm0, %v4496_v56  ;;  %4329 = vadd.xlane.f32.xlu1 %v4328_v21  ;;  %v9039_v49 = vpop.f32.mrb[92].mxu1 }
 0x2f2   : > { %v6454_v8 = vpop.eup %6453  ;;  %v4527_v60 = vmul.f32 %v6452_v25, %v8902_v63  ;;  %v4033_v2 = vpop.xlane.xlu0 %4032  ;;  %v4238_v63 = vsel %vm1912_vm2, %v8678_v15, 0.0  ;;  %v4331_v15 = vsel %vm1912_vm2, %v8687_v26, 0.0  ;;  %v9916_v25 = vld [vmem:[#allocation65_spill] sm:$0xff] }
 0x2f3   : > { %v4528_v54 = vmul.f32 %v6454_v8, %v8899_v47  ;;  %v4036_v23 = vpop.xlane.xlu1 %4035  ;;  %6463 = vrcp.f32 %v4033_v2  ;;  %v9042_v11 = vpop.f32.mrb[93].mxu1 }
 0x2f4   : > { %4655 = vst.msk [vmem:[%s8766_s27 + $0x190] sm:$0xff] %vm403_vm0, %v4527_v60  ;;  %6465 = vrcp.f32 %v4036_v23  ;;  %4236 = vadd.xlane.f32.xlu0 %v4235_v41  ;;  %v9918_v41 = vld [vmem:[#allocation68_spill] sm:$0xff] }
 0x2f5   : > { %v6456_v52 = vpop.eup %6455  ;;  %4656 = vst.msk [vmem:[%s8766_s27 + $0x198] sm:$0xff] %vm403_vm0, %v4528_v54  ;;  %4239 = vadd.xlane.f32.xlu1 %v4238_v63  ;;  %v9053_v58 = vpop.f32.mrb[94].mxu0 }
 0x2f6   : > { %v6458_v47 = vpop.eup %6457  ;;  %v4497_v12 = vmul.f32 %v6456_v52, %v8916_v57  ;;  %v4129_v38 = vpop.xlane.xlu0 %4128  ;;  %v9914_v57 = vld [vmem:[#allocation57_spill] sm:$0xff]  ;;  %v4343_v52 = vsel %vm1912_vm2, %v9918_v41, 0.0 }
 0x2f7   : > { %v4498_v36 = vmul.f32 %v6458_v47, %v8913_v14  ;;  %v4132_v24 = vpop.xlane.xlu1 %4131  ;;  %6467 = vrcp.f32 %v4129_v38  ;;  %v9056_v22 = vpop.f32.mrb[95].mxu0  ;;  %v4334_v53 = vsel %vm1912_vm2, %v9914_v57, 0.0  ;;  %v9919_v47 = vld [vmem:[#allocation64_spill] sm:$0xff] }
 0x2f8   : > { %4625 = vst.msk [vmem:[%s8766_s27 + $0xa0] sm:$0xff] %vm403_vm0, %v4497_v12  ;;  %6469 = vrcp.f32 %v4132_v24  ;;  %4332 = vadd.xlane.f32.xlu0 %v4331_v15  ;;  %v4346_v12 = vsel %vm1912_vm2, %v9919_v47, 0.0 }
 0x2f9   : > { %v6460_v34 = vpop.eup %6459  ;;  %4626 = vst.msk [vmem:[%s8766_s27 + $0xa8] sm:$0xff] %vm403_vm0, %v4498_v36  ;;  %4335 = vadd.xlane.f32.xlu1 %v4334_v53  ;;  %v9067_v5 = vpop.f32.mrb[94].mxu1 }
 0x2fa   : > { %v6462_v14 = vpop.eup %6461  ;;  %v4529_v40 = vmul.f32 %v6460_v34, %v8930_v29  ;;  %v4039_v39 = vpop.xlane.xlu0 %4038  ;;  %v4244_v29 = vsel %vm1912_vm2, %v8713_v31, 0.0  ;;  %v9915_v31 = vld [vmem:[#allocation60_spill] sm:$0xff] }
 0x2fb   : > { %v4530_v44 = vmul.f32 %v6462_v14, %v8927_v19  ;;  %v4042_v46 = vpop.xlane.xlu1 %4041  ;;  %6471 = vrcp.f32 %v4039_v39  ;;  %v9070_v26 = vpop.f32.mrb[95].mxu1  ;;  %v4340_v0 = vsel %vm1912_vm2, %v9915_v31, 0.0 }
 0x2fc   : > { %4657 = vst.msk [vmem:[%s8766_s27 + $0x1a0] sm:$0xff] %vm403_vm0, %v4529_v40  ;;  %6473 = vrcp.f32 %v4042_v46  ;;  %4242 = vadd.xlane.f32.xlu0 %v4241_v42 }
 0x2fd   : > { %v6464_v61 = vpop.eup %6463  ;;  %4658 = vst.msk [vmem:[%s8766_s27 + $0x1a8] sm:$0xff] %vm403_vm0, %v4530_v44  ;;  %4245 = vadd.xlane.f32.xlu1 %v4244_v29 }
 0x2fe   : > { %v6466_v19 = vpop.eup %6465  ;;  %v4499_v10 = vmul.f32 %v6464_v61, %v8944_v30  ;;  %v4135_v3 = vpop.xlane.xlu0 %4134 }
 0x2ff   : > { %v4500_v51 = vmul.f32 %v6466_v19, %v8941_v33  ;;  %v4138_v4 = vpop.xlane.xlu1 %4137  ;;  %6475 = vrcp.f32 %v4135_v3 }
 0x300   : > { %4627 = vst.msk [vmem:[%s8766_s27 + $0xb0] sm:$0xff] %vm403_vm0, %v4499_v10  ;;  %6477 = vrcp.f32 %v4138_v4  ;;  %4338 = vadd.xlane.f32.xlu0 %v4337_v50 }
 0x301   : > { %v6468_v1 = vpop.eup %6467  ;;  %4628 = vst.msk [vmem:[%s8766_s27 + $0xb8] sm:$0xff] %vm403_vm0, %v4500_v51  ;;  %4341 = vadd.xlane.f32.xlu1 %v4340_v0  ;;  %v9091_v9 = vpop.f32.mrb[96].mxu0 }
 0x302   : > { %v6470_v30 = vpop.eup %6469  ;;  %v4531_v33 = vmul.f32 %v6468_v1, %v8958_v59  ;;  %v4045_v13 = vpop.xlane.xlu0 %4044  ;;  %v4247_v59 = vsel %vm1912_vm2, %v9916_v25, 0.0 }
 0x303   : > { %v4532_v56 = vmul.f32 %v6470_v30, %v8955_v43  ;;  %v9094_v37 = vpop.f32.mrb[96].mxu1  ;;  %v4048_v6 = vpop.xlane.xlu1 %4047  ;;  %6479 = vrcp.f32 %v4045_v13  ;;  %v9917_v43 = vld [vmem:[#allocation61_spill] sm:$0xff] }
 0x304   : > { %4659 = vst.msk [vmem:[%s8766_s27 + $0x1b0] sm:$0xff] %vm403_vm0, %v4531_v33  ;;  %6481 = vrcp.f32 %v4048_v6  ;;  %v9098_v32 = vpop.f32.mrb[97].mxu0  ;;  %v9100_v18 = vpop.f32.mrb[97].mxu1  ;;  %v4250_v21 = vsel %vm1912_vm2, %v9917_v43, 0.0  ;;  %4248 = vadd.xlane.f32.xlu0 %v4247_v59 }
 0x305   : > { %v6472_v35 = vpop.eup %6471  ;;  %4660 = vst.msk [vmem:[%s8766_s27 + $0x1b8] sm:$0xff] %vm403_vm0, %v4532_v56  ;;  %4251 = vadd.xlane.f32.xlu1 %v4250_v21 }
 0x306   : > { %v6474_v8 = vpop.eup %6473  ;;  %v4501_v60 = vmul.f32 %v6472_v35, %v8972_v27  ;;  %v4141_v2 = vpop.xlane.xlu0 %4140 }
 0x307   : > { %v4502_v54 = vmul.f32 %v6474_v8, %v8969_v45  ;;  %v4144_v23 = vpop.xlane.xlu1 %4143  ;;  %6483 = vrcp.f32 %v4141_v2 }
 0x308   : > { %4629 = vst.msk [vmem:[%s8766_s27 + $0xc0] sm:$0xff] %vm403_vm0, %v4501_v60  ;;  %6485 = vrcp.f32 %v4144_v23  ;;  %4344 = vadd.xlane.f32.xlu0 %v4343_v52 }
 0x309   : > { %v6476_v63 = vpop.eup %6475  ;;  %4630 = vst.msk [vmem:[%s8766_s27 + $0xc8] sm:$0xff] %vm403_vm0, %v4502_v54  ;;  %4347 = vadd.xlane.f32.xlu1 %v4346_v12  ;;  %v9119_v38 = vpop.f32.mrb[98].mxu0 }
 0x30a   : > { %v6478_v27 = vpop.eup %6477  ;;  %v4533_v45 = vmul.f32 %v6476_v63, %v8986_v16  ;;  %v4051_v36 = vpop.xlane.xlu0 %4050 }
 0x30b   : > { %v4534_v24 = vmul.f32 %v6478_v27, %v8983_v55  ;;  %v9122_v15 = vpop.f32.mrb[98].mxu1  ;;  %v4054_v34 = vpop.xlane.xlu1 %4053  ;;  %6487 = vrcp.f32 %v4051_v36 }
 0x30c   : > { %4661 = vst.msk [vmem:[%s8766_s27 + $0x1c0] sm:$0xff] %vm403_vm0, %v4533_v45  ;;  %6489 = vrcp.f32 %v4054_v34  ;;  %v9126_v57 = vpop.f32.mrb[99].mxu0  ;;  %v9128_v53 = vpop.f32.mrb[99].mxu1 }
 0x30d   : > { %v6480_v16 = vpop.eup %6479  ;;  %4662 = vst.msk [vmem:[%s8766_s27 + $0x1c8] sm:$0xff] %vm403_vm0, %v4534_v24 }
 0x30e   : > { %v6482_v14 = vpop.eup %6481  ;;  %v4503_v40 = vmul.f32 %v6480_v16, %v9000_v48  ;;  %v4147_v55 = vpop.xlane.xlu0 %4146 }
 0x30f   : > { %v4504_v39 = vmul.f32 %v6482_v14, %v8997_v7  ;;  %v4150_v44 = vpop.xlane.xlu1 %4149  ;;  %6491 = vrcp.f32 %v4147_v55 }
 0x310   : > { %4631 = vst.msk [vmem:[%s8766_s27 + $0xd0] sm:$0xff] %vm403_vm0, %v4503_v40  ;;  %6493 = vrcp.f32 %v4150_v44 }
 0x311   : > { %v6484_v46 = vpop.eup %6483  ;;  %4632 = vst.msk [vmem:[%s8766_s27 + $0xd8] sm:$0xff] %vm403_vm0, %v4504_v39  ;;  %v9139_v29 = vpop.f32.mrb[100].mxu0 }
 0x312   : > { %v6486_v42 = vpop.eup %6485  ;;  %v4535_v61 = vmul.f32 %v6484_v46, %v9014_v62  ;;  %v4057_v19 = vpop.xlane.xlu0 %4056 }
 0x313   : > { %v4536_v48 = vmul.f32 %v6486_v42, %v9011_v28  ;;  %v9142_v10 = vpop.f32.mrb[100].mxu1  ;;  %v4060_v7 = vpop.xlane.xlu1 %4059  ;;  %6495 = vrcp.f32 %v4057_v19 }
 0x314   : > { %4663 = vst.msk [vmem:[%s8766_s27 + $0x1d0] sm:$0xff] %vm403_vm0, %v4535_v61  ;;  %6497 = vrcp.f32 %v4060_v7  ;;  %v9146_v3 = vpop.f32.mrb[101].mxu0  ;;  %v9148_v51 = vpop.f32.mrb[101].mxu1 }
 0x315   : > { %v6488_v4 = vpop.eup %6487  ;;  %4664 = vst.msk [vmem:[%s8766_s27 + $0x1d8] sm:$0xff] %vm403_vm0, %v4536_v48 }
 0x316   : > { %v6490_v62 = vpop.eup %6489  ;;  %v4505_v50 = vmul.f32 %v6488_v4, %v9028_v20  ;;  %v4153_v28 = vpop.xlane.xlu0 %4152 }
 0x317   : > { %v4506_v1 = vmul.f32 %v6490_v62, %v9025_v17  ;;  %v4156_v31 = vpop.xlane.xlu1 %4155  ;;  %6499 = vrcp.f32 %v4153_v28 }
 0x318   : > { %4633 = vst.msk [vmem:[%s8766_s27 + $0xe0] sm:$0xff] %vm403_vm0, %v4505_v50  ;;  %6501 = vrcp.f32 %v4156_v31 }
 0x319   : > { %v6492_v0 = vpop.eup %6491  ;;  %4634 = vst.msk [vmem:[%s8766_s27 + $0xe8] sm:$0xff] %vm403_vm0, %v4506_v1  ;;  %v9159_v13 = vpop.f32.mrb[102].mxu0 }
 0x31a   : > { %v6494_v30 = vpop.eup %6493  ;;  %v4537_v33 = vmul.f32 %v6492_v0, %v9042_v11  ;;  %v4159_v56 = vpop.xlane.xlu0 %4158 }
 0x31b   : > { %v4538_v20 = vmul.f32 %v6494_v30, %v9039_v49  ;;  %v9162_v6 = vpop.f32.mrb[102].mxu1  ;;  %v4162_v17 = vpop.xlane.xlu1 %4161  ;;  %6503 = vrcp.f32 %v4159_v56 }
 0x31c   : > { %4665 = vst.msk [vmem:[%s8766_s27 + $0x1e0] sm:$0xff] %vm403_vm0, %v4537_v33  ;;  %6505 = vrcp.f32 %v4162_v17  ;;  %v9166_v25 = vpop.f32.mrb[103].mxu0  ;;  %v9168_v59 = vpop.f32.mrb[103].mxu1 }
 0x31d   : > { %v6496_v35 = vpop.eup %6495  ;;  %4666 = vst.msk [vmem:[%s8766_s27 + $0x1e8] sm:$0xff] %vm403_vm0, %v4538_v20 }
 0x31e   : > { %v6498_v11 = vpop.eup %6497  ;;  %v4507_v43 = vmul.f32 %v6496_v35, %v9056_v22  ;;  %v4255_v49 = vpop.xlane.xlu0 %4254 }
 0x31f   : > { %v4508_v21 = vmul.f32 %v6498_v11, %v9053_v58  ;;  %v4258_v8 = vpop.xlane.xlu1 %4257  ;;  %6507 = vrcp.f32 %v4255_v49 }
 0x320   : > { %4635 = vst.msk [vmem:[%s8766_s27 + $0xf0] sm:$0xff] %vm403_vm0, %v4507_v43  ;;  %6509 = vrcp.f32 %v4258_v8 }
 0x321   : > { %v6500_v60 = vpop.eup %6499  ;;  %4636 = vst.msk [vmem:[%s8766_s27 + $0xf8] sm:$0xff] %vm403_vm0, %v4508_v21  ;;  %v9179_v23 = vpop.f32.mrb[104].mxu0 }
 0x322   : > { %v6502_v2 = vpop.eup %6501  ;;  %v4539_v54 = vmul.f32 %v6500_v60, %v9070_v26  ;;  %v4165_v41 = vpop.xlane.xlu0 %4164 }
 0x323   : > { %v4540_v22 = vmul.f32 %v6502_v2, %v9067_v5  ;;  %v9182_v52 = vpop.f32.mrb[104].mxu1  ;;  %v4168_v58 = vpop.xlane.xlu1 %4167  ;;  %6511 = vrcp.f32 %v4165_v41 }
 0x324   : > { %4667 = vst.msk [vmem:[%s8766_s27 + $0x1f0] sm:$0xff] %vm403_vm0, %v4539_v54  ;;  %6513 = vrcp.f32 %v4168_v58  ;;  %v9186_v63 = vpop.f32.mrb[105].mxu0  ;;  %v9188_v47 = vpop.f32.mrb[105].mxu1 }
 0x325   : > { %v6504_v12 = vpop.eup %6503  ;;  %4668 = vst.msk [vmem:[%s8766_s27 + $0x1f8] sm:$0xff] %vm403_vm0, %v4540_v22 }
 0x326   : > { %v6506_v26 = vpop.eup %6505  ;;  %v4541_v27 = vmul.f32 %v6504_v12, %v9098_v32  ;;  %v4261_v5 = vpop.xlane.xlu0 %4260 }
 0x327   : > { %v4542_v45 = vmul.f32 %v6506_v26, %v9091_v9  ;;  %v4264_v36 = vpop.xlane.xlu1 %4263  ;;  %6515 = vrcp.f32 %v4261_v5 }
 0x328   : > { %4669 = vst.msk [vmem:[%s8766_s27 + $0x200] sm:$0xff] %vm403_vm0, %v4541_v27  ;;  %6517 = vrcp.f32 %v4264_v36 }
 0x329   : > { %v6508_v24 = vpop.eup %6507  ;;  %4670 = vst.msk [vmem:[%s8766_s27 + $0x208] sm:$0xff] %vm403_vm0, %v4542_v45  ;;  %v9199_v14 = vpop.f32.mrb[106].mxu0 }
 0x32a   : > { %v6510_v34 = vpop.eup %6509  ;;  %v4573_v16 = vmul.f32 %v6508_v24, %v9100_v18  ;;  %v4171_v40 = vpop.xlane.xlu0 %4170 }
 0x32b   : > { %v4574_v32 = vmul.f32 %v6510_v34, %v9094_v37  ;;  %v9202_v55 = vpop.f32.mrb[106].mxu1  ;;  %v4174_v9 = vpop.xlane.xlu1 %4173  ;;  %6519 = vrcp.f32 %v4171_v40 }
 0x32c   : > { %4701 = vst.msk [vmem:[%s8766_s27 + $0x300] sm:$0xff] %vm403_vm0, %v4573_v16  ;;  %6521 = vrcp.f32 %v4174_v9  ;;  %v9206_v39 = vpop.f32.mrb[107].mxu0  ;;  %v9208_v44 = vpop.f32.mrb[107].mxu1 }
 0x32d   : > { %v6512_v46 = vpop.eup %6511  ;;  %4702 = vst.msk [vmem:[%s8766_s27 + $0x308] sm:$0xff] %vm403_vm0, %v4574_v32 }
 0x32e   : > { %v6514_v18 = vpop.eup %6513  ;;  %v4543_v42 = vmul.f32 %v6512_v46, %v9126_v57  ;;  %v4267_v37 = vpop.xlane.xlu0 %4266 }
 0x32f   : > { %v4544_v61 = vmul.f32 %v6514_v18, %v9119_v38  ;;  %v4270_v19 = vpop.xlane.xlu1 %4269  ;;  %6523 = vrcp.f32 %v4267_v37 }
 0x330   : > { %4671 = vst.msk [vmem:[%s8766_s27 + $0x210] sm:$0xff] %vm403_vm0, %v4543_v42  ;;  %6525 = vrcp.f32 %v4270_v19 }
 0x331   : > { %v6516_v48 = vpop.eup %6515  ;;  %4672 = vst.msk [vmem:[%s8766_s27 + $0x218] sm:$0xff] %vm403_vm0, %v4544_v61  ;;  %v9219_v62 = vpop.f32.mrb[108].mxu0 }
 0x332   : > { %v6518_v7 = vpop.eup %6517  ;;  %v4575_v4 = vmul.f32 %v6516_v48, %v9128_v53  ;;  %v4177_v50 = vpop.xlane.xlu0 %4176 }
 0x333   : > { %v4576_v57 = vmul.f32 %v6518_v7, %v9122_v15  ;;  %v9222_v28 = vpop.f32.mrb[108].mxu1  ;;  %v4180_v38 = vpop.xlane.xlu1 %4179  ;;  %6527 = vrcp.f32 %v4177_v50 }
 0x334   : > { %4703 = vst.msk [vmem:[%s8766_s27 + $0x310] sm:$0xff] %vm403_vm0, %v4575_v4  ;;  %6529 = vrcp.f32 %v4180_v38  ;;  %v9226_v1 = vpop.f32.mrb[109].mxu0  ;;  %v9228_v31 = vpop.f32.mrb[109].mxu1 }
 0x335   : > { %v6520_v0 = vpop.eup %6519  ;;  %4704 = vst.msk [vmem:[%s8766_s27 + $0x318] sm:$0xff] %vm403_vm0, %v4576_v57 }
 0x336   : > { %v6522_v53 = vpop.eup %6521  ;;  %v4545_v30 = vmul.f32 %v6520_v0, %v9146_v3  ;;  %v4273_v15 = vpop.xlane.xlu0 %4272 }
 0x337   : > { %v4546_v33 = vmul.f32 %v6522_v53, %v9139_v29  ;;  %v4276_v56 = vpop.xlane.xlu1 %4275  ;;  %6531 = vrcp.f32 %v4273_v15 }
 0x338   : > { %4673 = vst.msk [vmem:[%s8766_s27 + $0x220] sm:$0xff] %vm403_vm0, %v4545_v30  ;;  %6533 = vrcp.f32 %v4276_v56 }
 0x339   : > { %v6524_v20 = vpop.eup %6523  ;;  %4674 = vst.msk [vmem:[%s8766_s27 + $0x228] sm:$0xff] %vm403_vm0, %v4546_v33  ;;  %v9239_v11 = vpop.f32.mrb[110].mxu0 }
 0x33a   : > { %v6526_v17 = vpop.eup %6525  ;;  %v4577_v35 = vmul.f32 %v6524_v20, %v9148_v51  ;;  %v4183_v43 = vpop.xlane.xlu0 %4182 }
 0x33b   : > { %v4578_v3 = vmul.f32 %v6526_v17, %v9142_v10  ;;  %v9242_v49 = vpop.f32.mrb[110].mxu1  ;;  %v4186_v29 = vpop.xlane.xlu1 %4185  ;;  %6535 = vrcp.f32 %v4183_v43 }
 0x33c   : > { %4705 = vst.msk [vmem:[%s8766_s27 + $0x320] sm:$0xff] %vm403_vm0, %v4577_v35  ;;  %6537 = vrcp.f32 %v4186_v29  ;;  %v9246_v21 = vpop.f32.mrb[111].mxu0  ;;  %v9248_v8 = vpop.f32.mrb[111].mxu1 }
 0x33d   : > { %v6528_v60 = vpop.eup %6527  ;;  %4706 = vst.msk [vmem:[%s8766_s27 + $0x328] sm:$0xff] %vm403_vm0, %v4578_v3 }
 0x33e   : > { %v6530_v51 = vpop.eup %6529  ;;  %v4547_v2 = vmul.f32 %v6528_v60, %v9166_v25  ;;  %v4279_v10 = vpop.xlane.xlu0 %4278 }
 0x33f   : > { %v4548_v54 = vmul.f32 %v6530_v51, %v9159_v13  ;;  %v4282_v41 = vpop.xlane.xlu1 %4281  ;;  %6539 = vrcp.f32 %v4279_v10 }
 0x340   : > { %4675 = vst.msk [vmem:[%s8766_s27 + $0x230] sm:$0xff] %vm403_vm0, %v4547_v2  ;;  %6541 = vrcp.f32 %v4282_v41 }
 0x341   : > { %v6532_v22 = vpop.eup %6531  ;;  %4676 = vst.msk [vmem:[%s8766_s27 + $0x238] sm:$0xff] %vm403_vm0, %v4548_v54  ;;  %v9259_v26 = vpop.f32.mrb[112].mxu0 }
 0x342   : > { %v6534_v58 = vpop.eup %6533  ;;  %v4579_v12 = vmul.f32 %v6532_v22, %v9168_v59  ;;  %v4189_v27 = vpop.xlane.xlu0 %4188 }
 0x343   : > { %v4580_v25 = vmul.f32 %v6534_v58, %v9162_v6  ;;  %v9262_v5 = vpop.f32.mrb[112].mxu1  ;;  %v4192_v13 = vpop.xlane.xlu1 %4191  ;;  %6543 = vrcp.f32 %v4189_v27 }
 0x344   : > { %4707 = vst.msk [vmem:[%s8766_s27 + $0x330] sm:$0xff] %vm403_vm0, %v4579_v12  ;;  %6545 = vrcp.f32 %v4192_v13  ;;  %v9266_v45 = vpop.f32.mrb[113].mxu0  ;;  %v9268_v36 = vpop.f32.mrb[113].mxu1 }
 0x345   : > { %v6536_v24 = vpop.eup %6535  ;;  %4708 = vst.msk [vmem:[%s8766_s27 + $0x338] sm:$0xff] %vm403_vm0, %v4580_v25 }
 0x346   : > { %v6538_v59 = vpop.eup %6537  ;;  %v4549_v34 = vmul.f32 %v6536_v24, %v9186_v63  ;;  %v4285_v6 = vpop.xlane.xlu0 %4284 }
 0x347   : > { %v4550_v16 = vmul.f32 %v6538_v59, %v9179_v23  ;;  %v4288_v40 = vpop.xlane.xlu1 %4287  ;;  %6547 = vrcp.f32 %v4285_v6 }
 0x348   : > { %4677 = vst.msk [vmem:[%s8766_s27 + $0x240] sm:$0xff] %vm403_vm0, %v4549_v34  ;;  %6549 = vrcp.f32 %v4288_v40 }
 0x349   : > { %v6540_v32 = vpop.eup %6539  ;;  %4678 = vst.msk [vmem:[%s8766_s27 + $0x248] sm:$0xff] %vm403_vm0, %v4550_v16  ;;  %v9279_v18 = vpop.f32.mrb[114].mxu0 }
 0x34a   : > { %v6542_v9 = vpop.eup %6541  ;;  %v4581_v46 = vmul.f32 %v6540_v32, %v9188_v47  ;;  %v4195_v42 = vpop.xlane.xlu0 %4194 }
 0x34b   : > { %v4582_v63 = vmul.f32 %v6542_v9, %v9182_v52  ;;  %v9282_v37 = vpop.f32.mrb[114].mxu1  ;;  %v4198_v23 = vpop.xlane.xlu1 %4197  ;;  %6551 = vrcp.f32 %v4195_v42 }
 0x34c   : > { %4709 = vst.msk [vmem:[%s8766_s27 + $0x340] sm:$0xff] %vm403_vm0, %v4581_v46  ;;  %6553 = vrcp.f32 %v4198_v23  ;;  %v9286_v61 = vpop.f32.mrb[115].mxu0  ;;  %v9288_v19 = vpop.f32.mrb[115].mxu1 }
 0x34d   : > { %v6544_v48 = vpop.eup %6543  ;;  %4710 = vst.msk [vmem:[%s8766_s27 + $0x348] sm:$0xff] %vm403_vm0, %v4582_v63 }
 0x34e   : > { %v6546_v47 = vpop.eup %6545  ;;  %v4551_v7 = vmul.f32 %v6544_v48, %v9206_v39  ;;  %v4291_v52 = vpop.xlane.xlu0 %4290 }
 0x34f   : > { %v4552_v4 = vmul.f32 %v6546_v47, %v9199_v14  ;;  %v4294_v50 = vpop.xlane.xlu1 %4293  ;;  %6555 = vrcp.f32 %v4291_v52 }
 0x350   : > { %4679 = vst.msk [vmem:[%s8766_s27 + $0x250] sm:$0xff] %vm403_vm0, %v4551_v7  ;;  %6557 = vrcp.f32 %v4294_v50 }
 0x351   : > { %v6548_v57 = vpop.eup %6547  ;;  %4680 = vst.msk [vmem:[%s8766_s27 + $0x258] sm:$0xff] %vm403_vm0, %v4552_v4  ;;  %v9299_v53 = vpop.f32.mrb[116].mxu0 }
 0x352   : > { %v6550_v38 = vpop.eup %6549  ;;  %v4583_v0 = vmul.f32 %v6548_v57, %v9208_v44  ;;  %v4201_v30 = vpop.xlane.xlu0 %4200 }
 0x353   : > { %v4584_v39 = vmul.f32 %v6550_v38, %v9202_v55  ;;  %v9302_v15 = vpop.f32.mrb[116].mxu1  ;;  %v4204_v14 = vpop.xlane.xlu1 %4203  ;;  %6559 = vrcp.f32 %v4201_v30 }
 0x354   : > { %4711 = vst.msk [vmem:[%s8766_s27 + $0x350] sm:$0xff] %vm403_vm0, %v4583_v0  ;;  %6561 = vrcp.f32 %v4204_v14  ;;  %v9306_v33 = vpop.f32.mrb[117].mxu0  ;;  %v9308_v56 = vpop.f32.mrb[117].mxu1 }
 0x355   : > { %v6552_v20 = vpop.eup %6551  ;;  %4712 = vst.msk [vmem:[%s8766_s27 + $0x358] sm:$0xff] %vm403_vm0, %v4584_v39 }
 0x356   : > { %v6554_v44 = vpop.eup %6553  ;;  %v4553_v17 = vmul.f32 %v6552_v20, %v9226_v1  ;;  %v4297_v55 = vpop.xlane.xlu0 %4296 }
 0x357   : > { %v4554_v35 = vmul.f32 %v6554_v44, %v9219_v62  ;;  %v4300_v43 = vpop.xlane.xlu1 %4299  ;;  %6563 = vrcp.f32 %v4297_v55 }
 0x358   : > { %4681 = vst.msk [vmem:[%s8766_s27 + $0x260] sm:$0xff] %vm403_vm0, %v4553_v17  ;;  %6565 = vrcp.f32 %v4300_v43 }
 0x359   : > { %v6556_v3 = vpop.eup %6555  ;;  %4682 = vst.msk [vmem:[%s8766_s27 + $0x268] sm:$0xff] %vm403_vm0, %v4554_v35  ;;  %v9319_v51 = vpop.f32.mrb[118].mxu0 }
 0x35a   : > { %v6558_v29 = vpop.eup %6557  ;;  %v4585_v60 = vmul.f32 %v6556_v3, %v9228_v31  ;;  %v4207_v2 = vpop.xlane.xlu0 %4206 }
 0x35b   : > { %v4586_v1 = vmul.f32 %v6558_v29, %v9222_v28  ;;  %v9322_v10 = vpop.f32.mrb[118].mxu1  ;;  %v4210_v62 = vpop.xlane.xlu1 %4209  ;;  %6567 = vrcp.f32 %v4207_v2 }
 0x35c   : > { %4713 = vst.msk [vmem:[%s8766_s27 + $0x360] sm:$0xff] %vm403_vm0, %v4585_v60  ;;  %6569 = vrcp.f32 %v4210_v62  ;;  %v9326_v54 = vpop.f32.mrb[119].mxu0  ;;  %v9328_v41 = vpop.f32.mrb[119].mxu1 }
 0x35d   : > { %v6560_v22 = vpop.eup %6559  ;;  %4714 = vst.msk [vmem:[%s8766_s27 + $0x368] sm:$0xff] %vm403_vm0, %v4586_v1 }
 0x35e   : > { %v6562_v31 = vpop.eup %6561  ;;  %v4555_v58 = vmul.f32 %v6560_v22, %v9246_v21  ;;  %v4303_v28 = vpop.xlane.xlu0 %4302 }
 0x35f   : > { %v4556_v12 = vmul.f32 %v6562_v31, %v9239_v11  ;;  %v4306_v27 = vpop.xlane.xlu1 %4305  ;;  %6571 = vrcp.f32 %v4303_v28 }
 0x360   : > { %4683 = vst.msk [vmem:[%s8766_s27 + $0x270] sm:$0xff] %vm403_vm0, %v4555_v58  ;;  %6573 = vrcp.f32 %v4306_v27 }
 0x361   : > { %v6564_v25 = vpop.eup %6563  ;;  %4684 = vst.msk [vmem:[%s8766_s27 + $0x278] sm:$0xff] %vm403_vm0, %v4556_v12  ;;  %v9339_v59 = vpop.f32.mrb[120].mxu0 }
 0x362   : > { %v6566_v13 = vpop.eup %6565  ;;  %v4587_v24 = vmul.f32 %v6564_v25, %v9248_v8  ;;  %v4213_v34 = vpop.xlane.xlu0 %4212 }
 0x363   : > { %v4588_v21 = vmul.f32 %v6566_v13, %v9242_v49  ;;  %v9342_v6 = vpop.f32.mrb[120].mxu1  ;;  %v4216_v11 = vpop.xlane.xlu1 %4215  ;;  %6575 = vrcp.f32 %v4213_v34 }
 0x364   : > { %4715 = vst.msk [vmem:[%s8766_s27 + $0x370] sm:$0xff] %vm403_vm0, %v4587_v24  ;;  %6577 = vrcp.f32 %v4216_v11  ;;  %v9346_v16 = vpop.f32.mrb[121].mxu0  ;;  %v9348_v40 = vpop.f32.mrb[121].mxu1 }
 0x365   : > { %v6568_v32 = vpop.eup %6567  ;;  %4716 = vst.msk [vmem:[%s8766_s27 + $0x378] sm:$0xff] %vm403_vm0, %v4588_v21 }
 0x366   : > { %v6570_v8 = vpop.eup %6569  ;;  %v4557_v9 = vmul.f32 %v6568_v32, %v9266_v45  ;;  %v4309_v49 = vpop.xlane.xlu0 %4308 }
 0x367   : > { %v4558_v46 = vmul.f32 %v6570_v8, %v9259_v26  ;;  %v4312_v42 = vpop.xlane.xlu1 %4311  ;;  %6579 = vrcp.f32 %v4309_v49 }
 0x368   : > { %4685 = vst.msk [vmem:[%s8766_s27 + $0x280] sm:$0xff] %vm403_vm0, %v4557_v9  ;;  %6581 = vrcp.f32 %v4312_v42 }
 0x369   : > { %v6572_v63 = vpop.eup %6571  ;;  %4686 = vst.msk [vmem:[%s8766_s27 + $0x288] sm:$0xff] %vm403_vm0, %v4558_v46 }
 0x36a   : > { %v6574_v23 = vpop.eup %6573  ;;  %v4589_v48 = vmul.f32 %v6572_v63, %v9268_v36  ;;  %v9359_v47 = vpop.f32.mrb[122].mxu0 }
 0x36b   : > { %v4219_v7 = vpop.xlane.xlu0 %4218  ;;  %v4590_v45 = vmul.f32 %v6574_v23, %v9262_v5  ;;  %v9362_v52 = vpop.f32.mrb[122].mxu1 }
 0x36c   : > { %v4222_v26 = vpop.xlane.xlu1 %4221  ;;  %6583 = vrcp.f32 %v4219_v7  ;;  %4717 = vst.msk [vmem:[%s8766_s27 + $0x380] sm:$0xff] %vm403_vm0, %v4589_v48  ;;  %v9366_v4 = vpop.f32.mrb[123].mxu0 }
 0x36d   : > { %6585 = vrcp.f32 %v4222_v26  ;;  %v9368_v50 = vpop.f32.mrb[123].mxu1  ;;  %v6576_v57 = vpop.eup %6575  ;;  %4718 = vst.msk [vmem:[%s8766_s27 + $0x388] sm:$0xff] %vm403_vm0, %v4590_v45 }
 0x36e   : > { %v6578_v36 = vpop.eup %6577  ;;  %v4559_v38 = vmul.f32 %v6576_v57, %v9286_v61 }
 0x36f   : > { %v4315_v5 = vpop.xlane.xlu0 %4314  ;;  %v4560_v0 = vmul.f32 %v6578_v36, %v9279_v18 }
 0x370   : > { %v4318_v30 = vpop.xlane.xlu1 %4317  ;;  %6587 = vrcp.f32 %v4315_v5  ;;  %4687 = vst.msk [vmem:[%s8766_s27 + $0x290] sm:$0xff] %vm403_vm0, %v4559_v38 }
 0x371   : > { %6589 = vrcp.f32 %v4318_v30  ;;  %v6580_v39 = vpop.eup %6579  ;;  %4688 = vst.msk [vmem:[%s8766_s27 + $0x298] sm:$0xff] %vm403_vm0, %v4560_v0 }
 0x372   : > { %v6582_v14 = vpop.eup %6581  ;;  %v4591_v20 = vmul.f32 %v6580_v39, %v9288_v19  ;;  %v9379_v44 = vpop.f32.mrb[124].mxu0 }
 0x373   : > { %v4225_v17 = vpop.xlane.xlu0 %4224  ;;  %v4592_v61 = vmul.f32 %v6582_v14, %v9282_v37  ;;  %v9382_v55 = vpop.f32.mrb[124].mxu1 }
 0x374   : > { %v4228_v18 = vpop.xlane.xlu1 %4227  ;;  %6591 = vrcp.f32 %v4225_v17  ;;  %4719 = vst.msk [vmem:[%s8766_s27 + $0x390] sm:$0xff] %vm403_vm0, %v4591_v20  ;;  %v9386_v35 = vpop.f32.mrb[125].mxu0 }
 0x375   : > { %6593 = vrcp.f32 %v4228_v18  ;;  %v9388_v43 = vpop.f32.mrb[125].mxu1  ;;  %4720 = vst.msk [vmem:[%s8766_s27 + $0x398] sm:$0xff] %vm403_vm0, %v4592_v61 }
 0x376   : > { %v6584_v3 = vpop.eup %6583 }
 0x377   : > { %v6586_v19 = vpop.eup %6585  ;;  %v4561_v29 = vmul.f32 %v6584_v3, %v9306_v33  ;;  %v4321_v37 = vpop.xlane.xlu0 %4320 }
 0x378   : > { %v4562_v60 = vmul.f32 %v6586_v19, %v9299_v53  ;;  %v4324_v2 = vpop.xlane.xlu1 %4323  ;;  %6595 = vrcp.f32 %v4321_v37 }
 0x379   : > { %4689 = vst.msk [vmem:[%s8766_s27 + $0x2a0] sm:$0xff] %vm403_vm0, %v4561_v29  ;;  %6597 = vrcp.f32 %v4324_v2 }
 0x37a   : > { %v6588_v1 = vpop.eup %6587  ;;  %4690 = vst.msk [vmem:[%s8766_s27 + $0x2a8] sm:$0xff] %vm403_vm0, %v4562_v60  ;;  %v9399_v31 = vpop.f32.mrb[126].mxu0 }
 0x37b   : > { %v6590_v62 = vpop.eup %6589  ;;  %v4593_v22 = vmul.f32 %v6588_v1, %v9308_v56  ;;  %v4231_v58 = vpop.xlane.xlu0 %4230 }
 0x37c   : > { %v4594_v33 = vmul.f32 %v6590_v62, %v9302_v15  ;;  %v9402_v28 = vpop.f32.mrb[126].mxu1  ;;  %v4234_v53 = vpop.xlane.xlu1 %4233  ;;  %6599 = vrcp.f32 %v4231_v58 }
 0x37d   : > { %4721 = vst.msk [vmem:[%s8766_s27 + $0x3a0] sm:$0xff] %vm403_vm0, %v4593_v22  ;;  %6601 = vrcp.f32 %v4234_v53  ;;  %v9406_v12 = vpop.f32.mrb[127].mxu0  ;;  %v9408_v27 = vpop.f32.mrb[127].mxu1 }
 0x37e   : > { %v6592_v25 = vpop.eup %6591  ;;  %4722 = vst.msk [vmem:[%s8766_s27 + $0x3a8] sm:$0xff] %vm403_vm0, %v4594_v33 }
 0x37f   : > { %v6594_v56 = vpop.eup %6593  ;;  %v4563_v15 = vmul.f32 %v6592_v25, %v9326_v54  ;;  %v4327_v13 = vpop.xlane.xlu0 %4326 }
 0x380   : > { %v4564_v24 = vmul.f32 %v6594_v56, %v9319_v51  ;;  %v4330_v34 = vpop.xlane.xlu1 %4329  ;;  %6603 = vrcp.f32 %v4327_v13 }
 0x381   : > { %4691 = vst.msk [vmem:[%s8766_s27 + $0x2b0] sm:$0xff] %vm403_vm0, %v4563_v15  ;;  %6605 = vrcp.f32 %v4330_v34 }
 0x382   : > { %v6596_v21 = vpop.eup %6595  ;;  %4692 = vst.msk [vmem:[%s8766_s27 + $0x2b8] sm:$0xff] %vm403_vm0, %v4564_v24 }
 0x383   : > { %v6598_v11 = vpop.eup %6597  ;;  %v4595_v32 = vmul.f32 %v6596_v21, %v9328_v41  ;;  %v4237_v8 = vpop.xlane.xlu0 %4236 }
 0x384   : > { %v4596_v9 = vmul.f32 %v6598_v11, %v9322_v10  ;;  %v4240_v54 = vpop.xlane.xlu1 %4239  ;;  %6607 = vrcp.f32 %v4237_v8 }
 0x385   : > { %4723 = vst.msk [vmem:[%s8766_s27 + $0x3b0] sm:$0xff] %vm403_vm0, %v4595_v32  ;;  %6609 = vrcp.f32 %v4240_v54 }
 0x386   : > { %v6600_v51 = vpop.eup %6599  ;;  %4724 = vst.msk [vmem:[%s8766_s27 + $0x3b8] sm:$0xff] %vm403_vm0, %v4596_v9 }
 0x387   : > { %v6602_v49 = vpop.eup %6601  ;;  %v4565_v46 = vmul.f32 %v6600_v51, %v9346_v16  ;;  %v4333_v42 = vpop.xlane.xlu0 %4332 }
 0x388   : > { %v4566_v63 = vmul.f32 %v6602_v49, %v9339_v59  ;;  %v4336_v41 = vpop.xlane.xlu1 %4335  ;;  %6611 = vrcp.f32 %v4333_v42 }
 0x389   : > { %4693 = vst.msk [vmem:[%s8766_s27 + $0x2c0] sm:$0xff] %vm403_vm0, %v4565_v46  ;;  %6613 = vrcp.f32 %v4336_v41 }
 0x38a   : > { %v6604_v10 = vpop.eup %6603  ;;  %4694 = vst.msk [vmem:[%s8766_s27 + $0x2c8] sm:$0xff] %vm403_vm0, %v4566_v63 }
 0x38b   : > { %v6606_v23 = vpop.eup %6605  ;;  %v4597_v48 = vmul.f32 %v6604_v10, %v9348_v40  ;;  %v4243_v7 = vpop.xlane.xlu0 %4242 }
 0x38c   : > { %v4598_v45 = vmul.f32 %v6606_v23, %v9342_v6  ;;  %v4246_v16 = vpop.xlane.xlu1 %4245  ;;  %6615 = vrcp.f32 %v4243_v7 }
 0x38d   : > { %4725 = vst.msk [vmem:[%s8766_s27 + $0x3c0] sm:$0xff] %vm403_vm0, %v4597_v48  ;;  %6617 = vrcp.f32 %v4246_v16 }
 0x38e   : > { %v6608_v59 = vpop.eup %6607  ;;  %4726 = vst.msk [vmem:[%s8766_s27 + $0x3c8] sm:$0xff] %vm403_vm0, %v4598_v45 }
 0x38f   : > { %v6610_v26 = vpop.eup %6609  ;;  %v4567_v57 = vmul.f32 %v6608_v59, %v9366_v4  ;;  %v4339_v36 = vpop.xlane.xlu0 %4338 }
 0x390   : > { %v4568_v38 = vmul.f32 %v6610_v26, %v9359_v47  ;;  %v4342_v40 = vpop.xlane.xlu1 %4341  ;;  %6619 = vrcp.f32 %v4339_v36 }
 0x391   : > { %4695 = vst.msk [vmem:[%s8766_s27 + $0x2d0] sm:$0xff] %vm403_vm0, %v4567_v57  ;;  %6621 = vrcp.f32 %v4342_v40 }
 0x392   : > { %v6612_v6 = vpop.eup %6611  ;;  %4696 = vst.msk [vmem:[%s8766_s27 + $0x2d8] sm:$0xff] %vm403_vm0, %v4568_v38 }
 0x393   : > { %v6614_v5 = vpop.eup %6613  ;;  %v4599_v0 = vmul.f32 %v6612_v6, %v9368_v50  ;;  %v4249_v30 = vpop.xlane.xlu0 %4248 }
 0x394   : > { %v4600_v39 = vmul.f32 %v6614_v5, %v9362_v52  ;;  %v4252_v4 = vpop.xlane.xlu1 %4251  ;;  %6623 = vrcp.f32 %v4249_v30 }
 0x395   : > { %4727 = vst.msk [vmem:[%s8766_s27 + $0x3d0] sm:$0xff] %vm403_vm0, %v4599_v0  ;;  %6625 = vrcp.f32 %v4252_v4 }
 0x396   : > { %v6616_v47 = vpop.eup %6615  ;;  %4728 = vst.msk [vmem:[%s8766_s27 + $0x3d8] sm:$0xff] %vm403_vm0, %v4600_v39 }
 0x397   : > { %v6618_v14 = vpop.eup %6617  ;;  %v4569_v20 = vmul.f32 %v6616_v47, %v9386_v35  ;;  %v4345_v17 = vpop.xlane.xlu0 %4344 }
 0x398   : > { %v4570_v50 = vmul.f32 %v6618_v14, %v9379_v44  ;;  %v4348_v61 = vpop.xlane.xlu1 %4347  ;;  %6627 = vrcp.f32 %v4345_v17 }
 0x399   : > { %4697 = vst.msk [vmem:[%s8766_s27 + $0x2e0] sm:$0xff] %vm403_vm0, %v4569_v20  ;;  %6629 = vrcp.f32 %v4348_v61 }
 0x39a   : > { %v6620_v52 = vpop.eup %6619  ;;  %4698 = vst.msk [vmem:[%s8766_s27 + $0x2e8] sm:$0xff] %vm403_vm0, %v4570_v50 }
 0x39b   : > { %v6622_v18 = vpop.eup %6621  ;;  %v4601_v3 = vmul.f32 %v6620_v52, %v9388_v43 }
 0x39c   : > { %v4602_v35 = vmul.f32 %v6622_v18, %v9382_v55 }
 0x39d   : > { %4729 = vst.msk [vmem:[%s8766_s27 + $0x3e0] sm:$0xff] %vm403_vm0, %v4601_v3 }
 0x39e   : > { %v6624_v44 = vpop.eup %6623  ;;  %4730 = vst.msk [vmem:[%s8766_s27 + $0x3e8] sm:$0xff] %vm403_vm0, %v4602_v35 }
 0x39f   : > { %v6626_v19 = vpop.eup %6625  ;;  %v4571_v29 = vmul.f32 %v6624_v44, %v9406_v12 }
 0x3a0   : > { %v4572_v37 = vmul.f32 %v6626_v19, %v9399_v31 }
 0x3a1   : > { %4699 = vst.msk [vmem:[%s8766_s27 + $0x2f0] sm:$0xff] %vm403_vm0, %v4571_v29 }
 0x3a2   : > { %v6628_v60 = vpop.eup %6627  ;;  %4700 = vst.msk [vmem:[%s8766_s27 + $0x2f8] sm:$0xff] %vm403_vm0, %v4572_v37 }
 0x3a3   : > { %v6630_v2 = vpop.eup %6629  ;;  %v4603_v43 = vmul.f32 %v6628_v60, %v9408_v27 }
 0x3a4   : > { %v4604_v55 = vmul.f32 %v6630_v2, %v9402_v28 }
 0x3a5   : > { %4731 = vst.msk [vmem:[%s8766_s27 + $0x3f0] sm:$0xff] %vm403_vm0, %v4603_v43 }
 0x3a6   : > { %4732 = vst.msk [vmem:[%s8766_s27 + $0x3f8] sm:$0xff] %vm403_vm0, %v4604_v55 }
 0x3a7 PF: > { %s13_s12 = sadd.s32 1, %s6637_s12  }
 0x3a8   : > { %p10_p4 = scmp.ge.s32.totalorder %s13_s12, 4  }
 0x3aa   :  { %12 = sbr.rel (!%p10_p4) target bundleno = 1 (0x1), region = 68 }

// kernel: up_trans_block.14
= control target key start
LH: loop header
LB: loop body
LE: loop exit
PB: predicated region body
PF: predicated region fallthrough
CT: control target
= control target key end

     0   :  { %s2346_s15 = smov 0   ;;  %s3778_s0 = inlined_call_operand.vmem [shape: f32[2,18,18,32], index: 0, kind: input, shape index: {}]   ;;  %s3779_s1 = inlined_call_operand.vmem [shape: f32[9,32], index: 1, kind: input, shape index: {}]   ;;  %s3780_s2 = inlined_call_operand.vmem [shape: f32[1,32], index: 2, kind: input, shape index: {}]   ;;  %s3781_s3 = inlined_call_operand.vmem [shape: f32[2,16,16,32], index: 3, kind: input, shape index: {}]   ;;  %s3782_s4 = inlined_call_operand.vmem [shape: f32[2,16,16,32], index: 4, kind: output, shape index: {}]  }
   0x1 LB: > { %s1940_s16 = sadd.s32 4294967295, %s2319_s15   ;;  %p1944_p0 = scmp.ge.s32.totalorder %s2319_s15, 1  ;;  %s2319_s15 = sphi %s2346_s15, %s14_s15  }
   0x2   : > { %p172_p1 = scmp.lt.s32.totalorder %s2319_s15, 3 }
   0x4   : > { %p173_p2 = pnand %p1944_p0, %p172_p1 }
   0x5   : > { %p203_p3 = scmp.lt.s32.totalorder (!%p173_p2), %s1940_s16, 1  ;;  %v2360_v0 = vld [vmem:[%s3779_s1] ss:$0 sm:$0xff] (!%p173_p2)  ;;  %v2365_v1 = vld [vmem:[%s3779_s1 + $0x1] ss:$0 sm:$0xff] (!%p173_p2)  ;;  %vm1840_vm0 = vcmask (!%p173_p2), 261120  }
   0x6   : > { %176 = sbr.rel (%p173_p2) target bundleno = 366 (0x16e), region = 36  ;;  %v2370_v2 = vld [vmem:[%s3779_s1 + $0x2] ss:$0 sm:$0xff] (!%p173_p2)  ;;  %v2380_v3 = vld [vmem:[%s3779_s1 + $0x3] ss:$0 sm:$0xff] (!%p173_p2) }
   0x7   : > { %v2385_v4 = vld [vmem:[%s3779_s1 + $0x4] ss:$0 sm:$0xff] (!%p173_p2)  ;;  %v2390_v5 = vld [vmem:[%s3779_s1 + $0x5] ss:$0 sm:$0xff] (!%p173_p2)  ;;  %v2405_v14 = vld [vmem:[%s3779_s1 + $0x6] ss:$0 sm:$0xff] (!%p173_p2) }
   0x8   : > { %v2412_v17 = vld [vmem:[%s3779_s1 + $0x7] ss:$0 sm:$0xff] (!%p173_p2)  ;;  %v2417_v18 = vld [vmem:[%s3779_s1 + $0x8] ss:$0 sm:$0xff] (!%p173_p2) }
   0xd   : > { %s3784_s16 = smov (!%p203_p3, %s1940_s16), 1 }
   0xe   : > { %s2156_s17 = smul.u32 432, %s3784_s16 }
  0x10   : > { %s2375_s26 = scalar_lea.vmem %s3778_s0, %s2156_s17  ;;  %s2154_s17 = sshll.u32 %s3784_s16, 8 }
  0x11   : > { %v219_v6 = vld [vmem:[%s2375_s26] sm:$0xff]  ;;  %v1953_v12 = vld [vmem:[%s2375_s26 + $0x18] sm:$0xff]  ;;  %v220_v22 = vld [vmem:[%s2375_s26 + $0x8] sm:$0xff]  ;;  %s2699_s20 = scalar_lea.vmem %s3781_s3, %s2154_s17  ;;  %s2722_s23 = scalar_lea.vmem %s3782_s4, %s2154_s17 }
  0x12   : > { %v320_v7 = vld [vmem:[%s2375_s26 + $0x1] sm:$0xff]  ;;  %v255_v9 = vmul.f32 %v2360_v0, %v219_v6  ;;  %v2400_v13 = vld [vmem:[%s2375_s26 + $0x19] sm:$0xff]  ;;  %v559_v15 = vmul.f32 %v2380_v3, %v1953_v12  ;;  %v321_v23 = vld [vmem:[%s2375_s26 + $0x9] sm:$0xff]  ;;  %v257_v25 = vmul.f32 %v1953_v12, %v2360_v0  ;;  %v256_v29 = vmul.f32 %v2360_v0, %v220_v22 }
  0x13   : > { %v421_v8 = vld [vmem:[%s2375_s26 + $0x2] sm:$0xff]  ;;  %v356_v10 = vmul.f32 %v2365_v1, %v320_v7  ;;  %v2019_v16 = vld [vmem:[%s2375_s26 + $0x1a] sm:$0xff]  ;;  %v660_v20 = vmul.f32 %v2385_v4, %v2400_v13  ;;  %v422_v24 = vld [vmem:[%s2375_s26 + $0xa] sm:$0xff]  ;;  %v357_v30 = vmul.f32 %v2365_v1, %v321_v23  ;;  %v358_v32 = vmul.f32 %v2400_v13, %v2365_v1 }
  0x14   : > { %v457_v11 = vmul.f32 %v2370_v2, %v421_v8  ;;  %v761_v21 = vmul.f32 %v2390_v5, %v2019_v16  ;;  %v2052_v26 = vld [vmem:[%s2375_s26 + $0x30] sm:$0xff]  ;;  %v458_v31 = vmul.f32 %v2370_v2, %v422_v24  ;;  %v1954_v37 = vld [vmem:[%s2375_s26 + $0x20] sm:$0xff]  ;;  %v2053_v45 = vld [vmem:[%s2375_s26 + $0x38] sm:$0xff]  ;;  %v459_v49 = vmul.f32 %v2019_v16, %v2370_v2 }
  0x15   : > { %v388_v19 = vadd.f32 %v356_v10, %v255_v9  ;;  %v2428_v27 = vld [vmem:[%s2375_s26 + $0x31] sm:$0xff]  ;;  %v863_v34 = vmul.f32 %v2405_v14, %v2052_v26  ;;  %v2442_v38 = vld [vmem:[%s2375_s26 + $0x21] sm:$0xff]  ;;  %v389_v40 = vadd.f32 %v357_v30, %v256_v29  ;;  %v560_v41 = vmul.f32 %v2380_v3, %v1954_v37  ;;  %v2451_v46 = vld [vmem:[%s2375_s26 + $0x39] sm:$0xff] }
  0x16   : > { %v2118_v28 = vld [vmem:[%s2375_s26 + $0x32] sm:$0xff]  ;;  %v964_v35 = vmul.f32 %v2412_v17, %v2428_v27  ;;  %v2020_v39 = vld [vmem:[%s2375_s26 + $0x22] sm:$0xff]  ;;  %v661_v42 = vmul.f32 %v2385_v4, %v2442_v38  ;;  %v2454_v47 = vld [vmem:[%s2375_s26 + $0x3a] sm:$0xff]  ;;  %v390_v48 = vadd.f32 %v358_v32, %v257_v25  ;;  %v561_v50 = vmul.f32 %v2052_v26, %v2380_v3 }
  0x17   : > { %v489_v33 = vadd.f32 %v457_v11, %v388_v19  ;;  %v1065_v36 = vmul.f32 %v2417_v18, %v2118_v28  ;;  %v762_v43 = vmul.f32 %v2390_v5, %v2020_v39  ;;  %v490_v51 = vadd.f32 %v458_v31, %v389_v40  ;;  %v2467_v60 = vld [vmem:[%s2375_s26 + $0x48] sm:$0xff]  ;;  %v2491_v29 = vld [vmem:[%s2375_s26 + $0x50] sm:$0xff] }
  0x18   : > { %v864_v52 = vmul.f32 %v2405_v14, %v2053_v45  ;;  %v965_v53 = vmul.f32 %v2412_v17, %v2451_v46  ;;  %v1066_v54 = vmul.f32 %v2417_v18, %v2454_v47  ;;  %v491_v56 = vadd.f32 %v459_v49, %v390_v48  ;;  %v2470_v61 = vld [vmem:[%s2375_s26 + $0x49] sm:$0xff] }
  0x19   : > { %v591_v44 = vadd.f32 %v559_v15, %v489_v33  ;;  %v662_v57 = vmul.f32 %v2428_v27, %v2385_v4  ;;  %v763_v58 = vmul.f32 %v2118_v28, %v2390_v5  ;;  %v592_v59 = vadd.f32 %v560_v41, %v490_v51  ;;  %v2481_v11 = vld [vmem:[%s2375_s26 + $0x4a] sm:$0xff] }
  0x1a   : > { %v258_v62 = vmul.f32 %v1954_v37, %v2360_v0  ;;  %v359_v63 = vmul.f32 %v2442_v38, %v2365_v1  ;;  %v460_v6 = vmul.f32 %v2020_v39, %v2370_v2  ;;  %v593_v8 = vadd.f32 %v561_v50, %v491_v56  ;;  %v2502_v39 = vld [vmem:[%s3780_s2] ss:$0 sm:$0xff] }
  0x1b   : > { %v692_v55 = vadd.f32 %v660_v20, %v591_v44  ;;  %v865_v9 = vmul.f32 %v2405_v14, %v2467_v60  ;;  %v966_v10 = vmul.f32 %v2412_v17, %v2470_v61  ;;  %v693_v12 = vadd.f32 %v661_v42, %v592_v59  ;;  %v2505_v42 = vld [vmem:[%s2375_s26 + $0x51] sm:$0xff] }
  0x1c   : > { %v1067_v15 = vmul.f32 %v2417_v18, %v2481_v11  ;;  %v391_v16 = vadd.f32 %v359_v63, %v258_v62  ;;  %v562_v19 = vmul.f32 %v2053_v45, %v2380_v3  ;;  %v694_v22 = vadd.f32 %v662_v57, %v593_v8 }
  0x1d   : > { %v793_v7 = vadd.f32 %v761_v21, %v692_v55  ;;  %v663_v21 = vmul.f32 %v2451_v46, %v2385_v4  ;;  %v764_v23 = vmul.f32 %v2454_v47, %v2390_v5  ;;  %v794_v24 = vadd.f32 %v762_v43, %v693_v12 }
  0x1e   : > { %v492_v25 = vadd.f32 %v460_v6, %v391_v16  ;;  %v259_v30 = vmul.f32 %v2052_v26, %v2360_v0  ;;  %v360_v31 = vmul.f32 %v2428_v27, %v2365_v1  ;;  %v795_v33 = vadd.f32 %v763_v58, %v694_v22  ;;  %v2508_v26 = vld [vmem:[%s2375_s26 + $0x52] sm:$0xff]  ;;  %v2523_v6 = vld [vmem:[%s2375_s26 + $0x60] sm:$0xff] }
  0x1f   : > { %v895_v20 = vadd.f32 %v863_v34, %v793_v7  ;;  %v866_v34 = vmul.f32 %v2405_v14, %v2491_v29  ;;  %v461_v37 = vmul.f32 %v2118_v28, %v2370_v2  ;;  %v896_v40 = vadd.f32 %v864_v52, %v794_v24  ;;  %v2533_v16 = vld [vmem:[%s2375_s26 + $0x61] sm:$0xff] }
  0x20   : > { %v594_v41 = vadd.f32 %v562_v19, %v492_v25  ;;  %v392_v43 = vadd.f32 %v360_v31, %v259_v30  ;;  %v897_v48 = vadd.f32 %v865_v9, %v795_v33  ;;  %v967_v28 = vmul.f32 %v2412_v17, %v2505_v42 }
  0x21   : > { %v996_v32 = vadd.f32 %v964_v35, %v895_v20  ;;  %v563_v35 = vmul.f32 %v2467_v60, %v2380_v3  ;;  %v1068_v49 = vmul.f32 %v2417_v18, %v2508_v26  ;;  %v997_v50 = vadd.f32 %v965_v53, %v896_v40 }
  0x22   : > { %v695_v51 = vadd.f32 %v663_v21, %v594_v41  ;;  %v493_v52 = vadd.f32 %v461_v37, %v392_v43  ;;  %v664_v55 = vmul.f32 %v2470_v61, %v2385_v4  ;;  %v998_v57 = vadd.f32 %v966_v10, %v897_v48 }
  0x23   : > { %v1097_v44 = vadd.f32 %v1065_v36, %v996_v32  ;;  %v765_v36 = vmul.f32 %v2481_v11, %v2390_v5  ;;  %v260_v58 = vmul.f32 %v2053_v45, %v2360_v0  ;;  %v1098_v59 = vadd.f32 %v1066_v54, %v997_v50 }
  0x24   : > { %v796_v62 = vadd.f32 %v764_v23, %v695_v51  ;;  %v595_v63 = vadd.f32 %v563_v35, %v493_v52  ;;  %v361_v53 = vmul.f32 %v2451_v46, %v2365_v1  ;;  %v1099_v8 = vadd.f32 %v1067_v15, %v998_v57  ;;  %v2539_v15 = vld [vmem:[%s2375_s26 + $0x62] sm:$0xff] }
  0x25   : > { %v1136_v56 = vadd.f32 %v2502_v39, %v1097_v44  ;;  %v867_v9 = vmul.f32 %v2405_v14, %v2523_v6  ;;  %v462_v10 = vmul.f32 %v2454_v47, %v2370_v2  ;;  %v1137_v12 = vadd.f32 %v2502_v39, %v1098_v59  ;;  %v2555_v57 = vld [vmem:[%s2375_s26 + $0x68] sm:$0xff] }
  0x26   : > { %v898_v45 = vadd.f32 %v866_v34, %v796_v62  ;;  %v696_v54 = vadd.f32 %v664_v55, %v595_v63  ;;  %v393_v19 = vadd.f32 %v361_v53, %v260_v58  ;;  %v1138_v22 = vadd.f32 %v2502_v39, %v1099_v8 }
  0x27   : > { %v1200_v7 = vmul.f32 %v1136_v56, %v1136_v56  ;;  %v968_v21 = vmul.f32 %v2412_v17, %v2533_v16  ;;  %v564_v23 = vmul.f32 %v2491_v29, %v2380_v3  ;;  %v1201_v24 = vmul.f32 %v1137_v12, %v1137_v12 }
  0x28   : > { %v999_v47 = vadd.f32 %v967_v28, %v898_v45  ;;  %v797_v25 = vadd.f32 %v765_v36, %v696_v54  ;;  %v1069_v30 = vmul.f32 %v2417_v18, %v2539_v15  ;;  %v1202_v32 = vmul.f32 %v1138_v22, %v1138_v22 }
  0x29   : > { %v1232_v20 = vmul.f32 %v1200_v7, %v1136_v56  ;;  %v494_v33 = vadd.f32 %v462_v10, %v393_v19  ;;  %v665_v34 = vmul.f32 %v2505_v42, %v2385_v4  ;;  %v2547_v37 = vmul.f32 0.5, %v1136_v56 }
  0x2a   : > { %v1233_v40 = vmul.f32 %v1201_v24, %v1137_v12  ;;  %v1100_v41 = vadd.f32 %v1068_v49, %v999_v47  ;;  %v899_v43 = vadd.f32 %v867_v9, %v797_v25  ;;  %v1234_v44 = vmul.f32 %v1202_v32, %v1138_v22 }
  0x2b   : > { %v1264_v31 = vmul.f32 0.044715, %v1232_v20  ;;  %v596_v48 = vadd.f32 %v564_v23, %v494_v33  ;;  %v766_v28 = vmul.f32 %v2508_v26, %v2390_v5  ;;  %v2551_v50 = vmul.f32 0.5, %v1137_v12  ;;  %v2568_v20 = vld [vmem:[%s2375_s26 + $0x6a] sm:$0xff] }
  0x2c   : > { %v1265_v51 = vmul.f32 0.044715, %v1233_v40  ;;  %v1139_v52 = vadd.f32 %v2502_v39, %v1100_v41  ;;  %v1000_v55 = vadd.f32 %v968_v21, %v899_v43  ;;  %v1266_v58 = vmul.f32 0.044715, %v1234_v44 }
  0x2d   : > { %v1296_v35 = vadd.f32 %v1264_v31, %v1136_v56  ;;  %v697_v59 = vadd.f32 %v665_v34, %v596_v48  ;;  %v868_v49 = vmul.f32 %v2405_v14, %v2555_v57  ;;  %v2560_v56 = vld [vmem:[%s2375_s26 + $0x69] sm:$0xff]  ;;  %v261_v10 = vmul.f32 %v2467_v60, %v2360_v0 }
  0x2e   : > { %v1297_v62 = vadd.f32 %v1265_v51, %v1137_v12  ;;  %v1203_v63 = vmul.f32 %v1139_v52, %v1139_v52  ;;  %v1101_v53 = vadd.f32 %v1069_v30, %v1000_v55  ;;  %v969_v7 = vmul.f32 %v2412_v17, %v2560_v56  ;;  %v2589_v51 = vld [vmem:[%s2375_s26 + $0x78] sm:$0xff] }
  0x2f   : > { %v1328_v36 = vmul.f32 0.7978846, %v1296_v35  ;;  %v1298_v8 = vadd.f32 %v1266_v58, %v1138_v22  ;;  %v798_v9 = vadd.f32 %v766_v28, %v697_v59  ;;  %v362_v12 = vmul.f32 %v2470_v61, %v2365_v1 }
  0x30   : > { %v1329_v45 = vmul.f32 0.7978846, %v1297_v62  ;;  %v1235_v54 = vmul.f32 %v1203_v63, %v1139_v52  ;;  %v1140_v19 = vadd.f32 %v2502_v39, %v1101_v53  ;;  %v1070_v24 = vmul.f32 %v2417_v18, %v2568_v20  ;;  %v2601_v63 = vld [vmem:[%s2375_s26 + $0x79] sm:$0xff] }
  0x31   : > { %2165 = vtanh.f32 %v1328_v36  ;;  %v1330_v21 = vmul.f32 0.7978846, %v1298_v8  ;;  %v900_v23 = vadd.f32 %v868_v49, %v798_v9  ;;  %v463_v47 = vmul.f32 %v2481_v11, %v2370_v2  ;;  %v2604_v53 = vld [vmem:[%s2375_s26 + $0x7a] sm:$0xff] }
  0x32   : > { %2167 = vtanh.f32 %v1329_v45  ;;  %v2576_v25 = vmul.f32 0.5, %v1138_v22  ;;  %v1267_v60 = vmul.f32 0.044715, %v1235_v54  ;;  %v1204_v30 = vmul.f32 %v1140_v19, %v1140_v19 }
  0x33   : > { %2169 = vtanh.f32 %v1330_v21  ;;  %v1001_v31 = vadd.f32 %v969_v7, %v900_v23  ;;  %v394_v32 = vadd.f32 %v362_v12, %v261_v10  ;;  %v565_v33 = vmul.f32 %v2523_v6, %v2380_v3  ;;  %v2615_v23 = vld [vmem:[%s2375_s26 + $0x80] sm:$0xff] }
  0x34   : > { %v2580_v34 = vmul.f32 0.5, %v1139_v52  ;;  %v1299_v40 = vadd.f32 %v1267_v60, %v1139_v52  ;;  %v2582_v41 = vmul.f32 0.5, %v1140_v19  ;;  %v1236_v43 = vmul.f32 %v1204_v30, %v1140_v19 }
  0x35   : > { %v1102_v11 = vadd.f32 %v1070_v24, %v1001_v31  ;;  %v495_v22 = vadd.f32 %v463_v47, %v394_v32  ;;  %v666_v35 = vmul.f32 %v2533_v16, %v2385_v4  ;;  %v767_v44 = vmul.f32 %v2539_v15, %v2390_v5 }
  0x36   : > { %v1331_v48 = vmul.f32 0.7978846, %v1299_v40  ;;  %v1268_v28 = vmul.f32 0.044715, %v1236_v43  ;;  %v262_v52 = vmul.f32 %v2491_v29, %v2360_v0  ;;  %v363_v55 = vmul.f32 %v2505_v42, %v2365_v1 }
  0x37   : > { %v1141_v36 = vadd.f32 %v2502_v39, %v1102_v11  ;;  %v597_v58 = vadd.f32 %v565_v33, %v495_v22  ;;  %v869_v59 = vmul.f32 %v2405_v14, %v2589_v51  ;;  %v464_v49 = vmul.f32 %v2508_v26, %v2370_v2 }
  0x38   : > { %2171 = vtanh.f32 %v1331_v48  ;;  %v1300_v62 = vadd.f32 %v1268_v28, %v1140_v19  ;;  %v395_v29 = vadd.f32 %v363_v55, %v262_v52  ;;  %v566_v7 = vmul.f32 %v2555_v57, %v2380_v3 }
  0x39   : > { %v1205_v9 = vmul.f32 %v1141_v36, %v1141_v36  ;;  %v698_v10 = vadd.f32 %v666_v35, %v597_v58  ;;  %v970_v45 = vmul.f32 %v2412_v17, %v2601_v63  ;;  %v1071_v26 = vmul.f32 %v2417_v18, %v2604_v53 }
  0x3a   : > { %v1332_v12 = vmul.f32 0.7978846, %v1300_v62  ;;  %v496_v19 = vadd.f32 %v464_v49, %v395_v29  ;;  %v667_v21 = vmul.f32 %v2560_v56, %v2385_v4  ;;  %v768_v60 = vmul.f32 %v2568_v20, %v2390_v5 }
  0x3b   : > { %v2166_v8 = vpop.eup %2165  ;;  %v1237_v24 = vmul.f32 %v1205_v9, %v1141_v36  ;;  %v799_v47 = vadd.f32 %v767_v44, %v698_v10  ;;  %v870_v30 = vmul.f32 %v2405_v14, %v2615_v23  ;;  %v263_v40 = vmul.f32 %v2523_v6, %v2360_v0 }
  0x3c   : > { %v1392_v54 = vadd.f32 1.0, %v2166_v8  ;;  %v2168_v31 = vpop.eup %2167  ;;  %2173 = vtanh.f32 %v1332_v12  ;;  %v598_v33 = vadd.f32 %v566_v7, %v496_v19  ;;  %v364_v44 = vmul.f32 %v2533_v16, %v2365_v1  ;;  %v2634_v8 = vld [vmem:[%s2375_s26 + $0x81] sm:$0xff] }
  0x3d   : > { %v2170_v43 = vpop.eup %2169  ;;  %v1393_v11 = vadd.f32 1.0, %v2168_v31  ;;  %v1269_v22 = vmul.f32 0.044715, %v1237_v24  ;;  %v901_v35 = vadd.f32 %v869_v59, %v799_v47  ;;  %v2631_v59 = vmul.f32 0.5, %v1141_v36 }
  0x3e   : > { %v1424_v32 = vmul.f32 %v1392_v54, %v2547_v37  ;;  %v1394_v28 = vadd.f32 1.0, %v2170_v43  ;;  %v699_v52 = vadd.f32 %v667_v21, %v598_v33  ;;  %v465_v37 = vmul.f32 %v2539_v15, %v2370_v2  ;;  %v2640_v54 = vld [vmem:[%s2375_s26 + $0x82] sm:$0xff] }
  0x3f   : > { %v1425_v55 = vmul.f32 %v1393_v11, %v2551_v50  ;;  %v1301_v58 = vadd.f32 %v1269_v22, %v1141_v36  ;;  %v1002_v6 = vadd.f32 %v970_v45, %v901_v35  ;;  %v396_v49 = vadd.f32 %v364_v44, %v263_v40 }
  0x40   : > { %v1456_v48 = vadd.f32 %v2400_v13, %v1424_v32  ;;  %v1426_v29 = vmul.f32 %v1394_v28, %v2576_v25  ;;  %v800_v7 = vadd.f32 %v768_v60, %v699_v52  ;;  %v971_v15 = vmul.f32 %v2412_v17, %v2634_v8 }
  0x41   : > { %v1457_v13 = vadd.f32 %v2442_v38, %v1425_v55  ;;  %v1333_v9 = vmul.f32 0.7978846, %v1301_v58  ;;  %v1103_v10 = vadd.f32 %v1071_v26, %v1002_v6  ;;  %v1072_v25 = vmul.f32 %v2417_v18, %v2640_v54 }
  0x42   : > { %v1520_v62 = vmul.f32 %v1456_v48, %v1456_v48  ;;  %v2172_v50 = vpop.eup %2171  ;;  %v1458_v12 = vadd.f32 %v2428_v27, %v1426_v29  ;;  %v902_v19 = vadd.f32 %v870_v30, %v800_v7  ;;  %v497_v24 = vadd.f32 %v465_v37, %v396_v49 }
  0x43   : > { %v1521_v36 = vmul.f32 %v1457_v13, %v1457_v13  ;;  %v1395_v21 = vadd.f32 1.0, %v2172_v50  ;;  %2175 = vtanh.f32 %v1333_v9  ;;  %v1142_v26 = vadd.f32 %v2502_v39, %v1103_v10 }
  0x44   : > { %v1552_v45 = vmul.f32 %v1520_v62, %v1456_v48  ;;  %v1522_v47 = vmul.f32 %v1458_v12, %v1458_v12  ;;  %v567_v60 = vmul.f32 %v2589_v51, %v2380_v3  ;;  %v2648_v31 = vmul.f32 0.5, %v1456_v48 }
  0x45   : > { %v1553_v32 = vmul.f32 %v1521_v36, %v1457_v13  ;;  %v1427_v27 = vmul.f32 %v1395_v21, %v2580_v34  ;;  %v1003_v30 = vadd.f32 %v971_v15, %v902_v19  ;;  %v2651_v43 = vmul.f32 0.5, %v1457_v13 }
  0x46   : > { %v1584_v38 = vmul.f32 0.044715, %v1552_v45  ;;  %v2174_v33 = vpop.eup %2173  ;;  %v1554_v11 = vmul.f32 %v1522_v47, %v1458_v12  ;;  %v1206_v22 = vmul.f32 %v1142_v26, %v1142_v26  ;;  %v599_v6 = vadd.f32 %v567_v60, %v497_v24  ;;  %v2668_v47 = vld [vmem:[%s2375_s26 + $0x90] sm:$0xff] }
  0x47   : > { %v1585_v35 = vmul.f32 0.044715, %v1553_v32  ;;  %v1459_v44 = vadd.f32 %v2451_v46, %v1427_v27  ;;  %v1396_v28 = vadd.f32 1.0, %v2174_v33  ;;  %v1104_v52 = vadd.f32 %v1072_v25, %v1003_v30  ;;  %v2676_v30 = vld [vmem:[%s2375_s26 + $0x91] sm:$0xff] }
  0x48   : > { %v1616_v40 = vadd.f32 %v1584_v38, %v1456_v48  ;;  %v1586_v55 = vmul.f32 0.044715, %v1554_v11  ;;  %v1238_v58 = vmul.f32 %v1206_v22, %v1142_v26  ;;  %v668_v48 = vmul.f32 %v2601_v63, %v2385_v4  ;;  %v2683_v22 = vld [vmem:[%s2375_s26 + $0x92] sm:$0xff] }
  0x49   : > { %v1617_v49 = vadd.f32 %v1585_v35, %v1457_v13  ;;  %v1523_v62 = vmul.f32 %v1459_v44, %v1459_v44  ;;  %v1428_v34 = vmul.f32 %v1396_v28, %v2582_v41  ;;  %v1143_v9 = vadd.f32 %v2502_v39, %v1104_v52 }
  0x4a   : > { %v1648_v37 = vmul.f32 0.7978846, %v1616_v40  ;;  %v1618_v29 = vadd.f32 %v1586_v55, %v1458_v12  ;;  %v1270_v7 = vmul.f32 0.044715, %v1238_v58  ;;  %v2658_v46 = vmul.f32 0.5, %v1458_v12 }
  0x4b   : > { %v1649_v10 = vmul.f32 0.7978846, %v1617_v49  ;;  %v1555_v15 = vmul.f32 %v1523_v62, %v1459_v44  ;;  %v2661_v50 = vadd.f32 %v2470_v61, %v1428_v34  ;;  %v2663_v45 = vmul.f32 0.5, %v1142_v26 }
  0x4c   : > { %2177 = vtanh.f32 %v1648_v37  ;;  %v1650_v13 = vmul.f32 0.7978846, %v1618_v29  ;;  %v1302_v41 = vadd.f32 %v1270_v7, %v1142_v26  ;;  %v1207_v19 = vmul.f32 %v1143_v9, %v1143_v9 }
  0x4d   : > { %v2176_v25 = vpop.eup %2175  ;;  %2179 = vtanh.f32 %v1649_v10  ;;  %v1587_v36 = vmul.f32 0.044715, %v1555_v15  ;;  %v1524_v21 = vmul.f32 %v2661_v50, %v2661_v50  ;;  %v700_v12 = vadd.f32 %v668_v48, %v599_v6 }
  0x4e   : > { %2181 = vtanh.f32 %v1650_v13  ;;  %v1397_v24 = vadd.f32 1.0, %v2176_v25  ;;  %v1334_v38 = vmul.f32 0.7978846, %v1302_v41  ;;  %v1239_v61 = vmul.f32 %v1207_v19, %v1143_v9  ;;  %v1776_v19 = vld [vmem:[%s2699_s20] sm:$0xff] }
  0x4f   : > { %v1619_v60 = vadd.f32 %v1587_v36, %v1459_v44  ;;  %v1556_v26 = vmul.f32 %v1524_v21, %v2661_v50  ;;  %v769_v32 = vmul.f32 %v2604_v53, %v2390_v5  ;;  %v871_v27 = vmul.f32 %v2405_v14, %v2668_v47 }
  0x50   : > { %v1429_v33 = vmul.f32 %v1397_v24, %v2631_v59  ;;  %2183 = vtanh.f32 %v1334_v38  ;;  %v1271_v40 = vmul.f32 0.044715, %v1239_v61  ;;  %v972_v11 = vmul.f32 %v2412_v17, %v2676_v30 }
  0x51   : > { %v1651_v35 = vmul.f32 0.7978846, %v1619_v60  ;;  %v1588_v28 = vmul.f32 0.044715, %v1556_v26  ;;  %v801_v52 = vadd.f32 %v769_v32, %v700_v12  ;;  %v1073_v37 = vmul.f32 %v2417_v18, %v2683_v22  ;;  %v2727_v32 = vld [vmem:[%s2375_s26 + $0x98] sm:$0xff] }
  0x52   : > { %v2688_v55 = vadd.f32 %v2505_v42, %v1429_v33  ;;  %v1303_v58 = vadd.f32 %v1271_v40, %v1143_v9  ;;  %v264_v59 = vmul.f32 %v2555_v57, %v2360_v0  ;;  %v365_v6 = vmul.f32 %v2560_v56, %v2365_v1 }
  0x53   : > { %2185 = vtanh.f32 %v1651_v35  ;;  %v1620_v49 = vadd.f32 %v1588_v28, %v2661_v50  ;;  %v903_v62 = vadd.f32 %v871_v27, %v801_v52  ;;  %v466_v42 = vmul.f32 %v2568_v20, %v2370_v2  ;;  %v1777_v27 = vld [vmem:[%s2699_s20 + $0x8] sm:$0xff]  ;;  %v2734_v35 = vld [vmem:[%s2375_s26 + $0x99] sm:$0xff] }
  0x54   : > { %v2704_v48 = vmul.f32 0.5, %v1459_v44  ;;  %v1525_v57 = vmul.f32 %v2688_v55, %v2688_v55  ;;  %v1335_v29 = vmul.f32 0.7978846, %v1303_v58  ;;  %v397_v7 = vadd.f32 %v365_v6, %v264_v59 }
  0x55   : > { %v1652_v15 = vmul.f32 0.7978846, %v1620_v49  ;;  %v1004_v13 = vadd.f32 %v972_v11, %v903_v62  ;;  %v568_v41 = vmul.f32 %v2615_v23, %v2380_v3  ;;  %v669_v44 = vmul.f32 %v2634_v8, %v2385_v4  ;;  %v2742_v49 = vld [vmem:[%s2375_s26 + $0x9a] sm:$0xff] }
  0x56   : > { %v2178_v34 = vpop.eup %2177  ;;  %v1557_v25 = vmul.f32 %v1525_v57, %v2688_v55  ;;  %2187 = vtanh.f32 %v1335_v29  ;;  %v498_v20 = vadd.f32 %v466_v42, %v397_v7  ;;  %v2715_v12 = vmul.f32 0.5, %v1143_v9 }
  0x57   : > { %v1712_v10 = vadd.f32 1.0, %v2178_v34  ;;  %v2180_v36 = vpop.eup %2179  ;;  %2189 = vtanh.f32 %v1652_v15  ;;  %v1105_v24 = vadd.f32 %v1073_v37, %v1004_v13  ;;  %v872_v11 = vmul.f32 %v2405_v14, %v2727_v32  ;;  %v1778_v37 = vld [vmem:[%s2699_s20 + $0x10] sm:$0xff] }
  0x58   : > { %v2182_v38 = vpop.eup %2181  ;;  %v1713_v61 = vadd.f32 1.0, %v2180_v36  ;;  %v1589_v60 = vmul.f32 0.044715, %v1557_v25  ;;  %v600_v26 = vadd.f32 %v568_v41, %v498_v20  ;;  %v973_v6 = vmul.f32 %v2412_v17, %v2734_v35  ;;  %v1779_v36 = vld [vmem:[%s2699_s20 + $0x18] sm:$0xff] }
  0x59   : > { %v1744_v21 = vmul.f32 %v1712_v10, %v2648_v31  ;;  %v770_v31 = vmul.f32 %v2640_v54, %v2390_v5  ;;  %v1714_v33 = vadd.f32 1.0, %v2182_v38  ;;  %v1144_v40 = vadd.f32 %v2502_v39, %v1105_v24 }
  0x5a   : > { %v2184_v28 = vpop.eup %2183  ;;  %v1745_v52 = vmul.f32 %v1713_v61, %v2651_v43  ;;  %v1621_v58 = vadd.f32 %v1589_v60, %v2688_v55  ;;  %v701_v59 = vadd.f32 %v669_v44, %v600_v26  ;;  %v1074_v43 = vmul.f32 %v2417_v18, %v2742_v49 }
  0x5b   : > { %v1808_v9 = vadd.f32 %v1776_v19, %v1744_v21  ;;  %v1746_v62 = vmul.f32 %v1714_v33, %v2658_v46  ;;  %v1398_v42 = vadd.f32 1.0, %v2184_v28  ;;  %v1208_v34 = vmul.f32 %v1144_v40, %v1144_v40 }
  0x5c   : > { %v1809_v57 = vadd.f32 %v1777_v27, %v1745_v52  ;;  %v1653_v29 = vmul.f32 0.7978846, %v1621_v58  ;;  %v802_v7 = vadd.f32 %v770_v31, %v701_v59  ;;  %v265_v10 = vmul.f32 %v2589_v51, %v2360_v0 }
  0x5d   : > { %1841 = vst.msk [vmem:[%s2722_s23] sm:$0xff] %vm1840_vm0, %v1808_v9  ;;  %v2186_v15 = vpop.eup %2185  ;;  %v1810_v13 = vadd.f32 %v1778_v37, %v1746_v62  ;;  %v1430_v41 = vmul.f32 %v1398_v42, %v2663_v45  ;;  %v1240_v19 = vmul.f32 %v1208_v34, %v1144_v40  ;;  %v366_v46 = vmul.f32 %v2601_v63, %v2365_v1 }
  0x5e   : > { %1842 = vst.msk [vmem:[%s2722_s23 + $0x8] sm:$0xff] %vm1840_vm0, %v1809_v57  ;;  %v1715_v25 = vadd.f32 1.0, %v2186_v15  ;;  %2191 = vtanh.f32 %v1653_v29  ;;  %v904_v20 = vadd.f32 %v872_v11, %v802_v7  ;;  %v467_v44 = vmul.f32 %v2604_v53, %v2370_v2 }
  0x5f   : > { %1843 = vst.msk [vmem:[%s2722_s23 + $0x10] sm:$0xff] %vm1840_vm0, %v1810_v13  ;;  %v1492_v51 = vmul.f32 0.5, %v2661_v50  ;;  %v1462_v21 = vadd.f32 %v2533_v16, %v1430_v41  ;;  %v1272_v45 = vmul.f32 0.044715, %v1240_v19  ;;  %v398_v24 = vadd.f32 %v366_v46, %v265_v10  ;;  %v2787_v13 = vld [vmem:[%s2375_s26 + $0xa9] sm:$0xff] }
  0x60   : > { %v2188_v38 = vpop.eup %2187  ;;  %v1747_v61 = vmul.f32 %v1715_v25, %v2704_v48  ;;  %v1493_v60 = vmul.f32 0.5, %v2688_v55  ;;  %v1005_v26 = vadd.f32 %v973_v6, %v904_v20  ;;  %v569_v53 = vmul.f32 %v2668_v47, %v2380_v3  ;;  %v1780_v48 = vld [vmem:[%s2699_s20 + $0x20] sm:$0xff] }
  0x61   : > { %v2190_v31 = vpop.eup %2189  ;;  %v1526_v9 = vmul.f32 %v1462_v21, %v1462_v21  ;;  %v1399_v27 = vadd.f32 1.0, %v2188_v38  ;;  %v1304_v33 = vadd.f32 %v1272_v45, %v1144_v40  ;;  %v670_v16 = vmul.f32 %v2676_v30, %v2385_v4 }
  0x62   : > { %v1811_v50 = vadd.f32 %v1779_v36, %v1747_v61  ;;  %v1716_v11 = vadd.f32 1.0, %v2190_v31  ;;  %v1106_v28 = vadd.f32 %v1074_v43, %v1005_v26  ;;  %v499_v52 = vadd.f32 %v467_v44, %v398_v24  ;;  %v2796_v36 = vld [vmem:[%s2375_s26 + $0xaa] sm:$0xff] }
  0x63   : > { %v1558_v37 = vmul.f32 %v1526_v9, %v1462_v21  ;;  %v1431_v55 = vmul.f32 %v1399_v27, %v2715_v12  ;;  %v2771_v58 = vmul.f32 0.5, %v1144_v40  ;;  %v1336_v59 = vmul.f32 0.7978846, %v1304_v33  ;;  %v2782_v12 = vld [vmem:[%s2375_s26 + $0xa8] sm:$0xff] }
  0x64   : > { %1844 = vst.msk [vmem:[%s2722_s23 + $0x18] sm:$0xff] %vm1840_vm0, %v1811_v50  ;;  %v1748_v6 = vmul.f32 %v1716_v11, %v1492_v51  ;;  %v1145_v62 = vadd.f32 %v2502_v39, %v1106_v28  ;;  %v601_v42 = vadd.f32 %v569_v53, %v499_v52  ;;  %v771_v34 = vmul.f32 %v2683_v22, %v2390_v5 }
  0x65   : > { %v2778_v43 = vmul.f32 0.5, %v1462_v21  ;;  %v1590_v57 = vmul.f32 0.044715, %v1558_v37  ;;  %v1463_v29 = vadd.f32 %v2560_v56, %v1431_v55  ;;  %2193 = vtanh.f32 %v1336_v59 }
  0x66   : > { %v1812_v40 = vadd.f32 %v1780_v48, %v1748_v6  ;;  %v1209_v7 = vmul.f32 %v1145_v62, %v1145_v62  ;;  %v702_v10 = vadd.f32 %v670_v16, %v601_v42  ;;  %v873_v15 = vmul.f32 %v2405_v14, %v2782_v12  ;;  %v2816_v42 = vld [vmem:[%s2375_s26 + $0xb0] sm:$0xff] }
  0x67   : > { %v1622_v41 = vadd.f32 %v1590_v57, %v1462_v21  ;;  %v1527_v19 = vmul.f32 %v1463_v29, %v1463_v29  ;;  %v974_v46 = vmul.f32 %v2412_v17, %v2787_v13  ;;  %v266_v56 = vmul.f32 %v2615_v23, %v2360_v0  ;;  %v1781_v23 = vld [vmem:[%s2699_s20 + $0x28] sm:$0xff] }
  0x68   : > { %v2192_v25 = vpop.eup %2191  ;;  %1845 = vst.msk [vmem:[%s2722_s23 + $0x20] sm:$0xff] %vm1840_vm0, %v1812_v40  ;;  %v1241_v20 = vmul.f32 %v1209_v7, %v1145_v62  ;;  %v803_v44 = vadd.f32 %v771_v34, %v702_v10  ;;  %v367_v51 = vmul.f32 %v2634_v8, %v2365_v1  ;;  %v468_v21 = vmul.f32 %v2640_v54, %v2370_v2 }
  0x69   : > { %v1717_v45 = vadd.f32 1.0, %v2192_v25  ;;  %v1654_v24 = vmul.f32 0.7978846, %v1622_v41  ;;  %v1559_v38 = vmul.f32 %v1527_v19, %v1463_v29  ;;  %v1075_v61 = vmul.f32 %v2417_v18, %v2796_v36  ;;  %v2830_v19 = vld [vmem:[%s2375_s26 + $0xb1] sm:$0xff] }
  0x6a   : > { %v1273_v26 = vmul.f32 0.044715, %v1241_v20  ;;  %v905_v53 = vadd.f32 %v873_v15, %v803_v44  ;;  %v399_v31 = vadd.f32 %v367_v51, %v266_v56  ;;  %v570_v9 = vmul.f32 %v2727_v32, %v2380_v3 }
  0x6b   : > { %v1749_v27 = vmul.f32 %v1717_v45, %v1493_v60  ;;  %2195 = vtanh.f32 %v1654_v24  ;;  %v1591_v33 = vmul.f32 0.044715, %v1559_v38  ;;  %v2807_v16 = vmul.f32 0.5, %v1145_v62 }
  0x6c   : > { %v1305_v54 = vadd.f32 %v1273_v26, %v1145_v62  ;;  %v1006_v50 = vadd.f32 %v974_v46, %v905_v53  ;;  %v500_v11 = vadd.f32 %v468_v21, %v399_v31  ;;  %v671_v28 = vmul.f32 %v2734_v35, %v2385_v4  ;;  %v2835_v46 = vld [vmem:[%s2375_s26 + $0xb2] sm:$0xff]  ;;  %v2852_v26 = vld [vmem:[%s2375_s26 + $0xc0] sm:$0xff] }
  0x6d   : > { %v1813_v52 = vadd.f32 %v1781_v23, %v1749_v27  ;;  %v2811_v48 = vmul.f32 0.5, %v1463_v29  ;;  %v1623_v37 = vadd.f32 %v1591_v33, %v1463_v29  ;;  %v772_v55 = vmul.f32 %v2742_v49, %v2390_v5  ;;  %v2859_v33 = vld [vmem:[%s2375_s26 + $0xc1] sm:$0xff] }
  0x6e   : > { %v1337_v60 = vmul.f32 0.7978846, %v1305_v54  ;;  %v1107_v59 = vadd.f32 %v1075_v61, %v1006_v50  ;;  %v602_v6 = vadd.f32 %v570_v9, %v500_v11  ;;  %v267_v62 = vmul.f32 %v2668_v47, %v2360_v0 }
  0x6f   : > { %v2194_v34 = vpop.eup %2193  ;;  %1846 = vst.msk [vmem:[%s2722_s23 + $0x28] sm:$0xff] %vm1840_vm0, %v1813_v52  ;;  %v1655_v57 = vmul.f32 0.7978846, %v1623_v37  ;;  %v874_v29 = vmul.f32 %v2405_v14, %v2816_v42  ;;  %v368_v40 = vmul.f32 %v2676_v30, %v2365_v1  ;;  %v469_v7 = vmul.f32 %v2683_v22, %v2370_v2 }
  0x70   : > { %v1400_v10 = vadd.f32 1.0, %v2194_v34  ;;  %2197 = vtanh.f32 %v1337_v60  ;;  %v1146_v15 = vadd.f32 %v2502_v39, %v1107_v59  ;;  %v703_v41 = vadd.f32 %v671_v28, %v602_v6 }
  0x71   : > { %2199 = vtanh.f32 %v1655_v57  ;;  %v975_v47 = vmul.f32 %v2412_v17, %v2830_v19  ;;  %v400_v56 = vadd.f32 %v368_v40, %v267_v62  ;;  %v571_v25 = vmul.f32 %v2782_v12, %v2380_v3 }
  0x72   : > { %v1432_v22 = vmul.f32 %v1400_v10, %v2771_v58  ;;  %v1210_v20 = vmul.f32 %v1146_v15, %v1146_v15  ;;  %v804_v44 = vadd.f32 %v772_v55, %v703_v41  ;;  %v1076_v51 = vmul.f32 %v2417_v18, %v2835_v46  ;;  %v2871_v55 = vld [vmem:[%s2375_s26 + $0xc2] sm:$0xff] }
  0x73   : > { %v2842_v21 = vmul.f32 0.5, %v1146_v15  ;;  %v501_v45 = vadd.f32 %v469_v7, %v400_v56  ;;  %v672_v24 = vmul.f32 %v2787_v13, %v2385_v4  ;;  %v773_v38 = vmul.f32 %v2796_v36, %v2390_v5  ;;  %v2885_v56 = vld [vmem:[%s2375_s26 + $0xc8] sm:$0xff] }
  0x74   : > { %v2849_v61 = vadd.f32 %v2601_v63, %v1432_v22  ;;  %v1242_v58 = vmul.f32 %v1210_v20, %v1146_v15  ;;  %v906_v23 = vadd.f32 %v874_v29, %v804_v44  ;;  %v268_v53 = vmul.f32 %v2727_v32, %v2360_v0  ;;  %v1782_v32 = vld [vmem:[%s2699_s20 + $0x30] sm:$0xff] }
  0x75   : > { %v2196_v31 = vpop.eup %2195  ;;  %v603_v9 = vadd.f32 %v571_v25, %v501_v45  ;;  %v875_v27 = vmul.f32 %v2405_v14, %v2852_v26  ;;  %v369_v54 = vmul.f32 %v2734_v35, %v2365_v1  ;;  %v470_v63 = vmul.f32 %v2742_v49, %v2370_v2  ;;  %v2893_v20 = vld [vmem:[%s2375_s26 + $0xc9] sm:$0xff] }
  0x76   : > { %v1718_v50 = vadd.f32 1.0, %v2196_v31  ;;  %v1528_v11 = vmul.f32 %v2849_v61, %v2849_v61  ;;  %v1274_v28 = vmul.f32 0.044715, %v1242_v58  ;;  %v976_v0 = vmul.f32 %v2412_v17, %v2859_v33 }
  0x77   : > { %v1007_v52 = vadd.f32 %v975_v47, %v906_v23  ;;  %v704_v37 = vadd.f32 %v672_v24, %v603_v9  ;;  %v401_v60 = vadd.f32 %v369_v54, %v268_v53  ;;  %v572_v1 = vmul.f32 %v2816_v42, %v2380_v3  ;;  %v2900_v24 = vld [vmem:[%s3779_s1 + $0x7] ss:$0 sm:$0xff] }
  0x78   : > { %v1750_v59 = vmul.f32 %v1718_v50, %v2778_v43  ;;  %v1560_v2 = vmul.f32 %v1528_v11, %v2849_v61  ;;  %v1306_v49 = vadd.f32 %v1274_v28, %v1146_v15  ;;  %v1077_v6 = vmul.f32 %v2417_v18, %v2871_v55 }
  0x79   : > { %v1108_v17 = vadd.f32 %v1076_v51, %v1007_v52  ;;  %v805_v62 = vadd.f32 %v773_v38, %v704_v37  ;;  %v502_v34 = vadd.f32 %v470_v63, %v401_v60  ;;  %v673_v57 = vmul.f32 %v2830_v19, %v2385_v4  ;;  %v2936_v52 = vld [vmem:[%s2375_s26 + $0xca] sm:$0xff]  ;;  %v2943_v60 = vld [vmem:[%s3779_s1 + $0x8] ss:$0 sm:$0xff] }
  0x7a   : > { %v2198_v29 = vpop.eup %2197  ;;  %v1814_v40 = vadd.f32 %v1782_v32, %v1750_v59  ;;  %v1592_v3 = vmul.f32 0.044715, %v1560_v2  ;;  %v1338_v43 = vmul.f32 0.7978846, %v1306_v49  ;;  %v774_v7 = vmul.f32 %v2835_v46, %v2390_v5  ;;  %v1783_v5 = vld [vmem:[%s2699_s20 + $0x38] sm:$0xff] }
  0x7b   : > { %v2200_v10 = vpop.eup %2199  ;;  %v1401_v15 = vadd.f32 1.0, %v2198_v29  ;;  %v1147_v18 = vadd.f32 %v2502_v39, %v1108_v17  ;;  %v907_v41 = vadd.f32 %v875_v27, %v805_v62  ;;  %v604_v47 = vadd.f32 %v572_v1, %v502_v34  ;;  %v2950_v1 = vld [vmem:[%s3779_s1 + $0x3] ss:$0 sm:$0xff] }
  0x7c   : > { %1847 = vst.msk [vmem:[%s2722_s23 + $0x30] sm:$0xff] %vm1840_vm0, %v1814_v40  ;;  %v1719_v4 = vadd.f32 1.0, %v2200_v10  ;;  %v1624_v25 = vadd.f32 %v1592_v3, %v2849_v61  ;;  %2201 = vtanh.f32 %v1338_v43  ;;  %v876_v22 = vmul.f32 %v2405_v14, %v2885_v56  ;;  %v2908_v14 = vld [vmem:[%s3779_s1] ss:$0 sm:$0xff]  ;;  %v2969_v40 = vld [vmem:[%s3779_s1 + $0x5] ss:$0 sm:$0xff] }
  0x7d   : > { %v1433_v44 = vmul.f32 %v1401_v15, %v2807_v16  ;;  %v1211_v51 = vmul.f32 %v1147_v18, %v1147_v18  ;;  %v1008_v45 = vadd.f32 %v976_v0, %v907_v41  ;;  %v977_v38 = vmul.f32 %v2900_v24, %v2893_v20  ;;  %v2974_v43 = vld [vmem:[%s2375_s26 + $0xd8] sm:$0xff] }
  0x7e   : > { %v1751_v58 = vmul.f32 %v1719_v4, %v2811_v48  ;;  %v1656_v23 = vmul.f32 0.7978846, %v1624_v25  ;;  %v705_v53 = vadd.f32 %v673_v57, %v604_v47  ;;  %v269_v16 = vmul.f32 %v2908_v14, %v2782_v12  ;;  %v2918_v48 = vld [vmem:[%s3779_s1 + $0x1] ss:$0 sm:$0xff]  ;;  %v2925_v12 = vld [vmem:[%s3779_s1 + $0x2] ss:$0 sm:$0xff] }
  0x7f   : > { %v2913_v31 = vadd.f32 %v2634_v8, %v1433_v44  ;;  %v1243_v9 = vmul.f32 %v1211_v51, %v1147_v18  ;;  %v1109_v27 = vadd.f32 %v1077_v6, %v1008_v45  ;;  %v370_v54 = vmul.f32 %v2918_v48, %v2787_v13  ;;  %v2962_v57 = vld [vmem:[%s3779_s1 + $0x4] ss:$0 sm:$0xff]  ;;  %v2985_v47 = vld [vmem:[%s2375_s26 + $0xd9] sm:$0xff] }
  0x80   : > { %v1815_v63 = vadd.f32 %v1783_v5, %v1751_v58  ;;  %2203 = vtanh.f32 %v1656_v23  ;;  %v806_v50 = vadd.f32 %v774_v7, %v705_v53  ;;  %v471_v8 = vmul.f32 %v2925_v12, %v2796_v36  ;;  %v2994_v53 = vld [vmem:[%s2375_s26 + $0xda] sm:$0xff] }
  0x81   : > { %v1496_v11 = vmul.f32 0.5, %v2849_v61  ;;  %v1529_v28 = vmul.f32 %v2913_v31, %v2913_v31  ;;  %v1275_v0 = vmul.f32 0.044715, %v1243_v9  ;;  %v2933_v32 = vadd.f32 %v2502_v39, %v1109_v27 }
  0x82   : > { %1848 = vst.msk [vmem:[%s2722_s23 + $0x38] sm:$0xff] %vm1840_vm0, %v1815_v63  ;;  %v908_v37 = vadd.f32 %v876_v22, %v806_v50  ;;  %v1078_v36 = vmul.f32 %v2943_v60, %v2936_v52  ;;  %v402_v61 = vadd.f32 %v370_v54, %v269_v16  ;;  %v573_v59 = vmul.f32 %v2950_v1, %v2852_v26 }
  0x83   : > { %v1561_v2 = vmul.f32 %v1529_v28, %v2913_v31  ;;  %v2955_v49 = vmul.f32 0.5, %v1147_v18  ;;  %v1307_v6 = vadd.f32 %v1275_v0, %v1147_v18  ;;  %v1212_v17 = vmul.f32 %v2933_v32, %v2933_v32  ;;  %v2980_v18 = vld [vmem:[%s3779_s1 + $0x6] ss:$0 sm:$0xff] }
  0x84   : > { %v1009_v62 = vadd.f32 %v977_v38, %v908_v37  ;;  %v503_v34 = vadd.f32 %v471_v8, %v402_v61  ;;  %v674_v29 = vmul.f32 %v2962_v57, %v2859_v33  ;;  %v775_v3 = vmul.f32 %v2969_v40, %v2871_v55  ;;  %v1784_v61 = vld [vmem:[%s2699_s20 + $0x40] sm:$0xff] }
  0x85   : > { %v1593_v7 = vmul.f32 0.044715, %v1561_v2  ;;  %v1339_v10 = vmul.f32 0.7978846, %v1307_v6  ;;  %v1244_v15 = vmul.f32 %v1212_v17, %v2933_v32  ;;  %v877_v41 = vmul.f32 %v2980_v18, %v2974_v43 }
  0x86   : > { %v2202_v4 = vpop.eup %2201  ;;  %v1110_v25 = vadd.f32 %v1078_v36, %v1009_v62  ;;  %v605_v22 = vadd.f32 %v573_v59, %v503_v34  ;;  %v978_v5 = vmul.f32 %v2900_v24, %v2985_v47  ;;  %v270_v44 = vmul.f32 %v2908_v14, %v2816_v42 }
  0x87   : > { %v1625_v51 = vadd.f32 %v1593_v7, %v2913_v31  ;;  %v1402_v45 = vadd.f32 1.0, %v2202_v4  ;;  %2205 = vtanh.f32 %v1339_v10  ;;  %v1276_v38 = vmul.f32 0.044715, %v1244_v15 }
  0x88   : > { %v1149_v58 = vadd.f32 %v2502_v39, %v1110_v25  ;;  %v706_v23 = vadd.f32 %v674_v29, %v605_v22  ;;  %v371_v16 = vmul.f32 %v2918_v48, %v2830_v19  ;;  %v472_v9 = vmul.f32 %v2925_v12, %v2835_v46  ;;  %v3017_v25 = vld [vmem:[%s2375_s26 + $0xe0] sm:$0xff] }
  0x89   : > { %v1657_v27 = vmul.f32 0.7978846, %v1625_v51  ;;  %v1434_v42 = vmul.f32 %v1402_v45, %v2842_v21  ;;  %v1308_v54 = vadd.f32 %v1276_v38, %v2933_v32  ;;  %v1079_v63 = vmul.f32 %v2943_v60, %v2994_v53 }
  0x8a   : > { %v2204_v50 = vpop.eup %2203  ;;  %v1213_v39 = vmul.f32 %v1149_v58, %v1149_v58  ;;  %v807_v8 = vadd.f32 %v775_v3, %v706_v23  ;;  %v403_v28 = vadd.f32 %v371_v16, %v270_v44  ;;  %v574_v0 = vmul.f32 %v2950_v1, %v2885_v56  ;;  %v3032_v16 = vld [vmem:[%s3780_s2] ss:$0 sm:$0xff] }
  0x8b   : > { %v1720_v37 = vadd.f32 1.0, %v2204_v50  ;;  %2207 = vtanh.f32 %v1657_v27  ;;  %v1466_v36 = vadd.f32 %v2676_v30, %v1434_v42  ;;  %v1340_v46 = vmul.f32 0.7978846, %v1308_v54  ;;  %v3036_v42 = vld [vmem:[%s2375_s26 + $0xe1] sm:$0xff] }
  0x8c   : > { %v1245_v59 = vmul.f32 %v1213_v39, %v1149_v58  ;;  %v909_v21 = vadd.f32 %v877_v41, %v807_v8  ;;  %v504_v2 = vadd.f32 %v472_v9, %v403_v28  ;;  %v675_v6 = vmul.f32 %v2962_v57, %v2893_v20 }
  0x8d   : > { %v1752_v17 = vmul.f32 %v1720_v37, %v1496_v11  ;;  %v1497_v62 = vmul.f32 0.5, %v2913_v31  ;;  %v1530_v34 = vmul.f32 %v1466_v36, %v1466_v36  ;;  %2209 = vtanh.f32 %v1340_v46 }
  0x8e   : > { %v1277_v29 = vmul.f32 0.044715, %v1245_v59  ;;  %v1010_v3 = vadd.f32 %v978_v5, %v909_v21  ;;  %v606_v7 = vadd.f32 %v574_v0, %v504_v2  ;;  %v776_v30 = vmul.f32 %v2969_v40, %v2936_v52 }
  0x8f   : > { %v1816_v10 = vadd.f32 %v1784_v61, %v1752_v17  ;;  %v1562_v15 = vmul.f32 %v1530_v34, %v1466_v36  ;;  %v1180_v41 = vmul.f32 0.5, %v2933_v32  ;;  %v3014_v4 = vmul.f32 0.5, %v1149_v58  ;;  %v1785_v34 = vld [vmem:[%s2699_s20 + $0x48] sm:$0xff] }
  0x90   : > { %v1309_v11 = vadd.f32 %v1277_v29, %v1149_v58  ;;  %v1111_v31 = vadd.f32 %v1079_v63, %v1010_v3  ;;  %v707_v22 = vadd.f32 %v675_v6, %v606_v7  ;;  %v878_v5 = vmul.f32 %v2980_v18, %v3017_v25  ;;  %v3041_v63 = vld [vmem:[%s2375_s26 + $0xe2] sm:$0xff] }
  0x91   : > { %v2206_v44 = vpop.eup %2205  ;;  %1849 = vst.msk [vmem:[%s2722_s23 + $0x40] sm:$0xff] %vm1840_vm0, %v1816_v10  ;;  %v1594_v51 = vmul.f32 0.044715, %v1562_v15  ;;  %v271_v45 = vmul.f32 %v2908_v14, %v2852_v26  ;;  %v372_v32 = vmul.f32 %v2918_v48, %v2859_v33  ;;  %v473_v38 = vmul.f32 %v2925_v12, %v2871_v55 }
  0x92   : > { %v1403_v58 = vadd.f32 1.0, %v2206_v44  ;;  %v1341_v23 = vmul.f32 0.7978846, %v1309_v11  ;;  %v1150_v9 = vadd.f32 %v3032_v16, %v1111_v31  ;;  %v808_v27 = vadd.f32 %v776_v30, %v707_v22  ;;  %v3057_v30 = vld [vmem:[%s2375_s26 + $0xf0] sm:$0xff] }
  0x93   : > { %v1626_v54 = vadd.f32 %v1594_v51, %v1466_v36  ;;  %v979_v26 = vmul.f32 %v2900_v24, %v3036_v42  ;;  %v404_v50 = vadd.f32 %v372_v32, %v271_v45  ;;  %v575_v55 = vmul.f32 %v2950_v1, %v2974_v43  ;;  %v3062_v31 = vld [vmem:[%s2375_s26 + $0xf1] sm:$0xff] }
  0x94   : > { %v1435_v39 = vmul.f32 %v1403_v58, %v2955_v49  ;;  %2211 = vtanh.f32 %v1341_v23  ;;  %v1214_v8 = vmul.f32 %v1150_v9, %v1150_v9  ;;  %v1080_v28 = vmul.f32 %v2943_v60, %v3041_v63 }
  0x95   : > { %v2208_v0 = vpop.eup %2207  ;;  %v1658_v37 = vmul.f32 0.7978846, %v1626_v54  ;;  %v910_v46 = vadd.f32 %v878_v5, %v808_v27  ;;  %v505_v61 = vadd.f32 %v473_v38, %v404_v50  ;;  %v676_v59 = vmul.f32 %v2962_v57, %v2985_v47 }
  0x96   : > { %v1721_v21 = vadd.f32 1.0, %v2208_v0  ;;  %v3050_v2 = vmul.f32 0.5, %v1466_v36  ;;  %v1467_v6 = vadd.f32 %v2734_v35, %v1435_v39  ;;  %v1246_v49 = vmul.f32 %v1214_v8, %v1150_v9 }
  0x97   : > { %v2210_v17 = vpop.eup %2209  ;;  %2213 = vtanh.f32 %v1658_v37  ;;  %v1011_v29 = vadd.f32 %v979_v26, %v910_v46  ;;  %v607_v3 = vadd.f32 %v575_v55, %v505_v61  ;;  %v777_v7 = vmul.f32 %v2969_v40, %v2994_v53  ;;  %v3077_v55 = vld [vmem:[%s2375_s26 + $0xf2] sm:$0xff] }
  0x98   : > { %v1753_v10 = vmul.f32 %v1721_v21, %v1497_v62  ;;  %v1531_v15 = vmul.f32 %v1467_v6, %v1467_v6  ;;  %v1404_v11 = vadd.f32 1.0, %v2210_v17  ;;  %v879_v36 = vmul.f32 %v2980_v18, %v3057_v30 }
  0x99   : > { %v1278_v35 = vmul.f32 0.044715, %v1246_v49  ;;  %v1112_v22 = vadd.f32 %v1080_v28, %v1011_v29  ;;  %v708_v5 = vadd.f32 %v676_v59, %v607_v3  ;;  %v980_v44 = vmul.f32 %v2900_v24, %v3062_v31 }
  0x9a   : > { %v1817_v51 = vadd.f32 %v1785_v34, %v1753_v10  ;;  %v1563_v45 = vmul.f32 %v1531_v15, %v1467_v6  ;;  %v1436_v32 = vmul.f32 %v1404_v11, %v1180_v41  ;;  %v272_v62 = vmul.f32 %v2908_v14, %v2885_v56 }
  0x9b   : > { %v1310_v38 = vadd.f32 %v1278_v35, %v1150_v9  ;;  %v1151_v58 = vadd.f32 %v3032_v16, %v1112_v22  ;;  %v809_v23 = vadd.f32 %v777_v7, %v708_v5  ;;  %v373_v27 = vmul.f32 %v2918_v48, %v2893_v20  ;;  %v1786_v22 = vld [vmem:[%s2699_s20 + $0x50] sm:$0xff] }
  0x9c   : > { %1850 = vst.msk [vmem:[%s2722_s23 + $0x48] sm:$0xff] %vm1840_vm0, %v1817_v51  ;;  %v1595_v54 = vmul.f32 0.044715, %v1563_v45  ;;  %v1468_v26 = vadd.f32 %v2787_v13, %v1436_v32  ;;  %v3074_v50 = vmul.f32 0.5, %v1150_v9  ;;  %v474_v41 = vmul.f32 %v2925_v12, %v2936_v52  ;;  %v3094_v32 = vld [vmem:[%s2375_s26 + $0xf8] sm:$0xff] }
  0x9d   : > { %v1342_v56 = vmul.f32 0.7978846, %v1310_v38  ;;  %v1215_v39 = vmul.f32 %v1151_v58, %v1151_v58  ;;  %v911_v8 = vadd.f32 %v879_v36, %v809_v23  ;;  %v1081_v28 = vmul.f32 %v2943_v60, %v3077_v55 }
  0x9e   : > { %v2212_v0 = vpop.eup %2211  ;;  %v1627_v37 = vadd.f32 %v1595_v54, %v1467_v6  ;;  %v1532_v46 = vmul.f32 %v1468_v26, %v1468_v26  ;;  %v405_v61 = vadd.f32 %v373_v27, %v272_v62  ;;  %v576_v13 = vmul.f32 %v2950_v1, %v3017_v25  ;;  %v3100_v27 = vld [vmem:[%s2375_s26 + $0xf9] sm:$0xff] }
  0x9f   : > { %v1405_v9 = vadd.f32 1.0, %v2212_v0  ;;  %2215 = vtanh.f32 %v1342_v56  ;;  %v1247_v59 = vmul.f32 %v1215_v39, %v1151_v58  ;;  %v1012_v21 = vadd.f32 %v980_v44, %v911_v8 }
  0xa0   : > { %v1659_v49 = vmul.f32 0.7978846, %v1627_v37  ;;  %v1564_v52 = vmul.f32 %v1532_v46, %v1468_v26  ;;  %v506_v17 = vadd.f32 %v474_v41, %v405_v61  ;;  %v677_v34 = vmul.f32 %v2962_v57, %v3036_v42 }
  0xa1   : > { %v2214_v29 = vpop.eup %2213  ;;  %v1437_v3 = vmul.f32 %v1405_v9, %v3014_v4  ;;  %v1279_v7 = vmul.f32 0.044715, %v1247_v59  ;;  %v1113_v10 = vadd.f32 %v1081_v28, %v1012_v21  ;;  %v778_v15 = vmul.f32 %v2969_v40, %v3041_v63 }
  0xa2   : > { %v1722_v11 = vadd.f32 1.0, %v2214_v29  ;;  %2217 = vtanh.f32 %v1659_v49  ;;  %v1596_v36 = vmul.f32 0.044715, %v1564_v52  ;;  %v608_v35 = vadd.f32 %v576_v13, %v506_v17 }
  0xa3   : > { %v1499_v5 = vmul.f32 0.5, %v1467_v6  ;;  %v1469_v44 = vadd.f32 %v2830_v19, %v1437_v3  ;;  %v1311_v51 = vadd.f32 %v1279_v7, %v1151_v58  ;;  %v1152_v45 = vadd.f32 %v3032_v16, %v1113_v10 }
  0xa4   : > { %v1754_v4 = vmul.f32 %v1722_v11, %v3050_v2  ;;  %v1628_v62 = vadd.f32 %v1596_v36, %v1468_v26  ;;  %v709_v38 = vadd.f32 %v677_v34, %v608_v35  ;;  %v880_v23 = vmul.f32 %v2980_v18, %v3094_v32  ;;  %v3107_v2 = vld [vmem:[%s2375_s26 + $0xfa] sm:$0xff] }
  0xa5   : > { %v1533_v54 = vmul.f32 %v1469_v44, %v1469_v44  ;;  %v3102_v6 = vmul.f32 0.5, %v1151_v58  ;;  %v1343_v19 = vmul.f32 0.7978846, %v1311_v51  ;;  %v981_v41 = vmul.f32 %v2900_v24, %v3100_v27 }
  0xa6   : > { %v1818_v56 = vadd.f32 %v1786_v22, %v1754_v4  ;;  %v1660_v39 = vmul.f32 0.7978846, %v1628_v62  ;;  %v1216_v8 = vmul.f32 %v1152_v45, %v1152_v45  ;;  %v810_v28 = vadd.f32 %v778_v15, %v709_v38  ;;  %v1787_v62 = vld [vmem:[%s2699_s20 + $0x58] sm:$0xff] }
  0xa7   : > { %v1565_v0 = vmul.f32 %v1533_v54, %v1469_v44  ;;  %2219 = vtanh.f32 %v1343_v19  ;;  %v1082_v37 = vmul.f32 %v2943_v60, %v3107_v2  ;;  %v273_v46 = vmul.f32 %v2908_v14, %v2974_v43  ;;  %v3140_v19 = vld [vmem:[%s2375_s26 + $0x108] sm:$0xff] }
  0xa8   : > { %1851 = vst.msk [vmem:[%s2722_s23 + $0x50] sm:$0xff] %vm1840_vm0, %v1818_v56  ;;  %2221 = vtanh.f32 %v1660_v39  ;;  %v1248_v58 = vmul.f32 %v1216_v8, %v1152_v45  ;;  %v912_v61 = vadd.f32 %v880_v23, %v810_v28  ;;  %v374_v13 = vmul.f32 %v2918_v48, %v2985_v47 }
  0xa9   : > { %v2216_v9 = vpop.eup %2215  ;;  %v1500_v59 = vmul.f32 0.5, %v1468_v26  ;;  %v1597_v21 = vmul.f32 0.044715, %v1565_v0  ;;  %v475_v49 = vmul.f32 %v2925_v12, %v2994_v53  ;;  %v577_v52 = vmul.f32 %v2950_v1, %v3057_v30 }
  0xaa   : > { %v1406_v17 = vadd.f32 1.0, %v2216_v9  ;;  %v1280_v34 = vmul.f32 0.044715, %v1248_v58  ;;  %v1013_v43 = vadd.f32 %v981_v41, %v912_v61  ;;  %v406_v29 = vadd.f32 %v374_v13, %v273_v46  ;;  %v3143_v41 = vld [vmem:[%s2375_s26 + $0x109] sm:$0xff] }
  0xab   : > { %v3121_v3 = vmul.f32 0.5, %v1469_v44  ;;  %v1629_v7 = vadd.f32 %v1597_v21, %v1469_v44  ;;  %v3123_v10 = vmul.f32 0.5, %v1152_v45  ;;  %v678_v26 = vmul.f32 %v2962_v57, %v3062_v31 }
  0xac   : > { %v2218_v15 = vpop.eup %2217  ;;  %v1438_v53 = vmul.f32 %v1406_v17, %v3074_v50  ;;  %v1312_v11 = vadd.f32 %v1280_v34, %v1152_v45  ;;  %v1114_v36 = vadd.f32 %v1082_v37, %v1013_v43  ;;  %v507_v35 = vadd.f32 %v475_v49, %v406_v29  ;;  %v3166_v17 = vld [vmem:[%s2375_s26 + $0x10a] sm:$0xff]  ;;  %v1788_v43 = vld [vmem:[%s2699_s20 + $0x60] sm:$0xff] }
  0xad   : > { %v1723_v22 = vadd.f32 1.0, %v2218_v15  ;;  %v1661_v51 = vmul.f32 0.7978846, %v1629_v7  ;;  %v779_v4 = vmul.f32 %v2969_v40, %v3077_v55  ;;  %v274_v44 = vmul.f32 %v2908_v14, %v3017_v25 }
  0xae   : > { %v3134_v38 = vadd.f32 %v2859_v33, %v1438_v53  ;;  %v1344_v23 = vmul.f32 0.7978846, %v1312_v11  ;;  %v3137_v54 = vadd.f32 %v3032_v16, %v1114_v36  ;;  %v609_v50 = vadd.f32 %v577_v52, %v507_v35 }
  0xaf   : > { %v1755_v45 = vmul.f32 %v1723_v22, %v1499_v5  ;;  %2223 = vtanh.f32 %v1661_v51  ;;  %v375_v56 = vmul.f32 %v2918_v48, %v3036_v42  ;;  %v476_v25 = vmul.f32 %v2925_v12, %v3041_v63  ;;  %v3175_v22 = vld [vmem:[%s2375_s26 + $0x110] sm:$0xff] }
  0xb0   : > { %v1534_v33 = vmul.f32 %v3134_v38, %v3134_v38  ;;  %2225 = vtanh.f32 %v1344_v23  ;;  %v881_v39 = vmul.f32 %v2980_v18, %v3140_v19  ;;  %v982_v5 = vmul.f32 %v2900_v24, %v3143_v41  ;;  %v3178_v51 = vld [vmem:[%s2375_s26 + $0x111] sm:$0xff] }
  0xb1   : > { %v2220_v8 = vpop.eup %2219  ;;  %v1819_v28 = vadd.f32 %v1787_v62, %v1755_v45  ;;  %v1217_v0 = vmul.f32 %v3137_v54, %v3137_v54  ;;  %v710_v37 = vadd.f32 %v678_v26, %v609_v50  ;;  %v407_v46 = vadd.f32 %v375_v56, %v274_v44  ;;  %v3188_v56 = vld [vmem:[%s2375_s26 + $0x112] sm:$0xff] }
  0xb2   : > { %v2222_v63 = vpop.eup %2221  ;;  %v1566_v58 = vmul.f32 %v1534_v33, %v3134_v38  ;;  %v1407_v61 = vadd.f32 1.0, %v2220_v8  ;;  %v578_v13 = vmul.f32 %v2950_v1, %v3094_v32  ;;  %v679_v9 = vmul.f32 %v2962_v57, %v3100_v27 }
  0xb3   : > { %1852 = vst.msk [vmem:[%s2722_s23 + $0x58] sm:$0xff] %vm1840_vm0, %v1819_v28  ;;  %v1724_v21 = vadd.f32 1.0, %v2222_v63  ;;  %v1249_v49 = vmul.f32 %v1217_v0, %v3137_v54  ;;  %v811_v52 = vadd.f32 %v779_v4, %v710_v37  ;;  %v508_v34 = vadd.f32 %v476_v25, %v407_v46 }
  0xb4   : > { %v1598_v29 = vmul.f32 0.044715, %v1566_v58  ;;  %v1439_v7 = vmul.f32 %v1407_v61, %v3102_v6  ;;  %v1083_v26 = vmul.f32 %v2943_v60, %v3166_v17  ;;  %v780_v15 = vmul.f32 %v2969_v40, %v3107_v2 }
  0xb5   : > { %v1756_v53 = vmul.f32 %v1724_v21, %v1500_v59  ;;  %v1281_v11 = vmul.f32 0.044715, %v1249_v49  ;;  %v913_v36 = vadd.f32 %v881_v39, %v811_v52  ;;  %v610_v35 = vadd.f32 %v578_v13, %v508_v34  ;;  %v1789_v13 = vld [vmem:[%s2699_s20 + $0x68] sm:$0xff] }
  0xb6   : > { %v1630_v4 = vadd.f32 %v1598_v29, %v3134_v38  ;;  %v1471_v6 = vadd.f32 %v2893_v20, %v1439_v7  ;;  %v882_v44 = vmul.f32 %v2980_v18, %v3175_v22  ;;  %v983_v62 = vmul.f32 %v2900_v24, %v3178_v51 }
  0xb7   : > { %v1820_v23 = vadd.f32 %v1788_v43, %v1756_v53  ;;  %v1313_v59 = vadd.f32 %v1281_v11, %v3137_v54  ;;  %v1014_v50 = vadd.f32 %v982_v5, %v913_v36  ;;  %v711_v45 = vadd.f32 %v679_v9, %v610_v35 }
  0xb8   : > { %v1662_v25 = vmul.f32 0.7978846, %v1630_v4  ;;  %v1535_v33 = vmul.f32 %v1471_v6, %v1471_v6  ;;  %v1084_v39 = vmul.f32 %v2943_v60, %v3188_v56  ;;  %v275_v20 = vmul.f32 %v2908_v14, %v3057_v30 }
  0xb9   : > { %v2224_v8 = vpop.eup %2223  ;;  %1853 = vst.msk [vmem:[%s2722_s23 + $0x60] sm:$0xff] %vm1840_vm0, %v1820_v23  ;;  %v1345_v28 = vmul.f32 0.7978846, %v1313_v59  ;;  %v1115_v0 = vadd.f32 %v1083_v26, %v1014_v50  ;;  %v812_v37 = vadd.f32 %v780_v15, %v711_v45  ;;  %v376_v5 = vmul.f32 %v2918_v48, %v3062_v31 }
  0xba   : > { %v2226_v46 = vpop.eup %2225  ;;  %v1725_v63 = vadd.f32 1.0, %v2224_v8  ;;  %2227 = vtanh.f32 %v1662_v25  ;;  %v1567_v58 = vmul.f32 %v1535_v33, %v1471_v6  ;;  %v477_v61 = vmul.f32 %v2925_v12, %v3077_v55 }
  0xbb   : > { %v1408_v9 = vadd.f32 1.0, %v2226_v46  ;;  %2229 = vtanh.f32 %v1345_v28  ;;  %v1154_v30 = vadd.f32 %v3032_v16, %v1115_v0  ;;  %v914_v21 = vadd.f32 %v882_v44, %v812_v37  ;;  %v3235_v0 = vld [vmem:[%s2375_s26 + $0x122] sm:$0xff] }
  0xbc   : > { %v1757_v49 = vmul.f32 %v1725_v63, %v3121_v3  ;;  %v1599_v52 = vmul.f32 0.044715, %v1567_v58  ;;  %v408_v34 = vadd.f32 %v376_v5, %v275_v20  ;;  %v579_v43 = vmul.f32 %v2950_v1, %v3140_v19 }
  0xbd   : > { %v1440_v29 = vmul.f32 %v1408_v9, %v3123_v10  ;;  %v1218_v7 = vmul.f32 %v1154_v30, %v1154_v30  ;;  %v1015_v26 = vadd.f32 %v983_v62, %v914_v21  ;;  %v680_v11 = vmul.f32 %v2962_v57, %v3143_v41 }
  0xbe   : > { %v1821_v15 = vadd.f32 %v1789_v13, %v1757_v49  ;;  %v1631_v55 = vadd.f32 %v1599_v52, %v1471_v6  ;;  %v509_v53 = vadd.f32 %v477_v61, %v408_v34  ;;  %v1502_v36 = vmul.f32 0.5, %v3134_v38  ;;  %v1790_v49 = vld [vmem:[%s2699_s20 + $0x70] sm:$0xff] }
  0xbf   : > { %v1472_v3 = vadd.f32 %v2985_v47, %v1440_v29  ;;  %v1250_v35 = vmul.f32 %v1218_v7, %v1154_v30  ;;  %v1116_v4 = vadd.f32 %v1084_v39, %v1015_v26  ;;  %v1185_v10 = vmul.f32 0.5, %v3137_v54  ;;  %v3221_v47 = vld [vmem:[%s2375_s26 + $0x120] sm:$0xff] }
  0xc0   : > { %1854 = vst.msk [vmem:[%s2722_s23 + $0x68] sm:$0xff] %vm1840_vm0, %v1821_v15  ;;  %v1663_v44 = vmul.f32 0.7978846, %v1631_v55  ;;  %v611_v62 = vadd.f32 %v579_v43, %v509_v53  ;;  %v781_v23 = vmul.f32 %v2969_v40, %v3166_v17  ;;  %v3215_v59 = vmul.f32 0.5, %v1471_v6  ;;  %v3226_v54 = vld [vmem:[%s2375_s26 + $0x121] sm:$0xff] }
  0xc1   : > { %v1536_v50 = vmul.f32 %v1472_v3, %v1472_v3  ;;  %v1282_v45 = vmul.f32 0.044715, %v1250_v35  ;;  %v3218_v38 = vadd.f32 %v3032_v16, %v1116_v4  ;;  %v883_v33 = vmul.f32 %v2980_v18, %v3221_v47 }
  0xc2   : > { %2231 = vtanh.f32 %v1663_v44  ;;  %v712_v25 = vadd.f32 %v680_v11, %v611_v62  ;;  %v276_v39 = vmul.f32 %v2908_v14, %v3094_v32  ;;  %v984_v28 = vmul.f32 %v2900_v24, %v3226_v54 }
  0xc3   : > { %v1568_v6 = vmul.f32 %v1536_v50, %v1472_v3  ;;  %v1314_v20 = vadd.f32 %v1282_v45, %v1154_v30  ;;  %v1219_v8 = vmul.f32 %v3218_v38, %v3218_v38  ;;  %v1085_v46 = vmul.f32 %v2943_v60, %v3235_v0 }
  0xc4   : > { %v2228_v37 = vpop.eup %2227  ;;  %v813_v5 = vadd.f32 %v781_v23, %v712_v25  ;;  %v377_v63 = vmul.f32 %v2918_v48, %v3100_v27  ;;  %v478_v32 = vmul.f32 %v2925_v12, %v3107_v2  ;;  %v580_v29 = vmul.f32 %v2950_v1, %v3175_v22 }
  0xc5   : > { %v2230_v58 = vpop.eup %2229  ;;  %v1726_v61 = vadd.f32 1.0, %v2228_v37  ;;  %v1600_v13 = vmul.f32 0.044715, %v1568_v6  ;;  %v1346_v9 = vmul.f32 0.7978846, %v1314_v20  ;;  %v1251_v21 = vmul.f32 %v1219_v8, %v3218_v38 }
  0xc6   : > { %v1409_v52 = vadd.f32 1.0, %v2230_v58  ;;  %v915_v34 = vadd.f32 %v883_v33, %v813_v5  ;;  %v409_v43 = vadd.f32 %v377_v63, %v276_v39  ;;  %v681_v11 = vmul.f32 %v2962_v57, %v3178_v51  ;;  %v3260_v33 = vld [vmem:[%s2375_s26 + $0x128] sm:$0xff]  ;;  %v1791_v5 = vld [vmem:[%s2699_s20 + $0x78] sm:$0xff] }
  0xc7   : > { %v1758_v7 = vmul.f32 %v1726_v61, %v1502_v36  ;;  %v1632_v26 = vadd.f32 %v1600_v13, %v1472_v3  ;;  %2233 = vtanh.f32 %v1346_v9  ;;  %v1283_v15 = vmul.f32 0.044715, %v1251_v21  ;;  %v3287_v9 = vld [vmem:[%s2375_s26 + $0x12a] sm:$0xff] }
  0xc8   : > { %v1441_v55 = vmul.f32 %v1409_v52, %v1185_v10  ;;  %v1016_v2 = vadd.f32 %v984_v28, %v915_v34  ;;  %v510_v53 = vadd.f32 %v478_v32, %v409_v43  ;;  %v1186_v44 = vmul.f32 0.5, %v1154_v30  ;;  %v3272_v28 = vld [vmem:[%s2375_s26 + $0x129] sm:$0xff] }
  0xc9   : > { %v1822_v35 = vadd.f32 %v1790_v49, %v1758_v7  ;;  %v1664_v4 = vmul.f32 0.7978846, %v1632_v26  ;;  %v1315_v62 = vadd.f32 %v1283_v15, %v3218_v38  ;;  %v782_v10 = vmul.f32 %v2969_v40, %v3188_v56 }
  0xca   : > { %v3251_v23 = vadd.f32 %v3036_v42, %v1441_v55  ;;  %v1117_v36 = vadd.f32 %v1085_v46, %v1016_v2  ;;  %v612_v50 = vadd.f32 %v580_v29, %v510_v53  ;;  %v3257_v45 = vmul.f32 0.5, %v1472_v3 }
  0xcb   : > { %1855 = vst.msk [vmem:[%s2722_s23 + $0x70] sm:$0xff] %vm1840_vm0, %v1822_v35  ;;  %2235 = vtanh.f32 %v1664_v4  ;;  %v1347_v25 = vmul.f32 0.7978846, %v1315_v62  ;;  %v277_v30 = vmul.f32 %v2908_v14, %v3140_v19  ;;  %v884_v3 = vmul.f32 %v2980_v18, %v3260_v33 }
  0xcc   : > { %v2232_v42 = vpop.eup %2231  ;;  %v1537_v39 = vmul.f32 %v3251_v23, %v3251_v23  ;;  %v3267_v6 = vadd.f32 %v3032_v16, %v1117_v36  ;;  %v713_v20 = vadd.f32 %v681_v11, %v612_v50  ;;  %v378_v37 = vmul.f32 %v2918_v48, %v3143_v41  ;;  %v3300_v11 = vld [vmem:[%s2375_s26 + $0x138] sm:$0xff] }
  0xcd   : > { %v1727_v8 = vadd.f32 1.0, %v2232_v42  ;;  %2237 = vtanh.f32 %v1347_v25  ;;  %v479_v19 = vmul.f32 %v2925_v12, %v3166_v17  ;;  %v985_v58 = vmul.f32 %v2900_v24, %v3272_v28 }
  0xce   : > { %v1569_v46 = vmul.f32 %v1537_v39, %v3251_v23  ;;  %v1220_v63 = vmul.f32 %v3267_v6, %v3267_v6  ;;  %v814_v32 = vadd.f32 %v782_v10, %v713_v20  ;;  %v1187_v13 = vmul.f32 0.5, %v3218_v38 }
  0xcf   : > { %v1759_v61 = vmul.f32 %v1727_v8, %v3215_v59  ;;  %v410_v21 = vadd.f32 %v378_v37, %v277_v30  ;;  %v581_v17 = vmul.f32 %v2950_v1, %v3221_v47  ;;  %v1086_v43 = vmul.f32 %v2943_v60, %v3287_v9 }
  0xd0   : > { %v1601_v49 = vmul.f32 0.044715, %v1569_v46  ;;  %v1252_v52 = vmul.f32 %v1220_v63, %v3267_v6  ;;  %v916_v34 = vadd.f32 %v884_v3, %v814_v32  ;;  %v682_v38 = vmul.f32 %v2962_v57, %v3226_v54  ;;  %v1792_v46 = vld [vmem:[%s2699_s20 + $0x80] sm:$0xff] }
  0xd1   : > { %v2234_v29 = vpop.eup %2233  ;;  %v1823_v7 = vadd.f32 %v1791_v5, %v1759_v61  ;;  %v511_v59 = vadd.f32 %v479_v19, %v410_v21  ;;  %v783_v26 = vmul.f32 %v2969_v40, %v3235_v0  ;;  %v885_v4 = vmul.f32 %v2980_v18, %v3300_v11  ;;  %v3317_v5 = vld [vmem:[%s2375_s26 + $0x139] sm:$0xff] }
  0xd2   : > { %v1633_v15 = vadd.f32 %v1601_v49, %v3251_v23  ;;  %v1410_v55 = vadd.f32 1.0, %v2234_v29  ;;  %v1284_v2 = vmul.f32 0.044715, %v1252_v52  ;;  %v1017_v53 = vadd.f32 %v985_v58, %v916_v34 }
  0xd3   : > { %1856 = vst.msk [vmem:[%s2722_s23 + $0x78] sm:$0xff] %vm1840_vm0, %v1823_v7  ;;  %v613_v35 = vadd.f32 %v581_v17, %v511_v59  ;;  %v278_v62 = vmul.f32 %v2908_v14, %v3175_v22  ;;  %v379_v36 = vmul.f32 %v2918_v48, %v3178_v51  ;;  %v480_v3 = vmul.f32 %v2925_v12, %v3188_v56 }
  0xd4   : > { %v1665_v50 = vmul.f32 0.7978846, %v1633_v15  ;;  %v1442_v10 = vmul.f32 %v1410_v55, %v1186_v44  ;;  %v1316_v25 = vadd.f32 %v1284_v2, %v3267_v6  ;;  %v1118_v30 = vadd.f32 %v1086_v43, %v1017_v53  ;;  %v3340_v2 = vld [vmem:[%s2375_s26 + $0x140] sm:$0xff] }
  0xd5   : > { %v2236_v42 = vpop.eup %2235  ;;  %v714_v39 = vadd.f32 %v682_v38, %v613_v35  ;;  %v411_v20 = vadd.f32 %v379_v36, %v278_v62  ;;  %v582_v8 = vmul.f32 %v2950_v1, %v3260_v33  ;;  %v986_v56 = vmul.f32 %v2900_v24, %v3317_v5  ;;  %v3348_v62 = vld [vmem:[%s2375_s26 + $0x141] sm:$0xff] }
  0xd6   : > { %v1728_v22 = vadd.f32 1.0, %v2236_v42  ;;  %2239 = vtanh.f32 %v1665_v50  ;;  %v1474_v37 = vadd.f32 %v3062_v31, %v1442_v10  ;;  %v1348_v19 = vmul.f32 0.7978846, %v1316_v25  ;;  %v3327_v31 = vld [vmem:[%s2375_s26 + $0x13a] sm:$0xff] }
  0xd7   : > { %v2238_v44 = vpop.eup %2237  ;;  %v3321_v63 = vadd.f32 %v3032_v16, %v1118_v30  ;;  %v815_v32 = vadd.f32 %v783_v26, %v714_v39  ;;  %v512_v58 = vadd.f32 %v480_v3, %v411_v20  ;;  %v683_v49 = vmul.f32 %v2962_v57, %v3272_v28  ;;  %v3354_v39 = vld [vmem:[%s2375_s26 + $0x142] sm:$0xff] }
  0xd8   : > { %v1760_v61 = vmul.f32 %v1728_v22, %v3257_v45  ;;  %v1538_v21 = vmul.f32 %v1474_v37, %v1474_v37  ;;  %v1411_v17 = vadd.f32 1.0, %v2238_v44  ;;  %2241 = vtanh.f32 %v1348_v19 }
  0xd9   : > { %v1221_v52 = vmul.f32 %v3321_v63, %v3321_v63  ;;  %v917_v34 = vadd.f32 %v885_v4, %v815_v32  ;;  %v1087_v43 = vmul.f32 %v2943_v60, %v3327_v31  ;;  %v614_v59 = vadd.f32 %v582_v8, %v512_v58 }
  0xda   : > { %v1824_v29 = vadd.f32 %v1792_v46, %v1760_v61  ;;  %v1570_v45 = vmul.f32 %v1538_v21, %v1474_v37  ;;  %v1443_v7 = vmul.f32 %v1411_v17, %v1187_v13  ;;  %v1505_v38 = vmul.f32 0.5, %v3251_v23  ;;  %v1793_v21 = vld [vmem:[%s2699_s20 + $0x88] sm:$0xff] }
  0xdb   : > { %v1253_v26 = vmul.f32 %v1221_v52, %v3321_v63  ;;  %v1018_v15 = vadd.f32 %v986_v56, %v917_v34  ;;  %v784_v55 = vmul.f32 %v2969_v40, %v3287_v9  ;;  %v715_v4 = vadd.f32 %v683_v49, %v614_v59 }
  0xdc   : > { %1857 = vst.msk [vmem:[%s2722_s23 + $0x80] sm:$0xff] %vm1840_vm0, %v1824_v29  ;;  %v1602_v53 = vmul.f32 0.044715, %v1570_v45  ;;  %v1475_v35 = vadd.f32 %v3100_v27, %v1443_v7  ;;  %v886_v13 = vmul.f32 %v2980_v18, %v3340_v2  ;;  %v1188_v23 = vmul.f32 0.5, %v3267_v6 }
  0xdd   : > { %v1285_v36 = vmul.f32 0.044715, %v1253_v26  ;;  %v1119_v50 = vadd.f32 %v1087_v43, %v1018_v15  ;;  %v987_v10 = vmul.f32 %v2900_v24, %v3348_v62  ;;  %v816_v42 = vadd.f32 %v784_v55, %v715_v4 }
  0xde   : > { %v1634_v25 = vadd.f32 %v1602_v53, %v1474_v37  ;;  %v1539_v30 = vmul.f32 %v1475_v35, %v1475_v35  ;;  %v279_v27 = vmul.f32 %v2908_v14, %v3221_v47  ;;  %v1088_v6 = vmul.f32 %v2943_v60, %v3354_v39 }
  0xdf   : > { %v1317_v20 = vadd.f32 %v1285_v36, %v3321_v63  ;;  %v3360_v3 = vadd.f32 %v3032_v16, %v1119_v50  ;;  %v380_v8 = vmul.f32 %v2918_v48, %v3226_v54  ;;  %v918_v46 = vadd.f32 %v886_v13, %v816_v42 }
  0xe0   : > { %v2240_v22 = vpop.eup %2239  ;;  %v1666_v19 = vmul.f32 0.7978846, %v1634_v25  ;;  %v1571_v44 = vmul.f32 %v1539_v30, %v1475_v35  ;;  %v481_v32 = vmul.f32 %v2925_v12, %v3235_v0  ;;  %v583_v61 = vmul.f32 %v2950_v1, %v3300_v11  ;;  %v3388_v25 = vld [vmem:[%s2375_s26 + $0x150] sm:$0xff] }
  0xe1   : > { %v1729_v56 = vadd.f32 1.0, %v2240_v22  ;;  %v1349_v47 = vmul.f32 0.7978846, %v1317_v20  ;;  %v1222_v58 = vmul.f32 %v3360_v3, %v3360_v3  ;;  %v1019_v49 = vadd.f32 %v987_v10, %v918_v46 }
  0xe2   : > { %2243 = vtanh.f32 %v1666_v19  ;;  %v1603_v17 = vmul.f32 0.044715, %v1571_v44  ;;  %v412_v52 = vadd.f32 %v380_v8, %v279_v27  ;;  %v2242_v34 = vpop.eup %2241  ;;  %v1506_v29 = vmul.f32 0.5, %v1474_v37  ;;  %v3403_v8 = vld [vmem:[%s2375_s26 + $0x152] sm:$0xff] }
  0xe3   : > { %v1761_v43 = vmul.f32 %v1729_v56, %v1505_v38  ;;  %2245 = vtanh.f32 %v1349_v47  ;;  %v1254_v0 = vmul.f32 %v1222_v58, %v3360_v3  ;;  %v1412_v7 = vadd.f32 1.0, %v2242_v34  ;;  %v3424_v58 = vld [vmem:[%s2375_s26 + $0x158] sm:$0xff] }
  0xe4   : > { %v1635_v45 = vadd.f32 %v1603_v17, %v1475_v35  ;;  %v1120_v59 = vadd.f32 %v1088_v6, %v1019_v49  ;;  %v513_v26 = vadd.f32 %v481_v32, %v412_v52  ;;  %v1189_v55 = vmul.f32 0.5, %v3321_v63  ;;  %v3400_v6 = vld [vmem:[%s2375_s26 + $0x151] sm:$0xff] }
  0xe5   : > { %v1825_v15 = vadd.f32 %v1793_v21, %v1761_v43  ;;  %v1286_v53 = vmul.f32 0.044715, %v1254_v0  ;;  %v684_v4 = vmul.f32 %v2962_v57, %v3317_v5  ;;  %v1444_v38 = vmul.f32 %v1412_v7, %v1188_v23  ;;  %v1794_v52 = vld [vmem:[%s2699_s20 + $0x90] sm:$0xff] }
  0xe6   : > { %v1667_v13 = vmul.f32 0.7978846, %v1635_v45  ;;  %v3378_v37 = vadd.f32 %v3032_v16, %v1120_v59  ;;  %v615_v36 = vadd.f32 %v583_v61, %v513_v26  ;;  %v3382_v50 = vmul.f32 0.5, %v1475_v35 }
  0xe7   : > { %1858 = vst.msk [vmem:[%s2722_s23 + $0x88] sm:$0xff] %vm1840_vm0, %v1825_v15  ;;  %v1318_v10 = vadd.f32 %v1286_v53, %v3360_v3  ;;  %v785_v63 = vmul.f32 %v2969_v40, %v3327_v31  ;;  %v280_v30 = vmul.f32 %v2908_v14, %v3260_v33  ;;  %v3393_v23 = vadd.f32 %v3143_v41, %v1444_v38 }
  0xe8   : > { %2247 = vtanh.f32 %v1667_v13  ;;  %v1223_v42 = vmul.f32 %v3378_v37, %v3378_v37  ;;  %v887_v35 = vmul.f32 %v2980_v18, %v3388_v25  ;;  %v716_v20 = vadd.f32 %v684_v4, %v615_v36  ;;  %v3451_v13 = vld [vmem:[%s3779_s1 + $0x1] ss:$0 sm:$0xff] }
  0xe9   : > { %v1350_v27 = vmul.f32 0.7978846, %v1318_v10  ;;  %v381_v14 = vmul.f32 %v2918_v48, %v3272_v28  ;;  %v482_v41 = vmul.f32 %v2925_v12, %v3287_v9  ;;  %v1540_v33 = vmul.f32 %v3393_v23, %v3393_v23 }
  0xea   : > { %v1255_v22 = vmul.f32 %v1223_v42, %v3378_v37  ;;  %v988_v19 = vmul.f32 %v2900_v24, %v3400_v6  ;;  %v1089_v44 = vmul.f32 %v2943_v60, %v3403_v8  ;;  %v817_v46 = vadd.f32 %v785_v63, %v716_v20 }
  0xeb   : > { %2249 = vtanh.f32 %v1350_v27  ;;  %v413_v32 = vadd.f32 %v381_v14, %v280_v30  ;;  %v584_v48 = vmul.f32 %v2950_v1, %v3340_v2  ;;  %v1572_v9 = vmul.f32 %v1540_v33, %v3393_v23  ;;  %v3429_v1 = vld [vmem:[%s2375_s26 + $0x159] sm:$0xff] }
  0xec   : > { %v2244_v12 = vpop.eup %2243  ;;  %v1287_v56 = vmul.f32 0.044715, %v1255_v22  ;;  %v685_v47 = vmul.f32 %v2962_v57, %v3348_v62  ;;  %v786_v24 = vmul.f32 %v2969_v40, %v3354_v39  ;;  %v919_v21 = vadd.f32 %v887_v35, %v817_v46  ;;  %v3436_v57 = vld [vmem:[%s3779_s1 + $0x7] ss:$0 sm:$0xff]  ;;  %v1795_v33 = vld [vmem:[%s2699_s20 + $0x98] sm:$0xff] }
  0xed   : > { %v2246_v60 = vpop.eup %2245  ;;  %v1730_v61 = vadd.f32 1.0, %v2244_v12  ;;  %v514_v17 = vadd.f32 %v482_v41, %v413_v32  ;;  %v888_v49 = vmul.f32 %v2980_v18, %v3424_v58  ;;  %v1604_v34 = vmul.f32 0.044715, %v1572_v9  ;;  %v3443_v18 = vld [vmem:[%s3779_s1] ss:$0 sm:$0xff] }
  0xee   : > { %v1413_v43 = vadd.f32 1.0, %v2246_v60  ;;  %v1319_v0 = vadd.f32 %v1287_v56, %v3378_v37  ;;  %v989_v40 = vmul.f32 %v3436_v57, %v3429_v1  ;;  %v1020_v7 = vadd.f32 %v988_v19, %v919_v21  ;;  %v3473_v41 = vld [vmem:[%s3779_s1 + $0x3] ss:$0 sm:$0xff]  ;;  %v3482_v19 = vld [vmem:[%s2375_s26 + $0x15a] sm:$0xff]  ;;  %v3490_v9 = vld [vmem:[%s3779_s1 + $0x8] ss:$0 sm:$0xff] }
  0xef   : > { %v1762_v45 = vmul.f32 %v1730_v61, %v1506_v29  ;;  %v616_v59 = vadd.f32 %v584_v48, %v514_v17  ;;  %v281_v26 = vmul.f32 %v3443_v18, %v3300_v11  ;;  %v1636_v15 = vadd.f32 %v1604_v34, %v3393_v23  ;;  %v3458_v11 = vld [vmem:[%s3779_s1 + $0x2] ss:$0 sm:$0xff]  ;;  %v3511_v34 = vld [vmem:[%s2375_s26 + $0x168] sm:$0xff] }
  0xf0   : > { %v1445_v53 = vmul.f32 %v1413_v43, %v1189_v55  ;;  %v1351_v4 = vmul.f32 0.7978846, %v1319_v0  ;;  %v382_v29 = vmul.f32 %v3451_v13, %v3317_v5  ;;  %v1121_v36 = vadd.f32 %v1089_v44, %v1020_v7  ;;  %v3516_v7 = vld [vmem:[%s3779_s1 + $0x6] ss:$0 sm:$0xff] }
  0xf1   : > { %v1826_v38 = vadd.f32 %v1794_v52, %v1762_v45  ;;  %v717_v10 = vadd.f32 %v685_v47, %v616_v59  ;;  %v483_v55 = vmul.f32 %v3458_v11, %v3327_v31  ;;  %v1668_v30 = vmul.f32 0.7978846, %v1636_v15  ;;  %v3521_v59 = vld [vmem:[%s2375_s26 + $0x169] sm:$0xff] }
  0xf2   : > { %v2248_v63 = vpop.eup %2247  ;;  %v3463_v42 = vadd.f32 %v3178_v51, %v1445_v53  ;;  %2251 = vtanh.f32 %v1351_v4  ;;  %v414_v35 = vadd.f32 %v382_v29, %v281_v26  ;;  %v3468_v20 = vadd.f32 %v3032_v16, %v1121_v36 }
  0xf3   : > { %1859 = vst.msk [vmem:[%s2722_s23 + $0x90] sm:$0xff] %vm1840_vm0, %v1826_v38  ;;  %v1731_v27 = vadd.f32 1.0, %v2248_v63  ;;  %v818_v14 = vadd.f32 %v786_v24, %v717_v10  ;;  %v585_v31 = vmul.f32 %v3473_v41, %v3388_v25  ;;  %2253 = vtanh.f32 %v1668_v30  ;;  %v3531_v10 = vld [vmem:[%s2375_s26 + $0x16a] sm:$0xff] }
  0xf4   : > { %v1541_v51 = vmul.f32 %v3463_v42, %v3463_v42  ;;  %v1190_v22 = vmul.f32 0.5, %v3360_v3  ;;  %v515_v44 = vadd.f32 %v483_v55, %v414_v35  ;;  %v1224_v48 = vmul.f32 %v3468_v20, %v3468_v20 }
  0xf5   : > { %v2250_v46 = vpop.eup %2249  ;;  %v1763_v32 = vmul.f32 %v1731_v27, %v3382_v50  ;;  %v920_v12 = vadd.f32 %v888_v49, %v818_v14  ;;  %v1090_v56 = vmul.f32 %v3490_v9, %v3482_v19  ;;  %v3498_v50 = vld [vmem:[%s3779_s1 + $0x4] ss:$0 sm:$0xff]  ;;  %v3506_v49 = vld [vmem:[%s3779_s1 + $0x5] ss:$0 sm:$0xff]  ;;  %v1191_v26 = vmul.f32 0.5, %v3378_v37 }
  0xf6   : > { %v1573_v3 = vmul.f32 %v1541_v51, %v3463_v42  ;;  %v1414_v47 = vadd.f32 1.0, %v2250_v46  ;;  %v617_v24 = vadd.f32 %v585_v31, %v515_v44  ;;  %v686_v60 = vmul.f32 %v3498_v50, %v3400_v6 }
  0xf7   : > { %v1827_v61 = vadd.f32 %v1795_v33, %v1763_v32  ;;  %v1256_v21 = vmul.f32 %v1224_v48, %v3468_v20  ;;  %v1021_v17 = vadd.f32 %v989_v40, %v920_v12  ;;  %v787_v52 = vmul.f32 %v3506_v49, %v3403_v8 }
  0xf8   : > { %v1605_v43 = vmul.f32 0.044715, %v1573_v3  ;;  %v1446_v0 = vmul.f32 %v1414_v47, %v1190_v22  ;;  %v718_v45 = vadd.f32 %v686_v60, %v617_v24  ;;  %v889_v40 = vmul.f32 %v3516_v7, %v3511_v34  ;;  %v1796_v47 = vld [vmem:[%s2699_s20 + $0xa0] sm:$0xff] }
  0xf9   : > { %1860 = vst.msk [vmem:[%s2722_s23 + $0x98] sm:$0xff] %vm1840_vm0, %v1827_v61  ;;  %v1288_v15 = vmul.f32 0.044715, %v1256_v21  ;;  %v1122_v53 = vadd.f32 %v1090_v56, %v1021_v17  ;;  %v990_v4 = vmul.f32 %v3436_v57, %v3521_v59  ;;  %v282_v55 = vmul.f32 %v3443_v18, %v3340_v2 }
  0xfa   : > { %v1637_v29 = vadd.f32 %v1605_v43, %v3463_v42  ;;  %v1478_v38 = vadd.f32 %v3226_v54, %v1446_v0  ;;  %v819_v36 = vadd.f32 %v787_v52, %v718_v45  ;;  %v1091_v37 = vmul.f32 %v3490_v9, %v3531_v10  ;;  %v3558_v0 = vld [vmem:[%s3780_s2] ss:$0 sm:$0xff] }
  0xfb   : > { %v1320_v63 = vadd.f32 %v1288_v15, %v3468_v20  ;;  %v3537_v30 = vadd.f32 %v3032_v16, %v1122_v53  ;;  %v383_v35 = vmul.f32 %v3451_v13, %v3348_v62  ;;  %v484_v33 = vmul.f32 %v3458_v11, %v3354_v39 }
  0xfc   : > { %v2252_v27 = vpop.eup %2251  ;;  %v1669_v14 = vmul.f32 0.7978846, %v1637_v29  ;;  %v1542_v54 = vmul.f32 %v1478_v38, %v1478_v38  ;;  %v921_v31 = vadd.f32 %v889_v40, %v819_v36  ;;  %v1508_v2 = vmul.f32 0.5, %v3393_v23 }
  0xfd   : > { %v1415_v51 = vadd.f32 1.0, %v2252_v27  ;;  %v1352_v22 = vmul.f32 0.7978846, %v1320_v63  ;;  %v1225_v16 = vmul.f32 %v3537_v30, %v3537_v30  ;;  %v2254_v44 = vpop.eup %2253  ;;  %v415_v48 = vadd.f32 %v383_v35, %v282_v55 }
  0xfe   : > { %2255 = vtanh.f32 %v1669_v14  ;;  %v1574_v46 = vmul.f32 %v1542_v54, %v1478_v38  ;;  %v1022_v32 = vadd.f32 %v990_v4, %v921_v31  ;;  %v1732_v12 = vadd.f32 1.0, %v2254_v44  ;;  %v3580_v54 = vld [vmem:[%s2375_s26 + $0x171] sm:$0xff] }
  0xff   : > { %v1447_v56 = vmul.f32 %v1415_v51, %v1191_v26  ;;  %2257 = vtanh.f32 %v1352_v22  ;;  %v1257_v3 = vmul.f32 %v1225_v16, %v3537_v30  ;;  %v516_v60 = vadd.f32 %v484_v33, %v415_v48  ;;  %v3586_v51 = vld [vmem:[%s2375_s26 + $0x172] sm:$0xff] }
 0x100   : > { %v1606_v24 = vmul.f32 0.044715, %v1574_v46  ;;  %v1123_v39 = vadd.f32 %v1091_v37, %v1022_v32  ;;  %v586_v23 = vmul.f32 %v3473_v41, %v3424_v58  ;;  %v1764_v61 = vmul.f32 %v1732_v12, %v1508_v2  ;;  %v3571_v37 = vld [vmem:[%s2375_s26 + $0x170] sm:$0xff] }
 0x101   : > { %v1479_v21 = vadd.f32 %v3272_v28, %v1447_v56  ;;  %v1289_v17 = vmul.f32 0.044715, %v1257_v3  ;;  %v687_v52 = vmul.f32 %v3498_v50, %v3429_v1  ;;  %v788_v28 = vmul.f32 %v3506_v49, %v3482_v19 }
 0x102   : > { %v1638_v43 = vadd.f32 %v1606_v24, %v1478_v38  ;;  %v3561_v45 = vadd.f32 %v3558_v0, %v1123_v39  ;;  %v618_v40 = vadd.f32 %v586_v23, %v516_v60  ;;  %v1828_v26 = vadd.f32 %v1796_v47, %v1764_v61 }
 0x103   : > { %v1509_v15 = vmul.f32 0.5, %v3463_v42  ;;  %v1543_v53 = vmul.f32 %v1479_v21, %v1479_v21  ;;  %v1321_v4 = vadd.f32 %v1289_v17, %v3537_v30  ;;  %v1192_v36 = vmul.f32 0.5, %v3468_v20 }
 0x104   : > { %v1670_v29 = vmul.f32 0.7978846, %v1638_v43  ;;  %v1226_v55 = vmul.f32 %v3561_v45, %v3561_v45  ;;  %v719_v63 = vadd.f32 %v687_v52, %v618_v40  ;;  %1861 = vst.msk [vmem:[%s2722_s23 + $0xa0] sm:$0xff] %vm1840_vm0, %v1828_v26  ;;  %v3575_v35 = vmul.f32 0.5, %v1478_v38 }
 0x105   : > { %v1575_v27 = vmul.f32 %v1543_v53, %v1479_v21  ;;  %v1353_v14 = vmul.f32 0.7978846, %v1321_v4  ;;  %v890_v42 = vmul.f32 %v3516_v7, %v3571_v37  ;;  %v991_v33 = vmul.f32 %v3436_v57, %v3580_v54 }
 0x106   : > { %2259 = vtanh.f32 %v1670_v29  ;;  %v1258_v20 = vmul.f32 %v1226_v55, %v3561_v45  ;;  %v820_v31 = vadd.f32 %v788_v28, %v719_v63  ;;  %v283_v38 = vmul.f32 %v3443_v18, %v3388_v25  ;;  %v1797_v25 = vld [vmem:[%s2699_s20 + $0xa8] sm:$0xff]  ;;  %v3614_v63 = vld [vmem:[%s2375_s26 + $0x180] sm:$0xff] }
 0x107   : > { %v1607_v2 = vmul.f32 0.044715, %v1575_v27  ;;  %2261 = vtanh.f32 %v1353_v14  ;;  %v384_v22 = vmul.f32 %v3451_v13, %v3400_v6  ;;  %v1092_v32 = vmul.f32 %v3490_v9, %v3586_v51  ;;  %v3623_v14 = vld [vmem:[%s2375_s26 + $0x181] sm:$0xff] }
 0x108   : > { %v2256_v16 = vpop.eup %2255  ;;  %v1290_v44 = vmul.f32 0.044715, %v1258_v20  ;;  %v922_v46 = vadd.f32 %v890_v42, %v820_v31  ;;  %v485_v48 = vmul.f32 %v3458_v11, %v3403_v8  ;;  %v587_v24 = vmul.f32 %v3473_v41, %v3511_v34 }
 0x109   : > { %v2258_v12 = vpop.eup %2257  ;;  %v1733_v56 = vadd.f32 1.0, %v2256_v16  ;;  %v1639_v3 = vadd.f32 %v1607_v2, %v1479_v21  ;;  %v416_v47 = vadd.f32 %v384_v22, %v283_v38  ;;  %v1193_v60 = vmul.f32 0.5, %v3537_v30 }
 0x10a   : > { %v1416_v39 = vadd.f32 1.0, %v2258_v12  ;;  %v1322_v23 = vadd.f32 %v1290_v44, %v3561_v45  ;;  %v1023_v61 = vadd.f32 %v991_v33, %v922_v46  ;;  %v688_v8 = vmul.f32 %v3498_v50, %v3521_v59  ;;  %v3637_v44 = vld [vmem:[%s2375_s26 + $0x182] sm:$0xff] }
 0x10b   : > { %v1765_v17 = vmul.f32 %v1733_v56, %v1509_v15  ;;  %v1671_v52 = vmul.f32 0.7978846, %v1639_v3  ;;  %v517_v43 = vadd.f32 %v485_v48, %v416_v47  ;;  %v3603_v40 = vmul.f32 0.5, %v1479_v21 }
 0x10c   : > { %v1448_v28 = vmul.f32 %v1416_v39, %v1192_v36  ;;  %v1354_v26 = vmul.f32 0.7978846, %v1322_v23  ;;  %v1124_v53 = vadd.f32 %v1092_v32, %v1023_v61  ;;  %v789_v29 = vmul.f32 %v3506_v49, %v3531_v10  ;;  %v1798_v32 = vld [vmem:[%s2699_s20 + $0xb0] sm:$0xff] }
 0x10d   : > { %v1829_v4 = vadd.f32 %v1797_v25, %v1765_v17  ;;  %2263 = vtanh.f32 %v1671_v52  ;;  %v619_v30 = vadd.f32 %v587_v24, %v517_v43  ;;  %v284_v21 = vmul.f32 %v3443_v18, %v3424_v58  ;;  %v3652_v52 = vld [vmem:[%s2375_s26 + $0x188] sm:$0xff] }
 0x10e   : > { %v3608_v15 = vadd.f32 %v3317_v5, %v1448_v28  ;;  %2265 = vtanh.f32 %v1354_v26  ;;  %v3611_v55 = vadd.f32 %v3558_v0, %v1124_v53  ;;  %v891_v27 = vmul.f32 %v3516_v7, %v3614_v63 }
 0x10f   : > { %1862 = vst.msk [vmem:[%s2722_s23 + $0xa8] sm:$0xff] %vm1840_vm0, %v1829_v4  ;;  %v720_v36 = vadd.f32 %v688_v8, %v619_v30  ;;  %v385_v5 = vmul.f32 %v3451_v13, %v3429_v1  ;;  %v486_v42 = vmul.f32 %v3458_v11, %v3482_v19  ;;  %v1194_v58 = vmul.f32 0.5, %v3561_v45  ;;  %v3662_v4 = vld [vmem:[%s2375_s26 + $0x189] sm:$0xff] }
 0x110   : > { %v2260_v20 = vpop.eup %2259  ;;  %v1544_v31 = vmul.f32 %v3608_v15, %v3608_v15  ;;  %v1227_v33 = vmul.f32 %v3611_v55, %v3611_v55  ;;  %v992_v2 = vmul.f32 %v3436_v57, %v3623_v14  ;;  %v588_v19 = vmul.f32 %v3473_v41, %v3571_v37 }
 0x111   : > { %v2262_v38 = vpop.eup %2261  ;;  %v1734_v22 = vadd.f32 1.0, %v2260_v20  ;;  %v821_v16 = vadd.f32 %v789_v29, %v720_v36  ;;  %v417_v46 = vadd.f32 %v385_v5, %v284_v21  ;;  %v1093_v56 = vmul.f32 %v3490_v9, %v3637_v44 }
 0x112   : > { %v1576_v48 = vmul.f32 %v1544_v31, %v3608_v15  ;;  %v1417_v45 = vadd.f32 1.0, %v2262_v38  ;;  %v1259_v12 = vmul.f32 %v1227_v33, %v3611_v55  ;;  %v689_v25 = vmul.f32 %v3498_v50, %v3580_v54  ;;  %v1799_v33 = vld [vmem:[%s2699_s20 + $0xb8] sm:$0xff] }
 0x113   : > { %v1766_v3 = vmul.f32 %v1734_v22, %v3575_v35  ;;  %v923_v47 = vadd.f32 %v891_v27, %v821_v16  ;;  %v518_v24 = vadd.f32 %v486_v42, %v417_v46  ;;  %v790_v17 = vmul.f32 %v3506_v49, %v3586_v51 }
 0x114   : > { %v1608_v39 = vmul.f32 0.044715, %v1576_v48  ;;  %v1449_v23 = vmul.f32 %v1417_v45, %v1193_v60  ;;  %v1291_v61 = vmul.f32 0.044715, %v1259_v12  ;;  %v892_v35 = vmul.f32 %v3516_v7, %v3652_v52 }
 0x115   : > { %v1830_v43 = vadd.f32 %v1798_v32, %v1766_v3  ;;  %v1024_v8 = vadd.f32 %v992_v2, %v923_v47  ;;  %v620_v28 = vadd.f32 %v588_v19, %v518_v24  ;;  %v285_v30 = vmul.f32 %v3443_v18, %v3511_v34  ;;  %v3683_v32 = vld [vmem:[%s2375_s26 + $0x18a] sm:$0xff] }
 0x116   : > { %v1640_v26 = vadd.f32 %v1608_v39, %v3608_v15  ;;  %v3658_v53 = vadd.f32 %v3348_v62, %v1449_v23  ;;  %v1323_v60 = vadd.f32 %v1291_v61, %v3611_v55  ;;  %v993_v27 = vmul.f32 %v3436_v57, %v3662_v4  ;;  %v2082_v23 = vld [vmem:[%s2375_s26 + $0x198] sm:$0xff] }
 0x117   : > { %v2264_v29 = vpop.eup %2263  ;;  %1863 = vst.msk [vmem:[%s2722_s23 + $0xb0] sm:$0xff] %vm1840_vm0, %v1830_v43  ;;  %v1125_v21 = vadd.f32 %v1093_v56, %v1024_v8  ;;  %v721_v36 = vadd.f32 %v689_v25, %v620_v28  ;;  %v386_v62 = vmul.f32 %v3451_v13, %v3521_v59  ;;  %v487_v34 = vmul.f32 %v3458_v11, %v3531_v10 }
 0x118   : > { %v2266_v5 = vpop.eup %2265  ;;  %v1735_v42 = vadd.f32 1.0, %v2264_v29  ;;  %v1672_v20 = vmul.f32 0.7978846, %v1640_v26  ;;  %v1545_v31 = vmul.f32 %v3658_v53, %v3658_v53  ;;  %v1355_v38 = vmul.f32 0.7978846, %v1323_v60  ;;  %v2115_v29 = vld [vmem:[%s2375_s26 + $0x199] sm:$0xff] }
 0x119   : > { %v1418_v2 = vadd.f32 1.0, %v2266_v5  ;;  %v3678_v22 = vadd.f32 %v3558_v0, %v1125_v21  ;;  %v822_v16 = vadd.f32 %v790_v17, %v721_v36  ;;  %v418_v48 = vadd.f32 %v386_v62, %v285_v30 }
 0x11a   : > { %v1767_v46 = vmul.f32 %v1735_v42, %v3603_v40  ;;  %2267 = vtanh.f32 %v1672_v20  ;;  %v1577_v19 = vmul.f32 %v1545_v31, %v3658_v53  ;;  %v1094_v12 = vmul.f32 %v3490_v9, %v3683_v32 }
 0x11b   : > { %v1450_v45 = vmul.f32 %v1418_v2, %v1194_v58  ;;  %2269 = vtanh.f32 %v1355_v38  ;;  %v1228_v10 = vmul.f32 %v3678_v22, %v3678_v22  ;;  %v924_v47 = vadd.f32 %v892_v35, %v822_v16 }
 0x11c   : > { %v1831_v56 = vadd.f32 %v1799_v33, %v1767_v46  ;;  %v1609_v3 = vmul.f32 0.044715, %v1577_v19  ;;  %v519_v40 = vadd.f32 %v487_v34, %v418_v48  ;;  %v589_v58 = vmul.f32 %v3473_v41, %v3614_v63  ;;  %v1800_v46 = vld [vmem:[%s2699_s20 + $0xc0] sm:$0xff] }
 0x11d   : > { %v3690_v24 = vadd.f32 %v3400_v6, %v1450_v45  ;;  %v1260_v25 = vmul.f32 %v1228_v10, %v3678_v22  ;;  %v690_v39 = vmul.f32 %v3498_v50, %v3623_v14  ;;  %v1512_v61 = vmul.f32 0.5, %v3608_v15 }
 0x11e   : > { %1864 = vst.msk [vmem:[%s2722_s23 + $0xb8] sm:$0xff] %vm1840_vm0, %v1831_v56  ;;  %v1641_v17 = vadd.f32 %v1609_v3, %v3658_v53  ;;  %v1025_v43 = vadd.f32 %v993_v27, %v924_v47  ;;  %v621_v28 = vadd.f32 %v589_v58, %v519_v40  ;;  %v791_v63 = vmul.f32 %v3506_v49, %v3637_v44  ;;  %v2148_v27 = vld [vmem:[%s2375_s26 + $0x19a] sm:$0xff] }
 0x11f   : > { %v1546_v6 = vmul.f32 %v3690_v24, %v3690_v24  ;;  %v1292_v8 = vmul.f32 0.044715, %v1260_v25  ;;  %v1195_v26 = vmul.f32 0.5, %v3611_v55  ;;  %v893_v30 = vmul.f32 %v3516_v7, %v2082_v23  ;;  %v2116_v23 = vld [vmem:[%s2375_s26 + $0x1a1] sm:$0xff] }
 0x120   : > { %v1673_v35 = vmul.f32 0.7978846, %v1641_v17  ;;  %v1126_v60 = vadd.f32 %v1094_v12, %v1025_v43  ;;  %v722_v36 = vadd.f32 %v690_v39, %v621_v28  ;;  %v286_v62 = vmul.f32 %v3443_v18, %v3571_v37  ;;  %v2149_v28 = vld [vmem:[%s2375_s26 + $0x1a2] sm:$0xff] }
 0x121   : > { %v1578_v15 = vmul.f32 %v1546_v6, %v3690_v24  ;;  %v1324_v21 = vadd.f32 %v1292_v8, %v3678_v22  ;;  %v387_v55 = vmul.f32 %v3451_v13, %v3580_v54  ;;  %v488_v44 = vmul.f32 %v3458_v11, %v3586_v51 }
 0x122   : > { %2271 = vtanh.f32 %v1673_v35  ;;  %v3715_v5 = vadd.f32 %v3558_v0, %v1126_v60  ;;  %v823_v31 = vadd.f32 %v791_v63, %v722_v36  ;;  %v994_v34 = vmul.f32 %v3436_v57, %v2115_v29  ;;  %v1801_v29 = vld [vmem:[%s2699_s20 + $0xc8] sm:$0xff] }
 0x123   : > { %v1610_v42 = vmul.f32 0.044715, %v1578_v15  ;;  %v1356_v20 = vmul.f32 0.7978846, %v1324_v21  ;;  %v1095_v37 = vmul.f32 %v3490_v9, %v2148_v27  ;;  %v419_v2 = vadd.f32 %v387_v55, %v286_v62 }
 0x124   : > { %v2268_v33 = vpop.eup %2267  ;;  %v1229_v18 = vmul.f32 %v3715_v5, %v3715_v5  ;;  %v590_v13 = vmul.f32 %v3473_v41, %v3652_v52  ;;  %v925_v51 = vadd.f32 %v893_v30, %v823_v31  ;;  %v691_v10 = vmul.f32 %v3498_v50, %v3662_v4  ;;  %v2083_v41 = vld [vmem:[%s2375_s26 + $0x1a0] sm:$0xff] }
 0x125   : > { %v2270_v38 = vpop.eup %2269  ;;  %v1736_v16 = vadd.f32 1.0, %v2268_v33  ;;  %v1642_v11 = vadd.f32 %v1610_v42, %v3690_v24  ;;  %2273 = vtanh.f32 %v1356_v20  ;;  %v520_v45 = vadd.f32 %v488_v44, %v419_v2 }
 0x126   : > { %v1419_v19 = vadd.f32 1.0, %v2270_v38  ;;  %v1261_v48 = vmul.f32 %v1229_v18, %v3715_v5  ;;  %v1026_v3 = vadd.f32 %v994_v34, %v925_v51  ;;  %v792_v25 = vmul.f32 %v3506_v49, %v3683_v32  ;;  %v1802_v38 = vld [vmem:[%s2699_s20 + $0xd0] sm:$0xff] }
 0x127   : > { %v1768_v12 = vmul.f32 %v1736_v16, %v1512_v61  ;;  %v1674_v56 = vmul.f32 0.7978846, %v1642_v11  ;;  %v622_v40 = vadd.f32 %v590_v13, %v520_v45  ;;  %v894_v43 = vmul.f32 %v3516_v7, %v2083_v41 }
 0x128   : > { %v1451_v52 = vmul.f32 %v1419_v19, %v1195_v26  ;;  %v1293_v47 = vmul.f32 0.044715, %v1261_v48  ;;  %v1127_v39 = vadd.f32 %v1095_v37, %v1026_v3  ;;  %v1513_v6 = vmul.f32 0.5, %v3658_v53 }
 0x129   : > { %v1832_v58 = vadd.f32 %v1800_v46, %v1768_v12  ;;  %2275 = vtanh.f32 %v1674_v56  ;;  %v723_v61 = vadd.f32 %v691_v10, %v622_v40  ;;  %v995_v26 = vmul.f32 %v3436_v57, %v2116_v23 }
 0x12a   : > { %v1483_v17 = vadd.f32 %v3429_v1, %v1451_v52  ;;  %v1325_v50 = vadd.f32 %v1293_v47, %v3715_v5  ;;  %v1166_v8 = vadd.f32 %v3558_v0, %v1127_v39  ;;  %v1196_v60 = vmul.f32 0.5, %v3678_v22 }
 0x12b   : > { %1865 = vst.msk [vmem:[%s2722_s23 + $0xc0] sm:$0xff] %vm1840_vm0, %v1832_v58  ;;  %v824_v35 = vadd.f32 %v792_v25, %v723_v61  ;;  %v1096_v53 = vmul.f32 %v3490_v9, %v2149_v28  ;;  %v1514_v20 = vmul.f32 0.5, %v3690_v24  ;;  %v1197_v24 = vmul.f32 0.5, %v3715_v5 }
 0x12c   : > { %v2272_v49 = vpop.eup %2271  ;;  %v1547_v32 = vmul.f32 %v1483_v17, %v1483_v17  ;;  %v1357_v63 = vmul.f32 0.7978846, %v1325_v50  ;;  %v1230_v30 = vmul.f32 %v1166_v8, %v1166_v8  ;;  %v1515_v40 = vmul.f32 0.5, %v1483_v17 }
 0x12d   : > { %v1737_v1 = vadd.f32 1.0, %v2272_v49  ;;  %v926_v7 = vadd.f32 %v894_v43, %v824_v35  ;;  %v1198_v39 = vmul.f32 0.5, %v1166_v8  ;;  %v1803_v43 = vld [vmem:[%s2699_s20 + $0xd8] sm:$0xff] }
 0x12e   : > { %v1579_v15 = vmul.f32 %v1547_v32, %v1483_v17  ;;  %2277 = vtanh.f32 %v1357_v63  ;;  %v1262_v27 = vmul.f32 %v1230_v30, %v1166_v8 }
 0x12f   : > { %v2274_v21 = vpop.eup %2273  ;;  %v1769_v36 = vmul.f32 %v1737_v1, %v1513_v6  ;;  %v1027_v44 = vadd.f32 %v995_v26, %v926_v7  ;;  %v1804_v7 = vld [vmem:[%s2699_s20 + $0xe0] sm:$0xff] }
 0x130   : > { %v1611_v62 = vmul.f32 0.044715, %v1579_v15  ;;  %v1420_v55 = vadd.f32 1.0, %v2274_v21  ;;  %v1294_v57 = vmul.f32 0.044715, %v1262_v27 }
 0x131   : > { %v1833_v42 = vadd.f32 %v1801_v29, %v1769_v36  ;;  %v1128_v34 = vadd.f32 %v1096_v53, %v1027_v44 }
 0x132   : > { %v1643_v22 = vadd.f32 %v1611_v62, %v1483_v17  ;;  %v1452_v31 = vmul.f32 %v1420_v55, %v1196_v60  ;;  %v1326_v18 = vadd.f32 %v1294_v57, %v1166_v8 }
 0x133   : > { %v2276_v33 = vpop.eup %2275  ;;  %1866 = vst.msk [vmem:[%s2722_s23 + $0xc8] sm:$0xff] %vm1840_vm0, %v1833_v42  ;;  %v1167_v13 = vadd.f32 %v3558_v0, %v1128_v34  ;;  %v1805_v34 = vld [vmem:[%s2699_s20 + $0xe8] sm:$0xff] }
 0x134   : > { %v1738_v37 = vadd.f32 1.0, %v2276_v33  ;;  %v1675_v9 = vmul.f32 0.7978846, %v1643_v22  ;;  %v1484_v2 = vadd.f32 %v3521_v59, %v1452_v31  ;;  %v1358_v16 = vmul.f32 0.7978846, %v1326_v18 }
 0x135   : > { %v1231_v46 = vmul.f32 %v1167_v13, %v1167_v13  ;;  %v1199_v30 = vmul.f32 0.5, %v1167_v13 }
 0x136   : > { %v1770_v11 = vmul.f32 %v1738_v37, %v1514_v20  ;;  %2279 = vtanh.f32 %v1675_v9  ;;  %v1548_v51 = vmul.f32 %v1484_v2, %v1484_v2  ;;  %v1516_v1 = vmul.f32 0.5, %v1484_v2 }
 0x137   : > { %2281 = vtanh.f32 %v1358_v16  ;;  %v1263_v12 = vmul.f32 %v1231_v46, %v1167_v13  ;;  %v1806_v16 = vld [vmem:[%s2699_s20 + $0xf0] sm:$0xff] }
 0x138   : > { %v2278_v19 = vpop.eup %2277  ;;  %v1834_v48 = vadd.f32 %v1802_v38, %v1770_v11  ;;  %v1580_v45 = vmul.f32 %v1548_v51, %v1484_v2 }
 0x139   : > { %v1421_v10 = vadd.f32 1.0, %v2278_v19  ;;  %v1295_v0 = vmul.f32 0.044715, %v1263_v12 }
 0x13a   : > { %1867 = vst.msk [vmem:[%s2722_s23 + $0xd0] sm:$0xff] %vm1840_vm0, %v1834_v48  ;;  %v1612_v56 = vmul.f32 0.044715, %v1580_v45  ;;  %v1807_v48 = vld [vmem:[%s2699_s20 + $0xf8] sm:$0xff] }
 0x13b   : > { %v1453_v59 = vmul.f32 %v1421_v10, %v1197_v24  ;;  %v1327_v52 = vadd.f32 %v1295_v0, %v1167_v13 }
 0x13c   : > { %v1644_v3 = vadd.f32 %v1612_v56, %v1484_v2 }
 0x13d   : > { %v1485_v41 = vadd.f32 %v3580_v54, %v1453_v59  ;;  %v1359_v25 = vmul.f32 0.7978846, %v1327_v52 }
 0x13e   : > { %v1676_v47 = vmul.f32 0.7978846, %v1644_v3 }
 0x13f   : > { %v1549_v5 = vmul.f32 %v1485_v41, %v1485_v41  ;;  %v1517_v42 = vmul.f32 0.5, %v1485_v41 }
 0x140   : > { %v2280_v58 = vpop.eup %2279  ;;  %2283 = vtanh.f32 %v1676_v47 }
 0x141   : > { %v2282_v23 = vpop.eup %2281  ;;  %v1739_v50 = vadd.f32 1.0, %v2280_v58  ;;  %v1581_v61 = vmul.f32 %v1549_v5, %v1485_v41  ;;  %2285 = vtanh.f32 %v1359_v25 }
 0x142   : > { %v1422_v6 = vadd.f32 1.0, %v2282_v23 }
 0x143   : > { %v1771_v28 = vmul.f32 %v1739_v50, %v1515_v40  ;;  %v1613_v49 = vmul.f32 0.044715, %v1581_v61 }
 0x144   : > { %v1454_v32 = vmul.f32 %v1422_v6, %v1198_v39 }
 0x145   : > { %v1835_v54 = vadd.f32 %v1803_v43, %v1771_v28  ;;  %v1645_v63 = vadd.f32 %v1613_v49, %v1485_v41 }
 0x146   : > { %v1486_v17 = vadd.f32 %v3623_v14, %v1454_v32 }
 0x147   : > { %1868 = vst.msk [vmem:[%s2722_s23 + $0xd8] sm:$0xff] %vm1840_vm0, %v1835_v54  ;;  %v1677_v35 = vmul.f32 0.7978846, %v1645_v63 }
 0x148   : > { %v1550_v26 = vmul.f32 %v1486_v17, %v1486_v17  ;;  %v1518_v2 = vmul.f32 0.5, %v1486_v17 }
 0x149   : > { %2287 = vtanh.f32 %v1677_v35 }
 0x14a   : > { %v2284_v8 = vpop.eup %2283  ;;  %v1582_v60 = vmul.f32 %v1550_v26, %v1486_v17 }
 0x14b   : > { %v2286_v29 = vpop.eup %2285  ;;  %v1740_v15 = vadd.f32 1.0, %v2284_v8 }
 0x14c   : > { %v1614_v53 = vmul.f32 0.044715, %v1582_v60  ;;  %v1423_v21 = vadd.f32 1.0, %v2286_v29 }
 0x14d   : > { %v1772_v36 = vmul.f32 %v1740_v15, %v1516_v1 }
 0x14e   : > { %v1646_v27 = vadd.f32 %v1614_v53, %v1486_v17  ;;  %v1455_v62 = vmul.f32 %v1423_v21, %v1199_v30 }
 0x14f   : > { %v1836_v14 = vadd.f32 %v1804_v7, %v1772_v36 }
 0x150   : > { %v1678_v55 = vmul.f32 0.7978846, %v1646_v27  ;;  %v1487_v44 = vadd.f32 %v3662_v4, %v1455_v62 }
 0x151   : > { %1869 = vst.msk [vmem:[%s2722_s23 + $0xe0] sm:$0xff] %vm1840_vm0, %v1836_v14 }
 0x152   : > { %2289 = vtanh.f32 %v1678_v55  ;;  %v1551_v57 = vmul.f32 %v1487_v44, %v1487_v44  ;;  %v1519_v24 = vmul.f32 0.5, %v1487_v44 }
 0x153   : > { %v2288_v20 = vpop.eup %2287 }
 0x154   : > { %v1741_v22 = vadd.f32 1.0, %v2288_v20  ;;  %v1583_v31 = vmul.f32 %v1551_v57, %v1487_v44 }
 0x156   : > { %v1773_v33 = vmul.f32 %v1741_v22, %v1517_v42  ;;  %v1615_v18 = vmul.f32 0.044715, %v1583_v31 }
 0x158   : > { %v1837_v37 = vadd.f32 %v1805_v34, %v1773_v33  ;;  %v1647_v9 = vadd.f32 %v1615_v18, %v1487_v44 }
 0x15a   : > { %1870 = vst.msk [vmem:[%s2722_s23 + $0xe8] sm:$0xff] %vm1840_vm0, %v1837_v37  ;;  %v1679_v4 = vmul.f32 0.7978846, %v1647_v9 }
 0x15c   : > { %v2290_v13 = vpop.eup %2289  ;;  %2291 = vtanh.f32 %v1679_v4 }
 0x15d   : > { %v1742_v38 = vadd.f32 1.0, %v2290_v13 }
 0x15f   : > { %v1774_v11 = vmul.f32 %v1742_v38, %v1518_v2 }
 0x161   : > { %v1838_v51 = vadd.f32 %v1806_v16, %v1774_v11 }
 0x163   : > { %1871 = vst.msk [vmem:[%s2722_s23 + $0xf0] sm:$0xff] %vm1840_vm0, %v1838_v51 }
 0x166   : > { %v2292_v46 = vpop.eup %2291 }
 0x167   : > { %v1743_v19 = vadd.f32 1.0, %v2292_v46 }
 0x169   : > { %v1775_v45 = vmul.f32 %v1743_v19, %v1519_v24 }
 0x16b   : > { %v1839_v10 = vadd.f32 %v1807_v48, %v1775_v45 }
 0x16d   : > { %1872 = vst.msk [vmem:[%s2722_s23 + $0xf8] sm:$0xff] %vm1840_vm0, %v1839_v10 }
 0x16e PF: > { %s14_s15 = sadd.s32 1, %s2319_s15  }
 0x16f   : > { %p11_p4 = scmp.ge.s32.totalorder %s14_s15, 4  }
 0x171   :  { %13 = sbr.rel (!%p11_p4) target bundleno = 1 (0x1), region = 71 }

// kernel: up_trans_block.15
= control target key start
LH: loop header
LB: loop body
LE: loop exit
PB: predicated region body
PF: predicated region fallthrough
CT: control target
= control target key end

     0   :  { %8 = vsyncpa [#allocation3], 0  ;;  %s2987_s0 = inlined_call_operand.vmem [shape: bf16[512,576], index: 0, kind: input, shape index: {}]   ;;  %s2988_s1 = inlined_call_operand.vmem [shape: bf16[576,128], index: 1, kind: input, shape index: {}]   ;;  %s2989_s2 = inlined_call_operand.vmem [shape: f32[1,128], index: 2, kind: input, shape index: {}]   ;;  %s2990_s3 = inlined_call_operand.hbm [shape: f32[512,128], index: 3, kind: output, shape index: {}]  }
   0x1   :  { %10 = vsyncpa [#allocation3 + $0x1], 0  ;;  %s2480_s12 = smov 0   ;;  %s2482_s13 = smov 0  }
   0x2   :  { %s2484_s14 = smov 0   ;;  %s2486_s15 = smov 0  }
   0x3   :  { %s2488_s16 = smov 0   ;;  %s2490_s17 = smov 0  }
   0x4 LB: > { %s1722_s18 = sadd.s32 4294967295, %s2455_s17   ;;  %s1723_s19 = sadd.s32 4294967294, %s2455_s17   ;;  %s2455_s17 = sphi %s2490_s17, %s16_s17   ;;  %s2451_s16 = sphi %s2488_s16, %s2997_s16   ;;  %s2447_s15 = sphi %s2486_s15, %s2996_s15   ;;  %s2443_s14 = sphi %s2484_s14, %s2995_s14   ;;  %s2439_s13 = sphi %s2482_s13, %s2994_s13   ;;  %s2435_s12 = sphi %s2480_s12, %s2993_s12  }
   0x5   : > { %s28_s20 = sadd.s32 1, %s2451_s16  ;;  %s115_s21 = sadd.s32 1, %s2443_s14 }
   0x6   : > { %p30_p0 = scmp.ge.s32.totalorder %s28_s20, 2  ;;  %p125_p1 = scmp.ne.s32.totalorder %s2443_s14, %s2439_s13 }
   0x7   : > { %p126_p2 = scmp.eq.s32.totalorder %s1722_s18, 1  ;;  %p131_p3 = scmp.ne.s32.totalorder %s2439_s13, %s2435_s12 }
   0x8   : > { %s2999_s20 = smov (%p30_p0, %s28_s20), 0  ;;  %p132_p5 = scmp.eq.s32.totalorder %s1723_s19, 1 }
   0x9   : > { %p2520_p4 = por %p126_p2, %p125_p1  ;;  %s110_s23 = ssub.s32 %s2451_s16, %s2999_s20 }
   0xa   : > { %p1728_p6 = scmp.ge.s32.totalorder %s2455_s17, 1  ;;  %p113_p7 = scmp.eq.s32.totalorder %s110_s23, 0 }
   0xb   : > { %p2527_p8 = por %p132_p5, %p131_p3  ;;  %p173_p9 = scmp.lt.s32.totalorder %s2455_s17, 3 }
   0xc   : > { %s2533_s25 = scalar_select %p113_p7, %s2443_s14, %s115_s21  }
   0xd   : > { %p174_p10 = pnand %p1728_p6, %p173_p9 }
   0xe   : > { %v2229_v0 = vld [vmem:[%s2988_s1 + $0x40] sm:$0xff] (!%p174_p10)   ;;  %s1730_s28 = sshll.u32 (!%p174_p10), %s2447_s15, 5  ;;  %v2231_v2 = vld [vmem:[%s2988_s1 + $0x48] sm:$0xff] (!%p174_p10)   ;;  %v2233_v4 = vld [vmem:[%s2988_s1 + $0x50] sm:$0xff] (!%p174_p10)   ;;  %vm1012_vm0 = vcmask (!%p174_p10), 523264   ;;  %s202_s18 = sand.u32 (!%p174_p10), 1, %s2439_s13  }
   0xf   : > { %177 = sbr.rel (%p174_p10) target bundleno = 437 (0x1b5), region = 32  ;;  %v2230_v1 = vld [vmem:[%s2988_s1] sm:$0xff] (!%p174_p10)   ;;  %1871 = vmatprep.subr.bf16.mxu0 (!%p174_p10), %v2229_v0  ;;  %2155 = vmatprep.subr.bf16.mxu1 (!%p174_p10), %v2229_v0  ;;  %p206_p11 = scmp.lt.s32.totalorder (!%p174_p10), %s1730_s28, 63  ;;  %v2232_v3 = vld [vmem:[%s2988_s1 + $0x8] sm:$0xff] (!%p174_p10)   ;;  %v2234_v5 = vld [vmem:[%s2988_s1 + $0x10] sm:$0xff] (!%p174_p10)  }
  0x10   : > { %1872 = vmatpush3.bf16.msra.mxu0 (!%p174_p10), %v2230_v1  ;;  %2163 = vmatpush3.bf16.msra.mxu1 (!%p174_p10), %v2230_v1  ;;  %v2235_v6 = vld [vmem:[%s2988_s1 + $0x58] sm:$0xff] (!%p174_p10)   ;;  %v2237_v8 = vld [vmem:[%s2988_s1 + $0x60] sm:$0xff] (!%p174_p10)   ;;  %v2239_v10 = vld [vmem:[%s2988_s1 + $0x68] sm:$0xff] (!%p174_p10)   ;;  %s1729_s19 = sshll.u32 (!%p174_p10), %s202_s18, 8  ;;  %s1870_s23 = sshll.u32 (!%p174_p10), %s2447_s15, 12 }
  0x11   : > { %1873 = vmatprep.subr.bf16.mxu0 (!%p174_p10), %v2231_v2  ;;  %2156 = vmatprep.subr.bf16.mxu1 (!%p174_p10), %v2231_v2  ;;  %v2236_v7 = vld [vmem:[%s2988_s1 + $0x18] sm:$0xff] (!%p174_p10)   ;;  %v2238_v9 = vld [vmem:[%s2988_s1 + $0x20] sm:$0xff] (!%p174_p10)   ;;  %v2240_v13 = vld [vmem:[%s2988_s1 + $0x28] sm:$0xff] (!%p174_p10)   ;;  %s2933_s30 = scalar_lea.hbm (!%p174_p10), %s2990_s3, %s1870_s23  ;;  %s2941_s4 = scalar_lea.sflag (!%p174_p10), [#allocation3], %s202_s18 }
  0x12   : > { %v2241_v14 = vld [vmem:[%s2988_s1 + $0x70] sm:$0xff] (!%p174_p10)   ;;  %v2243_v16 = vld [vmem:[%s2988_s1 + $0x78] sm:$0xff] (!%p174_p10)   ;;  %v2251_v18 = vld [vmem:[%s2988_s1 + $0xc0] sm:$0xff] (!%p174_p10)  }
  0x13   : > { %v2242_v15 = vld [vmem:[%s2988_s1 + $0x30] sm:$0xff] (!%p174_p10)   ;;  %v2244_v17 = vld [vmem:[%s2988_s1 + $0x38] sm:$0xff] (!%p174_p10)   ;;  %v2254_v19 = vld [vmem:[%s2988_s1 + $0x100] sm:$0xff] (!%p174_p10)  }
  0x14   : > { %1874 = vmatpush3.bf16.msra.mxu0 (!%p174_p10), %v2232_v3  ;;  %2164 = vmatpush3.bf16.msra.mxu1 (!%p174_p10), %v2232_v3  ;;  %v2252_v22 = vld [vmem:[%s2988_s1 + $0x80] sm:$0xff] (!%p174_p10)   ;;  %v2253_v23 = vld [vmem:[%s2988_s1 + $0xc8] sm:$0xff] (!%p174_p10)   ;;  %v2262_v28 = vld [vmem:[%s2988_s1 + $0xd0] sm:$0xff] (!%p174_p10)  }
  0x15   : > { %1875 = vmatprep.subr.bf16.mxu0 (!%p174_p10), %v2233_v4  ;;  %2157 = vmatprep.subr.bf16.mxu1 (!%p174_p10), %v2233_v4  ;;  %v2255_v26 = vld [vmem:[%s2988_s1 + $0x88] sm:$0xff] (!%p174_p10)   ;;  %v2263_v30 = vld [vmem:[%s2988_s1 + $0x90] sm:$0xff] (!%p174_p10)   ;;  %v2264_v31 = vld [vmem:[%s2988_s1 + $0xd8] sm:$0xff] (!%p174_p10)  }
  0x16   : > { %s3001_s28 = smov (!%p206_p11, %s1730_s28), 63  ;;  %v2265_v34 = vld [vmem:[%s2988_s1 + $0x98] sm:$0xff]   ;;  %v2285_v35 = vld [vmem:[%s2988_s1 + $0x108] sm:$0xff]   ;;  %v2272_v37 = vld [vmem:[%s2988_s1 + $0xe0] sm:$0xff]  }
  0x17   : > { %s2171_s21 = smul.u32 20, %s3001_s28  ;;  %v2273_v39 = vld [vmem:[%s2988_s1 + $0xa0] sm:$0xff]   ;;  %v2274_v40 = vld [vmem:[%s2988_s1 + $0xe8] sm:$0xff]   ;;  %v2282_v46 = vld [vmem:[%s2988_s1 + $0xf0] sm:$0xff]   ;;  %s2457_s28 = smov [#allocation2]  }
  0x18   : > { %1876 = vmatpush3.bf16.msra.mxu0 %v2234_v5  ;;  %2165 = vmatpush3.bf16.msra.mxu1 %v2234_v5  ;;  %v2275_v43 = vld [vmem:[%s2988_s1 + $0xa8] sm:$0xff]   ;;  %v2305_v47 = vld [vmem:[%s2988_s1 + $0x110] sm:$0xff]   ;;  %v2284_v49 = vld [vmem:[%s2988_s1 + $0xf8] sm:$0xff]   ;;  %s2381_s6 = sshll.u32 %s2457_s28, 4  ;;  %s2382_s6 = int_to_ptr.vmem [resolvable:$false] %s2381_s6 }
  0x19   : > { %1877 = vmatprep.subr.bf16.mxu0 %v2235_v6  ;;  %2158 = vmatprep.subr.bf16.mxu1 %v2235_v6  ;;  %s2566_s5 = scalar_lea.vmem %s2987_s0, %s2171_s21  ;;  %v2283_v48 = vld [vmem:[%s2988_s1 + $0xb0] sm:$0xff]   ;;  %v2286_v52 = vld [vmem:[%s2988_s1 + $0xb8] sm:$0xff]   ;;  %s2843_s21 = scalar_lea.vmem [#allocation2], %s1729_s19 }
  0x1a   : > { %v2247_v11 = vld [vmem:[%s2566_s5 + $0x4] ss:$20 sps:$4 sm:$0xff]   ;;  %v2245_v20 = vld [vmem:[%s2566_s5] ss:$20 sps:$4 sm:$0xff]   ;;  %v2260_v27 = vld [vmem:[%s2566_s5 + $0x28] ss:$20 sps:$4 sm:$0xff]  }
  0x1b   : > { %v2250_v12 = vld [vmem:[%s2566_s5 + $0x1e4] ss:$20 sps:$4 sm:$0xff]   ;;  %1093 = vmatprep.mubr.bf16.mxu0 %v2247_v11  ;;  %v2248_v21 = vld [vmem:[%s2566_s5 + $0x1e0] ss:$20 sps:$4 sm:$0xff]   ;;  %v2261_v29 = vld [vmem:[%s2566_s5 + $0x208] ss:$20 sps:$4 sm:$0xff]  }
  0x1c   : > { %1878 = vmatpush3.bf16.msra.mxu0 %v2236_v7  ;;  %2166 = vmatpush3.bf16.msra.mxu1 %v2236_v7  ;;  %v2256_v24 = vld [vmem:[%s2566_s5 + $0x2c] ss:$20 sps:$4 sm:$0xff]   ;;  %v2266_v32 = vld [vmem:[%s2566_s5 + $0x54] ss:$20 sps:$4 sm:$0xff]   ;;  %v2270_v36 = vld [vmem:[%s2566_s5 + $0x50] ss:$20 sps:$4 sm:$0xff]  }
  0x1d   : > { %1879 = vmatprep.subr.bf16.mxu0 %v2237_v8  ;;  %2159 = vmatprep.subr.bf16.mxu1 %v2237_v8  ;;  %v2258_v25 = vld [vmem:[%s2566_s5 + $0x20c] ss:$20 sps:$4 sm:$0xff]   ;;  %v2268_v33 = vld [vmem:[%s2566_s5 + $0x234] ss:$20 sps:$4 sm:$0xff]   ;;  %v2271_v38 = vld [vmem:[%s2566_s5 + $0x230] ss:$20 sps:$4 sm:$0xff]  }
  0x1e   : > { %1189 = vmatprep.mubr.bf16.mxu1 %v2250_v12  ;;  %v2276_v41 = vld [vmem:[%s2566_s5 + $0x7c] ss:$20 sps:$4 sm:$0xff]   ;;  %v2280_v44 = vld [vmem:[%s2566_s5 + $0x78] ss:$20 sps:$4 sm:$0xff]   ;;  %v2292_v54 = vld [vmem:[%s2566_s5 + $0xa0] ss:$20 sps:$4 sm:$0xff]  }
  0x1f   : > { %v2278_v42 = vld [vmem:[%s2566_s5 + $0x25c] ss:$20 sps:$4 sm:$0xff]   ;;  %v2281_v45 = vld [vmem:[%s2566_s5 + $0x258] ss:$20 sps:$4 sm:$0xff]   ;;  %v2295_v57 = vld [vmem:[%s2566_s5 + $0x34] ss:$20 sps:$4 sm:$0xff]  }
  0x20   : > { %1880 = vmatpush3.bf16.msra.mxu0 %v2238_v9  ;;  %2167 = vmatpush3.bf16.msra.mxu1 %v2238_v9  ;;  %v2287_v50 = vld [vmem:[%s2566_s5 + $0xa4] ss:$20 sps:$4 sm:$0xff]   ;;  %v2291_v51 = vld [vmem:[%s2566_s5 + $0xc] ss:$20 sps:$4 sm:$0xff]   ;;  %v2289_v53 = vld [vmem:[%s2566_s5 + $0x8] ss:$20 sps:$4 sm:$0xff]  }
  0x21   : > { %1881 = vmatprep.subr.bf16.mxu0 %v2239_v10  ;;  %2160 = vmatprep.subr.bf16.mxu1 %v2239_v10  ;;  %v2293_v55 = vld [vmem:[%s2566_s5 + $0xcc] ss:$20 sps:$4 sm:$0xff]   ;;  %v2324_v56 = vld [vmem:[%s2988_s1 + $0x118] sm:$0xff]   ;;  %v2298_v59 = vld [vmem:[%s2566_s5 + $0x30] ss:$20 sps:$4 sm:$0xff]   ;;  %s1623_s26 = sshll.u32 %s2843_s21, 4  ;;  %s2935_s26 = int_to_ptr.vmem [resolvable:$true] %s1623_s26 }
  0x22   : > { %v2297_v58 = vld [vmem:[%s2566_s5 + $0xc8] ss:$20 sps:$4 sm:$0xff]   ;;  %v2303_v62 = vld [vmem:[%s2566_s5 + $0xf0] ss:$20 sps:$4 sm:$0xff]   ;;  %v2304_v63 = vld [vmem:[%s2566_s5 + $0x58] ss:$20 sps:$4 sm:$0xff]   ;;  %p2384_p1 = scmp.lt.s32.totalorder %s2935_s26, %s2382_s6 }
  0x23   : > { %v2299_v60 = vld [vmem:[%s2566_s5 + $0xf4] ss:$20 sps:$4 sm:$0xff]   ;;  %v2301_v61 = vld [vmem:[%s2566_s5 + $0x5c] ss:$20 sps:$4 sm:$0xff]   ;;  %v2308_v1 = vld [vmem:[%s2566_s5 + $0x84] ss:$20 sps:$4 sm:$0xff]  }
  0x24   : > { %1882 = vmatpush3.bf16.msra.mxu0 %v2240_v13  ;;  %2168 = vmatpush3.bf16.msra.mxu1 %v2240_v13  ;;  %v2306_v0 = vld [vmem:[%s2566_s5 + $0x11c] ss:$20 sps:$4 sm:$0xff]   ;;  %v2310_v2 = vld [vmem:[%s2566_s5 + $0x118] ss:$20 sps:$4 sm:$0xff]   ;;  %v2311_v3 = vld [vmem:[%s2566_s5 + $0x80] ss:$20 sps:$4 sm:$0xff]  }
  0x25   : > { %1883 = vmatprep.subr.bf16.mxu0 %v2241_v14  ;;  %2161 = vmatprep.subr.bf16.mxu1 %v2241_v14  ;;  %v2312_v4 = vld [vmem:[%s2566_s5 + $0x144] ss:$20 sps:$4 sm:$0xff]   ;;  %v2314_v5 = vld [vmem:[%s2566_s5 + $0xac] ss:$20 sps:$4 sm:$0xff]   ;;  %v2317_v7 = vld [vmem:[%s2566_s5 + $0xa8] ss:$20 sps:$4 sm:$0xff]  }
  0x26   : > { %v2316_v6 = vld [vmem:[%s2566_s5 + $0x140] ss:$20 sps:$4 sm:$0xff]   ;;  %v2322_v10 = vld [vmem:[%s2566_s5 + $0x168] ss:$20 sps:$4 sm:$0xff]   ;;  %v2323_v11 = vld [vmem:[%s2566_s5 + $0xd0] ss:$20 sps:$4 sm:$0xff]  }
  0x27   : > { %v2318_v8 = vld [vmem:[%s2566_s5 + $0x16c] ss:$20 sps:$4 sm:$0xff]   ;;  %v2320_v9 = vld [vmem:[%s2566_s5 + $0xd4] ss:$20 sps:$4 sm:$0xff]   ;;  %v2327_v13 = vld [vmem:[%s2566_s5 + $0xfc] ss:$20 sps:$4 sm:$0xff]  }
  0x28   : > { %1884 = vmatpush3.bf16.msra.mxu0 %v2242_v15  ;;  %2169 = vmatpush3.bf16.msra.mxu1 %v2242_v15  ;;  %v2325_v12 = vld [vmem:[%s2566_s5 + $0x194] ss:$20 sps:$4 sm:$0xff]   ;;  %v2329_v14 = vld [vmem:[%s2566_s5 + $0x190] ss:$20 sps:$4 sm:$0xff]   ;;  %v2330_v15 = vld [vmem:[%s2566_s5 + $0xf8] ss:$20 sps:$4 sm:$0xff]  }
  0x29   : > { %1885 = vmatprep.subr.bf16.mxu0 %v2243_v16  ;;  %2162 = vmatprep.subr.bf16.mxu1 %v2243_v16  ;;  %v2331_v16 = vld [vmem:[%s2566_s5 + $0x1bc] ss:$20 sps:$4 sm:$0xff]   ;;  %s2377_s15 = scalar_lea.vmem %s2935_s26, 4096  ;;  %s2383_s7 = scalar_lea.vmem %s2382_s6, 8192 }
  0x2a   : > { %p2378_p12 = scmp.ne.s32.totalorder %s2935_s26, %s2377_s15  ;;  %p2385_p2 = scmp.lt.s32.totalorder %s2383_s7, %s2377_s15 }
  0x2c   : > { %1886 = vmatpush3.bf16.msra.mxu0 %v2244_v17  ;;  %2170 = vmatpush3.bf16.msra.mxu1 %v2244_v17  ;;  %v2333_v17 = vld [vmem:[%s2566_s5 + $0x124] ss:$20 sps:$4 sm:$0xff]   ;;  %p2379_p13 = pnand %p2378_p12, %p2520_p4  ;;  %p2386_p3 = por %p2385_p2, %p2384_p1 }
  0x2d   : > { %1983 = vmatprep.subr.bf16.mxu1 %v2251_v18  ;;  %2115 = vmatprep.subr.bf16.mxu0 %v2254_v19  ;;  %v2335_v18 = vld [vmem:[%s2566_s5 + $0x1b8] ss:$20 sps:$4 sm:$0xff]  }
  0x2e   : > { %p2380_p0 = pneg %p2379_p13 }
  0x2f   : > { %1094 = vmatmul.mubr.bf16.vlgmr.msra.gmra.mrb[0].mxu0 %v2245_v20  ;;  %1190 = vmatmul.mubr.bf16.vlgmr.msra.gmra.mrb[0].mxu1 %v2248_v21  ;;  %v2337_v20 = vld [vmem:[%s2566_s5 + $0x14c] ss:$20 sps:$4 sm:$0xff]   ;;  %v2339_v21 = vld [vmem:[%s2566_s5 + $0x10] ss:$20 sps:$4 sm:$0xff]  }
  0x30   : > { %1984 = vmatpush3.bf16.msra.mxu1 %v2252_v22  ;;  %2116 = vmatpush3.bf16.msra.mxu0 %v2254_v19  ;;  %v2336_v19 = vld [vmem:[%s2566_s5 + $0x120] ss:$20 sps:$4 sm:$0xff]   ;;  %v2340_v22 = vld [vmem:[%s2566_s5 + $0x148] ss:$20 sps:$4 sm:$0xff]   ;;  %p2387_p5 = pnand %p2386_p3, %p2380_p0 }
  0x31   : > { %1985 = vmatprep.subr.bf16.mxu1 %v2253_v23  ;;  %1101 = vmatprep.mubr.bf16.mxu0 %v2256_v24  ;;  %v2341_v23 = vld [vmem:[%s2566_s5 + $0x38] ss:$20 sps:$4 sm:$0xff]   ;;  %v2342_v24 = vld [vmem:[%s2566_s5 + $0x174] ss:$20 sps:$4 sm:$0xff]  }
  0x32   : > { %1197 = vmatprep.mubr.bf16.mxu1 %v2258_v25  ;;  %2117 = vmatprep.subr.bf16.mxu0 %v2285_v35  ;;  %v2344_v25 = vld [vmem:[%s2566_s5 + $0x60] ss:$20 sps:$4 sm:$0xff]  }
  0x34   : > { %1986 = vmatpush3.bf16.msra.mxu1 %v2255_v26  ;;  %2118 = vmatpush3.bf16.msra.mxu0 %v2285_v35  ;;  %v2345_v26 = vld [vmem:[%s2566_s5 + $0x170] ss:$20 sps:$4 sm:$0xff]   ;;  %v2356_v35 = vld [vmem:[%s2566_s5 + $0x128] ss:$20 sps:$4 sm:$0xff]  }
  0x35   : > { %1987 = vmatprep.subr.bf16.mxu1 %v2262_v28  ;;  %2119 = vmatprep.subr.bf16.mxu0 %v2305_v47  ;;  %v2347_v28 = vld [vmem:[%s2566_s5 + $0x19c] ss:$20 sps:$4 sm:$0xff]  }
  0x37   : > { %1102 = vmatmul.mubr.bf16.gmra.mrb[4].mxu0 %v2260_v27  ;;  %1198 = vmatmul.mubr.bf16.gmra.mrb[4].mxu1 %v2261_v29  ;;  %v2346_v27 = vld [vmem:[%s2566_s5 + $0x88] ss:$20 sps:$4 sm:$0xff]   ;;  %v2349_v29 = vld [vmem:[%s2566_s5 + $0xb0] ss:$20 sps:$4 sm:$0xff]  }
  0x38   : > { %1988 = vmatpush3.bf16.msra.mxu1 %v2263_v30  ;;  %1109 = vmatprep.mubr.bf16.mxu0 %v2266_v32  ;;  %v2350_v30 = vld [vmem:[%s2566_s5 + $0x198] ss:$20 sps:$4 sm:$0xff]  }
  0x39   : > { %1989 = vmatprep.subr.bf16.mxu1 %v2264_v31  ;;  %1205 = vmatprep.mubr.bf16.mxu1 %v2268_v33  ;;  %v2351_v31 = vld [vmem:[%s2566_s5 + $0xd8] ss:$20 sps:$4 sm:$0xff]   ;;  %v2354_v33 = vld [vmem:[%s2566_s5 + $0x100] ss:$20 sps:$4 sm:$0xff]  }
  0x3a   : > { %2120 = vmatpush3.bf16.msra.mxu0 %v2305_v47  ;;  %v2352_v32 = vld [vmem:[%s2566_s5 + $0x1c4] ss:$20 sps:$4 sm:$0xff]  }
  0x3b   : > { %2121 = vmatprep.subr.bf16.mxu0 %v2324_v56  ;;  %v2371_v47 = vld [vmem:[%s2566_s5 + $0x218] ss:$20 sps:$4 sm:$0xff]  }
  0x3c   : > { %1990 = vmatpush3.bf16.msra.mxu1 %v2265_v34  ;;  %v2355_v34 = vld [vmem:[%s2566_s5 + $0x1c0] ss:$20 sps:$4 sm:$0xff]  }
  0x3d   : > { %1991 = vmatprep.subr.bf16.mxu1 %v2272_v37  ;;  %v2359_v37 = vld [vmem:[%s2566_s5 + $0x150] ss:$20 sps:$4 sm:$0xff]  }
  0x3e   : > { %2122 = vmatpush3.bf16.msra.mxu0 %v2324_v56 }
  0x3f   : > { %1110 = vmatmul.mubr.bf16.gmra.mrb[8].mxu0 %v2270_v36  ;;  %1206 = vmatmul.mubr.bf16.gmra.mrb[8].mxu1 %v2271_v38  ;;  %v2357_v36 = vld [vmem:[%s2566_s5 + $0x1ec] ss:$20 sps:$4 sm:$0xff]   ;;  %v2360_v38 = vld [vmem:[%s2566_s5 + $0x1e8] ss:$20 sps:$4 sm:$0xff]  }
  0x40   : > { %1992 = vmatpush3.bf16.msra.mxu1 %v2273_v39  ;;  %1117 = vmatprep.mubr.bf16.mxu0 %v2276_v41  ;;  %v2361_v39 = vld [vmem:[%s2566_s5 + $0x178] ss:$20 sps:$4 sm:$0xff]   ;;  %v2364_v41 = vld [vmem:[%s2566_s5 + $0x1a0] ss:$20 sps:$4 sm:$0xff]  }
  0x41   : > { %1993 = vmatprep.subr.bf16.mxu1 %v2274_v40  ;;  %1213 = vmatprep.mubr.bf16.mxu1 %v2278_v42  ;;  %v2362_v40 = vld [vmem:[%s2566_s5 + $0x214] ss:$20 sps:$4 sm:$0xff]   ;;  %v2365_v42 = vld [vmem:[%s2566_s5 + $0x210] ss:$20 sps:$4 sm:$0xff]  }
  0x44   : > { %1994 = vmatpush3.bf16.msra.mxu1 %v2275_v43  ;;  %v2366_v43 = vld [vmem:[%s2566_s5 + $0x1c8] ss:$20 sps:$4 sm:$0xff]  }
  0x45   : > { %1995 = vmatprep.subr.bf16.mxu1 %v2282_v46  ;;  %v2370_v46 = vld [vmem:[%s2566_s5 + $0x238] ss:$20 sps:$4 sm:$0xff]  }
  0x47   : > { %1118 = vmatmul.mubr.bf16.gmra.mrb[12].mxu0 %v2280_v44  ;;  %1214 = vmatmul.mubr.bf16.gmra.mrb[12].mxu1 %v2281_v45  ;;  %v2367_v44 = vld [vmem:[%s2566_s5 + $0x23c] ss:$20 sps:$4 sm:$0xff]  }
  0x48   : > { %1996 = vmatpush3.bf16.msra.mxu1 %v2283_v48  ;;  %1125 = vmatprep.mubr.bf16.mxu0 %v2287_v50  ;;  %v2369_v45 = vld [vmem:[%s2566_s5 + $0x1f0] ss:$20 sps:$4 sm:$0xff]   ;;  %v2375_v50 = vld [vmem:[%s2566_s5 + $0x260] ss:$20 sps:$4 sm:$0xff]  }
  0x49   : > { %1997 = vmatprep.subr.bf16.mxu1 %v2284_v49  ;;  %1254 = vmatprep.mubr.bf16.mxu1 %v2291_v51  ;;  %v2372_v48 = vld [vmem:[%s2566_s5 + $0x264] ss:$20 sps:$4 sm:$0xff]   ;;  %v2374_v49 = vld [vmem:[%s2566_s5 + $0x240] ss:$20 sps:$4 sm:$0xff]   ;;  %v2376_v51 = vld [vmem:[%s2566_s5 + $0x268] ss:$20 sps:$4 sm:$0xff]  }
  0x4c   : > { %1998 = vmatpush3.bf16.msra.mxu1 %v2286_v52 }
  0x4f   : > { %1126 = vmatmul.mubr.bf16.gmra.mrb[16].mxu0 %v2292_v54  ;;  %1255 = vmatmul.mubr.bf16.vlgmr.msra.gmra.mrb[16].mxu1 %v2289_v53 }
  0x50   : > { %1133 = vmatprep.mubr.bf16.mxu0 %v2293_v55  ;;  %1262 = vmatprep.mubr.bf16.mxu1 %v2295_v57 }
  0x57   : > { %1134 = vmatmul.mubr.bf16.gmra.mrb[20].mxu0 %v2297_v58  ;;  %1263 = vmatmul.mubr.bf16.gmra.mrb[20].mxu1 %v2298_v59 }
  0x58   : > { %1141 = vmatprep.mubr.bf16.mxu0 %v2299_v60  ;;  %1270 = vmatprep.mubr.bf16.mxu1 %v2301_v61 }
  0x5f   : > { %1142 = vmatmul.mubr.bf16.gmra.mrb[24].mxu0 %v2303_v62  ;;  %1271 = vmatmul.mubr.bf16.gmra.mrb[24].mxu1 %v2304_v63 }
  0x60   : > { %1149 = vmatprep.mubr.bf16.mxu0 %v2306_v0  ;;  %1278 = vmatprep.mubr.bf16.mxu1 %v2308_v1 }
  0x67   : > { %1150 = vmatmul.mubr.bf16.gmra.mrb[28].mxu0 %v2310_v2  ;;  %1279 = vmatmul.mubr.bf16.gmra.mrb[28].mxu1 %v2311_v3 }
  0x68   : > { %1157 = vmatprep.mubr.bf16.mxu0 %v2312_v4  ;;  %1286 = vmatprep.mubr.bf16.mxu1 %v2314_v5 }
  0x6f   : > { %1158 = vmatmul.mubr.bf16.gmra.mrb[32].mxu0 %v2316_v6  ;;  %1287 = vmatmul.mubr.bf16.gmra.mrb[32].mxu1 %v2317_v7 }
  0x70   : > { %1165 = vmatprep.mubr.bf16.mxu0 %v2318_v8  ;;  %1294 = vmatprep.mubr.bf16.mxu1 %v2320_v9 }
  0x77   : > { %1166 = vmatmul.mubr.bf16.gmra.mrb[36].mxu0 %v2322_v10  ;;  %1295 = vmatmul.mubr.bf16.gmra.mrb[36].mxu1 %v2323_v11 }
  0x78   : > { %1173 = vmatprep.mubr.bf16.mxu0 %v2325_v12  ;;  %1302 = vmatprep.mubr.bf16.mxu1 %v2327_v13 }
  0x7f   : > { %1174 = vmatmul.mubr.bf16.gmra.mrb[40].mxu0 %v2329_v14  ;;  %1303 = vmatmul.mubr.bf16.gmra.mrb[40].mxu1 %v2330_v15 }
  0x80   : > { %1181 = vmatprep.mubr.bf16.mxu0 %v2331_v16  ;;  %1310 = vmatprep.mubr.bf16.mxu1 %v2333_v17 }
  0x87   : > { %1182 = vmatmul.mubr.bf16.gmra.mrb[44].mxu0 %v2335_v18  ;;  %1311 = vmatmul.mubr.bf16.gmra.mrb[44].mxu1 %v2336_v19 }
  0x88   : > { %1318 = vmatprep.mubr.bf16.mxu1 %v2337_v20  ;;  %2123 = vmatprep.mubr.msk.bf16.mxu0 %vm1012_vm0, %v2339_v21 }
  0x8f   : > { %1319 = vmatmul.mubr.bf16.gmra.mrb[48].mxu1 %v2340_v22  ;;  %2124 = vmatmul.mubr.msk.bf16.vlgmr.msra.gmra.mrb[48].mxu0 %vm1012_vm0, %v2341_v23 }
  0x90   : > { %1326 = vmatprep.mubr.bf16.mxu1 %v2342_v24  ;;  %2127 = vmatprep.mubr.msk.bf16.mxu0 %vm1012_vm0, %v2344_v25 }
  0x97   : > { %1327 = vmatmul.mubr.bf16.gmra.mrb[52].mxu1 %v2345_v26  ;;  %2128 = vmatmul.mubr.msk.bf16.gmra.mrb[52].mxu0 %vm1012_vm0, %v2346_v27 }
  0x98   : > { %1334 = vmatprep.mubr.bf16.mxu1 %v2347_v28  ;;  %2131 = vmatprep.mubr.msk.bf16.mxu0 %vm1012_vm0, %v2349_v29 }
  0x9f   : > { %1335 = vmatmul.mubr.bf16.gmra.mrb[56].mxu1 %v2350_v30  ;;  %2132 = vmatmul.mubr.msk.bf16.gmra.mrb[56].mxu0 %vm1012_vm0, %v2351_v31 }
  0xa0   : > { %1342 = vmatprep.mubr.bf16.mxu1 %v2352_v32  ;;  %2135 = vmatprep.mubr.msk.bf16.mxu0 %vm1012_vm0, %v2354_v33 }
  0xa7   : > { %1343 = vmatmul.mubr.bf16.gmra.mrb[60].mxu1 %v2355_v34  ;;  %2136 = vmatmul.mubr.msk.bf16.gmra.mrb[60].mxu0 %vm1012_vm0, %v2356_v35 }
  0xa8   : > { %1350 = vmatprep.mubr.bf16.mxu1 %v2357_v36  ;;  %2139 = vmatprep.mubr.msk.bf16.mxu0 %vm1012_vm0, %v2359_v37 }
  0xaf   : > { %1351 = vmatmul.mubr.bf16.gmra.mrb[64].mxu1 %v2360_v38  ;;  %2140 = vmatmul.mubr.msk.bf16.gmra.mrb[64].mxu0 %vm1012_vm0, %v2361_v39  ;;  %v2764_v38 = vld [vmem:[%s2989_s2] ss:$0 sm:$0xff] }
  0xb0   : > { %1358 = vmatprep.mubr.bf16.mxu1 %v2362_v40  ;;  %2143 = vmatprep.mubr.msk.bf16.mxu0 %vm1012_vm0, %v2364_v41 }
  0xb7   : > { %1359 = vmatmul.mubr.bf16.gmra.mrb[68].mxu1 %v2365_v42  ;;  %2144 = vmatmul.mubr.msk.bf16.gmra.mrb[68].mxu0 %vm1012_vm0, %v2366_v43 }
  0xb8   : > { %1366 = vmatprep.mubr.bf16.mxu1 %v2367_v44  ;;  %2147 = vmatprep.mubr.msk.bf16.mxu0 %vm1012_vm0, %v2369_v45 }
  0xbf   : > { %1367 = vmatmul.mubr.bf16.gmra.mrb[72].mxu1 %v2370_v46  ;;  %2148 = vmatmul.mubr.msk.bf16.gmra.mrb[72].mxu0 %vm1012_vm0, %v2371_v47 }
  0xc0   : > { %1374 = vmatprep.mubr.bf16.mxu1 %v2372_v48  ;;  %2151 = vmatprep.mubr.msk.bf16.mxu0 %vm1012_vm0, %v2374_v49 }
  0xc7   : > { %1375 = vmatmul.mubr.bf16.gmra.mrb[76].mxu1 %v2375_v50  ;;  %2152 = vmatmul.mubr.msk.bf16.gmra.mrb[76].mxu0 %vm1012_vm0, %v2376_v51 }
 0x102   : > { %v1959_v52 = vpop.f32.mrb[0].mxu1  ;;  %v1887_v53 = vpop.f32.mrb[0].mxu0 }
 0x103   : > { %v1960_v54 = vpop.f32.mrb[1].mxu1  ;;  %v1888_v55 = vpop.f32.mrb[1].mxu0 }
 0x104   : > { %v2745_v56 = vadd.f32 %v1960_v54, %v1959_v52  ;;  %v1962_v57 = vpop.f32.mrb[2].mxu1  ;;  %v1889_v58 = vadd.f32 %v1888_v55, %v1887_v53  ;;  %v1890_v59 = vpop.f32.mrb[2].mxu0 }
 0x105   : > { %v1963_v60 = vpop.f32.mrb[3].mxu1  ;;  %v1891_v61 = vpop.f32.mrb[3].mxu0 }
 0x106   : > { %v2747_v62 = vadd.f32 %v1963_v60, %v1962_v57  ;;  %v1892_v63 = vadd.f32 %v1891_v61, %v1890_v59  ;;  %v1096_v41 = vadd.f32 %v1889_v58, %v2764_v38 }
 0x108   : > { %v1099_v48 = vadd.f32 %v1892_v63, %v2764_v38 }
 0x10a   : > { %v1965_v0 = vpop.f32.mrb[4].mxu1  ;;  %v1893_v1 = vpop.f32.mrb[4].mxu0 }
 0x10b   : > { %v1966_v2 = vpop.f32.mrb[5].mxu1  ;;  %v1894_v3 = vpop.f32.mrb[5].mxu0 }
 0x10c   : > { %v2749_v4 = vadd.f32 %v1966_v2, %v1965_v0  ;;  %v1968_v5 = vpop.f32.mrb[6].mxu1  ;;  %v1895_v6 = vadd.f32 %v1894_v3, %v1893_v1  ;;  %v1896_v7 = vpop.f32.mrb[6].mxu0 }
 0x10d   : > { %v1969_v8 = vpop.f32.mrb[7].mxu1  ;;  %v1897_v9 = vpop.f32.mrb[7].mxu0 }
 0x10e   : > { %v2751_v10 = vadd.f32 %v1969_v8, %v1968_v5  ;;  %v1898_v11 = vadd.f32 %v1897_v9, %v1896_v7  ;;  %v1104_v58 = vadd.f32 %v1895_v6, %v2764_v38 }
 0x110   : > { %v1107_v63 = vadd.f32 %v1898_v11, %v2764_v38 }
 0x112   : > { %v1971_v12 = vpop.f32.mrb[8].mxu1  ;;  %v1899_v13 = vpop.f32.mrb[8].mxu0 }
 0x113   : > { %v1972_v14 = vpop.f32.mrb[9].mxu1  ;;  %v1900_v15 = vpop.f32.mrb[9].mxu0 }
 0x114   : > { %v2753_v16 = vadd.f32 %v1972_v14, %v1971_v12  ;;  %v1974_v17 = vpop.f32.mrb[10].mxu1  ;;  %v1901_v18 = vadd.f32 %v1900_v15, %v1899_v13  ;;  %v1902_v19 = vpop.f32.mrb[10].mxu0 }
 0x115   : > { %v1975_v20 = vpop.f32.mrb[11].mxu1  ;;  %v1903_v21 = vpop.f32.mrb[11].mxu0 }
 0x116   : > { %v2755_v22 = vadd.f32 %v1975_v20, %v1974_v17  ;;  %v1904_v23 = vadd.f32 %v1903_v21, %v1902_v19  ;;  %v1112_v6 = vadd.f32 %v1901_v18, %v2764_v38 }
 0x118   : > { %v1115_v11 = vadd.f32 %v1904_v23, %v2764_v38 }
 0x11a   : > { %v1977_v24 = vpop.f32.mrb[12].mxu1  ;;  %v1905_v25 = vpop.f32.mrb[12].mxu0 }
 0x11b   : > { %v1978_v26 = vpop.f32.mrb[13].mxu1  ;;  %v1906_v27 = vpop.f32.mrb[13].mxu0 }
 0x11c   : > { %v2757_v28 = vadd.f32 %v1978_v26, %v1977_v24  ;;  %v1980_v29 = vpop.f32.mrb[14].mxu1  ;;  %v1907_v30 = vadd.f32 %v1906_v27, %v1905_v25  ;;  %v1908_v31 = vpop.f32.mrb[14].mxu0 }
 0x11d   : > { %v1981_v32 = vpop.f32.mrb[15].mxu1  ;;  %v1909_v33 = vpop.f32.mrb[15].mxu0 }
 0x11e   : > { %v2759_v34 = vadd.f32 %v1981_v32, %v1980_v29  ;;  %v1910_v35 = vadd.f32 %v1909_v33, %v1908_v31  ;;  %v1120_v18 = vadd.f32 %v1907_v30, %v2764_v38 }
 0x120   : > { %v1123_v23 = vadd.f32 %v1910_v35, %v2764_v38 }
 0x122   : > { %v1999_v36 = vpop.f32.mrb[16].mxu1  ;;  %v1911_v37 = vpop.f32.mrb[16].mxu0 }
 0x123   : > { %v2000_v39 = vpop.f32.mrb[17].mxu1  ;;  %v1912_v40 = vpop.f32.mrb[17].mxu0 }
 0x124   : > { %v2001_v42 = vadd.f32 %v2000_v39, %v1999_v36  ;;  %v2002_v43 = vpop.f32.mrb[18].mxu1  ;;  %v1913_v44 = vadd.f32 %v1912_v40, %v1911_v37  ;;  %v1914_v45 = vpop.f32.mrb[18].mxu0 }
 0x125   : > { %v2003_v46 = vpop.f32.mrb[19].mxu1  ;;  %v1915_v47 = vpop.f32.mrb[19].mxu0 }
 0x126   : > { %v2004_v49 = vadd.f32 %v2003_v46, %v2002_v43  ;;  %v1916_v50 = vadd.f32 %v1915_v47, %v1914_v45  ;;  %v2768_v51 = vadd.f32 %v2001_v42, %v1096_v41  ;;  %v1128_v30 = vadd.f32 %v1913_v44, %v2764_v38 }
 0x128   : > { %v2770_v52 = vadd.f32 %v2004_v49, %v1099_v48  ;;  %v1131_v35 = vadd.f32 %v1916_v50, %v2764_v38 }
 0x12a   : > { %v2005_v53 = vpop.f32.mrb[20].mxu1  ;;  %v1917_v54 = vpop.f32.mrb[20].mxu0 }
 0x12b   : > { %v2006_v55 = vpop.f32.mrb[21].mxu1  ;;  %v1918_v57 = vpop.f32.mrb[21].mxu0 }
 0x12c   : > { %v2007_v59 = vadd.f32 %v2006_v55, %v2005_v53  ;;  %v2008_v60 = vpop.f32.mrb[22].mxu1  ;;  %v1919_v61 = vadd.f32 %v1918_v57, %v1917_v54  ;;  %v1920_v0 = vpop.f32.mrb[22].mxu0 }
 0x12d   : > { %v2009_v1 = vpop.f32.mrb[23].mxu1  ;;  %v1921_v2 = vpop.f32.mrb[23].mxu0 }
 0x12e   : > { %v2010_v3 = vadd.f32 %v2009_v1, %v2008_v60  ;;  %v1922_v5 = vadd.f32 %v1921_v2, %v1920_v0  ;;  %v2774_v7 = vadd.f32 %v2007_v59, %v1104_v58 }
 0x130   : > { %v2776_v8 = vadd.f32 %v2010_v3, %v1107_v63 }
 0x132   : > { %v2011_v9 = vpop.f32.mrb[24].mxu1  ;;  %v1923_v12 = vpop.f32.mrb[24].mxu0 }
 0x133   : > { %v2012_v13 = vpop.f32.mrb[25].mxu1  ;;  %v1924_v14 = vpop.f32.mrb[25].mxu0 }
 0x134   : > { %v2013_v15 = vadd.f32 %v2012_v13, %v2011_v9  ;;  %v2014_v17 = vpop.f32.mrb[26].mxu1  ;;  %v1925_v19 = vadd.f32 %v1924_v14, %v1923_v12  ;;  %v1926_v20 = vpop.f32.mrb[26].mxu0 }
 0x135   : > { %v2015_v21 = vpop.f32.mrb[27].mxu1  ;;  %v1927_v24 = vpop.f32.mrb[27].mxu0 }
 0x136   : > { %v2016_v25 = vadd.f32 %v2015_v21, %v2014_v17  ;;  %v1928_v26 = vadd.f32 %v1927_v24, %v1926_v20  ;;  %v2780_v27 = vadd.f32 %v2013_v15, %v1112_v6  ;;  %v1136_v6 = vadd.f32 %v1919_v61, %v2764_v38 }
 0x138   : > { %v2782_v29 = vadd.f32 %v2016_v25, %v1115_v11  ;;  %v1139_v11 = vadd.f32 %v1922_v5, %v2764_v38 }
 0x13a   : > { %v2017_v31 = vpop.f32.mrb[28].mxu1  ;;  %v1929_v32 = vpop.f32.mrb[28].mxu0 }
 0x13b   : > { %v2018_v33 = vpop.f32.mrb[29].mxu1  ;;  %v1930_v36 = vpop.f32.mrb[29].mxu0 }
 0x13c   : > { %v2019_v37 = vadd.f32 %v2018_v33, %v2017_v31  ;;  %v2020_v39 = vpop.f32.mrb[30].mxu1  ;;  %v1931_v40 = vadd.f32 %v1930_v36, %v1929_v32  ;;  %v1932_v41 = vpop.f32.mrb[30].mxu0 }
 0x13d   : > { %v2021_v42 = vpop.f32.mrb[31].mxu1  ;;  %v1933_v43 = vpop.f32.mrb[31].mxu0 }
 0x13e   : > { %v2022_v45 = vadd.f32 %v2021_v42, %v2020_v39  ;;  %v1934_v46 = vadd.f32 %v1933_v43, %v1932_v41  ;;  %v2786_v47 = vadd.f32 %v2019_v37, %v1120_v18  ;;  %v1144_v39 = vadd.f32 %v1925_v19, %v2764_v38 }
 0x140   : > { %v2788_v48 = vadd.f32 %v2022_v45, %v1123_v23 }
 0x142   : > { %v2023_v49 = vpop.f32.mrb[32].mxu1  ;;  %v1935_v53 = vpop.f32.mrb[32].mxu0 }
 0x143   : > { %v2024_v54 = vpop.f32.mrb[33].mxu1  ;;  %v1936_v55 = vpop.f32.mrb[33].mxu0 }
 0x144   : > { %v2025_v57 = vadd.f32 %v2024_v54, %v2023_v49  ;;  %v2026_v58 = vpop.f32.mrb[34].mxu1  ;;  %v2791_v59 = vadd.f32 %v1936_v55, %v1935_v53  ;;  %v1938_v60 = vpop.f32.mrb[34].mxu0  ;;  %v1147_v49 = vadd.f32 %v1928_v26, %v2764_v38 }
 0x145   : > { %v2027_v0 = vpop.f32.mrb[35].mxu1  ;;  %v1939_v1 = vpop.f32.mrb[35].mxu0 }
 0x146   : > { %v2028_v2 = vadd.f32 %v2027_v0, %v2026_v58  ;;  %v2794_v63 = vadd.f32 %v1939_v1, %v1938_v60  ;;  %v2796_v3 = vadd.f32 %v2025_v57, %v1128_v30  ;;  %v1152_v0 = vadd.f32 %v1931_v40, %v2764_v38 }
 0x148   : > { %v2798_v9 = vadd.f32 %v2028_v2, %v1131_v35 }
 0x14a   : > { %v2029_v12 = vpop.f32.mrb[36].mxu1  ;;  %v1941_v13 = vpop.f32.mrb[36].mxu0 }
 0x14b   : > { %v2030_v14 = vpop.f32.mrb[37].mxu1  ;;  %v1942_v44 = vpop.f32.mrb[37].mxu0 }
 0x14c   : > { %v2031_v15 = vadd.f32 %v2030_v14, %v2029_v12  ;;  %v2032_v17 = vpop.f32.mrb[38].mxu1  ;;  %v2801_v20 = vadd.f32 %v1942_v44, %v1941_v13  ;;  %v1944_v21 = vpop.f32.mrb[38].mxu0  ;;  %v1155_v14 = vadd.f32 %v1934_v46, %v2764_v38 }
 0x14d   : > { %v2033_v24 = vpop.f32.mrb[39].mxu1  ;;  %v1945_v50 = vpop.f32.mrb[39].mxu0 }
 0x14e   : > { %v2034_v25 = vadd.f32 %v2033_v24, %v2032_v17  ;;  %v2804_v31 = vadd.f32 %v1945_v50, %v1944_v21  ;;  %v2806_v32 = vadd.f32 %v2031_v15, %v1136_v6 }
 0x150   : > { %v2808_v33 = vadd.f32 %v2034_v25, %v1139_v11  ;;  %v1160_v25 = vadd.f32 %v2791_v59, %v2764_v38 }
 0x152   : > { %v2035_v36 = vpop.f32.mrb[40].mxu1  ;;  %v1947_v18 = vpop.f32.mrb[40].mxu0 }
 0x153   : > { %v2036_v37 = vpop.f32.mrb[41].mxu1  ;;  %v1948_v61 = vpop.f32.mrb[41].mxu0 }
 0x154   : > { %v2037_v41 = vadd.f32 %v2036_v37, %v2035_v36  ;;  %v2038_v42 = vpop.f32.mrb[42].mxu1  ;;  %v2811_v43 = vadd.f32 %v1948_v61, %v1947_v18  ;;  %v1950_v23 = vpop.f32.mrb[42].mxu0  ;;  %v1163_v61 = vadd.f32 %v2794_v63, %v2764_v38 }
 0x155   : > { %v2039_v45 = vpop.f32.mrb[43].mxu1  ;;  %v1951_v5 = vpop.f32.mrb[43].mxu0 }
 0x156   : > { %v2040_v53 = vadd.f32 %v2039_v45, %v2038_v42  ;;  %v2814_v54 = vadd.f32 %v1951_v5, %v1950_v23  ;;  %v2816_v55 = vadd.f32 %v2037_v41, %v1144_v39 }
 0x158   : > { %v2818_v30 = vadd.f32 %v2040_v53, %v1147_v49 }
 0x15a   : > { %v2041_v57 = vpop.f32.mrb[44].mxu1  ;;  %v1953_v58 = vpop.f32.mrb[44].mxu0 }
 0x15b   : > { %v2042_v19 = vpop.f32.mrb[45].mxu1  ;;  %v1954_v60 = vpop.f32.mrb[45].mxu0 }
 0x15c   : > { %v2043_v1 = vadd.f32 %v2042_v19, %v2041_v57  ;;  %v2044_v35 = vpop.f32.mrb[46].mxu1  ;;  %v2821_v2 = vadd.f32 %v1954_v60, %v1953_v58  ;;  %v1956_v26 = vpop.f32.mrb[46].mxu0  ;;  %v1168_v19 = vadd.f32 %v2801_v20, %v2764_v38 }
 0x15d   : > { %v2045_v12 = vpop.f32.mrb[47].mxu1  ;;  %v1957_v13 = vpop.f32.mrb[47].mxu0 }
 0x15e   : > { %v2046_v44 = vadd.f32 %v2045_v12, %v2044_v35  ;;  %v2824_v6 = vadd.f32 %v1957_v13, %v1956_v26  ;;  %v2827_v15 = vadd.f32 %v2043_v1, %v1152_v0  ;;  %v1171_v26 = vadd.f32 %v2804_v31, %v2764_v38 }
 0x160   : > { %v2829_v17 = vadd.f32 %v2046_v44, %v1155_v14 }
 0x162   : > { %v2047_v40 = vpop.f32.mrb[48].mxu1  ;;  %v2125_v21 = vpop.f32.mrb[48].mxu0 }
 0x163   : > { %v1426_v24 = vadd.f32 %v2125_v21, %v2774_v7  ;;  %v2048_v50 = vpop.f32.mrb[49].mxu1  ;;  %v1417_v11 = vpop.f32.mrb[49].mxu0 }
 0x164   : > { %v2049_v46 = vadd.f32 %v2048_v50, %v2047_v40  ;;  %v1418_v36 = vadd.f32 %v1417_v11, %v2768_v51  ;;  %v2050_v18 = vpop.f32.mrb[50].mxu1  ;;  %v2126_v37 = vpop.f32.mrb[50].mxu0 }
 0x165   : > { %v1546_v39 = vmax.f32 %v1426_v24, 0.0  ;;  %v1429_v41 = vadd.f32 %v2126_v37, %v2776_v8  ;;  %v2051_v42 = vpop.f32.mrb[51].mxu1  ;;  %v1420_v23 = vpop.f32.mrb[51].mxu0 }
 0x166   : > { %v1544_v45 = vmax.f32 %v1418_v36, 0.0  ;;  %v2052_v7 = vadd.f32 %v2051_v42, %v2050_v18  ;;  %v1421_v5 = vadd.f32 %v1420_v23, %v2770_v52  ;;  %v2841_v49 = vadd.f32 %v2049_v46, %v1160_v25 }
 0x167   : > { %1578 = vst [vmem:[%s2843_s21 + $0x10] sm:$0xff] %v1546_v39  ;;  %v1547_v51 = vmax.f32 %v1429_v41, 0.0  ;;  %v1176_v36 = vadd.f32 %v2811_v43, %v2764_v38  ;;  %v1179_v39 = vadd.f32 %v2814_v54, %v2764_v38 }
 0x168   : > { %1576 = vst [vmem:[%s2843_s21] sm:$0xff] %v1544_v45  ;;  %v1545_v59 = vmax.f32 %v1421_v5, 0.0  ;;  %v2847_v63 = vadd.f32 %v2052_v7, %v1163_v61 }
 0x169   : > { %1579 = vst [vmem:[%s2843_s21 + $0x18] sm:$0xff] %v1547_v51 }
 0x16a   : > { %1577 = vst [vmem:[%s2843_s21 + $0x8] sm:$0xff] %v1545_v59  ;;  %v2053_v8 = vpop.f32.mrb[52].mxu1  ;;  %v2129_v53 = vpop.f32.mrb[52].mxu0 }
 0x16b   : > { %v1442_v52 = vadd.f32 %v2129_v53, %v2786_v47  ;;  %v2054_v57 = vpop.f32.mrb[53].mxu1  ;;  %v1433_v58 = vpop.f32.mrb[53].mxu0 }
 0x16c   : > { %v2055_v60 = vadd.f32 %v2054_v57, %v2053_v8  ;;  %v1434_v0 = vadd.f32 %v1433_v58, %v2780_v27  ;;  %v2056_v1 = vpop.f32.mrb[54].mxu1  ;;  %v2130_v35 = vpop.f32.mrb[54].mxu0 }
 0x16d   : > { %v1550_v12 = vmax.f32 %v1442_v52, 0.0  ;;  %v1445_v47 = vadd.f32 %v2130_v35, %v2788_v48  ;;  %v2057_v13 = vpop.f32.mrb[55].mxu1  ;;  %v1436_v14 = vpop.f32.mrb[55].mxu0 }
 0x16e   : > { %v1548_v44 = vmax.f32 %v1434_v0, 0.0  ;;  %v2058_v40 = vadd.f32 %v2057_v13, %v2056_v1  ;;  %v1437_v20 = vadd.f32 %v1436_v14, %v2782_v29  ;;  %v1329_v21 = vadd.f32 %v2055_v60, %v1168_v19 }
 0x16f   : > { %1582 = vst [vmem:[%s2843_s21 + $0x30] sm:$0xff] %v1550_v12  ;;  %v1551_v24 = vmax.f32 %v1445_v47, 0.0  ;;  %v1187_v0 = vadd.f32 %v2824_v6, %v2764_v38 }
 0x170   : > { %1580 = vst [vmem:[%s2843_s21 + $0x20] sm:$0xff] %v1548_v44  ;;  %v1549_v27 = vmax.f32 %v1437_v20, 0.0  ;;  %v2861_v50 = vadd.f32 %v2058_v40, %v1171_v26 }
 0x171   : > { %1583 = vst [vmem:[%s2843_s21 + $0x38] sm:$0xff] %v1551_v24 }
 0x172   : > { %1581 = vst [vmem:[%s2843_s21 + $0x28] sm:$0xff] %v1549_v27  ;;  %v2059_v11 = vpop.f32.mrb[56].mxu1  ;;  %v2133_v31 = vpop.f32.mrb[56].mxu0  ;;  %v1192_v27 = vadd.f32 %v2745_v56, %v2764_v38 }
 0x173   : > { %v1458_v25 = vadd.f32 %v2133_v31, %v2806_v32  ;;  %v2060_v48 = vpop.f32.mrb[57].mxu1  ;;  %v1449_v46 = vpop.f32.mrb[57].mxu0 }
 0x174   : > { %v2061_v29 = vadd.f32 %v2060_v48, %v2059_v11  ;;  %v1450_v18 = vadd.f32 %v1449_v46, %v2796_v3  ;;  %v2062_v37 = vpop.f32.mrb[58].mxu1  ;;  %v2134_v61 = vpop.f32.mrb[58].mxu0  ;;  %v1195_v48 = vadd.f32 %v2747_v62, %v2764_v38 }
 0x175   : > { %v1554_v41 = vmax.f32 %v1458_v25, 0.0  ;;  %v1461_v32 = vadd.f32 %v2134_v61, %v2808_v33  ;;  %v2063_v42 = vpop.f32.mrb[59].mxu1  ;;  %v1452_v23 = vpop.f32.mrb[59].mxu0 }
 0x176   : > { %v1552_v45 = vmax.f32 %v1450_v18, 0.0  ;;  %v2064_v7 = vadd.f32 %v2063_v42, %v2062_v37  ;;  %v1453_v43 = vadd.f32 %v1452_v23, %v2798_v9  ;;  %v2873_v5 = vadd.f32 %v2061_v29, %v1176_v36 }
 0x177   : > { %1586 = vst [vmem:[%s2843_s21 + $0x50] sm:$0xff] %v1554_v41  ;;  %v1555_v3 = vmax.f32 %v1461_v32, 0.0  ;;  %v1184_v9 = vadd.f32 %v2821_v2, %v2764_v38 }
 0x178   : > { %1584 = vst [vmem:[%s2843_s21 + $0x40] sm:$0xff] %v1552_v45  ;;  %v1553_v51 = vmax.f32 %v1453_v43, 0.0  ;;  %v2877_v59 = vadd.f32 %v2064_v7, %v1179_v39  ;;  %v1200_v45 = vadd.f32 %v2749_v4, %v2764_v38 }
 0x179   : > { %1587 = vst [vmem:[%s2843_s21 + $0x58] sm:$0xff] %v1555_v3 }
 0x17a   : > { %1585 = vst [vmem:[%s2843_s21 + $0x48] sm:$0xff] %v1553_v51  ;;  %v2065_v54 = vpop.f32.mrb[60].mxu1  ;;  %v2137_v8 = vpop.f32.mrb[60].mxu0  ;;  %v1203_v51 = vadd.f32 %v2751_v10, %v2764_v38 }
 0x17b   : > { %v1474_v33 = vadd.f32 %v2137_v8, %v2827_v15  ;;  %v2066_v53 = vpop.f32.mrb[61].mxu1  ;;  %v1465_v52 = vpop.f32.mrb[61].mxu0 }
 0x17c   : > { %v2067_v57 = vadd.f32 %v2066_v53, %v2065_v54  ;;  %v1466_v58 = vadd.f32 %v1465_v52, %v2816_v55  ;;  %v2068_v19 = vpop.f32.mrb[62].mxu1  ;;  %v2138_v60 = vpop.f32.mrb[62].mxu0 }
 0x17d   : > { %v1558_v1 = vmax.f32 %v1474_v33, 0.0  ;;  %v1477_v15 = vadd.f32 %v2138_v60, %v2829_v17  ;;  %v2069_v35 = vpop.f32.mrb[63].mxu1  ;;  %v1468_v26 = vpop.f32.mrb[63].mxu0 }
 0x17e   : > { %v1556_v12 = vmax.f32 %v1466_v58, 0.0  ;;  %v2070_v47 = vadd.f32 %v2069_v35, %v2068_v19  ;;  %v1469_v2 = vadd.f32 %v1468_v26, %v2818_v30  ;;  %v1345_v13 = vadd.f32 %v2067_v57, %v1184_v9 }
 0x17f   : > { %1590 = vst [vmem:[%s2843_s21 + $0x70] sm:$0xff] %v1558_v1  ;;  %v1559_v14 = vmax.f32 %v1477_v15, 0.0  ;;  %v1208_v35 = vadd.f32 %v2753_v16, %v2764_v38 }
 0x180   : > { %1588 = vst [vmem:[%s2843_s21 + $0x60] sm:$0xff] %v1556_v12  ;;  %v1557_v55 = vmax.f32 %v1469_v2, 0.0  ;;  %v1348_v44 = vadd.f32 %v2070_v47, %v1187_v0  ;;  %v1211_v2 = vadd.f32 %v2755_v22, %v2764_v38 }
 0x181   : > { %1591 = vst [vmem:[%s2843_s21 + $0x78] sm:$0xff] %v1559_v14 }
 0x182   : > { %1589 = vst [vmem:[%s2843_s21 + $0x68] sm:$0xff] %v1557_v55  ;;  %v2071_v40 = vpop.f32.mrb[64].mxu1  ;;  %v2141_v20 = vpop.f32.mrb[64].mxu0 }
 0x183   : > { %v1490_v6 = vadd.f32 %v2141_v20, %v1329_v21  ;;  %v2072_v24 = vpop.f32.mrb[65].mxu1  ;;  %v1481_v17 = vpop.f32.mrb[65].mxu0 }
 0x184   : > { %v2073_v11 = vadd.f32 %v2072_v24, %v2071_v40  ;;  %v1482_v30 = vadd.f32 %v1481_v17, %v2841_v49  ;;  %v2074_v31 = vpop.f32.mrb[66].mxu1  ;;  %v2142_v25 = vpop.f32.mrb[66].mxu0 }
 0x185   : > { %v1562_v46 = vmax.f32 %v1490_v6, 0.0  ;;  %v1493_v21 = vadd.f32 %v2142_v25, %v2861_v50  ;;  %v2075_v36 = vpop.f32.mrb[67].mxu1  ;;  %v1484_v29 = vpop.f32.mrb[67].mxu0  ;;  %v1216_v25 = vadd.f32 %v2757_v28, %v2764_v38 }
 0x186   : > { %v1560_v18 = vmax.f32 %v1482_v30, 0.0  ;;  %v2076_v37 = vadd.f32 %v2075_v36, %v2074_v31  ;;  %v1485_v56 = vadd.f32 %v1484_v29, %v2847_v63  ;;  %v1353_v61 = vadd.f32 %v2073_v11, %v1192_v27 }
 0x187   : > { %1594 = vst [vmem:[%s2843_s21 + $0x90] sm:$0xff] %v1562_v46  ;;  %v1563_v39 = vmax.f32 %v1493_v21, 0.0  ;;  %v1219_v29 = vadd.f32 %v2759_v34, %v2764_v38 }
 0x188   : > { %1592 = vst [vmem:[%s2843_s21 + $0x80] sm:$0xff] %v1560_v18  ;;  %v1561_v49 = vmax.f32 %v1485_v56, 0.0  ;;  %v1356_v41 = vadd.f32 %v2076_v37, %v1195_v48 }
 0x189   : > { %1595 = vst [vmem:[%s2843_s21 + $0x98] sm:$0xff] %v1563_v39 }
 0x18a   : > { %1593 = vst [vmem:[%s2843_s21 + $0x88] sm:$0xff] %v1561_v49  ;;  %v2077_v32 = vpop.f32.mrb[68].mxu1  ;;  %v2145_v42 = vpop.f32.mrb[68].mxu0 }
 0x18b   : > { %v1506_v62 = vadd.f32 %v2145_v42, %v1345_v13  ;;  %v2078_v23 = vpop.f32.mrb[69].mxu1  ;;  %v1497_v50 = vpop.f32.mrb[69].mxu0 }
 0x18c   : > { %v2079_v7 = vadd.f32 %v2078_v23, %v2077_v32  ;;  %v1498_v63 = vadd.f32 %v1497_v50, %v2873_v5  ;;  %v2080_v43 = vpop.f32.mrb[70].mxu1  ;;  %v2146_v3 = vpop.f32.mrb[70].mxu0 }
 0x18d   : > { %v1566_v54 = vmax.f32 %v1506_v62, 0.0  ;;  %v1509_v8 = vadd.f32 %v2146_v3, %v1348_v44  ;;  %v2081_v33 = vpop.f32.mrb[71].mxu1  ;;  %v1500_v53 = vpop.f32.mrb[71].mxu0 }
 0x18e   : > { %v1564_v52 = vmax.f32 %v1498_v63, 0.0  ;;  %v2082_v9 = vadd.f32 %v2081_v33, %v2080_v43  ;;  %v1501_v57 = vadd.f32 %v1500_v53, %v2877_v59  ;;  %v1361_v4 = vadd.f32 %v2079_v7, %v1200_v45 }
 0x18f   : > { %1598 = vst [vmem:[%s2843_s21 + $0xb0] sm:$0xff] %v1566_v54  ;;  %v1567_v58 = vmax.f32 %v1509_v8, 0.0 }
 0x190   : > { %1596 = vst [vmem:[%s2843_s21 + $0xa0] sm:$0xff] %v1564_v52  ;;  %v1565_v5 = vmax.f32 %v1501_v57, 0.0  ;;  %v1364_v19 = vadd.f32 %v2082_v9, %v1203_v51 }
 0x191   : > { %1599 = vst [vmem:[%s2843_s21 + $0xb8] sm:$0xff] %v1567_v58 }
 0x192   : > { %1597 = vst [vmem:[%s2843_s21 + $0xa8] sm:$0xff] %v1565_v5  ;;  %v2083_v60 = vpop.f32.mrb[72].mxu1  ;;  %v2149_v0 = vpop.f32.mrb[72].mxu0 }
 0x193   : > { %v1522_v1 = vadd.f32 %v2149_v0, %v1361_v4  ;;  %v2084_v10 = vpop.f32.mrb[73].mxu1  ;;  %v1513_v15 = vpop.f32.mrb[73].mxu0 }
 0x194   : > { %v2085_v26 = vadd.f32 %v2084_v10, %v2083_v60  ;;  %v1514_v59 = vadd.f32 %v1513_v15, %v1353_v61  ;;  %v2086_v12 = vpop.f32.mrb[74].mxu1  ;;  %v2150_v47 = vpop.f32.mrb[74].mxu0 }
 0x195   : > { %v1570_v13 = vmax.f32 %v1522_v1, 0.0  ;;  %v1525_v14 = vadd.f32 %v2150_v47, %v1364_v19  ;;  %v2087_v55 = vpop.f32.mrb[75].mxu1  ;;  %v1516_v44 = vpop.f32.mrb[75].mxu0 }
 0x196   : > { %v1568_v40 = vmax.f32 %v1514_v59, 0.0  ;;  %v2088_v20 = vadd.f32 %v2087_v55, %v2086_v12  ;;  %v1517_v6 = vadd.f32 %v1516_v44, %v1356_v41  ;;  %v1369_v24 = vadd.f32 %v2085_v26, %v1208_v35 }
 0x197   : > { %1602 = vst [vmem:[%s2843_s21 + $0xd0] sm:$0xff] %v1570_v13  ;;  %v1571_v16 = vmax.f32 %v1525_v14, 0.0 }
 0x198   : > { %1600 = vst [vmem:[%s2843_s21 + $0xc0] sm:$0xff] %v1568_v40  ;;  %v1569_v17 = vmax.f32 %v1517_v6, 0.0  ;;  %v1372_v27 = vadd.f32 %v2088_v20, %v1211_v2 }
 0x199   : > { %1603 = vst [vmem:[%s2843_s21 + $0xd8] sm:$0xff] %v1571_v16 }
 0x19a   : > { %1601 = vst [vmem:[%s2843_s21 + $0xc8] sm:$0xff] %v1569_v17  ;;  %v2089_v11 = vpop.f32.mrb[76].mxu1  ;;  %v2153_v30 = vpop.f32.mrb[76].mxu0 }
 0x19b   : > { %v2090_v31 = vpop.f32.mrb[77].mxu1  ;;  %v1529_v22 = vpop.f32.mrb[77].mxu0 }
 0x19c   : > { %v2091_v48 = vadd.f32 %v2090_v31, %v2089_v11  ;;  %v1530_v46 = vadd.f32 %v1529_v22, %v1369_v24  ;;  %v2092_v21 = vpop.f32.mrb[78].mxu1  ;;  %v2154_v36 = vpop.f32.mrb[78].mxu0 }
 0x19d   : > { %v2093_v18 = vpop.f32.mrb[79].mxu1  ;;  %v1532_v37 = vpop.f32.mrb[79].mxu0 }
 0x19e   : > { %v1377_v56 = vadd.f32 %v2091_v48, %v1216_v25  ;;  %v1572_v61 = vmax.f32 %v1530_v46, 0.0  ;;  %v2094_v39 = vadd.f32 %v2093_v18, %v2092_v21  ;;  %v1533_v49 = vadd.f32 %v1532_v37, %v1372_v27 }
 0x1a0   : > { %v1538_v28 = vadd.f32 %v2153_v30, %v1377_v56  ;;  %1604 = vst [vmem:[%s2843_s21 + $0xe0] sm:$0xff] %v1572_v61  ;;  %v1380_v41 = vadd.f32 %v2094_v39, %v1219_v29  ;;  %v1573_v32 = vmax.f32 %v1533_v49, 0.0 }
 0x1a2   : > { %v1574_v42 = vmax.f32 %v1538_v28, 0.0  ;;  %v1541_v62 = vadd.f32 %v2154_v36, %v1380_v41  ;;  %1605 = vst [vmem:[%s2843_s21 + $0xe8] sm:$0xff] %v1573_v32 }
 0x1a4   : > { %1606 = vst [vmem:[%s2843_s21 + $0xf0] sm:$0xff] %v1574_v42  ;;  %v1575_v34 = vmax.f32 %v1541_v62, 0.0 }
 0x1a6   : > { %1607 = vst [vmem:[%s2843_s21 + $0xf8] sm:$0xff] %v1575_v34 }
 0x1a7   : > { %2390 = shalt.err (!%p2387_p5)
}
 0x1a8   : > { %s2391_s8 = scalar_lea.hbm %s2933_s30, 4096  ;;  %s2395_s5 = scalar_lea.hbm %s2990_s3, 8192 }
 0x1a9   : > { %p2392_p6 = scmp.ne.s32.totalorder %s2933_s30, %s2391_s8  ;;  %p2396_p10 = scmp.lt.u32.totalorder %s2933_s30, %s2990_s3 }
 0x1aa   : > { %p2397_p11 = scmp.lt.u32.totalorder %s2395_s5, %s2391_s8  ;;  %p2399_p13 = scmp.lt.u32.totalorder %s2391_s8, %s2933_s30 }
 0x1ab   : > { %p2393_p7 = pnand %p2392_p6, %p2520_p4 }
 0x1ac   : > { %p2398_p12 = por %p2397_p11, %p2396_p10 }
 0x1ad   : > { %p2394_p9 = pneg %p2393_p7 }
 0x1ae   : > { %p2400_p0 = por %p2399_p13, %p2398_p12 }
 0x1b0   : > { %p2401_p1 = pnand %p2400_p0, %p2394_p9 }
 0x1b2   : > { %2404 = shalt.err (!%p2401_p1)
}
 0x1b3   : > { %s2458_s19 = smov 128   ;;  %s2459_s21 = smov 8  }
 0x1b4   : > { %2172 = dma.vmem_to_hbm [thread:$0]  (%p2520_p4), %s2935_s26, 4096, %s2933_s30, %s2941_s4, %s2458_s19, %s2458_s19, %s2459_s21  }
 0x1b5 PF: > { %p2178_p2 = scmp.ge.s32.totalorder %s2455_s17, 2  ;;  %s1638_s23 = sand.u32 1, %s2435_s12  }
 0x1b6   : > { %s1639_s27 = scalar_lea.sflag [#allocation3], %s1638_s23 }
 0x1b7   : > { %p2175_p3 = pnand %p2178_p2, %p2527_p8 }
 0x1b9   : > { %2430 = dma.done.wait (!%p2175_p3), %s1639_s27, 4096  }
 0x1ba   : > { %2432 = vsyncadd (!%p2175_p3), %s1639_s27, 4294963200  ;;  %s16_s17 = sadd.s32 1, %s2455_s17   ;;  %s2993_s12 = smov %s2439_s13 }
 0x1bb   : > { %p13_p5 = scmp.ge.s32.totalorder %s16_s17, 4   ;;  %s2994_s13 = smov %s2443_s14 }
 0x1bc   : > { %s2995_s14 = smov %s2533_s25  ;;  %s2996_s15 = smov %s2451_s16 }
 0x1bd   : > { %s2997_s16 = smov %s2999_s20  ;;  %15 = sbr.rel (!%p13_p5) target bundleno = 4 (0x4), region = 73 }
 0x1c4   :  { %1644 = vsyncpa [#allocation3], 1 }
 0x1c5   :  { %1646 = vsyncpa [#allocation3 + $0x1], 1 }

</bundles_post_ra>
